<compile_context>
chip_gen: v5e
topology: v5e:2x2
jax: 0.10.0
libtpu: 0.0.40
codegen_flags: <defaults>
</compile_context>

<pallas_src>
import numpy as np
import jax
import jax.numpy as jnp
from jax import lax
from jax.experimental import pallas as pl
from jax.experimental.pallas import tpu as pltpu

MEL = 128            # mel_bins
WIN = 1024           # conv_extractor kernel size
HOP = 512            # conv_extractor stride (= WIN // 2 = padding)
T_OUT = 313          # hard-coded by LayerNorm(313)
N_LAYER = 3
L_IN = (T_OUT - 1) * HOP          # 159744 raw samples
EPS = 1e-5
NEG_SLOPE = 0.2


# ------------------------------ fused Pallas kernel --------------------------

def _tgram_kernel(x_ref, wlo_ref, whi_ref, wenc_ref, gamma_ref, beta_ref, o_ref):
    # One batch element per grid step. Channels-last layout: rows = time,
    # lanes = 128 channels (lane-dense everywhere).
    frames = x_ref[0].astype(jnp.bfloat16)                      # (T-1, HOP)

    # conv_extractor: window t = concat(padded_frame[t], padded_frame[t+1]).
    a = jnp.dot(frames, wlo_ref[...], preferred_element_type=jnp.float32)  # (T-1, MEL)
    b = jnp.dot(frames, whi_ref[...], preferred_element_type=jnp.float32)  # (T-1, MEL)
    zrow = jnp.zeros((1, MEL), jnp.float32)
    # y[0] = b[0]; y[t] = a[t-1] + b[t]; y[T-1] = a[T-2]  (zero padding at edges)
    h = (jnp.concatenate([b, zrow], axis=0) +
         jnp.concatenate([zrow, a], axis=0))                    # (T, MEL)

    for l in range(N_LAYER):
        # LayerNorm(T): normalize over the time axis (rows), affine per time step.
        mu = jnp.mean(h, axis=0, keepdims=True)                 # (1, MEL)
        var = jnp.mean((h - mu) * (h - mu), axis=0, keepdims=True)
        hn = (h - mu) * lax.rsqrt(var + EPS)
        hn = hn * gamma_ref[l] + beta_ref[l]                    # (T,1) bcast over lanes
        # LeakyReLU(0.2)
        hn = jnp.where(hn >= 0, hn, NEG_SLOPE * hn)
        # Conv1d(MEL, MEL, 3, stride 1, pad 1): one matmul over the 3 taps
        # concatenated along N, then +-1 time shift-adds.
        p = jnp.dot(hn.astype(jnp.bfloat16), wenc_ref[l],
                    preferred_element_type=jnp.float32)         # (T, 3*MEL)
        p0 = p[:, :MEL]
        p1 = p[:, MEL:2 * MEL]
        p2 = p[:, 2 * MEL:]
        h = (p1 +
             jnp.concatenate([zrow, p0[:-1]], axis=0) +         # tap k=0 -> t-1
             jnp.concatenate([p2[1:], zrow], axis=0))           # tap k=2 -> t+1

    o_ref[0] = h.astype(o_ref.dtype)                            # (T, MEL) lane-dense


def tgram_forward(x_wav, params):
    """x_wav: (B, 1, L_IN) float32 -> (B, MEL, T_OUT), matching PyTorch TgramNet."""
    w_lo, w_hi, w_enc, gamma, beta = params
    B = x_wav.shape[0]
    assert x_wav.shape[1:] == (1, L_IN), x_wav.shape
    frames = x_wav.reshape(B, T_OUT - 1, HOP)                   # free reshape, no pad

    out = pl.pallas_call(
        _tgram_kernel,
        out_shape=jax.ShapeDtypeStruct((B, T_OUT, MEL), jnp.float32),
        grid=(B,),
        in_specs=[
            pl.BlockSpec((1, T_OUT - 1, HOP), lambda i: (i, 0, 0)),       # frames
            pl.BlockSpec((HOP, MEL), lambda i: (0, 0)),                   # W_lo (resident)
            pl.BlockSpec((HOP, MEL), lambda i: (0, 0)),                   # W_hi (resident)
            pl.BlockSpec((N_LAYER, MEL, 3 * MEL), lambda i: (0, 0, 0)),   # enc weights
            pl.BlockSpec((N_LAYER, T_OUT, 1), lambda i: (0, 0, 0)),       # LN gamma
            pl.BlockSpec((N_LAYER, T_OUT, 1), lambda i: (0, 0, 0)),       # LN beta
        ],
        out_specs=pl.BlockSpec((1, T_OUT, MEL), lambda i: (i, 0, 0)),
        compiler_params=pltpu.CompilerParams(
            dimension_semantics=("parallel",)),                 # v7x: one batch per TC
    )(frames, w_lo, w_hi, w_enc, gamma, beta)

    # Kernel output is lane-dense (B, T, C); transpose to PyTorch NCL once here.
    return jnp.transpose(out, (0, 2, 1))


# ------------------------------ parameters -----------------------------------

def init_params(key):
    """Deterministic PyTorch-style Conv1d init; non-trivial LayerNorm affine."""
    ks = jax.random.split(key, 1 + 3 * N_LAYER)

    def uni(k, shape, fan_in):
        bound = 1.0 / np.sqrt(fan_in)
        return jax.random.uniform(k, shape, jnp.float32, -bound, bound)

    w_ext = uni(ks[0], (MEL, 1, WIN), 1 * WIN)                       # no bias
    w_enc = [uni(ks[1 + l], (MEL, MEL, 3), MEL * 3) for l in range(N_LAYER)]
    gammas = [1.0 + 0.1 * jax.random.normal(ks[1 + N_LAYER + l], (T_OUT,), jnp.float32)
              for l in range(N_LAYER)]
    betas = [0.1 * jax.random.normal(ks[1 + 2 * N_LAYER + l], (T_OUT,), jnp.float32)
             for l in range(N_LAYER)]
    return w_ext, w_enc, gammas, betas


def to_kernel_params(w_ext, w_enc, gammas, betas):
    # conv_extractor (MEL, 1, WIN): split into the two half-window matmul
    # weights (window = [frame_t | frame_{t+1}]); bf16 for native MXU rate.
    w_lo = jnp.transpose(w_ext[:, 0, :HOP]).astype(jnp.bfloat16)      # (HOP, MEL)
    w_hi = jnp.transpose(w_ext[:, 0, HOP:]).astype(jnp.bfloat16)      # (HOP, MEL)
    # encoder convs (MEL, MEL, 3) -> (cin, 3*cout) with taps [W0|W1|W2] along N.
    wk = jnp.stack(
        [jnp.concatenate([jnp.transpose(w[:, :, k]) for k in range(3)], axis=1)
         for w in w_enc], axis=0).astype(jnp.bfloat16)                # (3, MEL, 3*MEL)
    gam = jnp.stack(gammas, axis=0)[:, :, None].astype(jnp.float32)   # (3, T, 1)
    bet = jnp.stack(betas, axis=0)[:, :, None].astype(jnp.float32)    # (3, T, 1)
    return w_lo, w_hi, wk, gam, bet


# ------------------------------ pure-JAX reference ----------------------------

def torch_ref(x_wav, w_ext, w_enc, gammas, betas):
    y = lax.conv_general_dilated(
        x_wav, w_ext, window_strides=(HOP,), padding=[(WIN // 2, WIN // 2)],
        dimension_numbers=("NCH", "OIH", "NCH"),
        precision=lax.Precision.HIGHEST)                          # (B, MEL, T)
    for l in range(N_LAYER):
        mu = jnp.mean(y, axis=-1, keepdims=True)
        var = jnp.mean((y - mu) ** 2, axis=-1, keepdims=True)
        y = (y - mu) / jnp.sqrt(var + EPS)
        y = y * gammas[l][None, None, :] + betas[l][None, None, :]
        y = jnp.where(y >= 0, y, NEG_SLOPE * y)
        y = lax.conv_general_dilated(
            y, w_enc[l], window_strides=(1,), padding=[(1, 1)],
            dimension_numbers=("NCH", "OIH", "NCH"),
            precision=lax.Precision.HIGHEST)
    return y


# ------------------------------ main ------------------------------------------

if __name__ == "__main__":
    B = 2
    key = jax.random.PRNGKey(0)
    kx, kp = jax.random.split(key)

    x_wav = jax.random.normal(kx, (B, 1, L_IN), jnp.float32)
    w_ext, w_enc, gammas, betas = init_params(kp)
    params = to_kernel_params(w_ext, w_enc, gammas, betas)

    fwd = jax.jit(tgram_forward)
    out = jax.block_until_ready(fwd(x_wav, params))
    assert out.shape == (B, MEL, T_OUT), out.shape

    ref = torch_ref(x_wav, w_ext, w_enc, gammas, betas)
    err = float(jnp.max(jnp.abs(out - ref)))
    scale = float(jnp.max(jnp.abs(ref))) + 1e-6
    assert err / scale < 5e-2, (err, scale)
    print("KERNEL_OK")
</pallas_src>

<mosaic_0001>
module attributes {stable_mosaic.version = 11 : i64} {
  func.func @_tgram_kernel(%arg0: i32, %arg1: memref<1x312x512xf32, #tpu.memory_space<vmem>>, %arg2: memref<512x128xbf16, #tpu.memory_space<vmem>>, %arg3: memref<512x128xbf16, #tpu.memory_space<vmem>>, %arg4: memref<3x128x384xbf16, #tpu.memory_space<vmem>>, %arg5: memref<3x313x1xf32, #tpu.memory_space<vmem>>, %arg6: memref<3x313x1xf32, #tpu.memory_space<vmem>>, %arg7: memref<1x313x128xf32, #tpu.memory_space<vmem>>) attributes {dimension_semantics = [#tpu.dimension_semantics<parallel>], iteration_bounds = array<i64: 2>, scalar_prefetch = 0 : i64, scratch_operands = 0 : i64, tpu.core_type = #tpu.core_type<tc>, window_params = [{transform_indices = @transform_0, window_bounds = array<i64: 1, 312, 512>}, {pipeline_mode = #tpu.pipeline_mode<synchronous>, transform_indices = @transform_1, window_bounds = array<i64: 512, 128>}, {pipeline_mode = #tpu.pipeline_mode<synchronous>, transform_indices = @transform_2, window_bounds = array<i64: 512, 128>}, {pipeline_mode = #tpu.pipeline_mode<synchronous>, transform_indices = @transform_3, window_bounds = array<i64: 3, 128, 384>}, {pipeline_mode = #tpu.pipeline_mode<synchronous>, transform_indices = @transform_4, window_bounds = array<i64: 3, 313, 1>}, {pipeline_mode = #tpu.pipeline_mode<synchronous>, transform_indices = @transform_5, window_bounds = array<i64: 3, 313, 1>}, {transform_indices = @transform_6, window_bounds = array<i64: 1, 313, 128>}]} {
    %c0 = arith.constant 0 : index
    %c0_0 = arith.constant 0 : index
    %c0_1 = arith.constant 0 : index
    %0 = vector.load %arg1[%c0, %c0_0, %c0_1] : memref<1x312x512xf32, #tpu.memory_space<vmem>>, vector<1x312x512xf32>
    %1 = vector.shape_cast %0 : vector<1x312x512xf32> to vector<312x512xf32>
    %2 = arith.truncf %1 : vector<312x512xf32> to vector<312x512xbf16>
    %c0_2 = arith.constant 0 : index
    %c0_3 = arith.constant 0 : index
    %3 = vector.load %arg2[%c0_2, %c0_3] : memref<512x128xbf16, #tpu.memory_space<vmem>>, vector<512x128xbf16>
    %cst = arith.constant dense<0.000000e+00> : vector<312x128xf32>
    %4 = tpu.matmul %2, %3, %cst {dimension_numbers = #tpu.dot_dimension_numbers<[1], [0], [0], [1], [0, 0, 1, 1], [], []>} : vector<312x512xbf16>, vector<512x128xbf16>, vector<312x128xf32> -> vector<312x128xf32>
    %c0_4 = arith.constant 0 : index
    %c0_5 = arith.constant 0 : index
    %5 = vector.load %arg3[%c0_4, %c0_5] : memref<512x128xbf16, #tpu.memory_space<vmem>>, vector<512x128xbf16>
    %cst_6 = arith.constant dense<0.000000e+00> : vector<312x128xf32>
    %6 = tpu.matmul %2, %5, %cst_6 {dimension_numbers = #tpu.dot_dimension_numbers<[1], [0], [0], [1], [0, 0, 1, 1], [], []>} : vector<312x512xbf16>, vector<512x128xbf16>, vector<312x128xf32> -> vector<312x128xf32>
    %cst_7 = arith.constant 0.000000e+00 : f32
    %7 = vector.broadcast %cst_7 : f32 to vector<1x128xf32>
    %8 = tpu.concatenate %6, %7 in 0 : vector<312x128xf32>, vector<1x128xf32> -> vector<313x128xf32>
    %9 = tpu.concatenate %7, %4 in 0 : vector<1x128xf32>, vector<312x128xf32> -> vector<313x128xf32>
    %10 = arith.addf %8, %9 : vector<313x128xf32>
    %cst_8 = arith.constant dense<0.000000e+00> : vector<128xf32>
    %11 = vector.multi_reduction <add>, %10, %cst_8 [0] : vector<313x128xf32> to vector<128xf32>
    %12 = vector.shape_cast %11 : vector<128xf32> to vector<1x128xf32>
    %cst_9 = arith.constant 3.130000e+02 : f32
    %13 = vector.broadcast %cst_9 : f32 to vector<1x128xf32>
    %14 = arith.divf %12, %13 : vector<1x128xf32>
    %15 = vector.broadcast %14 : vector<1x128xf32> to vector<313x128xf32>
    %16 = arith.subf %10, %15 : vector<313x128xf32>
    %17 = vector.broadcast %14 : vector<1x128xf32> to vector<313x128xf32>
    %18 = arith.subf %10, %17 : vector<313x128xf32>
    %19 = arith.mulf %16, %18 : vector<313x128xf32>
    %cst_10 = arith.constant dense<0.000000e+00> : vector<128xf32>
    %20 = vector.multi_reduction <add>, %19, %cst_10 [0] : vector<313x128xf32> to vector<128xf32>
    %21 = vector.shape_cast %20 : vector<128xf32> to vector<1x128xf32>
    %cst_11 = arith.constant 3.130000e+02 : f32
    %22 = vector.broadcast %cst_11 : f32 to vector<1x128xf32>
    %23 = arith.divf %21, %22 : vector<1x128xf32>
    %24 = vector.broadcast %14 : vector<1x128xf32> to vector<313x128xf32>
    %25 = arith.subf %10, %24 : vector<313x128xf32>
    %cst_12 = arith.constant 9.99999974E-6 : f32
    %26 = vector.broadcast %cst_12 : f32 to vector<1x128xf32>
    %27 = arith.addf %23, %26 : vector<1x128xf32>
    %28 = math.rsqrt %27 : vector<1x128xf32>
    %29 = vector.broadcast %28 : vector<1x128xf32> to vector<313x128xf32>
    %30 = arith.mulf %25, %29 : vector<313x128xf32>
    %c0_13 = arith.constant 0 : index
    %c0_14 = arith.constant 0 : index
    %c0_15 = arith.constant 0 : index
    %31 = vector.load %arg5[%c0_13, %c0_14, %c0_15] : memref<3x313x1xf32, #tpu.memory_space<vmem>>, vector<1x313x1xf32>
    %32 = vector.shape_cast %31 : vector<1x313x1xf32> to vector<313x1xf32>
    %33 = vector.broadcast %32 : vector<313x1xf32> to vector<313x128xf32>
    %34 = arith.mulf %30, %33 : vector<313x128xf32>
    %c0_16 = arith.constant 0 : index
    %c0_17 = arith.constant 0 : index
    %c0_18 = arith.constant 0 : index
    %35 = vector.load %arg6[%c0_16, %c0_17, %c0_18] : memref<3x313x1xf32, #tpu.memory_space<vmem>>, vector<1x313x1xf32>
    %36 = vector.shape_cast %35 : vector<1x313x1xf32> to vector<313x1xf32>
    %37 = vector.broadcast %36 : vector<313x1xf32> to vector<313x128xf32>
    %38 = arith.addf %34, %37 : vector<313x128xf32>
    %cst_19 = arith.constant 0.000000e+00 : f32
    %39 = vector.broadcast %cst_19 : f32 to vector<313x128xf32>
    %40 = arith.cmpf oge, %38, %39 : vector<313x128xf32>
    %cst_20 = arith.constant 2.000000e-01 : f32
    %41 = vector.broadcast %cst_20 : f32 to vector<313x128xf32>
    %42 = arith.mulf %41, %38 : vector<313x128xf32>
    %43 = arith.select %40, %38, %42 : vector<313x128xi1>, vector<313x128xf32>
    %44 = arith.truncf %43 : vector<313x128xf32> to vector<313x128xbf16>
    %c0_21 = arith.constant 0 : index
    %c0_22 = arith.constant 0 : index
    %c0_23 = arith.constant 0 : index
    %45 = vector.load %arg4[%c0_21, %c0_22, %c0_23] : memref<3x128x384xbf16, #tpu.memory_space<vmem>>, vector<1x128x384xbf16>
    %46 = vector.shape_cast %45 : vector<1x128x384xbf16> to vector<128x384xbf16>
    %cst_24 = arith.constant dense<0.000000e+00> : vector<313x384xf32>
    %47 = tpu.matmul %44, %46, %cst_24 {dimension_numbers = #tpu.dot_dimension_numbers<[1], [0], [0], [1], [0, 0, 1, 1], [], []>} : vector<313x128xbf16>, vector<128x384xbf16>, vector<313x384xf32> -> vector<313x384xf32>
    %48 = vector.extract_strided_slice %47 {offsets = [0, 0], sizes = [313, 128], strides = [1, 1]} : vector<313x384xf32> to vector<313x128xf32>
    %49 = vector.extract_strided_slice %47 {offsets = [0, 128], sizes = [313, 128], strides = [1, 1]} : vector<313x384xf32> to vector<313x128xf32>
    %50 = vector.extract_strided_slice %47 {offsets = [0, 256], sizes = [313, 128], strides = [1, 1]} : vector<313x384xf32> to vector<313x128xf32>
    %51 = vector.extract_strided_slice %48 {offsets = [0, 0], sizes = [312, 128], strides = [1, 1]} : vector<313x128xf32> to vector<312x128xf32>
    %52 = tpu.concatenate %7, %51 in 0 : vector<1x128xf32>, vector<312x128xf32> -> vector<313x128xf32>
    %53 = arith.addf %49, %52 : vector<313x128xf32>
    %54 = vector.extract_strided_slice %50 {offsets = [1, 0], sizes = [312, 128], strides = [1, 1]} : vector<313x128xf32> to vector<312x128xf32>
    %55 = tpu.concatenate %54, %7 in 0 : vector<312x128xf32>, vector<1x128xf32> -> vector<313x128xf32>
    %56 = arith.addf %53, %55 : vector<313x128xf32>
    %cst_25 = arith.constant dense<0.000000e+00> : vector<128xf32>
    %57 = vector.multi_reduction <add>, %56, %cst_25 [0] : vector<313x128xf32> to vector<128xf32>
    %58 = vector.shape_cast %57 : vector<128xf32> to vector<1x128xf32>
    %cst_26 = arith.constant 3.130000e+02 : f32
    %59 = vector.broadcast %cst_26 : f32 to vector<1x128xf32>
    %60 = arith.divf %58, %59 : vector<1x128xf32>
    %61 = vector.broadcast %60 : vector<1x128xf32> to vector<313x128xf32>
    %62 = arith.subf %56, %61 : vector<313x128xf32>
    %63 = vector.broadcast %60 : vector<1x128xf32> to vector<313x128xf32>
    %64 = arith.subf %56, %63 : vector<313x128xf32>
    %65 = arith.mulf %62, %64 : vector<313x128xf32>
    %cst_27 = arith.constant dense<0.000000e+00> : vector<128xf32>
    %66 = vector.multi_reduction <add>, %65, %cst_27 [0] : vector<313x128xf32> to vector<128xf32>
    %67 = vector.shape_cast %66 : vector<128xf32> to vector<1x128xf32>
    %cst_28 = arith.constant 3.130000e+02 : f32
    %68 = vector.broadcast %cst_28 : f32 to vector<1x128xf32>
    %69 = arith.divf %67, %68 : vector<1x128xf32>
    %70 = vector.broadcast %60 : vector<1x128xf32> to vector<313x128xf32>
    %71 = arith.subf %56, %70 : vector<313x128xf32>
    %cst_29 = arith.constant 9.99999974E-6 : f32
    %72 = vector.broadcast %cst_29 : f32 to vector<1x128xf32>
    %73 = arith.addf %69, %72 : vector<1x128xf32>
    %74 = math.rsqrt %73 : vector<1x128xf32>
    %75 = vector.broadcast %74 : vector<1x128xf32> to vector<313x128xf32>
    %76 = arith.mulf %71, %75 : vector<313x128xf32>
    %c1 = arith.constant 1 : index
    %c0_30 = arith.constant 0 : index
    %c0_31 = arith.constant 0 : index
    %77 = vector.load %arg5[%c1, %c0_30, %c0_31] : memref<3x313x1xf32, #tpu.memory_space<vmem>>, vector<1x313x1xf32>
    %78 = vector.shape_cast %77 : vector<1x313x1xf32> to vector<313x1xf32>
    %79 = vector.broadcast %78 : vector<313x1xf32> to vector<313x128xf32>
    %80 = arith.mulf %76, %79 : vector<313x128xf32>
    %c1_32 = arith.constant 1 : index
    %c0_33 = arith.constant 0 : index
    %c0_34 = arith.constant 0 : index
    %81 = vector.load %arg6[%c1_32, %c0_33, %c0_34] : memref<3x313x1xf32, #tpu.memory_space<vmem>>, vector<1x313x1xf32>
    %82 = vector.shape_cast %81 : vector<1x313x1xf32> to vector<313x1xf32>
    %83 = vector.broadcast %82 : vector<313x1xf32> to vector<313x128xf32>
    %84 = arith.addf %80, %83 : vector<313x128xf32>
    %cst_35 = arith.constant 0.000000e+00 : f32
    %85 = vector.broadcast %cst_35 : f32 to vector<313x128xf32>
    %86 = arith.cmpf oge, %84, %85 : vector<313x128xf32>
    %cst_36 = arith.constant 2.000000e-01 : f32
    %87 = vector.broadcast %cst_36 : f32 to vector<313x128xf32>
    %88 = arith.mulf %87, %84 : vector<313x128xf32>
    %89 = arith.select %86, %84, %88 : vector<313x128xi1>, vector<313x128xf32>
    %90 = arith.truncf %89 : vector<313x128xf32> to vector<313x128xbf16>
    %c1_37 = arith.constant 1 : index
    %c0_38 = arith.constant 0 : index
    %c0_39 = arith.constant 0 : index
    %91 = vector.load %arg4[%c1_37, %c0_38, %c0_39] : memref<3x128x384xbf16, #tpu.memory_space<vmem>>, vector<1x128x384xbf16>
    %92 = vector.shape_cast %91 : vector<1x128x384xbf16> to vector<128x384xbf16>
    %cst_40 = arith.constant dense<0.000000e+00> : vector<313x384xf32>
    %93 = tpu.matmul %90, %92, %cst_40 {dimension_numbers = #tpu.dot_dimension_numbers<[1], [0], [0], [1], [0, 0, 1, 1], [], []>} : vector<313x128xbf16>, vector<128x384xbf16>, vector<313x384xf32> -> vector<313x384xf32>
    %94 = vector.extract_strided_slice %93 {offsets = [0, 0], sizes = [313, 128], strides = [1, 1]} : vector<313x384xf32> to vector<313x128xf32>
    %95 = vector.extract_strided_slice %93 {offsets = [0, 128], sizes = [313, 128], strides = [1, 1]} : vector<313x384xf32> to vector<313x128xf32>
    %96 = vector.extract_strided_slice %93 {offsets = [0, 256], sizes = [313, 128], strides = [1, 1]} : vector<313x384xf32> to vector<313x128xf32>
    %97 = vector.extract_strided_slice %94 {offsets = [0, 0], sizes = [312, 128], strides = [1, 1]} : vector<313x128xf32> to vector<312x128xf32>
    %98 = tpu.concatenate %7, %97 in 0 : vector<1x128xf32>, vector<312x128xf32> -> vector<313x128xf32>
    %99 = arith.addf %95, %98 : vector<313x128xf32>
    %100 = vector.extract_strided_slice %96 {offsets = [1, 0], sizes = [312, 128], strides = [1, 1]} : vector<313x128xf32> to vector<312x128xf32>
    %101 = tpu.concatenate %100, %7 in 0 : vector<312x128xf32>, vector<1x128xf32> -> vector<313x128xf32>
    %102 = arith.addf %99, %101 : vector<313x128xf32>
    %cst_41 = arith.constant dense<0.000000e+00> : vector<128xf32>
    %103 = vector.multi_reduction <add>, %102, %cst_41 [0] : vector<313x128xf32> to vector<128xf32>
    %104 = vector.shape_cast %103 : vector<128xf32> to vector<1x128xf32>
    %cst_42 = arith.constant 3.130000e+02 : f32
    %105 = vector.broadcast %cst_42 : f32 to vector<1x128xf32>
    %106 = arith.divf %104, %105 : vector<1x128xf32>
    %107 = vector.broadcast %106 : vector<1x128xf32> to vector<313x128xf32>
    %108 = arith.subf %102, %107 : vector<313x128xf32>
    %109 = vector.broadcast %106 : vector<1x128xf32> to vector<313x128xf32>
    %110 = arith.subf %102, %109 : vector<313x128xf32>
    %111 = arith.mulf %108, %110 : vector<313x128xf32>
    %cst_43 = arith.constant dense<0.000000e+00> : vector<128xf32>
    %112 = vector.multi_reduction <add>, %111, %cst_43 [0] : vector<313x128xf32> to vector<128xf32>
    %113 = vector.shape_cast %112 : vector<128xf32> to vector<1x128xf32>
    %cst_44 = arith.constant 3.130000e+02 : f32
    %114 = vector.broadcast %cst_44 : f32 to vector<1x128xf32>
    %115 = arith.divf %113, %114 : vector<1x128xf32>
    %116 = vector.broadcast %106 : vector<1x128xf32> to vector<313x128xf32>
    %117 = arith.subf %102, %116 : vector<313x128xf32>
    %cst_45 = arith.constant 9.99999974E-6 : f32
    %118 = vector.broadcast %cst_45 : f32 to vector<1x128xf32>
    %119 = arith.addf %115, %118 : vector<1x128xf32>
    %120 = math.rsqrt %119 : vector<1x128xf32>
    %121 = vector.broadcast %120 : vector<1x128xf32> to vector<313x128xf32>
    %122 = arith.mulf %117, %121 : vector<313x128xf32>
    %c2 = arith.constant 2 : index
    %c0_46 = arith.constant 0 : index
    %c0_47 = arith.constant 0 : index
    %123 = vector.load %arg5[%c2, %c0_46, %c0_47] : memref<3x313x1xf32, #tpu.memory_space<vmem>>, vector<1x313x1xf32>
    %124 = vector.shape_cast %123 : vector<1x313x1xf32> to vector<313x1xf32>
    %125 = vector.broadcast %124 : vector<313x1xf32> to vector<313x128xf32>
    %126 = arith.mulf %122, %125 : vector<313x128xf32>
    %c2_48 = arith.constant 2 : index
    %c0_49 = arith.constant 0 : index
    %c0_50 = arith.constant 0 : index
    %127 = vector.load %arg6[%c2_48, %c0_49, %c0_50] : memref<3x313x1xf32, #tpu.memory_space<vmem>>, vector<1x313x1xf32>
    %128 = vector.shape_cast %127 : vector<1x313x1xf32> to vector<313x1xf32>
    %129 = vector.broadcast %128 : vector<313x1xf32> to vector<313x128xf32>
    %130 = arith.addf %126, %129 : vector<313x128xf32>
    %cst_51 = arith.constant 0.000000e+00 : f32
    %131 = vector.broadcast %cst_51 : f32 to vector<313x128xf32>
    %132 = arith.cmpf oge, %130, %131 : vector<313x128xf32>
    %cst_52 = arith.constant 2.000000e-01 : f32
    %133 = vector.broadcast %cst_52 : f32 to vector<313x128xf32>
    %134 = arith.mulf %133, %130 : vector<313x128xf32>
    %135 = arith.select %132, %130, %134 : vector<313x128xi1>, vector<313x128xf32>
    %136 = arith.truncf %135 : vector<313x128xf32> to vector<313x128xbf16>
    %c2_53 = arith.constant 2 : index
    %c0_54 = arith.constant 0 : index
    %c0_55 = arith.constant 0 : index
    %137 = vector.load %arg4[%c2_53, %c0_54, %c0_55] : memref<3x128x384xbf16, #tpu.memory_space<vmem>>, vector<1x128x384xbf16>
    %138 = vector.shape_cast %137 : vector<1x128x384xbf16> to vector<128x384xbf16>
    %cst_56 = arith.constant dense<0.000000e+00> : vector<313x384xf32>
    %139 = tpu.matmul %136, %138, %cst_56 {dimension_numbers = #tpu.dot_dimension_numbers<[1], [0], [0], [1], [0, 0, 1, 1], [], []>} : vector<313x128xbf16>, vector<128x384xbf16>, vector<313x384xf32> -> vector<313x384xf32>
    %140 = vector.extract_strided_slice %139 {offsets = [0, 0], sizes = [313, 128], strides = [1, 1]} : vector<313x384xf32> to vector<313x128xf32>
    %141 = vector.extract_strided_slice %139 {offsets = [0, 128], sizes = [313, 128], strides = [1, 1]} : vector<313x384xf32> to vector<313x128xf32>
    %142 = vector.extract_strided_slice %139 {offsets = [0, 256], sizes = [313, 128], strides = [1, 1]} : vector<313x384xf32> to vector<313x128xf32>
    %143 = vector.extract_strided_slice %140 {offsets = [0, 0], sizes = [312, 128], strides = [1, 1]} : vector<313x128xf32> to vector<312x128xf32>
    %144 = tpu.concatenate %7, %143 in 0 : vector<1x128xf32>, vector<312x128xf32> -> vector<313x128xf32>
    %145 = arith.addf %141, %144 : vector<313x128xf32>
    %146 = vector.extract_strided_slice %142 {offsets = [1, 0], sizes = [312, 128], strides = [1, 1]} : vector<313x128xf32> to vector<312x128xf32>
    %147 = tpu.concatenate %146, %7 in 0 : vector<312x128xf32>, vector<1x128xf32> -> vector<313x128xf32>
    %148 = arith.addf %145, %147 : vector<313x128xf32>
    %c0_57 = arith.constant 0 : index
    %c0_58 = arith.constant 0 : index
    %c0_59 = arith.constant 0 : index
    %149 = vector.load %arg7[%c0_57, %c0_58, %c0_59] : memref<1x313x128xf32, #tpu.memory_space<vmem>>, vector<1x313x128xf32>
    %150 = vector.shape_cast %149 : vector<1x313x128xf32> to vector<313x128xf32>
    %151 = vector.shape_cast %148 : vector<313x128xf32> to vector<1x313x128xf32>
    tpu.vector_store %arg7[%c0_57, %c0_58, %c0_59], %151 {strides = array<i32>} : memref<1x313x128xf32, #tpu.memory_space<vmem>>, vector<1x313x128xf32>,
    return
  }
  func.func @transform_0(%arg0: i32) -> (i32, i32, i32) {
    %c0_i32 = arith.constant 0 : i32
    %c0_i32_0 = arith.constant 0 : i32
    %c0_i32_1 = arith.constant 0 : i32
    return %arg0, %c0_i32, %c0_i32_0 : i32, i32, i32
  }
  func.func @transform_1(%arg0: i32) -> (i32, i32) {
    %c0_i32 = arith.constant 0 : i32
    %c0_i32_0 = arith.constant 0 : i32
    %c0_i32_1 = arith.constant 0 : i32
    return %c0_i32, %c0_i32_0 : i32, i32
  }
  func.func @transform_2(%arg0: i32) -> (i32, i32) {
    %c0_i32 = arith.constant 0 : i32
    %c0_i32_0 = arith.constant 0 : i32
    %c0_i32_1 = arith.constant 0 : i32
    return %c0_i32, %c0_i32_0 : i32, i32
  }
  func.func @transform_3(%arg0: i32) -> (i32, i32, i32) {
    %c0_i32 = arith.constant 0 : i32
    %c0_i32_0 = arith.constant 0 : i32
    %c0_i32_1 = arith.constant 0 : i32
    %c0_i32_2 = arith.constant 0 : i32
    return %c0_i32, %c0_i32_0, %c0_i32_1 : i32, i32, i32
  }
  func.func @transform_4(%arg0: i32) -> (i32, i32, i32) {
    %c0_i32 = arith.constant 0 : i32
    %c0_i32_0 = arith.constant 0 : i32
    %c0_i32_1 = arith.constant 0 : i32
    %c0_i32_2 = arith.constant 0 : i32
    return %c0_i32, %c0_i32_0, %c0_i32_1 : i32, i32, i32
  }
  func.func @transform_5(%arg0: i32) -> (i32, i32, i32) {
    %c0_i32 = arith.constant 0 : i32
    %c0_i32_0 = arith.constant 0 : i32
    %c0_i32_1 = arith.constant 0 : i32
    %c0_i32_2 = arith.constant 0 : i32
    return %c0_i32, %c0_i32_0, %c0_i32_1 : i32, i32, i32
  }
  func.func @transform_6(%arg0: i32) -> (i32, i32, i32) {
    %c0_i32 = arith.constant 0 : i32
    %c0_i32_0 = arith.constant 0 : i32
    %c0_i32_1 = arith.constant 0 : i32
    return %arg0, %c0_i32, %c0_i32_0 : i32, i32, i32
  }
}

</mosaic_0001>

<bundles_post_ra>
// kernel: tgram_forward.1
= control target key start
LH: loop header
LB: loop body
LE: loop exit
PB: predicated region body
PF: predicated region fallthrough
CT: control target
= control target key end

     0   :  { %s8594_s21 = smov 0   ;;  %s12893_s0 = inlined_call_operand.vmem [shape: f32[2,312,512], index: 0, kind: input, shape index: {}]   ;;  %s12894_s1 = inlined_call_operand.vmem [shape: bf16[512,128], index: 1, kind: input, shape index: {}]   ;;  %s12895_s2 = inlined_call_operand.vmem [shape: bf16[512,128], index: 2, kind: input, shape index: {}]   ;;  %s12896_s3 = inlined_call_operand.vmem [shape: bf16[3,128,384], index: 3, kind: input, shape index: {}]   ;;  %s12897_s4 = inlined_call_operand.vmem [shape: f32[3,313,1], index: 4, kind: input, shape index: {}]   ;;  %s12898_s5 = inlined_call_operand.vmem [shape: f32[3,313,1], index: 5, kind: input, shape index: {}]   ;;  %s12899_s6 = inlined_call_operand.vmem [shape: f32[2,313,128], index: 6, kind: output, shape index: {}]  }
   0x1 LB: > { %s7589_s22 = sadd.s32 4294967295, %s8555_s21   ;;  %p7593_p0 = scmp.ge.s32.totalorder %s8555_s21, 1  ;;  %s8555_s21 = sphi %s8594_s21, %s16_s21  }
   0x2   : > { %p212_p1 = scmp.lt.s32.totalorder %s8555_s21, 3 }
   0x4   : > { %p213_p2 = pnand %p7593_p0, %p212_p1 }
   0x6   : > { %216 = sbr.rel (%p213_p2) target bundleno = 2669 (0xa6d), region = 44 }
   0xb   : > { %v8373_v0 = vld [vmem:[%s12894_s1 + $0x38] sm:$0xff]  ;;  %v8372_v1 = vld [vmem:[%s12894_s1 + $0x30] sm:$0xff]  ;;  %v8371_v2 = vld [vmem:[%s12894_s1 + $0x28] sm:$0xff]  ;;  %p242_p3 = scmp.lt.s32.totalorder %s7589_s22, 1  ;;  %vm1903_vm0 = vcmask 1040384  }
   0xc   : > { %8502 = vmatpush.bf16.msra.mxu1 %v8373_v0  ;;  %8503 = vmatpush.bf16.msra.mxu2 %v8373_v0  ;;  %v8370_v3 = vld [vmem:[%s12894_s1 + $0x20] sm:$0xff]  ;;  %v8369_v4 = vld [vmem:[%s12894_s1 + $0x18] sm:$0xff]  ;;  %v8368_v5 = vld [vmem:[%s12894_s1 + $0x10] sm:$0xff] }
   0xd   : > { %8504 = vmatpush.bf16.msra.mxu3 %v8373_v0  ;;  %744 = vmatpush.bf16.msra.mxu0 %v8373_v0  ;;  %s13362_s22 = smov (!%p242_p3, %s7589_s22), 1  ;;  %v8367_v6 = vld [vmem:[%s12894_s1 + $0x8] sm:$0xff]  ;;  %v8366_v7 = vld [vmem:[%s12894_s1] sm:$0xff]  ;;  %v8389_v14 = vld [vmem:[%s12894_s1 + $0xb8] sm:$0xff] }
   0xe   : > { %s8526_s11 = smul.u32 1248, %s13362_s22  ;;  %v8397_v15 = vld [vmem:[%s12894_s1 + $0xf8] sm:$0xff]  ;;  %v8388_v20 = vld [vmem:[%s12894_s1 + $0xb0] sm:$0xff]  ;;  %v8387_v23 = vld [vmem:[%s12894_s1 + $0xa8] sm:$0xff] }
   0xf   : > { %v8381_v16 = vld [vmem:[%s12894_s1 + $0x78] sm:$0xff]  ;;  %v8396_v21 = vld [vmem:[%s12894_s1 + $0xf0] sm:$0xff]  ;;  %v8395_v24 = vld [vmem:[%s12894_s1 + $0xe8] sm:$0xff]  ;;  %s8527_s8 = smul.u32 320, %s13362_s22 }
  0x10   : > { %8505 = vmatpush.bf16.msra.mxu1 %v8372_v1  ;;  %8506 = vmatpush.bf16.msra.mxu2 %v8372_v1  ;;  %s8629_s16 = scalar_lea.vmem %s12893_s0, %s8526_s11  ;;  %v8380_v22 = vld [vmem:[%s12894_s1 + $0x70] sm:$0xff]  ;;  %v8379_v25 = vld [vmem:[%s12894_s1 + $0x68] sm:$0xff]  ;;  %v8386_v26 = vld [vmem:[%s12894_s1 + $0xa0] sm:$0xff] }
  0x11   : > { %8507 = vmatpush.bf16.msra.mxu3 %v8372_v1  ;;  %745 = vmatpush.bf16.msra.mxu0 %v8372_v1  ;;  %v292_v8 = vld [vmem:[%s8629_s16 + $0x140] sm:$0xff]  ;;  %v8385_v35 = vld [vmem:[%s12894_s1 + $0x98] sm:$0xff]  ;;  %v8384_v41 = vld [vmem:[%s12894_s1 + $0x90] sm:$0xff]  ;;  %s12731_s11 = scalar_lea.vmem %s12899_s6, %s8527_s8 }
  0x12   : > { %v296_v9 = vld [vmem:[%s8629_s16 + $0x160] sm:$0xff]  ;;  %v8393_v36 = vld [vmem:[%s12894_s1 + $0xd8] sm:$0xff]  ;;  %v8392_v42 = vld [vmem:[%s12894_s1 + $0xd0] sm:$0xff] }
  0x13   : > { %v332_v10 = vld [vmem:[%s8629_s16 + $0x280] sm:$0xff]  ;;  %v8649_v17 = vpack.c.bf16 %v296_v9, %v292_v8  ;;  %v8377_v37 = vld [vmem:[%s12894_s1 + $0x58] sm:$0xff]  ;;  %v8376_v43 = vld [vmem:[%s12894_s1 + $0x50] sm:$0xff] }
  0x14   : > { %8508 = vmatpush.bf16.msra.mxu1 %v8371_v2  ;;  %8509 = vmatpush.bf16.msra.mxu2 %v8371_v2  ;;  %v336_v11 = vld [vmem:[%s8629_s16 + $0x2a0] sm:$0xff]  ;;  %v8383_v44 = vld [vmem:[%s12894_s1 + $0x88] sm:$0xff]  ;;  %v8429_v8 = vld [vmem:[%s12895_s2 + $0xf8] sm:$0xff] }
  0x15   : > { %8510 = vmatpush.bf16.msra.mxu3 %v8371_v2  ;;  %746 = vmatpush.bf16.msra.mxu0 %v8371_v2  ;;  %v372_v12 = vld [vmem:[%s8629_s16 + $0x3c0] sm:$0xff]  ;;  %v8651_v18 = vpack.c.bf16 %v336_v11, %v332_v10  ;;  %v8391_v45 = vld [vmem:[%s12894_s1 + $0xc8] sm:$0xff]  ;;  %v8413_v9 = vld [vmem:[%s12895_s2 + $0x78] sm:$0xff] }
  0x16   : > { %v376_v13 = vld [vmem:[%s8629_s16 + $0x3e0] sm:$0xff]  ;;  %v8375_v55 = vld [vmem:[%s12894_s1 + $0x48] sm:$0xff] }
  0x17   : > { %12981 = vst [vmem:[#allocation2_spill] sm:$0xff] %v8651_v18  ;;  %v8653_v19 = vpack.c.bf16 %v376_v13, %v372_v12  ;;  %v8394_v27 = vld [vmem:[%s12894_s1 + $0xe0] sm:$0xff] }
  0x18   : > { %8511 = vmatpush.bf16.msra.mxu1 %v8370_v3  ;;  %8512 = vmatpush.bf16.msra.mxu2 %v8370_v3  ;;  %v8378_v28 = vld [vmem:[%s12894_s1 + $0x60] sm:$0xff] }
  0x19   : > { %8513 = vmatpush.bf16.msra.mxu3 %v8370_v3  ;;  %747 = vmatpush.bf16.msra.mxu0 %v8370_v3  ;;  %12982 = vst [vmem:[#allocation3_spill] sm:$0xff] %v8653_v19  ;;  %v300_v29 = vld [vmem:[%s8629_s16 + $0x180] sm:$0xff] }
  0x1a   : > { %v304_v30 = vld [vmem:[%s8629_s16 + $0x1a0] sm:$0xff] }
  0x1b   : > { %v340_v31 = vld [vmem:[%s8629_s16 + $0x2c0] sm:$0xff]  ;;  %v8700_v38 = vpack.c.bf16 %v304_v30, %v300_v29  ;;  %v254_v29 = vld [vmem:[%s8629_s16 + $0x10] sm:$0xff] }
  0x1c   : > { %8514 = vmatpush.bf16.msra.mxu1 %v8369_v4  ;;  %8515 = vmatpush.bf16.msra.mxu2 %v8369_v4  ;;  %v344_v32 = vld [vmem:[%s8629_s16 + $0x2e0] sm:$0xff]  ;;  %v258_v30 = vld [vmem:[%s8629_s16 + $0x30] sm:$0xff] }
  0x1d   : > { %8516 = vmatpush.bf16.msra.mxu3 %v8369_v4  ;;  %748 = vmatpush.bf16.msra.mxu0 %v8369_v4  ;;  %v380_v33 = vld [vmem:[%s8629_s16 + $0x400] sm:$0xff]  ;;  %12983 = vst [vmem:[#allocation4_spill] sm:$0xff] %v8700_v38  ;;  %v8702_v39 = vpack.c.bf16 %v344_v32, %v340_v31  ;;  %v255_v31 = vld [vmem:[%s8629_s16 + $0x18] sm:$0xff] }
  0x1e   : > { %v384_v34 = vld [vmem:[%s8629_s16 + $0x420] sm:$0xff]  ;;  %v259_v32 = vld [vmem:[%s8629_s16 + $0x38] sm:$0xff] }
  0x1f   : > { %12984 = vst [vmem:[#allocation5_spill] sm:$0xff] %v8702_v39  ;;  %v8704_v40 = vpack.c.bf16 %v384_v34, %v380_v33  ;;  %v308_v46 = vld [vmem:[%s8629_s16 + $0x1c0] sm:$0xff]  ;;  %v8812_v34 = vpack.c.bf16 %v258_v30, %v254_v29 }
  0x20   : > { %8517 = vmatpush.bf16.msra.mxu1 %v8368_v5  ;;  %8518 = vmatpush.bf16.msra.mxu2 %v8368_v5  ;;  %v312_v47 = vld [vmem:[%s8629_s16 + $0x1e0] sm:$0xff] }
  0x21   : > { %8519 = vmatpush.bf16.msra.mxu3 %v8368_v5  ;;  %749 = vmatpush.bf16.msra.mxu0 %v8368_v5  ;;  %12985 = vst [vmem:[#allocation6_spill] sm:$0xff] %v8704_v40  ;;  %v348_v48 = vld [vmem:[%s8629_s16 + $0x300] sm:$0xff]  ;;  %v8730_v52 = vpack.c.bf16 %v312_v47, %v308_v46  ;;  %v263_v46 = vld [vmem:[%s8629_s16 + $0x58] sm:$0xff] }
  0x22   : > { %v352_v49 = vld [vmem:[%s8629_s16 + $0x320] sm:$0xff]  ;;  %v267_v47 = vld [vmem:[%s8629_s16 + $0x78] sm:$0xff] }
  0x23   : > { %v388_v50 = vld [vmem:[%s8629_s16 + $0x440] sm:$0xff]  ;;  %12986 = vst [vmem:[#allocation7_spill] sm:$0xff] %v8730_v52  ;;  %v8732_v53 = vpack.c.bf16 %v352_v49, %v348_v48 }
  0x24   : > { %8520 = vmatpush.bf16.msra.mxu1 %v8367_v6  ;;  %8521 = vmatpush.bf16.msra.mxu2 %v8367_v6  ;;  %v392_v51 = vld [vmem:[%s8629_s16 + $0x460] sm:$0xff] }
  0x25   : > { %8522 = vmatpush.bf16.msra.mxu3 %v8367_v6  ;;  %750 = vmatpush.bf16.msra.mxu0 %v8367_v6  ;;  %12987 = vst [vmem:[#allocation8_spill] sm:$0xff] %v8732_v53  ;;  %v8734_v54 = vpack.c.bf16 %v392_v51, %v388_v50  ;;  %v8382_v56 = vld [vmem:[%s12894_s1 + $0x80] sm:$0xff]  ;;  %v8838_v50 = vpack.c.bf16 %v267_v47, %v263_v46 }
  0x26   : > { %v8390_v57 = vld [vmem:[%s12894_s1 + $0xc0] sm:$0xff] }
  0x27   : > { %12988 = vst [vmem:[#allocation9_spill] sm:$0xff] %v8734_v54  ;;  %v252_v58 = vld [vmem:[%s8629_s16] sm:$0xff] }
  0x28   : > { %8523 = vmatpush.bf16.msra.mxu1 %v8366_v7  ;;  %8524 = vmatpush.bf16.msra.mxu2 %v8366_v7  ;;  %v256_v59 = vld [vmem:[%s8629_s16 + $0x20] sm:$0xff] }
  0x29   : > { %8525 = vmatpush.bf16.msra.mxu3 %v8366_v7  ;;  %751 = vmatpush.bf16.msra.mxu0 %v8366_v7  ;;  %v8374_v60 = vld [vmem:[%s12894_s1 + $0x40] sm:$0xff]  ;;  %v8753_v61 = vpack.c.bf16 %v256_v59, %v252_v58  ;;  %v8421_v7 = vld [vmem:[%s12895_s2 + $0xb8] sm:$0xff]  ;;  %v273_v58 = vld [vmem:[%s8629_s16 + $0xa8] sm:$0xff] }
  0x2a   : > { %v316_v62 = vld [vmem:[%s8629_s16 + $0x200] sm:$0xff]  ;;  %v270_v59 = vld [vmem:[%s8629_s16 + $0x90] sm:$0xff] }
  0x2b   : > { %777 = vmatmul.bf16.vlgmr.msra.gmra.mxu1 %v8649_v17  ;;  %802 = vmatmul.bf16.vlgmr.msra.gmra.mxu2 %v8651_v18  ;;  %v320_v63 = vld [vmem:[%s8629_s16 + $0x220] sm:$0xff] }
  0x2c   : > { %960 = vmatpush.bf16.msrb.mxu2 %v8389_v14  ;;  %852 = vmatpush.bf16.msrb.mxu1 %v8381_v16  ;;  %v356_v0 = vld [vmem:[%s8629_s16 + $0x340] sm:$0xff]  ;;  %v8762_v4 = vpack.c.bf16 %v320_v63, %v316_v62  ;;  %v271_v62 = vld [vmem:[%s8629_s16 + $0x98] sm:$0xff] }
  0x2d   : > { %1068 = vmatpush.bf16.msrb.mxu3 %v8397_v15  ;;  %752 = vmatmul.bf16.vlgmr.msra.gmra.mxu0 %v8753_v61  ;;  %v360_v1 = vld [vmem:[%s8629_s16 + $0x360] sm:$0xff]  ;;  %v275_v63 = vld [vmem:[%s8629_s16 + $0xb8] sm:$0xff] }
  0x2e   : > { %827 = vmatmul.bf16.vlgmr.msra.gmra.mxu3 %v8653_v19  ;;  %v396_v2 = vld [vmem:[%s8629_s16 + $0x480] sm:$0xff]  ;;  %12989 = vst [vmem:[#allocation10_spill] sm:$0xff] %v8762_v4  ;;  %v8764_v5 = vpack.c.bf16 %v360_v1, %v356_v0  ;;  %v310_v19 = vld [vmem:[%s8629_s16 + $0x1d0] sm:$0xff] }
  0x2f   : > { %v400_v3 = vld [vmem:[%s8629_s16 + $0x4a0] sm:$0xff] }
  0x30   : > { %961 = vmatpush.bf16.msrb.mxu2 %v8388_v20  ;;  %853 = vmatpush.bf16.msrb.mxu1 %v8380_v22  ;;  %12990 = vst [vmem:[#allocation11_spill] sm:$0xff] %v8764_v5  ;;  %v8766_v6 = vpack.c.bf16 %v400_v3, %v396_v2  ;;  %v260_v10 = vld [vmem:[%s8629_s16 + $0x40] sm:$0xff]  ;;  %v8858_v2 = vpack.c.bf16 %v275_v63, %v271_v62  ;;  %v293_v62 = vld [vmem:[%s8629_s16 + $0x148] sm:$0xff] }
  0x31   : > { %1069 = vmatpush.bf16.msrb.mxu3 %v8396_v21  ;;  %v264_v11 = vld [vmem:[%s8629_s16 + $0x60] sm:$0xff]  ;;  %v297_v63 = vld [vmem:[%s8629_s16 + $0x168] sm:$0xff] }
  0x32   : > { %12991 = vst [vmem:[#allocation12_spill] sm:$0xff] %v8766_v6  ;;  %v8782_v12 = vpack.c.bf16 %v264_v11, %v260_v10  ;;  %v324_v13 = vld [vmem:[%s8629_s16 + $0x240] sm:$0xff]  ;;  %v281_v10 = vld [vmem:[%s8629_s16 + $0xe8] sm:$0xff]  ;;  %v278_v11 = vld [vmem:[%s8629_s16 + $0xd0] sm:$0xff] }
  0x33   : > { %v328_v14 = vld [vmem:[%s8629_s16 + $0x260] sm:$0xff] }
  0x34   : > { %962 = vmatpush.bf16.msrb.mxu2 %v8387_v23  ;;  %854 = vmatpush.bf16.msrb.mxu1 %v8379_v25  ;;  %v364_v15 = vld [vmem:[%s8629_s16 + $0x380] sm:$0xff]  ;;  %v8790_v21 = vpack.c.bf16 %v328_v14, %v324_v13  ;;  %v282_v13 = vld [vmem:[%s8629_s16 + $0xf0] sm:$0xff]  ;;  %v279_v14 = vld [vmem:[%s8629_s16 + $0xd8] sm:$0xff] }
  0x35   : > { %1070 = vmatpush.bf16.msrb.mxu3 %v8395_v24  ;;  %v368_v16 = vld [vmem:[%s8629_s16 + $0x3a0] sm:$0xff] }
  0x36   : > { %v404_v20 = vld [vmem:[%s8629_s16 + $0x4c0] sm:$0xff]  ;;  %12992 = vst [vmem:[#allocation13_spill] sm:$0xff] %v8790_v21  ;;  %v8792_v22 = vpack.c.bf16 %v368_v16, %v364_v15  ;;  %v283_v15 = vld [vmem:[%s8629_s16 + $0xf8] sm:$0xff] }
  0x37   : > { %v8794_v23 = vpack.c.bf16 %v404_v20, %v404_v20  ;;  %v268_v24 = vld [vmem:[%s8629_s16 + $0x80] sm:$0xff]  ;;  %v8876_v20 = vpack.c.bf16 %v282_v13, %v278_v11 }
  0x38   : > { %963 = vmatpush.bf16.msrb.mxu2 %v8386_v26  ;;  %855 = vmatpush.bf16.msrb.mxu1 %v8378_v28  ;;  %12993 = vst [vmem:[#allocation14_spill] sm:$0xff] %v8792_v22  ;;  %v272_v25 = vld [vmem:[%s8629_s16 + $0xa0] sm:$0xff]  ;;  %v257_v28 = vld [vmem:[%s8629_s16 + $0x28] sm:$0xff] }
  0x39   : > { %1071 = vmatpush.bf16.msrb.mxu3 %v8394_v27  ;;  %12994 = vst [vmem:[#allocation15_spill] sm:$0xff] %v8794_v23  ;;  %v8801_v26 = vpack.c.bf16 %v272_v25, %v268_v24  ;;  %v253_v27 = vld [vmem:[%s8629_s16 + $0x8] sm:$0xff]  ;;  %v276_v51 = vld [vmem:[%s8629_s16 + $0xc0] sm:$0xff]  ;;  %v8880_v25 = vpack.c.bf16 %v283_v15, %v279_v14  ;;  %v8937_v14 = vpack.c.bf16 %v297_v63, %v293_v62  ;;  %v302_v62 = vld [vmem:[%s8629_s16 + $0x190] sm:$0xff] }
  0x3a   : > { %v8810_v33 = vpack.c.bf16 %v257_v28, %v253_v27  ;;  %v284_v3 = vld [vmem:[%s8629_s16 + $0x100] sm:$0xff]  ;;  %v8419_v27 = vld [vmem:[%s12895_s2 + $0xa8] sm:$0xff]  ;;  %v306_v63 = vld [vmem:[%s8629_s16 + $0x1b0] sm:$0xff] }
  0x3b   : > { %782 = vmatmul.bf16.gmra.mxu1 %v8700_v38  ;;  %807 = vmatmul.bf16.gmra.mxu2 %v8702_v39  ;;  %v8427_v28 = vld [vmem:[%s12895_s2 + $0xe8] sm:$0xff]  ;;  %13001 = vst [vmem:[#allocation22_spill] sm:$0xff] %v8937_v14 }
  0x3c   : > { %964 = vmatpush.bf16.msrb.mxu2 %v8385_v35  ;;  %856 = vmatpush.bf16.msrb.mxu1 %v8377_v37  ;;  %v8814_v35 = vpack.c.bf16 %v259_v32, %v255_v31  ;;  %v8428_v37 = vld [vmem:[%s12895_s2 + $0xf0] sm:$0xff]  ;;  %v8411_v31 = vld [vmem:[%s12895_s2 + $0x68] sm:$0xff] }
  0x3d   : > { %1072 = vmatpush.bf16.msrb.mxu3 %v8393_v36  ;;  %757 = vmatmul.bf16.gmra.mxu0 %v8782_v12  ;;  %v8420_v36 = vld [vmem:[%s12895_s2 + $0xb0] sm:$0xff] }
  0x3e   : > { %832 = vmatmul.bf16.gmra.mxu3 %v8704_v40  ;;  %v313_v40 = vld [vmem:[%s8629_s16 + $0x1e8] sm:$0xff] }
  0x40   : > { %965 = vmatpush.bf16.msrb.mxu2 %v8384_v41  ;;  %857 = vmatpush.bf16.msrb.mxu1 %v8376_v43  ;;  %v8412_v41 = vld [vmem:[%s12895_s2 + $0x70] sm:$0xff]  ;;  %v265_v43 = vld [vmem:[%s8629_s16 + $0x68] sm:$0xff] }
  0x41   : > { %1073 = vmatpush.bf16.msrb.mxu3 %v8392_v42  ;;  %v261_v42 = vld [vmem:[%s8629_s16 + $0x48] sm:$0xff] }
  0x42   : > { %v8834_v48 = vpack.c.bf16 %v265_v43, %v261_v42  ;;  %v290_v42 = vld [vmem:[%s8629_s16 + $0x130] sm:$0xff]  ;;  %v287_v43 = vld [vmem:[%s8629_s16 + $0x118] sm:$0xff] }
  0x44   : > { %966 = vmatpush.bf16.msrb.mxu2 %v8383_v44  ;;  %858 = vmatpush.bf16.msrb.mxu1 %v8375_v55  ;;  %v262_v44 = vld [vmem:[%s8629_s16 + $0x50] sm:$0xff]  ;;  %v280_v55 = vld [vmem:[%s8629_s16 + $0xe0] sm:$0xff] }
  0x45   : > { %1074 = vmatpush.bf16.msrb.mxu3 %v8391_v45  ;;  %v266_v45 = vld [vmem:[%s8629_s16 + $0x70] sm:$0xff] }
  0x46   : > { %v8836_v49 = vpack.c.bf16 %v266_v45, %v262_v44  ;;  %v291_v44 = vld [vmem:[%s8629_s16 + $0x138] sm:$0xff] }
  0x48   : > { %967 = vmatpush.bf16.msrb.mxu2 %v8382_v56  ;;  %859 = vmatpush.bf16.msrb.mxu1 %v8374_v60  ;;  %v8842_v56 = vpack.c.bf16 %v280_v55, %v276_v51  ;;  %v274_v60 = vld [vmem:[%s8629_s16 + $0xb0] sm:$0xff] }
  0x49   : > { %1075 = vmatpush.bf16.msrb.mxu3 %v8390_v57  ;;  %v269_v57 = vld [vmem:[%s8629_s16 + $0x88] sm:$0xff]  ;;  %v8856_v1 = vpack.c.bf16 %v274_v60, %v270_v59 }
  0x4a   : > { %v8854_v0 = vpack.c.bf16 %v273_v58, %v269_v57  ;;  %v8916_v57 = vpack.c.bf16 %v291_v44, %v287_v43  ;;  %v301_v43 = vld [vmem:[%s8629_s16 + $0x188] sm:$0xff] }
  0x4b   : > { %787 = vmatmul.bf16.gmra.mxu1 %v8730_v52  ;;  %812 = vmatmul.bf16.gmra.mxu2 %v8732_v53  ;;  %v305_v44 = vld [vmem:[%s8629_s16 + $0x1a8] sm:$0xff] }
  0x4c   : > { %1648 = vmatpush.bf16.msra.mxu2 %v8421_v7  ;;  %1540 = vmatpush.bf16.msra.mxu1 %v8413_v9  ;;  %v288_v7 = vld [vmem:[%s8629_s16 + $0x120] sm:$0xff]  ;;  %v277_v9 = vld [vmem:[%s8629_s16 + $0xc8] sm:$0xff]  ;;  %12998 = vst [vmem:[#allocation19_spill] sm:$0xff] %v8916_v57 }
  0x4d   : > { %1756 = vmatpush.bf16.msra.mxu3 %v8429_v8  ;;  %762 = vmatmul.bf16.gmra.mxu0 %v8801_v26  ;;  %v8862_v8 = vpack.c.bf16 %v288_v7, %v284_v3  ;;  %v8874_v16 = vpack.c.bf16 %v281_v10, %v277_v9  ;;  %v294_v3 = vld [vmem:[%s8629_s16 + $0x150] sm:$0xff]  ;;  %v295_v9 = vld [vmem:[%s8629_s16 + $0x158] sm:$0xff] }
  0x4e   : > { %837 = vmatmul.bf16.gmra.mxu3 %v8734_v54  ;;  %v298_v7 = vld [vmem:[%s8629_s16 + $0x170] sm:$0xff]  ;;  %v299_v10 = vld [vmem:[%s8629_s16 + $0x178] sm:$0xff] }
  0x4f   : > { %v8939_v15 = vpack.c.bf16 %v298_v7, %v294_v3  ;;  %v303_v3 = vld [vmem:[%s8629_s16 + $0x198] sm:$0xff] }
  0x50   : > { %1649 = vmatpush.bf16.msra.mxu2 %v8420_v36  ;;  %1541 = vmatpush.bf16.msra.mxu1 %v8412_v41  ;;  %v285_v36 = vld [vmem:[%s8629_s16 + $0x108] sm:$0xff]  ;;  %v286_v41 = vld [vmem:[%s8629_s16 + $0x110] sm:$0xff]  ;;  %v307_v7 = vld [vmem:[%s8629_s16 + $0x1b8] sm:$0xff] }
  0x51   : > { %1757 = vmatpush.bf16.msra.mxu3 %v8428_v37  ;;  %v289_v37 = vld [vmem:[%s8629_s16 + $0x128] sm:$0xff]  ;;  %v8912_v51 = vpack.c.bf16 %v290_v42, %v286_v41  ;;  %13002 = vst [vmem:[#allocation23_spill] sm:$0xff] %v8939_v15  ;;  %v8418_v41 = vld [vmem:[%s12895_s2 + $0xa0] sm:$0xff]  ;;  %v8979_v54 = vpack.c.bf16 %v307_v7, %v303_v3  ;;  %v315_v3 = vld [vmem:[%s8629_s16 + $0x1f8] sm:$0xff] }
  0x52   : > { %v8910_v47 = vpack.c.bf16 %v289_v37, %v285_v36  ;;  %v8426_v42 = vld [vmem:[%s12895_s2 + $0xe0] sm:$0xff] }
  0x53   : > { %12997 = vst [vmem:[#allocation18_spill] sm:$0xff] %v8912_v51 }
  0x54   : > { %1650 = vmatpush.bf16.msra.mxu2 %v8419_v27  ;;  %1542 = vmatpush.bf16.msra.mxu1 %v8411_v31  ;;  %12996 = vst [vmem:[#allocation17_spill] sm:$0xff] %v8910_v47 }
  0x55   : > { %1758 = vmatpush.bf16.msra.mxu3 %v8427_v28  ;;  %v8943_v28 = vpack.c.bf16 %v299_v10, %v295_v9  ;;  %13008 = vst [vmem:[#allocation29_spill] sm:$0xff] %v8979_v54 }
  0x57   : > { %13003 = vst [vmem:[#allocation24_spill] sm:$0xff] %v8943_v28 }
  0x58   : > { %1651 = vmatpush.bf16.msra.mxu2 %v8418_v41  ;;  %v8410_v41 = vld [vmem:[%s12895_s2 + $0x60] sm:$0xff] }
  0x59   : > { %1759 = vmatpush.bf16.msra.mxu3 %v8426_v42  ;;  %1543 = vmatpush.bf16.msra.mxu1 %v8410_v41 }
  0x5b   : > { %792 = vmatmul.bf16.gmra.mxu1 %v8762_v4  ;;  %817 = vmatmul.bf16.gmra.mxu2 %v8764_v5  ;;  %v311_v5 = vld [vmem:[%s8629_s16 + $0x1d8] sm:$0xff] }
  0x5d   : > { %767 = vmatmul.bf16.gmra.mxu0 %v8842_v56 }
  0x5e   : > { %842 = vmatmul.bf16.gmra.mxu3 %v8766_v6  ;;  %v8972_v6 = vpack.c.bf16 %v306_v63, %v302_v62  ;;  %v309_v63 = vld [vmem:[%s8629_s16 + $0x1c8] sm:$0xff] }
  0x5f   : > { %v9000_v53 = vpack.c.bf16 %v313_v40, %v309_v63 }
  0x60   : > { %13007 = vst [vmem:[#allocation28_spill] sm:$0xff] %v8972_v6 }
  0x61   : > { %13011 = vst [vmem:[#allocation32_spill] sm:$0xff] %v9000_v53 }
  0x6b   : > { %797 = vmatmul.bf16.gmra.mxu1 %v8790_v21  ;;  %822 = vmatmul.bf16.gmra.mxu2 %v8792_v22  ;;  %v314_v22 = vld [vmem:[%s8629_s16 + $0x1f0] sm:$0xff]  ;;  %v9006_v21 = vpack.c.bf16 %v315_v3, %v311_v5  ;;  %v2295_v3 = vld [vmem:[%s12897_s4 + $0x8] sm:$0xff] }
  0x6c   : > { %v9002_v39 = vpack.c.bf16 %v314_v22, %v310_v19  ;;  %v2574_v19 = vld [vmem:[%s12898_s5] sm:$0xff] }
  0x6d   : > { %772 = vmatmul.bf16.gmra.mxu0 %v8862_v8  ;;  %13013 = vst [vmem:[#allocation34_spill] sm:$0xff] %v9006_v21 }
  0x6e   : > { %847 = vmatmul.bf16.gmra.mxu3 %v8794_v23  ;;  %v8970_v23 = vpack.c.bf16 %v305_v44, %v301_v43  ;;  %13012 = vst [vmem:[#allocation33_spill] sm:$0xff] %v9002_v39 }
  0x70   : > { %13006 = vst [vmem:[#allocation27_spill] sm:$0xff] %v8970_v23 }
  0x7b   : > { %860 = vmatmul.bf16.vlgmr.msrb.gmra.mxu1 %v8810_v33  ;;  %968 = vmatmul.bf16.vlgmr.msrb.gmra.mxu2 %v8812_v34 }
  0x7e   : > { %1076 = vmatmul.bf16.vlgmr.msrb.gmra.mxu3 %v8814_v35 }
  0x8b   : > { %865 = vmatmul.bf16.gmra.mxu1 %v8834_v48  ;;  %973 = vmatmul.bf16.gmra.mxu2 %v8836_v49 }
  0x8e   : > { %1081 = vmatmul.bf16.gmra.mxu3 %v8838_v50 }
  0x9b   : > { %870 = vmatmul.bf16.gmra.mxu1 %v8854_v0  ;;  %978 = vmatmul.bf16.gmra.mxu2 %v8856_v1 }
  0x9e   : > { %1086 = vmatmul.bf16.gmra.mxu3 %v8858_v2 }
  0xa8   : > { %v8878_v24 = vpop.f32.mrf.mxu1 }
  0xab   : > { %875 = vmatmul.bf16.gmra.mxu1 %v8874_v16  ;;  %983 = vmatmul.bf16.gmra.mxu2 %v8876_v20 }
  0xae   : > { %1091 = vmatmul.bf16.gmra.mxu3 %v8880_v25  ;;  %v8891_v29 = vpop.f32.mrf.mxu2 }
  0xb0   : > { %v8898_v32 = vpop.f32.mrf.mxu1 }
  0xb1   : > { %v8893_v30 = vpop.f32.mrf.mxu3 }
  0xb6   : > { %v8906_v45 = vpop.f32.mrf.mxu2 }
  0xb8   : > { %v8914_v55 = vpop.f32.mrf.mxu1 }
  0xb9   : > { %v8908_v46 = vpop.f32.mrf.mxu3 }
  0xba   : > { %12995 = vst [vmem:[#allocation16_spill] sm:$0xff] %v8908_v46 }
  0xbb   : > { %880 = vmatmul.bf16.gmra.mxu1 %v8910_v47  ;;  %988 = vmatmul.bf16.gmra.mxu2 %v8912_v51 }
  0xbe   : > { %1096 = vmatmul.bf16.gmra.mxu3 %v8916_v57  ;;  %v8921_v58 = vpop.f32.mrf.mxu2 }
  0xc0   : > { %v8925_v60 = vpop.f32.mrf.mxu1 }
  0xc1   : > { %v8923_v59 = vpop.f32.mrf.mxu3 }
  0xc2   : > { %12999 = vst [vmem:[#allocation20_spill] sm:$0xff] %v8923_v59 }
  0xc6   : > { %v8933_v11 = vpop.f32.mrf.mxu2 }
  0xc8   : > { %v8941_v27 = vpop.f32.mrf.mxu1 }
  0xc9   : > { %v8935_v13 = vpop.f32.mrf.mxu3 }
  0xca   : > { %13000 = vst [vmem:[#allocation21_spill] sm:$0xff] %v8935_v13 }
  0xcb   : > { %885 = vmatmul.bf16.gmra.mxu1 %v8937_v14  ;;  %993 = vmatmul.bf16.gmra.mxu2 %v8939_v15  ;;  %v2576_v14 = vld [vmem:[%s12898_s5 + $0x10] sm:$0xff] }
  0xce   : > { %1101 = vmatmul.bf16.gmra.mxu3 %v8943_v28  ;;  %v8948_v31 = vpop.f32.mrf.mxu2 }
  0xd0   : > { %v8952_v37 = vpop.f32.mrf.mxu1 }
  0xd1   : > { %v8950_v36 = vpop.f32.mrf.mxu3 }
  0xd2   : > { %13004 = vst [vmem:[#allocation25_spill] sm:$0xff] %v8950_v36 }
  0xd6   : > { %v8966_v9 = vpop.f32.mrf.mxu2 }
  0xd8   : > { %v8977_v42 = vpop.f32.mrf.mxu1 }
  0xd9   : > { %v8968_v10 = vpop.f32.mrf.mxu3 }
  0xda   : > { %13005 = vst [vmem:[#allocation26_spill] sm:$0xff] %v8968_v10 }
  0xdb   : > { %890 = vmatmul.bf16.gmra.mxu1 %v8970_v23  ;;  %998 = vmatmul.bf16.gmra.mxu2 %v8972_v6  ;;  %v2294_v6 = vld [vmem:[%s12897_s4] sm:$0xff] }
  0xde   : > { %1106 = vmatmul.bf16.gmra.mxu3 %v8979_v54  ;;  %v8984_v43 = vpop.f32.mrf.mxu2  ;;  %v8557_v54 = vmov 0  }
  0xdf   : > { %8538 = vset.pattern.permute.xlu0 %v8557_v54  ;;  %8539 = vset.pattern.permute.xlu1 %v8557_v54 }
  0xe0   : > { %v8988_v62 = vpop.f32.mrf.mxu1  ;;  %2336 = vperm.xlu0 %8538, %v2294_v6   ;;  %2616 = vperm.xlu1 %8539, %v2574_v19   ;;  %v2575_v6 = vld [vmem:[%s12898_s5 + $0x8] sm:$0xff]  ;;  %v322_v19 = vld [vmem:[%s8629_s16 + $0x230] sm:$0xff] }
  0xe1   : > { %v8986_v44 = vpop.f32.mrf.mxu3  ;;  %8540 = vset.pattern.permute.xlu2 %v8557_v54  ;;  %v319_v54 = vld [vmem:[%s8629_s16 + $0x218] sm:$0xff] }
  0xe2   : > { %13009 = vst [vmem:[#allocation30_spill] sm:$0xff] %v8986_v44  ;;  %v753_v44 = vpop.f32.mrf.mxu0 }
  0xe6   : > { %v8996_v7 = vpop.f32.mrf.mxu2 }
  0xe8   : > { %v9004_v18 = vpop.f32.mrf.mxu1  ;;  %2341 = vperm.xlu0 %8538, %v2295_v3   ;;  %2621 = vperm.xlu1 %8539, %v2575_v6   ;;  %v2299_v6 = vld [vmem:[%s12897_s4 + $0x28] sm:$0xff] }
  0xe9   : > { %v8998_v41 = vpop.f32.mrf.mxu3 }
  0xea   : > { %13010 = vst [vmem:[#allocation31_spill] sm:$0xff] %v8998_v41  ;;  %v755_v63 = vpop.f32.mrf.mxu0  ;;  %v323_v41 = vld [vmem:[%s8629_s16 + $0x238] sm:$0xff] }
  0xeb   : > { %895 = vmatmul.bf16.gmra.mxu1 %v9000_v53  ;;  %1003 = vmatmul.bf16.gmra.mxu2 %v9002_v39  ;;  %v321_v39 = vld [vmem:[%s8629_s16 + $0x228] sm:$0xff]  ;;  %v318_v53 = vld [vmem:[%s8629_s16 + $0x210] sm:$0xff]  ;;  %v9041_v28 = vpack.c.bf16 %v323_v41, %v319_v54  ;;  %v8409_v54 = vld [vmem:[%s12895_s2 + $0x58] sm:$0xff] }
  0xec   : > { %v9039_v10 = vpack.c.bf16 %v322_v19, %v318_v53  ;;  %v2577_v53 = vld [vmem:[%s12898_s5 + $0x18] sm:$0xff]  ;;  %v325_v19 = vld [vmem:[%s8629_s16 + $0x248] sm:$0xff]  ;;  %1544 = vmatpush.bf16.msra.mxu1 %v8409_v54 }
  0xed   : > { %13017 = vst [vmem:[#allocation38_spill] sm:$0xff] %v9041_v28 }
  0xee   : > { %1111 = vmatmul.bf16.gmra.mxu3 %v9006_v21  ;;  %v9017_v40 = vpop.f32.mrf.mxu2  ;;  %v317_v21 = vld [vmem:[%s8629_s16 + $0x208] sm:$0xff]  ;;  %13016 = vst [vmem:[#allocation37_spill] sm:$0xff] %v9039_v10 }
  0xef   : > { %v9037_v4 = vpack.c.bf16 %v321_v39, %v317_v21  ;;  %v8417_v39 = vld [vmem:[%s12895_s2 + $0x98] sm:$0xff] }
  0xf0   : > { %v9021_v22 = vpop.f32.mrf.mxu1  ;;  %2626 = vperm.xlu0 %8538, %v2576_v14   ;;  %v8425_v21 = vld [vmem:[%s12895_s2 + $0xd8] sm:$0xff]  ;;  %2631 = vperm.xlu1 %8539, %v2577_v53   ;;  %v329_v53 = vld [vmem:[%s8629_s16 + $0x268] sm:$0xff] }
  0xf1   : > { %v9019_v5 = vpop.f32.mrf.mxu3  ;;  %13015 = vst [vmem:[#allocation36_spill] sm:$0xff] %v9037_v4  ;;  %1652 = vmatpush.bf16.msra.mxu2 %v8417_v39  ;;  %1760 = vmatpush.bf16.msra.mxu3 %v8425_v21  ;;  %v2578_v39 = vld [vmem:[%s12898_s5 + $0x20] sm:$0xff]  ;;  %v326_v21 = vld [vmem:[%s8629_s16 + $0x250] sm:$0xff]  ;;  %v9075_v13 = vpack.c.bf16 %v329_v53, %v325_v19  ;;  %v2581_v53 = vld [vmem:[%s12898_s5 + $0x38] sm:$0xff] }
  0xf2   : > { %13014 = vst [vmem:[#allocation35_spill] sm:$0xff] %v9019_v5 }
  0xf3   : > { %13019 = vst [vmem:[#allocation40_spill] sm:$0xff] %v9075_v13 }
  0xf6   : > { %v9035_v5 = vpop.f32.mrf.mxu2 }
  0xf8   : > { %v861_v36 = vpop.f32.mrf.mxu1  ;;  %2361 = vperm.xlu0 %8538, %v2299_v6   ;;  %2636 = vperm.xlu1 %8539, %v2578_v39   ;;  %v2296_v39 = vld [vmem:[%s12897_s4 + $0x10] sm:$0xff] }
  0xf9   : > { %v850_v23 = vpop.f32.mrf.mxu3  ;;  %v862_v15 = vadd.f32 %v861_v36, %v753_v44  ;;  %2346 = vperm.xlu2 %8540, %v2296_v39  }
  0xfa   : > { %v758_v23 = vpop.f32.mrf.mxu0 }
  0xfb   : > { %900 = vmatmul.bf16.gmra.mxu1 %v9037_v4  ;;  %1008 = vmatmul.bf16.gmra.mxu2 %v9039_v10 }
  0xfe   : > { %1116 = vmatmul.bf16.gmra.mxu3 %v9041_v28  ;;  %v969_v36 = vpop.f32.mrf.mxu2 }
  0xff   : > { %v970_v14 = vadd.f32 %v969_v36, %v862_v15  ;;  %v330_v15 = vld [vmem:[%s8629_s16 + $0x270] sm:$0xff] }
 0x100   : > { %v863_v41 = vpop.f32.mrf.mxu1  ;;  %v9077_v59 = vpack.c.bf16 %v330_v15, %v326_v21  ;;  %v333_v15 = vld [vmem:[%s8629_s16 + $0x288] sm:$0xff] }
 0x101   : > { %v1077_v44 = vpop.f32.mrf.mxu3  ;;  %v864_v36 = vadd.f32 %v863_v41, %v755_v63  ;;  %v2300_v63 = vld [vmem:[%s12897_s4 + $0x30] sm:$0xff] }
 0x102   : > { %v9058_v3 = vadd.f32 %v1077_v44, %v970_v14  ;;  %v327_v14 = vld [vmem:[%s8629_s16 + $0x258] sm:$0xff]  ;;  %v760_v10 = vpop.f32.mrf.mxu0  ;;  %13020 = vst [vmem:[#allocation41_spill] sm:$0xff] %v9077_v59  ;;  %2366 = vperm.xlu0 %8538, %v2300_v63  }
 0x103   : > { %v331_v44 = vld [vmem:[%s8629_s16 + $0x278] sm:$0xff] }
 0x104   : > { %13018 = vst [vmem:[#allocation39_spill] sm:$0xff] %v9058_v3  ;;  %v9079_v51 = vpack.c.bf16 %v331_v44, %v327_v14  ;;  %v12929_v41 = vrot.slane %v9058_v3, 7  ;;  %v334_v14 = vld [vmem:[%s8629_s16 + $0x290] sm:$0xff] }
 0x105   : > { %v338_v44 = vld [vmem:[%s8629_s16 + $0x2b0] sm:$0xff] }
 0x106   : > { %v971_v28 = vpop.f32.mrf.mxu2  ;;  %13021 = vst [vmem:[#allocation42_spill] sm:$0xff] %v9079_v51  ;;  %v9116_v39 = vpack.c.bf16 %v338_v44, %v334_v14  ;;  %v341_v14 = vld [vmem:[%s8629_s16 + $0x2c8] sm:$0xff]  ;;  %v2298_v44 = vld [vmem:[%s12897_s4 + $0x20] sm:$0xff] }
 0x107   : > { %v972_v4 = vadd.f32 %v971_v28, %v864_v36  ;;  %v337_v36 = vld [vmem:[%s8629_s16 + $0x2a8] sm:$0xff] }
 0x108   : > { %v866_v57 = vpop.f32.mrf.mxu1  ;;  %13025 = vst [vmem:[#allocation46_spill] sm:$0xff] %v9116_v39 }
 0x109   : > { %v1079_v52 = vpop.f32.mrf.mxu3  ;;  %v867_v38 = vadd.f32 %v866_v57, %v758_v23 }
 0x10a   : > { %v1080_v47 = vadd.f32 %v1079_v52, %v972_v4  ;;  %v2301_v52 = vld [vmem:[%s12897_s4 + $0x38] sm:$0xff]  ;;  %v763_v19 = vpop.f32.mrf.mxu0  ;;  %2651 = vperm.xlu0 %8538, %v2581_v53  }
 0x10b   : > { %905 = vmatmul.bf16.gmra.mxu1 %v9075_v13  ;;  %1013 = vmatmul.bf16.gmra.mxu2 %v9077_v59 }
 0x10c   : > { %v1905_v6 = vrot.slane %v1080_v47, 7  ;;  %2371 = vperm.xlu1 %8539, %v2301_v52   ;;  %v335_v52 = vld [vmem:[%s8629_s16 + $0x298] sm:$0xff] }
 0x10e   : > { %1121 = vmatmul.bf16.gmra.mxu3 %v9079_v51  ;;  %v9094_v4 = vsel %vm1903_vm0, %v12929_v41, %v1905_v6  ;;  %v974_v47 = vpop.f32.mrf.mxu2  ;;  %v9114_v51 = vpack.c.bf16 %v337_v36, %v333_v15 }
 0x10f   : > { %13022 = vst [vmem:[#allocation43_spill] sm:$0xff] %v9094_v4  ;;  %v975_v57 = vadd.f32 %v974_v47, %v867_v38  ;;  %v2302_v38 = vld [vmem:[%s12897_s4 + $0x40] sm:$0xff]  ;;  %v339_v47 = vld [vmem:[%s8629_s16 + $0x2b8] sm:$0xff] }
 0x110   : > { %v868_v23 = vpop.f32.mrf.mxu1  ;;  %13024 = vst [vmem:[#allocation45_spill] sm:$0xff] %v9114_v51  ;;  %v9118_v13 = vpack.c.bf16 %v339_v47, %v335_v52  ;;  %v8424_v47 = vld [vmem:[%s12895_s2 + $0xd0] sm:$0xff] }
 0x111   : > { %v1082_v28 = vpop.f32.mrf.mxu3  ;;  %v869_v63 = vadd.f32 %v868_v23, %v760_v10  ;;  %v2297_v10 = vld [vmem:[%s12897_s4 + $0x18] sm:$0xff]  ;;  %1761 = vmatpush.bf16.msra.mxu3 %v8424_v47 }
 0x112   : > { %v1083_v54 = vadd.f32 %v1082_v28, %v975_v57  ;;  %13026 = vst [vmem:[#allocation47_spill] sm:$0xff] %v9118_v13  ;;  %v765_v53 = vpop.f32.mrf.mxu0  ;;  %2351 = vperm.xlu2 %8540, %v2297_v10   ;;  %v342_v10 = vld [vmem:[%s8629_s16 + $0x2d0] sm:$0xff] }
 0x114   : > { %v1907_v21 = vrot.slane %v1083_v54, 7  ;;  %2376 = vperm.xlu1 %8539, %v2302_v38  }
 0x116   : > { %v9112_v57 = vsel %vm1903_vm0, %v1905_v6, %v1907_v21  ;;  %v976_v28 = vpop.f32.mrf.mxu2  ;;  %v2582_v6 = vld [vmem:[%s12898_s5 + $0x40] sm:$0xff] }
 0x117   : > { %13023 = vst [vmem:[#allocation44_spill] sm:$0xff] %v9112_v57  ;;  %v977_v41 = vadd.f32 %v976_v28, %v869_v63  ;;  %2656 = vperm.xlu0 %8538, %v2582_v6   ;;  %v2305_v63 = vld [vmem:[%s12897_s4 + $0x58] sm:$0xff]  ;;  %v346_v6 = vld [vmem:[%s8629_s16 + $0x2f0] sm:$0xff] }
 0x118   : > { %v871_v59 = vpop.f32.mrf.mxu1 }
 0x119   : > { %v1084_v54 = vpop.f32.mrf.mxu3  ;;  %v872_v3 = vadd.f32 %v871_v59, %v763_v19  ;;  %v2583_v59 = vld [vmem:[%s12898_s5 + $0x48] sm:$0xff] }
 0x11a   : > { %v1085_v4 = vadd.f32 %v1084_v54, %v977_v41  ;;  %v768_v28 = vpop.f32.mrf.mxu0  ;;  %v345_v54 = vld [vmem:[%s8629_s16 + $0x2e8] sm:$0xff]  ;;  %2356 = vperm.xlu2 %8540, %v2298_v44  }
 0x11b   : > { %910 = vmatmul.bf16.gmra.mxu1 %v9114_v51  ;;  %1018 = vmatmul.bf16.gmra.mxu2 %v9116_v39  ;;  %v9159_v51 = vpack.c.bf16 %v345_v54, %v341_v14  ;;  %v2579_v44 = vld [vmem:[%s12898_s5 + $0x28] sm:$0xff]  ;;  %v8408_v14 = vld [vmem:[%s12895_s2 + $0x50] sm:$0xff] }
 0x11c   : > { %v1909_v23 = vrot.slane %v1085_v4, 7  ;;  %2661 = vperm.xlu1 %8539, %v2583_v59   ;;  %1545 = vmatpush.bf16.msra.mxu1 %v8408_v14 }
 0x11d   : > { %13028 = vst [vmem:[#allocation49_spill] sm:$0xff] %v9159_v51 }
 0x11e   : > { %1126 = vmatmul.bf16.gmra.mxu3 %v9118_v13  ;;  %v9133_v41 = vsel %vm1903_vm0, %v1907_v21, %v1909_v23  ;;  %v979_v4 = vpop.f32.mrf.mxu2  ;;  %v8416_v21 = vld [vmem:[%s12895_s2 + $0x90] sm:$0xff] }
 0x11f   : > { %13027 = vst [vmem:[#allocation48_spill] sm:$0xff] %v9133_v41  ;;  %v980_v19 = vadd.f32 %v979_v4, %v872_v3  ;;  %v2584_v3 = vld [vmem:[%s12898_s5 + $0x50] sm:$0xff]  ;;  %v343_v4 = vld [vmem:[%s8629_s16 + $0x2d8] sm:$0xff]  ;;  %2391 = vperm.xlu0 %8538, %v2305_v63   ;;  %1653 = vmatpush.bf16.msra.mxu2 %v8416_v21  ;;  %v9161_v41 = vpack.c.bf16 %v346_v6, %v342_v10  ;;  %v2587_v6 = vld [vmem:[%s12898_s5 + $0x68] sm:$0xff] }
 0x120   : > { %v873_v38 = vpop.f32.mrf.mxu1  ;;  %v2580_v10 = vld [vmem:[%s12898_s5 + $0x30] sm:$0xff] }
 0x121   : > { %v1087_v15 = vpop.f32.mrf.mxu3  ;;  %v874_v59 = vadd.f32 %v873_v38, %v765_v53  ;;  %13029 = vst [vmem:[#allocation50_spill] sm:$0xff] %v9161_v41 }
 0x122   : > { %v1088_v36 = vadd.f32 %v1087_v15, %v980_v19  ;;  %v347_v19 = vld [vmem:[%s8629_s16 + $0x2f8] sm:$0xff]  ;;  %2641 = vperm.xlu2 %8540, %v2579_v44   ;;  %v770_v21 = vpop.f32.mrf.mxu0 }
 0x123   : > { %v9163_v46 = vpack.c.bf16 %v347_v19, %v343_v4  ;;  %v2308_v4 = vld [vmem:[%s12897_s4 + $0x70] sm:$0xff]  ;;  %v353_v19 = vld [vmem:[%s8629_s16 + $0x328] sm:$0xff]  ;;  %v351_v44 = vld [vmem:[%s8629_s16 + $0x318] sm:$0xff] }
 0x124   : > { %v1911_v52 = vrot.slane %v1088_v36, 7  ;;  %2666 = vperm.xlu1 %8539, %v2584_v3  }
 0x125   : > { %13030 = vst [vmem:[#allocation51_spill] sm:$0xff] %v9163_v46 }
 0x126   : > { %v9157_v15 = vsel %vm1903_vm0, %v1909_v23, %v1911_v52  ;;  %v981_v36 = vpop.f32.mrf.mxu2  ;;  %v2306_v23 = vld [vmem:[%s12897_s4 + $0x60] sm:$0xff] }
 0x127   : > { %v982_v13 = vadd.f32 %v981_v36, %v874_v59  ;;  %2396 = vperm.xlu0 %8538, %v2306_v23   ;;  %v350_v36 = vld [vmem:[%s8629_s16 + $0x310] sm:$0xff]  ;;  %v355_v23 = vld [vmem:[%s8629_s16 + $0x338] sm:$0xff] }
 0x128   : > { %v876_v57 = vpop.f32.mrf.mxu1 }
 0x129   : > { %v1089_v39 = vpop.f32.mrf.mxu3  ;;  %v877_v38 = vadd.f32 %v876_v57, %v768_v28 }
 0x12a   : > { %v1090_v53 = vadd.f32 %v1089_v39, %v982_v13  ;;  %v2307_v13 = vld [vmem:[%s12897_s4 + $0x68] sm:$0xff]  ;;  %2646 = vperm.xlu2 %8540, %v2580_v10  }
 0x12b   : > { %915 = vmatmul.bf16.gmra.mxu1 %v9159_v51  ;;  %1023 = vmatmul.bf16.gmra.mxu2 %v9161_v41  ;;  %v9205_v51 = vpack.c.bf16 %v355_v23, %v351_v44  ;;  %v2304_v44 = vld [vmem:[%s12897_s4 + $0x50] sm:$0xff]  ;;  %v2311_v23 = vld [vmem:[%s12897_s4 + $0x88] sm:$0xff] }
 0x12c   : > { %v1913_v63 = vrot.slane %v1090_v53, 7  ;;  %2401 = vperm.xlu1 %8539, %v2307_v13   ;;  %v354_v53 = vld [vmem:[%s8629_s16 + $0x330] sm:$0xff] }
 0x12d   : > { %13034 = vst [vmem:[#allocation55_spill] sm:$0xff] %v9205_v51 }
 0x12e   : > { %1131 = vmatmul.bf16.gmra.mxu3 %v9163_v46  ;;  %v9181_v57 = vsel %vm1903_vm0, %v1911_v52, %v1913_v63  ;;  %v984_v39 = vpop.f32.mrf.mxu2  ;;  %v349_v52 = vld [vmem:[%s8629_s16 + $0x308] sm:$0xff]  ;;  %v773_v46 = vpop.f32.mrf.mxu0 }
 0x12f   : > { %v985_v3 = vadd.f32 %v984_v39, %v877_v38  ;;  %2681 = vperm.xlu0 %8538, %v2587_v6  }
 0x130   : > { %v878_v28 = vpop.f32.mrf.mxu1 }
 0x131   : > { %v1092_v47 = vpop.f32.mrf.mxu3  ;;  %v879_v38 = vadd.f32 %v878_v28, %v770_v21  ;;  %v2303_v28 = vld [vmem:[%s12897_s4 + $0x48] sm:$0xff] }
 0x132   : > { %v1093_v54 = vadd.f32 %v1092_v47, %v985_v3  ;;  %v9201_v47 = vpack.c.bf16 %v353_v19, %v349_v52  ;;  %2381 = vperm.xlu2 %8540, %v2303_v28  }
 0x134   : > { %v1915_v59 = vrot.slane %v1093_v54, 7  ;;  %2406 = vperm.xlu1 %8539, %v2308_v4   ;;  %13032 = vst [vmem:[#allocation53_spill] sm:$0xff] %v9201_v47  ;;  %v9203_v54 = vpack.c.bf16 %v354_v53, %v350_v36 }
 0x136   : > { %v9199_v14 = vsel %vm1903_vm0, %v1913_v63, %v1915_v59  ;;  %v986_v13 = vpop.f32.mrf.mxu2  ;;  %13033 = vst [vmem:[#allocation54_spill] sm:$0xff] %v9203_v54  ;;  %v2588_v63 = vld [vmem:[%s12898_s5 + $0x70] sm:$0xff] }
 0x137   : > { %13031 = vst [vmem:[#allocation52_spill] sm:$0xff] %v9199_v14  ;;  %v987_v39 = vadd.f32 %v986_v13, %v879_v38  ;;  %2686 = vperm.xlu0 %8538, %v2588_v63   ;;  %v775_v38 = vpop.f32.mrf.mxu0  ;;  %v359_v63 = vld [vmem:[%s8629_s16 + $0x358] sm:$0xff] }
 0x138   : > { %v881_v41 = vpop.f32.mrf.mxu1 }
 0x139   : > { %v1094_v3 = vpop.f32.mrf.mxu3  ;;  %v882_v21 = vadd.f32 %v881_v41, %v773_v46  ;;  %v2589_v46 = vld [vmem:[%s12898_s5 + $0x78] sm:$0xff] }
 0x13a   : > { %v1095_v10 = vadd.f32 %v1094_v3, %v987_v39  ;;  %v2590_v39 = vld [vmem:[%s12898_s5 + $0x80] sm:$0xff]  ;;  %v361_v3 = vld [vmem:[%s8629_s16 + $0x368] sm:$0xff]  ;;  %2386 = vperm.xlu2 %8540, %v2304_v44  }
 0x13b   : > { %920 = vmatmul.bf16.gmra.mxu1 %v9201_v47  ;;  %1028 = vmatmul.bf16.gmra.mxu2 %v9203_v54  ;;  %v8415_v44 = vld [vmem:[%s12895_s2 + $0x88] sm:$0xff] }
 0x13c   : > { %v1917_v6 = vrot.slane %v1095_v10, 7  ;;  %2691 = vperm.xlu1 %8539, %v2589_v46   ;;  %v358_v10 = vld [vmem:[%s8629_s16 + $0x350] sm:$0xff]  ;;  %v363_v46 = vld [vmem:[%s8629_s16 + $0x378] sm:$0xff]  ;;  %1654 = vmatpush.bf16.msra.mxu2 %v8415_v44 }
 0x13d   : > { %v370_v44 = vld [vmem:[%s8629_s16 + $0x3b0] sm:$0xff] }
 0x13e   : > { %1136 = vmatmul.bf16.gmra.mxu3 %v9205_v51  ;;  %v9220_v41 = vsel %vm1903_vm0, %v1915_v59, %v1917_v6  ;;  %v989_v52 = vpop.f32.mrf.mxu2  ;;  %v357_v59 = vld [vmem:[%s8629_s16 + $0x348] sm:$0xff] }
 0x13f   : > { %13035 = vst [vmem:[#allocation56_spill] sm:$0xff] %v9220_v41  ;;  %v990_v4 = vadd.f32 %v989_v52, %v882_v21  ;;  %v362_v21 = vld [vmem:[%s8629_s16 + $0x370] sm:$0xff]  ;;  %2421 = vperm.xlu0 %8538, %v2311_v23   ;;  %v9240_v51 = vpack.c.bf16 %v361_v3, %v357_v59  ;;  %v9244_v41 = vpack.c.bf16 %v363_v46, %v359_v63  ;;  %v2313_v23 = vld [vmem:[%s12897_s4 + $0x98] sm:$0xff]  ;;  %v365_v46 = vld [vmem:[%s8629_s16 + $0x388] sm:$0xff] }
 0x140   : > { %v883_v36 = vpop.f32.mrf.mxu1  ;;  %v9242_v54 = vpack.c.bf16 %v362_v21, %v358_v10 }
 0x141   : > { %v1097_v19 = vpop.f32.mrf.mxu3  ;;  %v884_v28 = vadd.f32 %v883_v36, %v775_v38  ;;  %13036 = vst [vmem:[#allocation57_spill] sm:$0xff] %v9240_v51  ;;  %v2585_v36 = vld [vmem:[%s12898_s5 + $0x58] sm:$0xff] }
 0x142   : > { %v1098_v53 = vadd.f32 %v1097_v19, %v990_v4  ;;  %13037 = vst [vmem:[#allocation58_spill] sm:$0xff] %v9242_v54  ;;  %2671 = vperm.xlu2 %8540, %v2585_v36   ;;  %v369_v36 = vld [vmem:[%s8629_s16 + $0x3a8] sm:$0xff] }
 0x143   : > { %13038 = vst [vmem:[#allocation59_spill] sm:$0xff] %v9244_v41 }
 0x144   : > { %v1919_v13 = vrot.slane %v1098_v53, 7  ;;  %2696 = vperm.xlu1 %8539, %v2590_v39  }
 0x146   : > { %v9238_v52 = vsel %vm1903_vm0, %v1917_v6, %v1919_v13  ;;  %v991_v4 = vpop.f32.mrf.mxu2  ;;  %v2312_v6 = vld [vmem:[%s12897_s4 + $0x90] sm:$0xff] }
 0x147   : > { %v992_v19 = vadd.f32 %v991_v4, %v884_v28  ;;  %2426 = vperm.xlu0 %8538, %v2312_v6   ;;  %v8405_v4 = vld [vmem:[%s12895_s2 + $0x38] sm:$0xff]  ;;  %v366_v6 = vld [vmem:[%s8629_s16 + $0x390] sm:$0xff] }
 0x148   : > { %v886_v47 = vpop.f32.mrf.mxu1  ;;  %1432 = vmatpush.bf16.msrb.mxu0 %v8405_v4 }
 0x149   : > { %v1099_v53 = vpop.f32.mrf.mxu3  ;;  %v887_v59 = vadd.f32 %v886_v47, %v8878_v24  ;;  %v2586_v24 = vld [vmem:[%s12898_s5 + $0x60] sm:$0xff]  ;;  %v2593_v47 = vld [vmem:[%s12898_s5 + $0x98] sm:$0xff] }
 0x14a   : > { %v1100_v14 = vadd.f32 %v1099_v53, %v992_v19  ;;  %v8407_v19 = vld [vmem:[%s12895_s2 + $0x48] sm:$0xff]  ;;  %v2314_v53 = vld [vmem:[%s12897_s4 + $0xa0] sm:$0xff]  ;;  %2676 = vperm.xlu2 %8540, %v2586_v24  }
 0x14b   : > { %925 = vmatmul.bf16.gmra.mxu1 %v9240_v51  ;;  %1033 = vmatmul.bf16.gmra.mxu2 %v9242_v54  ;;  %v9295_v54 = vpack.c.bf16 %v370_v44, %v366_v6 }
 0x14c   : > { %v1921_v38 = vrot.slane %v1100_v14, 7  ;;  %v8423_v14 = vld [vmem:[%s12895_s2 + $0xc8] sm:$0xff]  ;;  %2431 = vperm.xlu1 %8539, %v2313_v23   ;;  %1546 = vmatpush.bf16.msra.mxu1 %v8407_v19 }
 0x14d   : > { %1762 = vmatpush.bf16.msra.mxu3 %v8423_v14  ;;  %v367_v14 = vld [vmem:[%s8629_s16 + $0x398] sm:$0xff]  ;;  %13040 = vst [vmem:[#allocation61_spill] sm:$0xff] %v9295_v54 }
 0x14e   : > { %1141 = vmatmul.bf16.gmra.mxu3 %v9244_v41  ;;  %v9266_v39 = vsel %vm1903_vm0, %v1919_v13, %v1921_v38  ;;  %v994_v3 = vpop.f32.mrf.mxu2  ;;  %v9293_v41 = vpack.c.bf16 %v369_v36, %v365_v46  ;;  %v2594_v46 = vld [vmem:[%s12898_s5 + $0xa0] sm:$0xff] }
 0x14f   : > { %v995_v10 = vadd.f32 %v994_v3, %v887_v59  ;;  %v371_v59 = vld [vmem:[%s8629_s16 + $0x3b8] sm:$0xff]  ;;  %2711 = vperm.xlu0 %8538, %v2593_v47   ;;  %v2595_v47 = vld [vmem:[%s12898_s5 + $0xa8] sm:$0xff] }
 0x150   : > { %v888_v28 = vpop.f32.mrf.mxu1  ;;  %13039 = vst [vmem:[#allocation60_spill] sm:$0xff] %v9293_v41  ;;  %v9297_v24 = vpack.c.bf16 %v371_v59, %v367_v14  ;;  %v373_v59 = vld [vmem:[%s8629_s16 + $0x3c8] sm:$0xff] }
 0x151   : > { %v1102_v21 = vpop.f32.mrf.mxu3  ;;  %v889_v23 = vadd.f32 %v888_v28, %v8898_v32  ;;  %v2309_v28 = vld [vmem:[%s12897_s4 + $0x78] sm:$0xff] }
 0x152   : > { %v1103_v63 = vadd.f32 %v1102_v21, %v995_v10  ;;  %13041 = vst [vmem:[#allocation62_spill] sm:$0xff] %v9297_v24  ;;  %2411 = vperm.xlu2 %8540, %v2309_v28   ;;  %v378_v28 = vld [vmem:[%s8629_s16 + $0x3f0] sm:$0xff] }
 0x154   : > { %v1923_v13 = vrot.slane %v1103_v63, 7  ;;  %2436 = vperm.xlu1 %8539, %v2314_v53  }
 0x156   : > { %v9291_v3 = vsel %vm1903_vm0, %v1921_v38, %v1923_v13  ;;  %v996_v10 = vpop.f32.mrf.mxu2  ;;  %v8404_v38 = vld [vmem:[%s12895_s2 + $0x30] sm:$0xff] }
 0x157   : > { %v997_v21 = vadd.f32 %v996_v10, %v889_v23  ;;  %1433 = vmatpush.bf16.msrb.mxu0 %v8404_v38  ;;  %2716 = vperm.xlu0 %8538, %v2594_v46   ;;  %v8403_v10 = vld [vmem:[%s12895_s2 + $0x28] sm:$0xff]  ;;  %v375_v46 = vld [vmem:[%s8629_s16 + $0x3d8] sm:$0xff] }
 0x158   : > { %v891_v51 = vpop.f32.mrf.mxu1 }
 0x159   : > { %v1104_v63 = vpop.f32.mrf.mxu3  ;;  %v892_v19 = vadd.f32 %v891_v51, %v8914_v55  ;;  %v2310_v51 = vld [vmem:[%s12897_s4 + $0x80] sm:$0xff] }
 0x15a   : > { %v1105_v32 = vadd.f32 %v1104_v63, %v997_v21  ;;  %v2596_v21 = vld [vmem:[%s12898_s5 + $0xb0] sm:$0xff]  ;;  %v377_v63 = vld [vmem:[%s8629_s16 + $0x3e8] sm:$0xff]  ;;  %2416 = vperm.xlu2 %8540, %v2310_v51  }
 0x15b   : > { %930 = vmatmul.bf16.gmra.mxu1 %v9293_v41  ;;  %1038 = vmatmul.bf16.gmra.mxu2 %v9295_v54 }
 0x15c   : > { %v1925_v4 = vrot.slane %v1105_v32, 7  ;;  %2721 = vperm.xlu1 %8539, %v2595_v47   ;;  %v374_v32 = vld [vmem:[%s8629_s16 + $0x3d0] sm:$0xff]  ;;  %v379_v47 = vld [vmem:[%s8629_s16 + $0x3f8] sm:$0xff]  ;;  %1434 = vmatpush.bf16.msrb.mxu0 %v8403_v10 }
 0x15d   : > { %v9344_v41 = vpack.c.bf16 %v379_v47, %v375_v46  ;;  %v381_v47 = vld [vmem:[%s8629_s16 + $0x408] sm:$0xff] }
 0x15e   : > { %1146 = vmatmul.bf16.gmra.mxu3 %v9297_v24  ;;  %v9316_v53 = vsel %vm1903_vm0, %v1923_v13, %v1925_v4  ;;  %v999_v36 = vpop.f32.mrf.mxu2  ;;  %v2317_v13 = vld [vmem:[%s12897_s4 + $0xb8] sm:$0xff]  ;;  %v9342_v24 = vpack.c.bf16 %v378_v28, %v374_v32 }
 0x15f   : > { %v1000_v6 = vadd.f32 %v999_v36, %v892_v19  ;;  %2451 = vperm.xlu0 %8538, %v2317_v13   ;;  %13044 = vst [vmem:[#allocation65_spill] sm:$0xff] %v9344_v41  ;;  %v8402_v13 = vld [vmem:[%s12895_s2 + $0x20] sm:$0xff] }
 0x160   : > { %v893_v23 = vpop.f32.mrf.mxu1  ;;  %13043 = vst [vmem:[#allocation64_spill] sm:$0xff] %v9342_v24  ;;  %1435 = vmatpush.bf16.msrb.mxu0 %v8402_v13  ;;  %v383_v13 = vld [vmem:[%s8629_s16 + $0x418] sm:$0xff] }
 0x161   : > { %v1107_v44 = vpop.f32.mrf.mxu3  ;;  %v894_v38 = vadd.f32 %v893_v23, %v8925_v60  ;;  %v2591_v60 = vld [vmem:[%s12898_s5 + $0x88] sm:$0xff] }
 0x162   : > { %v1108_v14 = vadd.f32 %v1107_v44, %v1000_v6  ;;  %2701 = vperm.xlu2 %8540, %v2591_v60   ;;  %v382_v60 = vld [vmem:[%s8629_s16 + $0x410] sm:$0xff] }
 0x164   : > { %v1927_v55 = vrot.slane %v1108_v14, 7  ;;  %2726 = vperm.xlu1 %8539, %v2596_v21   ;;  %v9340_v14 = vpack.c.bf16 %v377_v63, %v373_v59  ;;  %v2319_v59 = vld [vmem:[%s12897_s4 + $0xc8] sm:$0xff] }
 0x166   : > { %v9338_v19 = vsel %vm1903_vm0, %v1925_v4, %v1927_v55  ;;  %v1001_v36 = vpop.f32.mrf.mxu2  ;;  %13042 = vst [vmem:[#allocation63_spill] sm:$0xff] %v9340_v14  ;;  %v2318_v4 = vld [vmem:[%s12897_s4 + $0xc0] sm:$0xff] }
 0x167   : > { %v1002_v6 = vadd.f32 %v1001_v36, %v894_v38  ;;  %2456 = vperm.xlu0 %8538, %v2318_v4   ;;  %v8414_v36 = vld [vmem:[%s12895_s2 + $0x80] sm:$0xff]  ;;  %v386_v4 = vld [vmem:[%s8629_s16 + $0x430] sm:$0xff] }
 0x168   : > { %v896_v54 = vpop.f32.mrf.mxu1  ;;  %1655 = vmatpush.bf16.msra.mxu2 %v8414_v36 }
 0x169   : > { %v1109_v44 = vpop.f32.mrf.mxu3  ;;  %v897_v10 = vadd.f32 %v896_v54, %v8941_v27  ;;  %v2592_v27 = vld [vmem:[%s12898_s5 + $0x90] sm:$0xff]  ;;  %v2599_v54 = vld [vmem:[%s12898_s5 + $0xc8] sm:$0xff] }
 0x16a   : > { %v1110_v51 = vadd.f32 %v1109_v44, %v1002_v6  ;;  %v2320_v6 = vld [vmem:[%s12897_s4 + $0xd0] sm:$0xff]  ;;  %v8422_v44 = vld [vmem:[%s12895_s2 + $0xc0] sm:$0xff]  ;;  %2706 = vperm.xlu2 %8540, %v2592_v27  }
 0x16b   : > { %935 = vmatmul.bf16.gmra.mxu1 %v9340_v14  ;;  %1043 = vmatmul.bf16.gmra.mxu2 %v9342_v24  ;;  %v9392_v24 = vpack.c.bf16 %v386_v4, %v382_v60 }
 0x16c   : > { %v1929_v23 = vrot.slane %v1110_v51, 7  ;;  %2461 = vperm.xlu1 %8539, %v2319_v59   ;;  %v385_v51 = vld [vmem:[%s8629_s16 + $0x428] sm:$0xff]  ;;  %1763 = vmatpush.bf16.msra.mxu3 %v8422_v44 }
 0x16d   : > { %13046 = vst [vmem:[#allocation67_spill] sm:$0xff] %v9392_v24 }
 0x16e   : > { %1151 = vmatmul.bf16.gmra.mxu3 %v9344_v41  ;;  %v9363_v21 = vsel %vm1903_vm0, %v1927_v55, %v1929_v23  ;;  %v1004_v63 = vpop.f32.mrf.mxu2  ;;  %v9390_v41 = vpack.c.bf16 %v385_v51, %v381_v47  ;;  %v8406_v47 = vld [vmem:[%s12895_s2 + $0x40] sm:$0xff] }
 0x16f   : > { %v1005_v32 = vadd.f32 %v1004_v63, %v897_v10  ;;  %v387_v10 = vld [vmem:[%s8629_s16 + $0x438] sm:$0xff]  ;;  %2741 = vperm.xlu0 %8538, %v2599_v54   ;;  %v2600_v54 = vld [vmem:[%s12898_s5 + $0xd0] sm:$0xff]  ;;  %1547 = vmatpush.bf16.msra.mxu1 %v8406_v47 }
 0x170   : > { %v898_v38 = vpop.f32.mrf.mxu1  ;;  %13045 = vst [vmem:[#allocation66_spill] sm:$0xff] %v9390_v41  ;;  %v9394_v27 = vpack.c.bf16 %v387_v10, %v383_v13 }
 0x171   : > { %v1112_v28 = vpop.f32.mrf.mxu3  ;;  %v899_v59 = vadd.f32 %v898_v38, %v8952_v37  ;;  %v2315_v38 = vld [vmem:[%s12897_s4 + $0xa8] sm:$0xff] }
 0x172   : > { %v1113_v46 = vadd.f32 %v1112_v28, %v1005_v32  ;;  %13047 = vst [vmem:[#allocation68_spill] sm:$0xff] %v9394_v27  ;;  %2441 = vperm.xlu2 %8540, %v2315_v38   ;;  %v390_v38 = vld [vmem:[%s8629_s16 + $0x450] sm:$0xff] }
 0x174   : > { %v1931_v55 = vrot.slane %v1113_v46, 7  ;;  %2466 = vperm.xlu1 %8539, %v2320_v6   ;;  %v2601_v6 = vld [vmem:[%s12898_s5 + $0xd8] sm:$0xff] }
 0x176   : > { %v9388_v63 = vsel %vm1903_vm0, %v1929_v23, %v1931_v55  ;;  %v1006_v32 = vpop.f32.mrf.mxu2  ;;  %v8401_v23 = vld [vmem:[%s12895_s2 + $0x18] sm:$0xff] }
 0x177   : > { %v1007_v28 = vadd.f32 %v1006_v32, %v899_v59  ;;  %1436 = vmatpush.bf16.msrb.mxu0 %v8401_v23  ;;  %2746 = vperm.xlu0 %8538, %v2600_v54   ;;  %v389_v32 = vld [vmem:[%s8629_s16 + $0x448] sm:$0xff]  ;;  %v394_v23 = vld [vmem:[%s8629_s16 + $0x470] sm:$0xff]  ;;  %v391_v54 = vld [vmem:[%s8629_s16 + $0x458] sm:$0xff] }
 0x178   : > { %v901_v14 = vpop.f32.mrf.mxu1 }
 0x179   : > { %v1114_v46 = vpop.f32.mrf.mxu3  ;;  %v902_v44 = vadd.f32 %v901_v14, %v8977_v42  ;;  %v2316_v42 = vld [vmem:[%s12897_s4 + $0xb0] sm:$0xff] }
 0x17a   : > { %v1115_v37 = vadd.f32 %v1114_v46, %v1007_v28  ;;  %v2323_v28 = vld [vmem:[%s12897_s4 + $0xe8] sm:$0xff]  ;;  %v2602_v46 = vld [vmem:[%s12898_s5 + $0xe0] sm:$0xff]  ;;  %2446 = vperm.xlu2 %8540, %v2316_v42  }
 0x17b   : > { %940 = vmatmul.bf16.gmra.mxu1 %v9390_v41  ;;  %1048 = vmatmul.bf16.gmra.mxu2 %v9392_v24 }
 0x17c   : > { %v1933_v36 = vrot.slane %v1115_v37, 7  ;;  %2751 = vperm.xlu1 %8539, %v2601_v6   ;;  %v393_v37 = vld [vmem:[%s8629_s16 + $0x468] sm:$0xff]  ;;  %v395_v6 = vld [vmem:[%s8629_s16 + $0x478] sm:$0xff] }
 0x17d   : > { %v9444_v41 = vpack.c.bf16 %v395_v6, %v391_v54  ;;  %v397_v6 = vld [vmem:[%s8629_s16 + $0x488] sm:$0xff] }
 0x17e   : > { %1156 = vmatmul.bf16.gmra.mxu3 %v9394_v27  ;;  %v9416_v51 = vsel %vm1903_vm0, %v1931_v55, %v1933_v36  ;;  %v1009_v60 = vpop.f32.mrf.mxu2  ;;  %v8400_v55 = vld [vmem:[%s12895_s2 + $0x10] sm:$0xff]  ;;  %v9442_v27 = vpack.c.bf16 %v394_v23, %v390_v38 }
 0x17f   : > { %v1010_v4 = vadd.f32 %v1009_v60, %v902_v44  ;;  %1437 = vmatpush.bf16.msrb.mxu0 %v8400_v55  ;;  %2481 = vperm.xlu0 %8538, %v2323_v28   ;;  %13048 = vst [vmem:[#allocation69_spill] sm:$0xff] %v9444_v41  ;;  %v2325_v55 = vld [vmem:[%s12897_s4 + $0xf8] sm:$0xff] }
 0x180   : > { %v903_v13 = vpop.f32.mrf.mxu1 }
 0x181   : > { %v1117_v59 = vpop.f32.mrf.mxu3  ;;  %v904_v47 = vadd.f32 %v903_v13, %v8988_v62  ;;  %v2597_v62 = vld [vmem:[%s12898_s5 + $0xb8] sm:$0xff] }
 0x182   : > { %v1118_v10 = vadd.f32 %v1117_v59, %v1010_v4  ;;  %2731 = vperm.xlu2 %8540, %v2597_v62   ;;  %v2326_v62 = vld [vmem:[%s12897_s4 + $0x100] sm:$0xff] }
 0x184   : > { %v1935_v14 = vrot.slane %v1118_v10, 7  ;;  %2756 = vperm.xlu1 %8539, %v2602_v46   ;;  %v9440_v10 = vpack.c.bf16 %v393_v37, %v389_v32  ;;  %v8399_v32 = vld [vmem:[%s12895_s2 + $0x8] sm:$0xff] }
 0x185   : > { %1438 = vmatpush.bf16.msrb.mxu0 %v8399_v32  ;;  %v399_v32 = vld [vmem:[%s8629_s16 + $0x498] sm:$0xff] }
 0x186   : > { %v9438_v44 = vsel %vm1903_vm0, %v1933_v36, %v1935_v14  ;;  %v1011_v60 = vpop.f32.mrf.mxu2  ;;  %v2324_v36 = vld [vmem:[%s12897_s4 + $0xf0] sm:$0xff] }
 0x187   : > { %v1012_v4 = vadd.f32 %v1011_v60, %v904_v47  ;;  %2486 = vperm.xlu0 %8538, %v2324_v36   ;;  %v401_v60 = vld [vmem:[%s8629_s16 + $0x4a8] sm:$0xff] }
 0x188   : > { %v906_v24 = vpop.f32.mrf.mxu1 }
 0x189   : > { %v1119_v59 = vpop.f32.mrf.mxu3  ;;  %v907_v28 = vadd.f32 %v906_v24, %v9004_v18  ;;  %v2598_v18 = vld [vmem:[%s12898_s5 + $0xc0] sm:$0xff] }
 0x18a   : > { %v1120_v42 = vadd.f32 %v1119_v59, %v1012_v4  ;;  %v8398_v4 = vld [vmem:[%s12895_s2] sm:$0xff]  ;;  %v398_v59 = vld [vmem:[%s8629_s16 + $0x490] sm:$0xff]  ;;  %2736 = vperm.xlu2 %8540, %v2598_v18  }
 0x18b   : > { %945 = vmatmul.bf16.gmra.mxu1 %v9440_v10  ;;  %1053 = vmatmul.bf16.gmra.mxu2 %v9442_v27 }
 0x18c   : > { %v1937_v13 = vrot.slane %v1120_v42, 7  ;;  %2491 = vperm.xlu1 %8539, %v2325_v55   ;;  %v402_v42 = vld [vmem:[%s8629_s16 + $0x4b0] sm:$0xff]  ;;  %v403_v55 = vld [vmem:[%s8629_s16 + $0x4b8] sm:$0xff]  ;;  %1439 = vmatpush.bf16.msrb.mxu0 %v8398_v4 }
 0x18e   : > { %1161 = vmatmul.bf16.gmra.mxu3 %v9444_v41  ;;  %v9463_v46 = vsel %vm1903_vm0, %v1935_v14, %v1937_v13  ;;  %v1014_v37 = vpop.f32.mrf.mxu2  ;;  %v2605_v14 = vld [vmem:[%s12898_s5 + $0xf8] sm:$0xff]  ;;  %v9491_v41 = vpack.c.bf16 %v403_v55, %v399_v32  ;;  %v2322_v32 = vld [vmem:[%s12897_s4 + $0xe0] sm:$0xff] }
 0x18f   : > { %13049 = vst [vmem:[#allocation70_spill] sm:$0xff] %v9463_v46  ;;  %v1015_v38 = vadd.f32 %v1014_v37, %v907_v28  ;;  %2771 = vperm.xlu0 %8538, %v2605_v14   ;;  %v9489_v46 = vpack.c.bf16 %v402_v42, %v398_v59  ;;  %1440 = vmatmul.bf16.vlgmr.msrb.gmra.mxu0 %v8753_v61  ;;  %v2607_v61 = vld [vmem:[%s12898_s5 + $0x108] sm:$0xff] }
 0x190   : > { %v908_v47 = vpop.f32.mrf.mxu1 }
 0x191   : > { %v1122_v23 = vpop.f32.mrf.mxu3  ;;  %v909_v36 = vadd.f32 %v908_v47, %v9021_v22 }
 0x192   : > { %v1123_v54 = vadd.f32 %v1122_v23, %v1015_v38 }
 0x194   : > { %v1939_v24 = vrot.slane %v1123_v54, 7  ;;  %v9487_v54 = vpack.c.bf16 %v401_v60, %v397_v6  ;;  %2496 = vperm.xlu1 %8539, %v2326_v62   ;;  %v2606_v6 = vld [vmem:[%s12898_s5 + $0x100] sm:$0xff] }
 0x196   : > { %v9485_v28 = vsel %vm1903_vm0, %v1937_v13, %v1939_v24  ;;  %v1016_v37 = vpop.f32.mrf.mxu2  ;;  %v2321_v13 = vld [vmem:[%s12897_s4 + $0xd8] sm:$0xff] }
 0x197   : > { %v1017_v38 = vadd.f32 %v1016_v37, %v909_v36  ;;  %2471 = vperm.xlu2 %8540, %v2321_v13   ;;  %2776 = vperm.xlu0 %8538, %v2606_v6   ;;  %v405_v37 = vld [vmem:[%s8629_s16 + $0x4c8] sm:$0xff] }
 0x198   : > { %v911_v18 = vpop.f32.mrf.mxu1 }
 0x199   : > { %v1124_v23 = vpop.f32.mrf.mxu3  ;;  %v912_v60 = vadd.f32 %v911_v18, %v8891_v29  ;;  %v2329_v29 = vld [vmem:[%s12897_s4 + $0x118] sm:$0xff] }
 0x19a   : > { %v1125_v22 = vadd.f32 %v1124_v23, %v1017_v38  ;;  %v2608_v38 = vld [vmem:[%s12898_s5 + $0x110] sm:$0xff]  ;;  %v407_v18 = vld [vmem:[%s8629_s16 + $0x4d8] sm:$0xff] }
 0x19b   : > { %950 = vmatmul.bf16.gmra.mxu1 %v9487_v54  ;;  %1058 = vmatmul.bf16.gmra.mxu2 %v9489_v46 }
 0x19c   : > { %v1941_v47 = vrot.slane %v1125_v22, 7  ;;  %2781 = vperm.xlu1 %8539, %v2607_v61  }
 0x19e   : > { %1166 = vmatmul.bf16.gmra.mxu3 %v9491_v41  ;;  %v9508_v14 = vsel %vm1903_vm0, %v1939_v24, %v1941_v47  ;;  %v1019_v4 = vpop.f32.mrf.mxu2  ;;  %v406_v24 = vld [vmem:[%s8629_s16 + $0x4d0] sm:$0xff] }
 0x19f   : > { %v1020_v59 = vadd.f32 %v1019_v4, %v912_v60  ;;  %2476 = vperm.xlu2 %8540, %v2322_v32   ;;  %2511 = vperm.xlu0 %8538, %v2329_v29   ;;  %v9526_v60 = vpack.c.bf16 %v405_v37, %v405_v37  ;;  %v9528_v4 = vpack.c.bf16 %v406_v24, %v406_v24 }
 0x1a0   : > { %v913_v62 = vpop.f32.mrf.mxu1  ;;  %1445 = vmatmul.bf16.gmra.mxu0 %v8782_v12  ;;  %v2331_v12 = vld [vmem:[%s12897_s4 + $0x128] sm:$0xff] }
 0x1a1   : > { %v1127_v42 = vpop.f32.mrf.mxu3  ;;  %v914_v23 = vadd.f32 %v913_v62, %v8906_v45  ;;  %v2603_v45 = vld [vmem:[%s12898_s5 + $0xe8] sm:$0xff]  ;;  %v2330_v62 = vld [vmem:[%s12897_s4 + $0x120] sm:$0xff] }
 0x1a2   : > { %v1128_v36 = vadd.f32 %v1127_v42, %v1020_v59  ;;  %v9530_v42 = vpack.c.bf16 %v407_v18, %v407_v18 }
 0x1a4   : > { %v1943_v55 = vrot.slane %v1128_v36, 7  ;;  %2786 = vperm.xlu1 %8539, %v2608_v38  }
 0x1a6   : > { %v9524_v22 = vsel %vm1903_vm0, %v1941_v47, %v1943_v55  ;;  %v1021_v13 = vpop.f32.mrf.mxu2 }
 0x1a7   : > { %v1022_v6 = vadd.f32 %v1021_v13, %v914_v23  ;;  %2761 = vperm.xlu2 %8540, %v2603_v45   ;;  %2516 = vperm.xlu0 %8538, %v2330_v62   ;;  %v2604_v13 = vld [vmem:[%s12898_s5 + $0xf0] sm:$0xff] }
 0x1a8   : > { %v916_v59 = vpop.f32.mrf.mxu1 }
 0x1a9   : > { %v1129_v61 = vpop.f32.mrf.mxu3  ;;  %v917_v32 = vadd.f32 %v916_v59, %v8921_v58  ;;  %v2332_v58 = vld [vmem:[%s12897_s4 + $0x130] sm:$0xff] }
 0x1aa   : > { %v1130_v36 = vadd.f32 %v1129_v61, %v1022_v6  ;;  %v2611_v61 = vld [vmem:[%s12898_s5 + $0x128] sm:$0xff] }
 0x1ab   : > { %955 = vmatmul.bf16.gmra.mxu1 %v9526_v60  ;;  %1063 = vmatmul.bf16.gmra.mxu2 %v9528_v4 }
 0x1ac   : > { %v1945_v47 = vrot.slane %v1130_v36, 7  ;;  %2521 = vperm.xlu1 %8539, %v2331_v12  }
 0x1ae   : > { %1171 = vmatmul.bf16.gmra.mxu3 %v9530_v42  ;;  %v9547_v29 = vsel %vm1903_vm0, %v1943_v55, %v1945_v47  ;;  %v1024_v37 = vpop.f32.mrf.mxu2 }
 0x1af   : > { %v1025_v24 = vadd.f32 %v1024_v37, %v917_v32  ;;  %2766 = vperm.xlu2 %8540, %v2604_v13   ;;  %2801 = vperm.xlu0 %8538, %v2611_v61   ;;  %v2327_v37 = vld [vmem:[%s12897_s4 + $0x108] sm:$0xff] }
 0x1b0   : > { %v918_v23 = vpop.f32.mrf.mxu1  ;;  %1450 = vmatmul.bf16.gmra.mxu0 %v8801_v26  ;;  %v2613_v26 = vld [vmem:[%s12898_s5 + $0x138] sm:$0x1] }
 0x1b1   : > { %v1132_v38 = vpop.f32.mrf.mxu3  ;;  %v919_v55 = vadd.f32 %v918_v23, %v8933_v11  ;;  %v2612_v11 = vld [vmem:[%s12898_s5 + $0x130] sm:$0xff] }
 0x1b2   : > { %v1133_v18 = vadd.f32 %v1132_v38, %v1025_v24 }
 0x1b4   : > { %v1947_v6 = vrot.slane %v1133_v18, 7  ;;  %2526 = vperm.xlu1 %8539, %v2332_v58   ;;  %v7949_v58 = vld [vmem:[%s12897_s4 + $0x148] sm:$0xff] }
 0x1b6   : > { %v9560_v59 = vsel %vm1903_vm0, %v1945_v47, %v1947_v6  ;;  %v1026_v36 = vpop.f32.mrf.mxu2 }
 0x1b7   : > { %v1027_v45 = vadd.f32 %v1026_v36, %v919_v55  ;;  %2501 = vperm.xlu2 %8540, %v2327_v37   ;;  %2806 = vperm.xlu0 %8538, %v2612_v11   ;;  %v2609_v37 = vld [vmem:[%s12898_s5 + $0x118] sm:$0xff] }
 0x1b8   : > { %v921_v12 = vpop.f32.mrf.mxu1 }
 0x1b9   : > { %v1134_v62 = vpop.f32.mrf.mxu3  ;;  %v922_v47 = vadd.f32 %v921_v12, %v8948_v31  ;;  %v7988_v31 = vld [vmem:[%s12898_s5 + $0x140] sm:$0xff] }
 0x1ba   : > { %v1135_v32 = vadd.f32 %v1134_v62, %v1027_v45 }
 0x1bb   : > { %1548 = vmatmul.bf16.vlgmr.msra.gmra.mxu1 %v8810_v33  ;;  %1656 = vmatmul.bf16.vlgmr.msra.gmra.mxu2 %v8812_v34 }
 0x1bc   : > { %v1949_v24 = vrot.slane %v1135_v32, 7  ;;  %2811 = vperm.xlu1 %8539, %v2613_v26  }
 0x1be   : > { %1764 = vmatmul.bf16.vlgmr.msra.gmra.mxu3 %v8814_v35  ;;  %v9577_v38 = vsel %vm1903_vm0, %v1947_v6, %v1949_v24  ;;  %v1029_v23 = vpop.f32.mrf.mxu2  ;;  %v2328_v35 = vld [vmem:[%s12897_s4 + $0x110] sm:$0xff] }
 0x1bf   : > { %v1030_v33 = vadd.f32 %v1029_v23, %v922_v47  ;;  %2506 = vperm.xlu2 %8540, %v2328_v35   ;;  %4149 = vperm.xlu0 %8538, %v7949_v58  }
 0x1c0   : > { %v923_v18 = vpop.f32.mrf.mxu1  ;;  %1455 = vmatmul.bf16.gmra.mxu0 %v8842_v56  ;;  %v7951_v56 = vld [vmem:[%s12897_s4 + $0x158] sm:$0xff] }
 0x1c1   : > { %v1137_v34 = vpop.f32.mrf.mxu3  ;;  %v924_v6 = vadd.f32 %v923_v18, %v8966_v9  ;;  %v7950_v9 = vld [vmem:[%s12897_s4 + $0x150] sm:$0xff]  ;;  %v7991_v18 = vld [vmem:[%s12898_s5 + $0x158] sm:$0xff] }
 0x1c2   : > { %v1138_v13 = vadd.f32 %v1137_v34, %v1030_v33 }
 0x1c4   : > { %v1951_v61 = vrot.slane %v1138_v13, 7  ;;  %4425 = vperm.xlu1 %8539, %v7988_v31  }
 0x1c6   : > { %v9590_v55 = vsel %vm1903_vm0, %v1949_v24, %v1951_v61  ;;  %v1031_v36 = vpop.f32.mrf.mxu2 }
 0x1c7   : > { %v1032_v45 = vadd.f32 %v1031_v36, %v924_v6  ;;  %2791 = vperm.xlu2 %8540, %v2609_v37   ;;  %4154 = vperm.xlu0 %8538, %v7950_v9  }
 0x1c8   : > { %v926_v12 = vpop.f32.mrf.mxu1 }
 0x1c9   : > { %v1139_v62 = vpop.f32.mrf.mxu3  ;;  %v927_v24 = vadd.f32 %v926_v12, %v8984_v43  ;;  %v7952_v43 = vld [vmem:[%s12897_s4 + $0x160] sm:$0xff] }
 0x1ca   : > { %v1140_v32 = vadd.f32 %v1139_v62, %v1032_v45  ;;  %v2333_v45 = vld [vmem:[%s12897_s4 + $0x138] sm:$0x1] }
 0x1cb   : > { %1553 = vmatmul.bf16.gmra.mxu1 %v8834_v48  ;;  %1661 = vmatmul.bf16.gmra.mxu2 %v8836_v49 }
 0x1cc   : > { %v1953_v11 = vrot.slane %v1140_v32, 7  ;;  %4159 = vperm.xlu1 %8539, %v7951_v56  }
 0x1ce   : > { %1769 = vmatmul.bf16.gmra.mxu3 %v8838_v50  ;;  %v9607_v26 = vsel %vm1903_vm0, %v1951_v61, %v1953_v11  ;;  %v1034_v47 = vpop.f32.mrf.mxu2  ;;  %v2610_v50 = vld [vmem:[%s12898_s5 + $0x120] sm:$0xff] }
 0x1cf   : > { %13050 = vst [vmem:[#allocation71_spill] sm:$0xff] %v9607_v26  ;;  %v1035_v48 = vadd.f32 %v1034_v47, %v927_v24  ;;  %2796 = vperm.xlu2 %8540, %v2610_v50   ;;  %4440 = vperm.xlu0 %8538, %v7991_v18   ;;  %v7955_v24 = vld [vmem:[%s12897_s4 + $0x178] sm:$0xff]  ;;  %v7989_v18 = vld [vmem:[%s12898_s5 + $0x148] sm:$0xff] }
 0x1d0   : > { %v928_v23 = vpop.f32.mrf.mxu1  ;;  %1460 = vmatmul.bf16.gmra.mxu0 %v8862_v8  ;;  %v7993_v8 = vld [vmem:[%s12898_s5 + $0x168] sm:$0xff] }
 0x1d1   : > { %v1142_v49 = vpop.f32.mrf.mxu3  ;;  %v929_v13 = vadd.f32 %v928_v23, %v8996_v7  ;;  %v7992_v7 = vld [vmem:[%s12898_s5 + $0x160] sm:$0xff] }
 0x1d2   : > { %v1143_v33 = vadd.f32 %v1142_v49, %v1035_v48 }
 0x1d4   : > { %v1955_v34 = vrot.slane %v1143_v33, 7  ;;  %4164 = vperm.xlu1 %8539, %v7952_v43  }
 0x1d6   : > { %v9620_v35 = vsel %vm1903_vm0, %v1953_v11, %v1955_v34  ;;  %v1036_v61 = vpop.f32.mrf.mxu2 }
 0x1d7   : > { %v1037_v58 = vadd.f32 %v1036_v61, %v929_v13  ;;  %2531 = vperm.xlu2 %8540, %v2333_v45   ;;  %4445 = vperm.xlu0 %8538, %v7992_v7   ;;  %v7997_v45 = vld [vmem:[%s12898_s5 + $0x188] sm:$0xff] }
 0x1d8   : > { %v931_v6 = vpop.f32.mrf.mxu1 }
 0x1d9   : > { %v1144_v31 = vpop.f32.mrf.mxu3  ;;  %v932_v12 = vadd.f32 %v931_v6, %v9017_v40  ;;  %v7994_v40 = vld [vmem:[%s12898_s5 + $0x170] sm:$0xff] }
 0x1da   : > { %v1145_v36 = vadd.f32 %v1144_v31, %v1037_v58 }
 0x1db   : > { %1558 = vmatmul.bf16.gmra.mxu1 %v8854_v0  ;;  %1666 = vmatmul.bf16.gmra.mxu2 %v8856_v1 }
 0x1dc   : > { %v1957_v62 = vrot.slane %v1145_v36, 7  ;;  %4450 = vperm.xlu1 %8539, %v7993_v8  }
 0x1de   : > { %1774 = vmatmul.bf16.gmra.mxu3 %v8858_v2  ;;  %v9637_v32 = vsel %vm1903_vm0, %v1955_v34, %v1957_v62  ;;  %v1039_v37 = vpop.f32.mrf.mxu2  ;;  %v7948_v2 = vld [vmem:[%s12897_s4 + $0x140] sm:$0xff] }
 0x1df   : > { %13051 = vst [vmem:[#allocation72_spill] sm:$0xff] %v9637_v32  ;;  %v1040_v0 = vadd.f32 %v1039_v37, %v932_v12  ;;  %4144 = vperm.xlu2 %8540, %v7948_v2   ;;  %4179 = vperm.xlu0 %8538, %v7955_v24   ;;  %v7953_v2 = vld [vmem:[%s12897_s4 + $0x168] sm:$0xff]  ;;  %v13055_v24 = vld [vmem:[#allocation17_spill] sm:$0xff]  ;;  %v8170_v32 = vld [vmem:[%s12897_s4 + $0x2f0] sm:$0xff] }
 0x1e0   : > { %v933_v11 = vpop.f32.mrf.mxu1  ;;  %1465 = vmatmul.bf16.gmra.mxu0 %v8649_v17  ;;  %v7957_v17 = vld [vmem:[%s12897_s4 + $0x188] sm:$0xff] }
 0x1e1   : > { %v1147_v1 = vpop.f32.mrf.mxu3  ;;  %v934_v47 = vadd.f32 %v933_v11, %v9035_v5  ;;  %v7956_v5 = vld [vmem:[%s12897_s4 + $0x180] sm:$0xff]  ;;  %v13054_v11 = vld [vmem:[#allocation4_spill] sm:$0xff] }
 0x1e2   : > { %v1148_v9 = vadd.f32 %v1147_v1, %v1040_v0 }
 0x1e4   : > { %v1959_v56 = vrot.slane %v1148_v9, 7  ;;  %4455 = vperm.xlu1 %8539, %v7994_v40   ;;  %v13056_v40 = vld [vmem:[#allocation18_spill] sm:$0xff] }
 0x1e6   : > { %v9650_v48 = vsel %vm1903_vm0, %v1957_v62, %v1959_v56  ;;  %v1041_v49 = vpop.f32.mrf.mxu2  ;;  %v13053_v62 = vld [vmem:[#allocation16_spill] sm:$0xff] }
 0x1e7   : > { %v1042_v23 = vadd.f32 %v1041_v49, %v934_v47  ;;  %4430 = vperm.xlu2 %8540, %v7989_v18   ;;  %4184 = vperm.xlu0 %8538, %v7956_v5   ;;  %v7998_v47 = vld [vmem:[%s12898_s5 + $0x190] sm:$0xff]  ;;  %v13057_v49 = vld [vmem:[#allocation19_spill] sm:$0xff] }
 0x1e8   : > { %v936_v50 = vpop.f32.mrf.mxu1 }
 0x1e9   : > { %v1149_v33 = vpop.f32.mrf.mxu3  ;;  %v937_v13 = vadd.f32 %v936_v50, %v8893_v30  ;;  %v7958_v30 = vld [vmem:[%s12897_s4 + $0x190] sm:$0xff] }
 0x1ea   : > { %v1150_v34 = vadd.f32 %v1149_v33, %v1042_v23  ;;  %v7999_v23 = vld [vmem:[%s12898_s5 + $0x198] sm:$0xff]  ;;  %v13058_v33 = vld [vmem:[#allocation20_spill] sm:$0xff] }
 0x1eb   : > { %1563 = vmatmul.bf16.gmra.mxu1 %v8874_v16  ;;  %1671 = vmatmul.bf16.gmra.mxu2 %v8876_v20 }
 0x1ec   : > { %v1961_v43 = vrot.slane %v1150_v34, 7  ;;  %4189 = vperm.xlu1 %8539, %v7957_v17  }
 0x1ee   : > { %1779 = vmatmul.bf16.gmra.mxu3 %v8880_v25  ;;  %v9667_v61 = vsel %vm1903_vm0, %v1959_v56, %v1961_v43  ;;  %v1044_v58 = vpop.f32.mrf.mxu2  ;;  %v7990_v25 = vld [vmem:[%s12898_s5 + $0x150] sm:$0xff] }
 0x1ef   : > { %13052 = vst [vmem:[#allocation73_spill] sm:$0xff] %v9667_v61  ;;  %v1045_v16 = vadd.f32 %v1044_v58, %v937_v13  ;;  %4435 = vperm.xlu2 %8540, %v7990_v25   ;;  %4470 = vperm.xlu0 %8538, %v7997_v45   ;;  %v7954_v58 = vld [vmem:[%s12897_s4 + $0x170] sm:$0xff] }
 0x1f0   : > { %v938_v31 = vpop.f32.mrf.mxu1  ;;  %1470 = vmatmul.bf16.gmra.mxu0 %v13054_v11  ;;  %v13062_v11 = vld [vmem:[#allocation22_spill] sm:$0xff] }
 0x1f1   : > { %v1152_v20 = vpop.f32.mrf.mxu3  ;;  %v939_v7 = vadd.f32 %v938_v31, %v13053_v62  ;;  %v8000_v31 = vld [vmem:[%s12898_s5 + $0x1a0] sm:$0xff] }
 0x1f2   : > { %v1153_v6 = vadd.f32 %v1152_v20, %v1045_v16  ;;  %v7961_v20 = vld [vmem:[%s12897_s4 + $0x1a8] sm:$0xff] }
 0x1f4   : > { %v1963_v36 = vrot.slane %v1153_v6, 7  ;;  %4194 = vperm.xlu1 %8539, %v7958_v30   ;;  %v13060_v6 = vld [vmem:[#allocation21_spill] sm:$0xff] }
 0x1f6   : > { %v9680_v8 = vsel %vm1903_vm0, %v1961_v43, %v1963_v36  ;;  %v1046_v12 = vpop.f32.mrf.mxu2 }
 0x1f7   : > { %v1047_v37 = vadd.f32 %v1046_v12, %v939_v7  ;;  %4169 = vperm.xlu2 %8540, %v7953_v2   ;;  %4475 = vperm.xlu0 %8538, %v7998_v47   ;;  %v13061_v12 = vld [vmem:[#allocation7_spill] sm:$0xff]  ;;  %v7962_v2 = vld [vmem:[%s12897_s4 + $0x1b0] sm:$0xff] }
 0x1f8   : > { %v941_v1 = vpop.f32.mrf.mxu1 }
 0x1f9   : > { %v1154_v0 = vpop.f32.mrf.mxu3  ;;  %v942_v50 = vadd.f32 %v941_v1, %v13058_v33 }
 0x1fa   : > { %v1155_v9 = vadd.f32 %v1154_v0, %v1047_v37  ;;  %v7995_v0 = vld [vmem:[%s12898_s5 + $0x178] sm:$0xff] }
 0x1fb   : > { %1568 = vmatmul.bf16.gmra.mxu1 %v13055_v24  ;;  %1676 = vmatmul.bf16.gmra.mxu2 %v13056_v40  ;;  %v7963_v24 = vld [vmem:[%s12897_s4 + $0x1b8] sm:$0xff] }
 0x1fc   : > { %v1965_v56 = vrot.slane %v1155_v9, 7  ;;  %4480 = vperm.xlu1 %8539, %v7999_v23   ;;  %v13063_v9 = vld [vmem:[#allocation23_spill] sm:$0xff]  ;;  %v13065_v40 = vld [vmem:[#allocation25_spill] sm:$0xff] }
 0x1fe   : > { %1784 = vmatmul.bf16.gmra.mxu3 %v13057_v49  ;;  %v9697_v34 = vsel %vm1903_vm0, %v1963_v36, %v1965_v56  ;;  %v1049_v18 = vpop.f32.mrf.mxu2 }
 0x1ff   : > { %13059 = vst [vmem:[#allocation16_spill] sm:$0xff] %v9697_v34  ;;  %v1050_v43 = vadd.f32 %v1049_v18, %v942_v50  ;;  %4174 = vperm.xlu2 %8540, %v7954_v58   ;;  %4209 = vperm.xlu0 %8538, %v7961_v20   ;;  %v7964_v58 = vld [vmem:[%s12897_s4 + $0x1c0] sm:$0xff] }
 0x200   : > { %v943_v17 = vpop.f32.mrf.mxu1  ;;  %1475 = vmatmul.bf16.gmra.mxu0 %v13061_v12 }
 0x201   : > { %v1157_v5 = vpop.f32.mrf.mxu3  ;;  %v944_v25 = vadd.f32 %v943_v17, %v13060_v6 }
 0x202   : > { %v1158_v13 = vadd.f32 %v1157_v5, %v1050_v43  ;;  %v7996_v5 = vld [vmem:[%s12898_s5 + $0x180] sm:$0xff] }
 0x204   : > { %v1967_v16 = vrot.slane %v1158_v13, 7  ;;  %4485 = vperm.xlu1 %8539, %v8000_v31   ;;  %v8003_v13 = vld [vmem:[%s12898_s5 + $0x1b8] sm:$0xff] }
 0x206   : > { %v9710_v36 = vsel %vm1903_vm0, %v1965_v56, %v1967_v16  ;;  %v1051_v45 = vpop.f32.mrf.mxu2  ;;  %v13064_v56 = vld [vmem:[#allocation24_spill] sm:$0xff] }
 0x207   : > { %v1052_v30 = vadd.f32 %v1051_v45, %v944_v25  ;;  %4460 = vperm.xlu2 %8540, %v7995_v0   ;;  %4214 = vperm.xlu0 %8538, %v7962_v2   ;;  %v13072_v2 = vld [vmem:[#allocation29_spill] sm:$0xff] }
 0x208   : > { %v946_v7 = vpop.f32.mrf.mxu1 }
 0x209   : > { %v1159_v62 = vpop.f32.mrf.mxu3  ;;  %v947_v47 = vadd.f32 %v946_v7, %v13065_v40  ;;  %v13069_v7 = vld [vmem:[#allocation10_spill] sm:$0xff] }
 0x20a   : > { %v1160_v37 = vadd.f32 %v1159_v62, %v1052_v30 }
 0x20b   : > { %1573 = vmatmul.bf16.gmra.mxu1 %v13062_v11  ;;  %1681 = vmatmul.bf16.gmra.mxu2 %v13063_v9  ;;  %v13070_v11 = vld [vmem:[#allocation27_spill] sm:$0xff]  ;;  %v13071_v9 = vld [vmem:[#allocation28_spill] sm:$0xff] }
 0x20c   : > { %v1969_v1 = vrot.slane %v1160_v37, 7  ;;  %4219 = vperm.xlu1 %8539, %v7963_v24   ;;  %v9739_v31 = vpop.f32.mrf.mxu0  ;;  %v7959_v37 = vld [vmem:[%s12897_s4 + $0x198] sm:$0xff]  ;;  %v13073_v24 = vld [vmem:[#allocation30_spill] sm:$0xff] }
 0x20e   : > { %1789 = vmatmul.bf16.gmra.mxu3 %v13064_v56  ;;  %v9727_v49 = vsel %vm1903_vm0, %v1967_v16, %v1969_v1  ;;  %v1054_v23 = vpop.f32.mrf.mxu2  ;;  %v13067_v16 = vld [vmem:[#allocation26_spill] sm:$0xff]  ;;  %v8005_v56 = vld [vmem:[%s12898_s5 + $0x1c8] sm:$0xff] }
 0x20f   : > { %13066 = vst [vmem:[#allocation4_spill] sm:$0xff] %v9727_v49  ;;  %v1055_v33 = vadd.f32 %v1054_v23, %v947_v47  ;;  %4465 = vperm.xlu2 %8540, %v7996_v5   ;;  %4500 = vperm.xlu0 %8538, %v8003_v13   ;;  %v7960_v13 = vld [vmem:[%s12897_s4 + $0x1a0] sm:$0xff] }
 0x210   : > { %v948_v18 = vpop.f32.mrf.mxu1  ;;  %1480 = vmatmul.bf16.gmra.mxu0 %v13069_v7 }
 0x211   : > { %v1162_v50 = vpop.f32.mrf.mxu3  ;;  %v949_v20 = vadd.f32 %v948_v18, %v13067_v16  ;;  %v7967_v16 = vld [vmem:[%s12897_s4 + $0x1d8] sm:$0xff] }
 0x212   : > { %v1163_v43 = vadd.f32 %v1162_v50, %v1055_v33 }
 0x214   : > { %v1971_v17 = vrot.slane %v1163_v43, 7  ;;  %4224 = vperm.xlu1 %8539, %v7964_v58   ;;  %v9758_v47 = vpop.f32.mrf.mxu0 }
 0x216   : > { %v9742_v6 = vsel %vm1903_vm0, %v1969_v1, %v1971_v17  ;;  %v1056_v25 = vpop.f32.mrf.mxu2  ;;  %v8004_v1 = vld [vmem:[%s12898_s5 + $0x1c0] sm:$0xff] }
 0x217   : > { %13068 = vst [vmem:[#allocation17_spill] sm:$0xff] %v9742_v6  ;;  %v1057_v45 = vadd.f32 %v1056_v25, %v949_v20  ;;  %4199 = vperm.xlu2 %8540, %v7959_v37   ;;  %4505 = vperm.xlu0 %8538, %v8004_v1   ;;  %v13075_v20 = vld [vmem:[#allocation31_spill] sm:$0xff] }
 0x218   : > { %v951_v62 = vpop.f32.mrf.mxu1  ;;  %v8001_v1 = vld [vmem:[%s12898_s5 + $0x1a8] sm:$0xff] }
 0x219   : > { %v1164_v30 = vpop.f32.mrf.mxu3  ;;  %v952_v40 = vadd.f32 %v951_v62, %v13073_v24  ;;  %v7968_v24 = vld [vmem:[%s12897_s4 + $0x1e0] sm:$0xff] }
 0x21a   : > { %v1165_v12 = vadd.f32 %v1164_v30, %v1057_v45 }
 0x21b   : > { %1578 = vmatmul.bf16.gmra.mxu1 %v13070_v11  ;;  %1686 = vmatmul.bf16.gmra.mxu2 %v13071_v9  ;;  %v13077_v11 = vld [vmem:[#allocation13_spill] sm:$0xff] }
 0x21c   : > { %v1973_v0 = vrot.slane %v1165_v12, 7  ;;  %4510 = vperm.xlu1 %8539, %v8005_v56   ;;  %v13079_v56 = vld [vmem:[#allocation32_spill] sm:$0xff] }
 0x21d   : > { %v9773_v45 = vpop.f32.mrf.mxu0 }
 0x21e   : > { %1794 = vmatmul.bf16.gmra.mxu3 %v13072_v2  ;;  %v9761_v23 = vsel %vm1903_vm0, %v1971_v17, %v1973_v0  ;;  %v1059_v33 = vpop.f32.mrf.mxu2  ;;  %v8006_v17 = vld [vmem:[%s12898_s5 + $0x1d0] sm:$0xff] }
 0x21f   : > { %13074 = vst [vmem:[#allocation18_spill] sm:$0xff] %v9761_v23  ;;  %v1060_v50 = vadd.f32 %v1059_v33, %v952_v40  ;;  %4204 = vperm.xlu2 %8540, %v7960_v13   ;;  %4239 = vperm.xlu0 %8538, %v7967_v16   ;;  %v13081_v40 = vld [vmem:[#allocation34_spill] sm:$0xff]  ;;  %v7969_v33 = vld [vmem:[%s12897_s4 + $0x1e8] sm:$0xff] }
 0x220   : > { %v953_v43 = vpop.f32.mrf.mxu1  ;;  %1485 = vmatmul.bf16.gmra.mxu0 %v13077_v11 }
 0x221   : > { %v1167_v18 = vpop.f32.mrf.mxu3  ;;  %v954_v25 = vadd.f32 %v953_v43, %v13075_v20 }
 0x222   : > { %v1168_v5 = vadd.f32 %v1167_v18, %v1060_v50  ;;  %v13082_v50 = vld [vmem:[#allocation35_spill] sm:$0xff] }
 0x224   : > { %v1975_v58 = vrot.slane %v1168_v5, 7  ;;  %4515 = vperm.xlu1 %8539, %v8006_v17  }
 0x225   : > { %v9795_v43 = vpop.f32.mrf.mxu0 }
 0x226   : > { %v9776_v30 = vsel %vm1903_vm0, %v1973_v0, %v1975_v58  ;;  %v1061_v62 = vpop.f32.mrf.mxu2  ;;  %v13080_v0 = vld [vmem:[#allocation33_spill] sm:$0xff] }
 0x227   : > { %13076 = vst [vmem:[#allocation19_spill] sm:$0xff] %v9776_v30  ;;  %v1062_v7 = vadd.f32 %v1061_v62, %v954_v25  ;;  %4490 = vperm.xlu2 %8540, %v8001_v1   ;;  %4244 = vperm.xlu0 %8538, %v7968_v24   ;;  %v8002_v62 = vld [vmem:[%s12898_s5 + $0x1b0] sm:$0xff]  ;;  %v7965_v24 = vld [vmem:[%s12897_s4 + $0x1c8] sm:$0xff] }
 0x228   : > { %v956_v37 = vpop.f32.mrf.mxu1 }
 0x229   : > { %v1169_v12 = vpop.f32.mrf.mxu3  ;;  %v957_v18 = vadd.f32 %v956_v37, %v13082_v50  ;;  %v8010_v50 = vld [vmem:[%s12898_s5 + $0x1f0] sm:$0xff] }
 0x22a   : > { %v9779_v9 = vadd.f32 %v1169_v12, %v1062_v7  ;;  %v8009_v7 = vld [vmem:[%s12898_s5 + $0x1e8] sm:$0xff] }
 0x22b   : > { %1583 = vmatmul.bf16.gmra.mxu1 %v13079_v56  ;;  %1691 = vmatmul.bf16.gmra.mxu2 %v13080_v0  ;;  %v13085_v56 = vld [vmem:[#allocation2_spill] sm:$0xff] }
 0x22c   : > { %13078 = vst [vmem:[#allocation20_spill] sm:$0xff] %v9779_v9  ;;  %v12956_v2 = vrot.slane %v9779_v9, 7  ;;  %4249 = vperm.xlu1 %8539, %v7969_v33   ;;  %v13087_v33 = vld [vmem:[#allocation37_spill] sm:$0xff] }
 0x22d   : > { %v9813_v12 = vpop.f32.mrf.mxu0 }
 0x22e   : > { %1799 = vmatmul.bf16.gmra.mxu3 %v13081_v40  ;;  %v9800_v5 = vsel %vm1903_vm0, %v1975_v58, %v12956_v2  ;;  %v1064_v13 = vpop.f32.mrf.mxu2  ;;  %v7970_v58 = vld [vmem:[%s12897_s4 + $0x1f0] sm:$0xff] }
 0x22f   : > { %13083 = vst [vmem:[#allocation21_spill] sm:$0xff] %v9800_v5  ;;  %v1065_v16 = vadd.f32 %v1064_v13, %v957_v18  ;;  %4495 = vperm.xlu2 %8540, %v8002_v62   ;;  %4530 = vperm.xlu0 %8538, %v8009_v7   ;;  %v13086_v40 = vld [vmem:[#allocation36_spill] sm:$0xff]  ;;  %v13088_v18 = vld [vmem:[#allocation38_spill] sm:$0xff]  ;;  %v8011_v13 = vld [vmem:[%s12898_s5 + $0x1f8] sm:$0xff]  ;;  %v9831_v62 = vpop.permute.xlu0 %2336 }
 0x230   : > { %v958_v20 = vpop.f32.mrf.mxu1  ;;  %1490 = vmatmul.bf16.gmra.mxu0 %v13085_v56  ;;  %13089 = vst [vmem:[#allocation22_spill] sm:$0xff] %v9831_v62  ;;  %v13110_v62 = vld [vmem:[#allocation46_spill] sm:$0xff]  ;;  %v8026_v5 = vld [vmem:[%s12898_s5 + $0x270] sm:$0xff] }
 0x231   : > { %v1172_v17 = vpop.f32.mrf.mxu3 }
 0x232   : > { %v9802_v25 = vadd.f32 %v1172_v17, %v1065_v16 }
 0x234   : > { %13084 = vst [vmem:[#allocation7_spill] sm:$0xff] %v9802_v25  ;;  %4254 = vperm.xlu1 %8539, %v7970_v58   ;;  %v9833_v58 = vpop.permute.xlu1 %2616  ;;  %v13130_v25 = vld [vmem:[#allocation53_spill] sm:$0xff] }
 0x235   : > { %13090 = vst [vmem:[#allocation23_spill] sm:$0xff] %v9833_v58 }
 0x236   : > { %v1066_v37 = vpop.f32.mrf.mxu2 }
 0x237   : > { %4229 = vperm.xlu2 %8540, %v7965_v24   ;;  %4535 = vperm.xlu0 %8538, %v8010_v50   ;;  %v8012_v50 = vld [vmem:[%s12898_s5 + $0x200] sm:$0xff] }
 0x238   : > { %v1549_v1 = vpop.f32.mrf.mxu1 }
 0x239   : > { %v1174_v11 = vpop.f32.mrf.mxu3  ;;  %v1550_v0 = vadd.f32 %v1549_v1, %v9739_v31  ;;  %v9829_v31 = vpop.f32.mrf.mxu0  ;;  %v13091_v1 = vld [vmem:[#allocation39_spill] sm:$0xff] }
 0x23a   : > { %v13092_v56 = vrot.slane %v13091_v1, 7  ;;  %v9854_v1 = vpop.permute.xlu0 %2341 }
 0x23b   : > { %1588 = vmatmul.bf16.gmra.mxu1 %v13086_v40  ;;  %1696 = vmatmul.bf16.gmra.mxu2 %v13087_v33  ;;  %v7966_v40 = vld [vmem:[%s12897_s4 + $0x1d0] sm:$0xff]  ;;  %13095 = vst [vmem:[#allocation25_spill] sm:$0xff] %v9854_v1 }
 0x23c   : > { %4540 = vperm.xlu1 %8539, %v8011_v13   ;;  %v2021_v24 = vsel %vm1903_vm0, 0.0, %v13092_v56  ;;  %v8007_v56 = vld [vmem:[%s12898_s5 + $0x1d8] sm:$0xff] }
 0x23e   : > { %1804 = vmatmul.bf16.gmra.mxu3 %v13088_v18  ;;  %v1657_v16 = vpop.f32.mrf.mxu2 }
 0x23f   : > { %v1658_v17 = vadd.f32 %v1657_v16, %v1550_v0  ;;  %v7973_v0 = vld [vmem:[%s12897_s4 + $0x208] sm:$0xff]  ;;  %4234 = vperm.xlu2 %8540, %v7966_v40  }
 0x240   : > { %v1551_v7 = vpop.f32.mrf.mxu1  ;;  %4269 = vperm.xlu0 %8538, %v7973_v0   ;;  %v13097_v40 = vld [vmem:[#allocation43_spill] sm:$0xff]  ;;  %v13100_v0 = vld [vmem:[#allocation41_spill] sm:$0xff] }
 0x241   : > { %v1765_v20 = vpop.f32.mrf.mxu3  ;;  %v1552_v11 = vadd.f32 %v1551_v7, %v9758_v47  ;;  %v9850_v47 = vpop.f32.mrf.mxu0 }
 0x242   : > { %v1766_v37 = vadd.f32 %v1765_v20, %v1658_v17  ;;  %v13094_v20 = vld [vmem:[#allocation5_spill] sm:$0xff]  ;;  %v9885_v58 = vpop.permute.xlu0 %2626 }
 0x243   : > { %1495 = vmatmul.bf16.gmra.mxu0 %v13094_v20  ;;  %13104 = vst [vmem:[#allocation28_spill] sm:$0xff] %v9885_v58  ;;  %v13107_v58 = vld [vmem:[#allocation48_spill] sm:$0xff] }
 0x244   : > { %v9842_v33 = vadd.f32 %v2021_v24, %v1766_v37  ;;  %4545 = vperm.xlu1 %8539, %v8012_v50   ;;  %v9859_v24 = vpop.permute.xlu1 %2621  ;;  %v7974_v50 = vld [vmem:[%s12897_s4 + $0x210] sm:$0xff] }
 0x245   : > { %13096 = vst [vmem:[#allocation26_spill] sm:$0xff] %v9859_v24  ;;  %v8015_v24 = vld [vmem:[%s12898_s5 + $0x218] sm:$0xff] }
 0x246   : > { %13093 = vst [vmem:[#allocation24_spill] sm:$0xff] %v9842_v33  ;;  %v1659_v18 = vpop.f32.mrf.mxu2 }
 0x247   : > { %v1660_v13 = vadd.f32 %v1659_v18, %v1552_v11  ;;  %v13099_v11 = vld [vmem:[#allocation40_spill] sm:$0xff]  ;;  %4520 = vperm.xlu2 %8540, %v8007_v56   ;;  %v7975_v18 = vld [vmem:[%s12897_s4 + $0x218] sm:$0xff] }
 0x248   : > { %v1554_v17 = vpop.f32.mrf.mxu1  ;;  %4274 = vperm.xlu0 %8538, %v7974_v50   ;;  %v13102_v56 = vld [vmem:[#allocation44_spill] sm:$0xff] }
 0x249   : > { %v1767_v16 = vpop.f32.mrf.mxu3  ;;  %v1555_v37 = vadd.f32 %v1554_v17, %v9773_v45  ;;  %v13101_v45 = vld [vmem:[#allocation42_spill] sm:$0xff] }
 0x24a   : > { %v1768_v7 = vadd.f32 %v1767_v16, %v1660_v13  ;;  %v9873_v13 = vpop.f32.mrf.mxu0 }
 0x24b   : > { %1593 = vmatmul.bf16.gmra.mxu1 %v13099_v11  ;;  %1701 = vmatmul.bf16.gmra.mxu2 %v13100_v0  ;;  %v8008_v0 = vld [vmem:[%s12898_s5 + $0x1e0] sm:$0xff] }
 0x24c   : > { %v9862_v2 = vadd.f32 %v13097_v40, %v1768_v7  ;;  %4279 = vperm.xlu1 %8539, %v7975_v18   ;;  %v9890_v50 = vpop.permute.xlu1 %2631 }
 0x24d   : > { %13105 = vst [vmem:[#allocation29_spill] sm:$0xff] %v9890_v50  ;;  %v13109_v50 = vld [vmem:[#allocation45_spill] sm:$0xff] }
 0x24e   : > { %13098 = vst [vmem:[#allocation10_spill] sm:$0xff] %v9862_v2  ;;  %1809 = vmatmul.bf16.gmra.mxu3 %v13101_v45  ;;  %v1662_v16 = vpop.f32.mrf.mxu2 }
 0x24f   : > { %v1663_v17 = vadd.f32 %v1662_v16, %v1555_v37  ;;  %4525 = vperm.xlu2 %8540, %v8008_v0   ;;  %v7976_v37 = vld [vmem:[%s12897_s4 + $0x220] sm:$0xff]  ;;  %v7971_v0 = vld [vmem:[%s12897_s4 + $0x1f8] sm:$0xff] }
 0x250   : > { %v1556_v7 = vpop.f32.mrf.mxu1  ;;  %4560 = vperm.xlu0 %8538, %v8015_v24   ;;  %v8016_v24 = vld [vmem:[%s12898_s5 + $0x220] sm:$0xff] }
 0x251   : > { %v1770_v20 = vpop.f32.mrf.mxu3  ;;  %v1557_v11 = vadd.f32 %v1556_v7, %v9795_v43  ;;  %v13106_v7 = vld [vmem:[#allocation8_spill] sm:$0xff] }
 0x252   : > { %v1771_v40 = vadd.f32 %v1770_v20, %v1663_v17  ;;  %v9892_v43 = vpop.f32.mrf.mxu0 }
 0x253   : > { %1500 = vmatmul.bf16.gmra.mxu0 %v13106_v7 }
 0x254   : > { %v9880_v45 = vadd.f32 %v13102_v56, %v1771_v40  ;;  %4284 = vperm.xlu1 %8539, %v7976_v37  }
 0x256   : > { %13103 = vst [vmem:[#allocation27_spill] sm:$0xff] %v9880_v45  ;;  %v1664_v18 = vpop.f32.mrf.mxu2 }
 0x257   : > { %v1665_v16 = vadd.f32 %v1664_v18, %v1557_v11  ;;  %v13111_v11 = vld [vmem:[#allocation47_spill] sm:$0xff]  ;;  %4259 = vperm.xlu2 %8540, %v7971_v0   ;;  %v9913_v18 = vpop.permute.xlu0 %2361 }
 0x258   : > { %v1559_v20 = vpop.f32.mrf.mxu1  ;;  %13112 = vst [vmem:[#allocation31_spill] sm:$0xff] %v9913_v18  ;;  %4565 = vperm.xlu0 %8538, %v8016_v24   ;;  %v7979_v24 = vld [vmem:[%s12897_s4 + $0x238] sm:$0xff] }
 0x259   : > { %v1772_v17 = vpop.f32.mrf.mxu3  ;;  %v1560_v56 = vadd.f32 %v1559_v20, %v9813_v12  ;;  %v8017_v12 = vld [vmem:[%s12898_s5 + $0x228] sm:$0xff] }
 0x25a   : > { %v1773_v40 = vadd.f32 %v1772_v17, %v1665_v16  ;;  %v9911_v37 = vpop.f32.mrf.mxu0 }
 0x25b   : > { %1598 = vmatmul.bf16.gmra.mxu1 %v13109_v50  ;;  %1706 = vmatmul.bf16.gmra.mxu2 %v13110_v62  ;;  %v9915_v50 = vpop.permute.xlu1 %2636 }
 0x25c   : > { %v9900_v1 = vadd.f32 %v13107_v58, %v1773_v40  ;;  %13113 = vst [vmem:[#allocation13_spill] sm:$0xff] %v9915_v50  ;;  %4570 = vperm.xlu1 %8539, %v8017_v12   ;;  %v7972_v40 = vld [vmem:[%s12897_s4 + $0x200] sm:$0xff]  ;;  %v8013_v50 = vld [vmem:[%s12898_s5 + $0x208] sm:$0xff] }
 0x25e   : > { %13108 = vst [vmem:[#allocation30_spill] sm:$0xff] %v9900_v1  ;;  %1814 = vmatmul.bf16.gmra.mxu3 %v13111_v11  ;;  %v1667_v58 = vpop.f32.mrf.mxu2 }
 0x25f   : > { %v1668_v62 = vadd.f32 %v1667_v58, %v1560_v56  ;;  %4264 = vperm.xlu2 %8540, %v7972_v40   ;;  %v8018_v56 = vld [vmem:[%s12898_s5 + $0x230] sm:$0xff] }
 0x260   : > { %v1561_v17 = vpop.f32.mrf.mxu1  ;;  %4299 = vperm.xlu0 %8538, %v7979_v24   ;;  %v13119_v24 = vld [vmem:[#allocation50_spill] sm:$0xff] }
 0x261   : > { %v1775_v16 = vpop.f32.mrf.mxu3  ;;  %v1562_v7 = vadd.f32 %v1561_v17, %v9829_v31 }
 0x262   : > { %v1776_v20 = vadd.f32 %v1775_v16, %v1668_v62  ;;  %v9930_v11 = vpop.f32.mrf.mxu0  ;;  %v9932_v62 = vpop.permute.xlu0 %2366  ;;  %v13115_v16 = vld [vmem:[#allocation11_spill] sm:$0xff] }
 0x263   : > { %13114 = vst [vmem:[#allocation32_spill] sm:$0xff] %v9932_v62  ;;  %1505 = vmatmul.bf16.gmra.mxu0 %v13115_v16  ;;  %v9935_v17 = vpop.permute.xlu1 %2371  ;;  %v9955_v16 = vpop.permute.xlu2 %2346  ;;  %v13124_v62 = vld [vmem:[#allocation52_spill] sm:$0xff] }
 0x264   : > { %v9922_v0 = vadd.f32 %v9157_v15, %v1776_v20  ;;  %4575 = vperm.xlu1 %8539, %v8018_v56   ;;  %13116 = vst [vmem:[#allocation33_spill] sm:$0xff] %v9935_v17  ;;  %v7980_v56 = vld [vmem:[%s12897_s4 + $0x240] sm:$0xff] }
 0x265   : > { %13121 = vst [vmem:[#allocation35_spill] sm:$0xff] %v9955_v16 }
 0x266   : > { %v1669_v12 = vpop.f32.mrf.mxu2 }
 0x267   : > { %v1670_v31 = vadd.f32 %v1669_v12, %v1562_v7  ;;  %v13118_v7 = vld [vmem:[#allocation49_spill] sm:$0xff]  ;;  %v13120_v12 = vld [vmem:[#allocation51_spill] sm:$0xff]  ;;  %4550 = vperm.xlu2 %8540, %v8013_v50   ;;  %v8014_v50 = vld [vmem:[%s12898_s5 + $0x210] sm:$0xff] }
 0x268   : > { %v1564_v15 = vpop.f32.mrf.mxu1  ;;  %4304 = vperm.xlu0 %8538, %v7980_v56  }
 0x269   : > { %v1777_v58 = vpop.f32.mrf.mxu3  ;;  %v1565_v40 = vadd.f32 %v1564_v15, %v9850_v47  ;;  %v7981_v47 = vld [vmem:[%s12897_s4 + $0x248] sm:$0xff] }
 0x26a   : > { %v1778_v20 = vadd.f32 %v1777_v58, %v1670_v31  ;;  %v9953_v31 = vpop.f32.mrf.mxu0  ;;  %v9958_v17 = vpop.permute.xlu0 %2651 }
 0x26b   : > { %1603 = vmatmul.bf16.gmra.mxu1 %v13118_v7  ;;  %1711 = vmatmul.bf16.gmra.mxu2 %v13119_v24  ;;  %13122 = vst [vmem:[#allocation2_spill] sm:$0xff] %v9958_v17  ;;  %v13128_v17 = vld [vmem:[#allocation56_spill] sm:$0xff] }
 0x26c   : > { %v9942_v18 = vadd.f32 %v9181_v57, %v1778_v20  ;;  %4309 = vperm.xlu1 %8539, %v7981_v47  }
 0x26e   : > { %13117 = vst [vmem:[#allocation34_spill] sm:$0xff] %v9942_v18  ;;  %1819 = vmatmul.bf16.gmra.mxu3 %v13120_v12  ;;  %v1672_v58 = vpop.f32.mrf.mxu2  ;;  %v9963_v12 = vpop.permute.xlu1 %2376 }
 0x26f   : > { %v1673_v57 = vadd.f32 %v1672_v58, %v1565_v40  ;;  %13123 = vst [vmem:[#allocation36_spill] sm:$0xff] %v9963_v12  ;;  %v8021_v40 = vld [vmem:[%s12898_s5 + $0x248] sm:$0xff]  ;;  %4555 = vperm.xlu2 %8540, %v8014_v50   ;;  %v9978_v12 = vpop.permute.xlu2 %2351 }
 0x270   : > { %v1566_v20 = vpop.f32.mrf.mxu1  ;;  %4590 = vperm.xlu0 %8538, %v8021_v40   ;;  %13127 = vst [vmem:[#allocation38_spill] sm:$0xff] %v9978_v12  ;;  %v7977_v50 = vld [vmem:[%s12897_s4 + $0x228] sm:$0xff]  ;;  %v8022_v40 = vld [vmem:[%s12898_s5 + $0x250] sm:$0xff] }
 0x271   : > { %v1780_v15 = vpop.f32.mrf.mxu3  ;;  %v1567_v24 = vadd.f32 %v1566_v20, %v9873_v13  ;;  %v7982_v13 = vld [vmem:[%s12897_s4 + $0x250] sm:$0xff]  ;;  %v13126_v20 = vld [vmem:[#allocation14_spill] sm:$0xff] }
 0x272   : > { %v1781_v7 = vadd.f32 %v1780_v15, %v1673_v57  ;;  %v9974_v56 = vpop.f32.mrf.mxu0 }
 0x273   : > { %1510 = vmatmul.bf16.gmra.mxu0 %v13126_v20 }
 0x274   : > { %v9966_v9 = vadd.f32 %v13124_v62, %v1781_v7  ;;  %4314 = vperm.xlu1 %8539, %v7982_v13   ;;  %v9991_v13 = vpop.permute.xlu0 %2656 }
 0x275   : > { %13132 = vst [vmem:[#allocation5_spill] sm:$0xff] %v9991_v13 }
 0x276   : > { %13125 = vst [vmem:[#allocation37_spill] sm:$0xff] %v9966_v9  ;;  %v1674_v47 = vpop.f32.mrf.mxu2 }
 0x277   : > { %v1675_v58 = vadd.f32 %v1674_v47, %v1567_v24  ;;  %v13131_v24 = vld [vmem:[#allocation54_spill] sm:$0xff]  ;;  %4289 = vperm.xlu2 %8540, %v7977_v50   ;;  %v8023_v47 = vld [vmem:[%s12898_s5 + $0x258] sm:$0xff]  ;;  %v7978_v50 = vld [vmem:[%s12897_s4 + $0x230] sm:$0xff]  ;;  %v10011_v13 = vpop.permute.xlu2 %2356 }
 0x278   : > { %v1569_v15 = vpop.f32.mrf.mxu1  ;;  %4595 = vperm.xlu0 %8538, %v8022_v40   ;;  %13135 = vst [vmem:[#allocation40_spill] sm:$0xff] %v10011_v13  ;;  %v8019_v13 = vld [vmem:[%s12898_s5 + $0x238] sm:$0xff] }
 0x279   : > { %v1782_v57 = vpop.f32.mrf.mxu3  ;;  %v1570_v7 = vadd.f32 %v1569_v15, %v9892_v43  ;;  %v13133_v43 = vld [vmem:[#allocation55_spill] sm:$0xff] }
 0x27a   : > { %v1783_v62 = vadd.f32 %v1782_v57, %v1675_v58  ;;  %v9997_v58 = vpop.permute.xlu1 %2661 }
 0x27b   : > { %1608 = vmatmul.bf16.gmra.mxu1 %v13130_v25  ;;  %1716 = vmatmul.bf16.gmra.mxu2 %v13131_v24  ;;  %13134 = vst [vmem:[#allocation43_spill] sm:$0xff] %v9997_v58  ;;  %v7985_v58 = vld [vmem:[%s12897_s4 + $0x268] sm:$0xff] }
 0x27c   : > { %v9984_v16 = vadd.f32 %v13128_v17, %v1783_v62  ;;  %v9999_v17 = vpop.f32.mrf.mxu0  ;;  %4600 = vperm.xlu1 %8539, %v8023_v47  }
 0x27e   : > { %13129 = vst [vmem:[#allocation39_spill] sm:$0xff] %v9984_v16  ;;  %1824 = vmatmul.bf16.gmra.mxu3 %v13133_v43  ;;  %v1677_v25 = vpop.f32.mrf.mxu2 }
 0x27f   : > { %v1678_v57 = vadd.f32 %v1677_v25, %v1570_v7  ;;  %4294 = vperm.xlu2 %8540, %v7978_v50   ;;  %v8024_v7 = vld [vmem:[%s12898_s5 + $0x260] sm:$0xff] }
 0x280   : > { %v1571_v20 = vpop.f32.mrf.mxu1  ;;  %4329 = vperm.xlu0 %8538, %v7985_v58   ;;  %v13140_v58 = vld [vmem:[#allocation58_spill] sm:$0xff] }
 0x281   : > { %v1785_v15 = vpop.f32.mrf.mxu3  ;;  %v1572_v24 = vadd.f32 %v1571_v20, %v9911_v37  ;;  %v10018_v37 = vpop.permute.xlu0 %2391  ;;  %v13138_v20 = vld [vmem:[#allocation3_spill] sm:$0xff] }
 0x282   : > { %v1786_v62 = vadd.f32 %v1785_v15, %v1678_v57  ;;  %13136 = vst [vmem:[#allocation41_spill] sm:$0xff] %v10018_v37  ;;  %v10020_v25 = vpop.permute.xlu1 %2666  ;;  %v13139_v37 = vld [vmem:[#allocation57_spill] sm:$0xff] }
 0x283   : > { %13137 = vst [vmem:[#allocation42_spill] sm:$0xff] %v10020_v25  ;;  %1515 = vmatmul.bf16.gmra.mxu0 %v13138_v20 }
 0x284   : > { %v10006_v43 = vadd.f32 %v9238_v52, %v1786_v62  ;;  %v10016_v40 = vpop.f32.mrf.mxu0  ;;  %4605 = vperm.xlu1 %8539, %v8024_v7   ;;  %v13141_v7 = vld [vmem:[#allocation59_spill] sm:$0xff] }
 0x286   : > { %v1679_v47 = vpop.f32.mrf.mxu2 }
 0x287   : > { %v1680_v52 = vadd.f32 %v1679_v47, %v1572_v24  ;;  %v7986_v24 = vld [vmem:[%s12897_s4 + $0x270] sm:$0xff]  ;;  %4580 = vperm.xlu2 %8540, %v8019_v13  }
 0x288   : > { %v1574_v15 = vpop.f32.mrf.mxu1  ;;  %4334 = vperm.xlu0 %8538, %v7986_v24   ;;  %v8156_v24 = vld [vmem:[%s12897_s4 + $0x280] sm:$0xff] }
 0x289   : > { %v1787_v57 = vpop.f32.mrf.mxu3  ;;  %v1575_v50 = vadd.f32 %v1574_v15, %v9930_v11  ;;  %v7987_v11 = vld [vmem:[%s12897_s4 + $0x278] sm:$0x1]  ;;  %v10043_v15 = vpop.permute.xlu0 %2396 }
 0x28a   : > { %v1788_v62 = vadd.f32 %v1787_v57, %v1680_v52  ;;  %v10041_v52 = vpop.permute.xlu2 %2641  ;;  %13143 = vst [vmem:[#allocation8_spill] sm:$0xff] %v10043_v15  ;;  %v7983_v15 = vld [vmem:[%s12897_s4 + $0x258] sm:$0xff] }
 0x28b   : > { %1613 = vmatmul.bf16.gmra.mxu1 %v13139_v37  ;;  %1721 = vmatmul.bf16.gmra.mxu2 %v13140_v58  ;;  %13142 = vst [vmem:[#allocation44_spill] sm:$0xff] %v10041_v52 }
 0x28c   : > { %v10028_v12 = vadd.f32 %v9266_v39, %v1788_v62  ;;  %v10039_v47 = vpop.f32.mrf.mxu0  ;;  %4339 = vperm.xlu1 %8539, %v7987_v11   ;;  %v10045_v62 = vpop.permute.xlu1 %2401 }
 0x28d   : > { %13144 = vst [vmem:[#allocation48_spill] sm:$0xff] %v10045_v62 }
 0x28e   : > { %1829 = vmatmul.bf16.gmra.mxu3 %v13141_v7  ;;  %v1682_v39 = vpop.f32.mrf.mxu2  ;;  %v8020_v7 = vld [vmem:[%s12898_s5 + $0x240] sm:$0xff] }
 0x28f   : > { %v1683_v37 = vadd.f32 %v1682_v39, %v1575_v50  ;;  %v8027_v50 = vld [vmem:[%s12898_s5 + $0x278] sm:$0x1]  ;;  %4585 = vperm.xlu2 %8540, %v8020_v7  }
 0x290   : > { %v1576_v20 = vpop.f32.mrf.mxu1  ;;  %4620 = vperm.xlu0 %8538, %v8027_v50   ;;  %v13151_v50 = vld [vmem:[#allocation60_spill] sm:$0xff] }
 0x291   : > { %v1790_v57 = vpop.f32.mrf.mxu3  ;;  %v1577_v13 = vadd.f32 %v1576_v20, %v9953_v31  ;;  %v13147_v20 = vld [vmem:[#allocation6_spill] sm:$0xff]  ;;  %v10066_v7 = vpop.permute.xlu0 %2681 }
 0x292   : > { %v1791_v58 = vadd.f32 %v1790_v57, %v1683_v37  ;;  %v10062_v57 = vpop.permute.xlu2 %2646  ;;  %13148 = vst [vmem:[#allocation47_spill] sm:$0xff] %v10066_v7 }
 0x293   : > { %13146 = vst [vmem:[#allocation46_spill] sm:$0xff] %v10062_v57  ;;  %1520 = vmatmul.bf16.gmra.mxu0 %v13147_v20  ;;  %v13160_v57 = vld [vmem:[#allocation64_spill] sm:$0xff] }
 0x294   : > { %v10052_v25 = vadd.f32 %v9291_v3, %v1791_v58  ;;  %v10060_v11 = vpop.f32.mrf.mxu0  ;;  %5953 = vperm.xlu1 %8539, %v8156_v24   ;;  %v10071_v52 = vpop.permute.xlu1 %2406  ;;  %v13152_v24 = vld [vmem:[#allocation61_spill] sm:$0xff] }
 0x295   : > { %13149 = vst [vmem:[#allocation11_spill] sm:$0xff] %v10071_v52 }
 0x296   : > { %13145 = vst [vmem:[#allocation45_spill] sm:$0xff] %v10052_v25  ;;  %v1684_v39 = vpop.f32.mrf.mxu2 }
 0x297   : > { %v1685_v31 = vadd.f32 %v1684_v39, %v1577_v13  ;;  %v8196_v39 = vld [vmem:[%s12898_s5 + $0x280] sm:$0xff]  ;;  %4319 = vperm.xlu2 %8540, %v7983_v15  }
 0x298   : > { %v1579_v3 = vpop.f32.mrf.mxu1  ;;  %6234 = vperm.xlu0 %8538, %v8196_v39   ;;  %v7984_v15 = vld [vmem:[%s12897_s4 + $0x260] sm:$0xff]  ;;  %v8159_v39 = vld [vmem:[%s12897_s4 + $0x298] sm:$0xff] }
 0x299   : > { %v1792_v37 = vpop.f32.mrf.mxu3  ;;  %v1580_v62 = vadd.f32 %v1579_v3, %v9974_v56  ;;  %v13153_v56 = vld [vmem:[#allocation62_spill] sm:$0xff] }
 0x29a   : > { %v1793_v58 = vadd.f32 %v1792_v37, %v1685_v31  ;;  %v8197_v31 = vld [vmem:[%s12898_s5 + $0x288] sm:$0xff]  ;;  %v10088_v52 = vpop.permute.xlu2 %2381 }
 0x29b   : > { %1618 = vmatmul.bf16.gmra.mxu1 %v13151_v50  ;;  %1726 = vmatmul.bf16.gmra.mxu2 %v13152_v24  ;;  %13154 = vst [vmem:[#allocation50_spill] sm:$0xff] %v10088_v52 }
 0x29c   : > { %v10074_v13 = vadd.f32 %v9316_v53, %v1793_v58  ;;  %v10085_v37 = vpop.f32.mrf.mxu0  ;;  %6239 = vperm.xlu1 %8539, %v8197_v31   ;;  %v10104_v31 = vpop.permute.xlu1 %2691 }
 0x29d   : > { %13157 = vst [vmem:[#allocation14_spill] sm:$0xff] %v10104_v31  ;;  %v13159_v31 = vld [vmem:[#allocation63_spill] sm:$0xff] }
 0x29e   : > { %13150 = vst [vmem:[#allocation49_spill] sm:$0xff] %v10074_v13  ;;  %1834 = vmatmul.bf16.gmra.mxu3 %v13153_v56  ;;  %v1687_v3 = vpop.f32.mrf.mxu2 }
 0x29f   : > { %v1688_v53 = vadd.f32 %v1687_v3, %v1580_v62  ;;  %v10099_v62 = vpop.permute.xlu0 %2686  ;;  %4324 = vperm.xlu2 %8540, %v7984_v15   ;;  %v8025_v15 = vld [vmem:[%s12898_s5 + $0x268] sm:$0xff] }
 0x2a0   : > { %v1581_v58 = vpop.f32.mrf.mxu1  ;;  %13156 = vst [vmem:[#allocation52_spill] sm:$0xff] %v10099_v62  ;;  %5968 = vperm.xlu0 %8538, %v8159_v39  }
 0x2a1   : > { %v1795_v20 = vpop.f32.mrf.mxu3  ;;  %v1582_v24 = vadd.f32 %v1581_v58, %v9999_v17  ;;  %v8198_v17 = vld [vmem:[%s12898_s5 + $0x290] sm:$0xff] }
 0x2a2   : > { %v1796_v50 = vadd.f32 %v1795_v20, %v1688_v53  ;;  %v10121_v39 = vpop.permute.xlu2 %2386 }
 0x2a3   : > { %13161 = vst [vmem:[#allocation56_spill] sm:$0xff] %v10121_v39 }
 0x2a4   : > { %v10094_v56 = vadd.f32 %v9338_v19, %v1796_v50  ;;  %v10106_v3 = vpop.f32.mrf.mxu0  ;;  %6244 = vperm.xlu1 %8539, %v8198_v17   ;;  %v13158_v50 = vld [vmem:[#allocation9_spill] sm:$0xff] }
 0x2a5   : > { %1525 = vmatmul.bf16.gmra.mxu0 %v13158_v50  ;;  %v13162_v17 = vld [vmem:[#allocation65_spill] sm:$0xff] }
 0x2a6   : > { %13155 = vst [vmem:[#allocation51_spill] sm:$0xff] %v10094_v56  ;;  %v1689_v53 = vpop.f32.mrf.mxu2 }
 0x2a7   : > { %v1690_v20 = vadd.f32 %v1689_v53, %v1582_v24  ;;  %v8160_v24 = vld [vmem:[%s12897_s4 + $0x2a0] sm:$0xff]  ;;  %4610 = vperm.xlu2 %8540, %v8025_v15  }
 0x2a8   : > { %v1584_v58 = vpop.f32.mrf.mxu1  ;;  %5973 = vperm.xlu0 %8538, %v8160_v24   ;;  %v8201_v24 = vld [vmem:[%s12898_s5 + $0x2a8] sm:$0xff] }
 0x2a9   : > { %v1797_v19 = vpop.f32.mrf.mxu3  ;;  %v1585_v62 = vadd.f32 %v1584_v58, %v10016_v40  ;;  %v8161_v40 = vld [vmem:[%s12897_s4 + $0x2a8] sm:$0xff] }
 0x2aa   : > { %v1798_v7 = vadd.f32 %v1797_v19, %v1690_v20  ;;  %v10137_v19 = vpop.permute.xlu1 %2696 }
 0x2ab   : > { %1623 = vmatmul.bf16.gmra.mxu1 %v13159_v31  ;;  %1731 = vmatmul.bf16.gmra.mxu2 %v13160_v57  ;;  %v8453_v57 = vld [vmem:[%s12896_s3 + $0xb8] sm:$0xf0]  ;;  %v10135_v31 = vpop.permute.xlu0 %2421  ;;  %13164 = vst [vmem:[#allocation54_spill] sm:$0xff] %v10137_v19 }
 0x2ac   : > { %v10114_v52 = vadd.f32 %v9363_v21, %v1798_v7  ;;  %v7946_v21 = vld [vmem:[%s12896_s3 + $0xb0] sm:$0xf]  ;;  %v10133_v7 = vpop.f32.mrf.mxu0  ;;  %13163 = vst [vmem:[#allocation53_spill] sm:$0xff] %v10135_v31  ;;  %5978 = vperm.xlu1 %8539, %v8161_v40   ;;  %v7940_v40 = vld [vmem:[%s12896_s3 + $0xb4] sm:$0xf0] }
 0x2ad   : > { %v7947_v20 = vor.u32 %v8453_v57, %v7946_v21  ;;  %v10163_v57 = vpop.permute.xlu2 %2671  ;;  %v13167_v31 = vld [vmem:[#allocation12_spill] sm:$0xff] }
 0x2ae   : > { %1839 = vmatmul.bf16.gmra.mxu3 %v13162_v17  ;;  %v1692_v53 = vpop.f32.mrf.mxu2  ;;  %13165 = vst [vmem:[#allocation55_spill] sm:$0xff] %v10163_v57 }
 0x2af   : > { %v1693_v58 = vadd.f32 %v1692_v53, %v1585_v62  ;;  %3371 = vmatpush.bf16.msrb.mxu2 %v7947_v20  ;;  %4615 = vperm.xlu2 %8540, %v8026_v5   ;;  %v8162_v62 = vld [vmem:[%s12897_s4 + $0x2b0] sm:$0xff] }
 0x2b0   : > { %v1586_v15 = vpop.f32.mrf.mxu1  ;;  %6259 = vperm.xlu0 %8538, %v8201_v24   ;;  %v8452_v20 = vld [vmem:[%s12896_s3 + $0xb0] sm:$0xf0]  ;;  %v8157_v24 = vld [vmem:[%s12897_s4 + $0x288] sm:$0xff] }
 0x2b1   : > { %v1800_v50 = vpop.f32.mrf.mxu3  ;;  %v1587_v39 = vadd.f32 %v1586_v15, %v10039_v47  ;;  %v8451_v47 = vld [vmem:[%s12896_s3 + $0xac] sm:$0xf] }
 0x2b2   : > { %v1801_v17 = vadd.f32 %v1800_v50, %v1693_v58  ;;  %v7943_v53 = vor.u32 %v8451_v47, %v7940_v40  ;;  %v10171_v23 = vpop.permute.xlu1 %2431  ;;  %v13170_v40 = vld [vmem:[#allocation67_spill] sm:$0xff] }
 0x2b3   : > { %13168 = vst [vmem:[#allocation57_spill] sm:$0xff] %v10171_v23 }
 0x2b4   : > { %v10144_v30 = vadd.f32 %v9388_v63, %v1801_v17  ;;  %v7938_v63 = vld [vmem:[%s12896_s3 + $0xa8] sm:$0xf]  ;;  %v10161_v21 = vpop.f32.mrf.mxu0  ;;  %5983 = vperm.xlu1 %8539, %v8162_v62   ;;  %v10168_v17 = vpop.permute.xlu0 %2426  ;;  %3262 = vmatpush.bf16.msrb.mxu1 %v7943_v53  ;;  %v13169_v62 = vld [vmem:[#allocation66_spill] sm:$0xff] }
 0x2b5   : > { %v7939_v15 = vor.u32 %v8452_v20, %v7938_v63  ;;  %13166 = vst [vmem:[#allocation3_spill] sm:$0xff] %v10168_v17  ;;  %1530 = vmatmul.bf16.gmra.mxu0 %v13167_v31  ;;  %v8202_v31 = vld [vmem:[%s12898_s5 + $0x2b0] sm:$0xff]  ;;  %v10191_v53 = vpop.permute.xlu2 %2676 }
 0x2b6   : > { %v1694_v5 = vpop.f32.mrf.mxu2  ;;  %v13171_v63 = vld [vmem:[#allocation68_spill] sm:$0xff]  ;;  %13172 = vst [vmem:[#allocation58_spill] sm:$0xff] %v10191_v53 }
 0x2b7   : > { %v1695_v58 = vadd.f32 %v1694_v5, %v1587_v39  ;;  %3154 = vmatpush.bf16.msra.mxu0 %v7939_v15  ;;  %5958 = vperm.xlu2 %8540, %v8157_v24   ;;  %v8158_v15 = vld [vmem:[%s12897_s4 + $0x290] sm:$0xff] }
 0x2b8   : > { %v1589_v19 = vpop.f32.mrf.mxu1  ;;  %6264 = vperm.xlu0 %8538, %v8202_v31  }
 0x2b9   : > { %v1802_v50 = vpop.f32.mrf.mxu3  ;;  %v1590_v47 = vadd.f32 %v1589_v19, %v10060_v11  ;;  %v8203_v11 = vld [vmem:[%s12898_s5 + $0x2b8] sm:$0xff] }
 0x2ba   : > { %v1803_v57 = vadd.f32 %v1802_v50, %v1695_v58  ;;  %v10200_v24 = vpop.permute.xlu1 %2436 }
 0x2bb   : > { %1628 = vmatmul.bf16.gmra.mxu1 %v13169_v62  ;;  %1736 = vmatmul.bf16.gmra.mxu2 %v13170_v40  ;;  %13174 = vst [vmem:[#allocation6_spill] sm:$0xff] %v10200_v24  ;;  %v8204_v40 = vld [vmem:[%s12898_s5 + $0x2c0] sm:$0xff] }
 0x2bc   : > { %v10178_v39 = vadd.f32 %v9416_v51, %v1803_v57  ;;  %v10189_v19 = vpop.f32.mrf.mxu0  ;;  %6269 = vperm.xlu1 %8539, %v8203_v11   ;;  %v10195_v50 = vpop.permute.xlu0 %2711 }
 0x2bd   : > { %13173 = vst [vmem:[#allocation59_spill] sm:$0xff] %v10195_v50 }
 0x2be   : > { %1844 = vmatmul.bf16.gmra.mxu3 %v13171_v63  ;;  %v1697_v5 = vpop.f32.mrf.mxu2 }
 0x2bf   : > { %v1698_v51 = vadd.f32 %v1697_v5, %v1590_v47  ;;  %v8165_v47 = vld [vmem:[%s12897_s4 + $0x2c8] sm:$0xff]  ;;  %5963 = vperm.xlu2 %8540, %v8158_v15   ;;  %v8166_v15 = vld [vmem:[%s12897_s4 + $0x2d0] sm:$0xff] }
 0x2c0   : > { %v10193_v20 = vpop.f32.mrf.mxu1  ;;  %5998 = vperm.xlu0 %8538, %v8165_v47  }
 0x2c1   : > { %v1805_v57 = vpop.f32.mrf.mxu3 }
 0x2c2   : > { %v1806_v58 = vadd.f32 %v1805_v57, %v1698_v51  ;;  %v10219_v57 = vpop.permute.xlu2 %2411 }
 0x2c3   : > { %13176 = vst [vmem:[#allocation60_spill] sm:$0xff] %v10219_v57  ;;  %v8163_v57 = vld [vmem:[%s12897_s4 + $0x2b8] sm:$0xff] }
 0x2c4   : > { %v10203_v62 = vadd.f32 %v9438_v44, %v1806_v58  ;;  %v10211_v31 = vpop.f32.mrf.mxu0  ;;  %6274 = vperm.xlu1 %8539, %v8204_v40   ;;  %v13175_v44 = vld [vmem:[#allocation15_spill] sm:$0xff]  ;;  %v8199_v58 = vld [vmem:[%s12898_s5 + $0x298] sm:$0xff]  ;;  %v10229_v47 = vpop.permute.xlu0 %2716 }
 0x2c5   : > { %1535 = vmatmul.bf16.gmra.mxu0 %v13175_v44  ;;  %13177 = vst [vmem:[#allocation61_spill] sm:$0xff] %v10229_v47  ;;  %v13178_v40 = vld [vmem:[#allocation69_spill] sm:$0xff] }
 0x2c6   : > { %v10213_v63 = vpop.f32.mrf.mxu2 }
 0x2c7   : > { %6249 = vperm.xlu2 %8540, %v8199_v58   ;;  %v8200_v58 = vld [vmem:[%s12898_s5 + $0x2a0] sm:$0xff] }
 0x2c8   : > { %v1594_v5 = vpop.f32.mrf.mxu1  ;;  %6003 = vperm.xlu0 %8538, %v8166_v15  }
 0x2c9   : > { %v10215_v11 = vpop.f32.mrf.mxu3  ;;  %v1595_v51 = vadd.f32 %v1594_v5, %v10106_v3  ;;  %v8167_v3 = vld [vmem:[%s12897_s4 + $0x2d8] sm:$0xff]  ;;  %v10235_v5 = vpop.permute.xlu1 %2721 }
 0x2ca   : > { %13179 = vst [vmem:[#allocation62_spill] sm:$0xff] %v10235_v5  ;;  %v8207_v5 = vld [vmem:[%s12898_s5 + $0x2d8] sm:$0xff]  ;;  %v10250_v47 = vpop.permute.xlu2 %2416 }
 0x2cb   : > { %1633 = vmatmul.bf16.gmra.mxu1 %v9440_v10  ;;  %1741 = vmatmul.bf16.gmra.mxu2 %v9442_v27  ;;  %13180 = vst [vmem:[#allocation9_spill] sm:$0xff] %v10250_v47 }
 0x2cc   : > { %v10237_v44 = vpop.f32.mrf.mxu0  ;;  %6008 = vperm.xlu1 %8539, %v8167_v3   ;;  %v10263_v15 = vpop.permute.xlu0 %2451 }
 0x2cd   : > { %13181 = vst [vmem:[#allocation63_spill] sm:$0xff] %v10263_v15 }
 0x2ce   : > { %1849 = vmatmul.bf16.gmra.mxu3 %v13178_v40  ;;  %v1702_v10 = vpop.f32.mrf.mxu2 }
 0x2cf   : > { %v1703_v27 = vadd.f32 %v1702_v10, %v1595_v51  ;;  %6254 = vperm.xlu2 %8540, %v8200_v58   ;;  %v8168_v51 = vld [vmem:[%s12897_s4 + $0x2e0] sm:$0xff] }
 0x2d0   : > { %v10239_v50 = vpop.f32.mrf.mxu1  ;;  %6289 = vperm.xlu0 %8538, %v8207_v5   ;;  %v8208_v5 = vld [vmem:[%s12898_s5 + $0x2e0] sm:$0xff] }
 0x2d1   : > { %v1810_v24 = vpop.f32.mrf.mxu3 }
 0x2d2   : > { %v1811_v23 = vadd.f32 %v1810_v24, %v1703_v27  ;;  %v7934_v24 = vld [vmem:[%s12896_s3 + $0x98] sm:$0xf]  ;;  %v10267_v27 = vpop.permute.xlu1 %2726 }
 0x2d3   : > { %13182 = vst [vmem:[#allocation64_spill] sm:$0xff] %v10267_v27 }
 0x2d4   : > { %v10245_v40 = vadd.f32 %v9485_v28, %v1811_v23  ;;  %v8450_v28 = vld [vmem:[%s12896_s3 + $0xa0] sm:$0xf0]  ;;  %v10261_v23 = vpop.f32.mrf.mxu0  ;;  %6013 = vperm.xlu1 %8539, %v8168_v51   ;;  %v8209_v51 = vld [vmem:[%s12898_s5 + $0x2e8] sm:$0xff]  ;;  %v10300_v53 = vpop.permute.xlu0 %2456 }
 0x2d5   : > { %v7935_v10 = vor.u32 %v8450_v28, %v7934_v24  ;;  %v8449_v28 = vld [vmem:[%s12896_s3 + $0x98] sm:$0xf0]  ;;  %13184 = vst [vmem:[#allocation12_spill] sm:$0xff] %v10300_v53 }
 0x2d6   : > { %v10265_v3 = vpop.f32.mrf.mxu2 }
 0x2d7   : > { %3372 = vmatpush.bf16.msrb.mxu2 %v7935_v10  ;;  %5988 = vperm.xlu2 %8540, %v8163_v57  }
 0x2d8   : > { %v1599_v17 = vpop.f32.mrf.mxu1  ;;  %6294 = vperm.xlu0 %8538, %v8208_v5   ;;  %v8164_v5 = vld [vmem:[%s12897_s4 + $0x2c0] sm:$0xff] }
 0x2d9   : > { %v10269_v58 = vpop.f32.mrf.mxu3  ;;  %v1600_v47 = vadd.f32 %v1599_v17, %v10161_v21  ;;  %v8448_v21 = vld [vmem:[%s12896_s3 + $0x94] sm:$0xf] }
 0x2da   : > { %v10304_v6 = vpop.permute.xlu1 %2461 }
 0x2db   : > { %1638 = vmatmul.bf16.gmra.mxu1 %v9487_v54  ;;  %1746 = vmatmul.bf16.gmra.mxu2 %v9489_v46  ;;  %v7928_v54 = vld [vmem:[%s12896_s3 + $0x9c] sm:$0xf0]  ;;  %v7926_v46 = vld [vmem:[%s12896_s3 + $0x90] sm:$0xf]  ;;  %13185 = vst [vmem:[#allocation66_spill] sm:$0xff] %v10304_v6 }
 0x2dc   : > { %v10293_v17 = vpop.f32.mrf.mxu0  ;;  %v7931_v24 = vor.u32 %v8448_v21, %v7928_v54  ;;  %v7927_v15 = vor.u32 %v8449_v28, %v7926_v46  ;;  %6299 = vperm.xlu1 %8539, %v8209_v51   ;;  %v8210_v51 = vld [vmem:[%s12898_s5 + $0x2f0] sm:$0xff] }
 0x2de   : > { %1854 = vmatmul.bf16.gmra.mxu3 %v9491_v41  ;;  %v10295_v41 = vpop.permute.xlu2 %2701  ;;  %v1707_v57 = vpop.f32.mrf.mxu2  ;;  %3263 = vmatpush.bf16.msrb.mxu1 %v7931_v24  ;;  %v8205_v24 = vld [vmem:[%s12898_s5 + $0x2c8] sm:$0xff] }
 0x2df   : > { %13183 = vst [vmem:[#allocation65_spill] sm:$0xff] %v10295_v41  ;;  %v1708_v10 = vadd.f32 %v1707_v57, %v1600_v47  ;;  %3155 = vmatpush.bf16.msra.mxu0 %v7927_v15  ;;  %v8171_v47 = vld [vmem:[%s12897_s4 + $0x2f8] sm:$0xff]  ;;  %5993 = vperm.xlu2 %8540, %v8164_v5   ;;  %v10327_v57 = vpop.permute.xlu0 %2741 }
 0x2e0   : > { %v10302_v49 = vpop.f32.mrf.mxu1  ;;  %6028 = vperm.xlu0 %8538, %v8171_v47   ;;  %13187 = vst [vmem:[#allocation68_spill] sm:$0xff] %v10327_v57  ;;  %v8213_v57 = vld [vmem:[%s12898_s5 + $0x308] sm:$0xff] }
 0x2e1   : > { %v1815_v27 = vpop.f32.mrf.mxu3 }
 0x2e2   : > { %v1816_v34 = vadd.f32 %v1815_v27, %v1708_v10  ;;  %v10332_v28 = vpop.permute.xlu1 %2466  ;;  %v8172_v10 = vld [vmem:[%s12897_s4 + $0x300] sm:$0xff] }
 0x2e3   : > { %13188 = vst [vmem:[#allocation15_spill] sm:$0xff] %v10332_v28 }
 0x2e4   : > { %v10310_v21 = vadd.f32 %v9524_v22, %v1816_v34  ;;  %v10318_v54 = vpop.f32.mrf.mxu0  ;;  %6304 = vperm.xlu1 %8539, %v8210_v51  }
 0x2e6   : > { %v10320_v27 = vpop.f32.mrf.mxu2  ;;  %v10324_v46 = vpop.permute.xlu2 %2706 }
 0x2e7   : > { %13186 = vst [vmem:[#allocation67_spill] sm:$0xff] %v10324_v46  ;;  %6279 = vperm.xlu2 %8540, %v8205_v24  }
 0x2e8   : > { %v1604_v22 = vpop.f32.mrf.mxu1  ;;  %6033 = vperm.xlu0 %8538, %v8172_v10   ;;  %v10358_v10 = vpop.permute.xlu0 %2746 }
 0x2e9   : > { %v10322_v15 = vpop.f32.mrf.mxu3  ;;  %v1605_v34 = vadd.f32 %v1604_v22, %v10211_v31  ;;  %v8173_v31 = vld [vmem:[%s12897_s4 + $0x308] sm:$0xff]  ;;  %13190 = vst [vmem:[#allocation74_spill] sm:$0xff] %v10358_v10  ;;  %v8214_v10 = vld [vmem:[%s12898_s5 + $0x310] sm:$0xff] }
 0x2eb   : > { %1643 = vmatmul.bf16.gmra.mxu1 %v9526_v60  ;;  %1751 = vmatmul.bf16.gmra.mxu2 %v9528_v4 }
 0x2ec   : > { %v10343_v5 = vpop.f32.mrf.mxu0  ;;  %6038 = vperm.xlu1 %8539, %v8173_v31   ;;  %v10363_v31 = vpop.permute.xlu1 %2751 }
 0x2ed   : > { %13191 = vst [vmem:[#allocation75_spill] sm:$0xff] %v10363_v31 }
 0x2ee   : > { %1859 = vmatmul.bf16.gmra.mxu3 %v9530_v42  ;;  %v1712_v47 = vpop.f32.mrf.mxu2  ;;  %v10347_v28 = vpop.permute.xlu2 %2441  ;;  %v8206_v42 = vld [vmem:[%s12898_s5 + $0x2d0] sm:$0xff] }
 0x2ef   : > { %v1713_v51 = vadd.f32 %v1712_v47, %v1605_v34  ;;  %13189 = vst [vmem:[#allocation69_spill] sm:$0xff] %v10347_v28  ;;  %6284 = vperm.xlu2 %8540, %v8206_v42   ;;  %v8174_v34 = vld [vmem:[%s12897_s4 + $0x310] sm:$0xff]  ;;  %v8169_v42 = vld [vmem:[%s12897_s4 + $0x2e8] sm:$0xff] }
 0x2f0   : > { %v10345_v60 = vpop.f32.mrf.mxu1  ;;  %6319 = vperm.xlu0 %8538, %v8213_v57   ;;  %v8215_v57 = vld [vmem:[%s12898_s5 + $0x318] sm:$0xff]  ;;  %v10391_v6 = vpop.permute.xlu0 %2481 }
 0x2f1   : > { %v1820_v22 = vpop.f32.mrf.mxu3  ;;  %13193 = vst [vmem:[#allocation77_spill] sm:$0xff] %v10391_v6 }
 0x2f2   : > { %v1821_v4 = vadd.f32 %v1820_v22, %v1713_v51 }
 0x2f4   : > { %v10353_v24 = vadd.f32 %v9560_v59, %v1821_v4  ;;  %v10365_v47 = vpop.f32.mrf.mxu0  ;;  %6043 = vperm.xlu1 %8539, %v8174_v34   ;;  %v7922_v34 = vld [vmem:[%s12896_s3 + $0x80] sm:$0xf] }
 0x2f6   : > { %v10367_v51 = vpop.f32.mrf.mxu2  ;;  %v10378_v31 = vpop.permute.xlu2 %2446 }
 0x2f7   : > { %13192 = vst [vmem:[#allocation76_spill] sm:$0xff] %v10378_v31  ;;  %6018 = vperm.xlu2 %8540, %v8169_v42   ;;  %v10393_v42 = vpop.permute.xlu1 %2756 }
 0x2f8   : > { %v1609_v22 = vpop.f32.mrf.mxu1  ;;  %6324 = vperm.xlu0 %8538, %v8214_v10   ;;  %13194 = vst [vmem:[#allocation78_spill] sm:$0xff] %v10393_v42  ;;  %v8177_v10 = vld [vmem:[%s12897_s4 + $0x328] sm:$0xff]  ;;  %v10429_v42 = vpop.permute.xlu0 %2486 }
 0x2f9   : > { %v10369_v59 = vpop.f32.mrf.mxu3  ;;  %v1610_v4 = vadd.f32 %v1609_v22, %v10261_v23  ;;  %v8447_v23 = vld [vmem:[%s12896_s3 + $0x88] sm:$0xf0]  ;;  %13197 = vst [vmem:[#allocation81_spill] sm:$0xff] %v10429_v42 }
 0x2fa   : > { %v7923_v28 = vor.u32 %v8447_v23, %v7922_v34 }
 0x2fc   : > { %v10389_v22 = vpop.f32.mrf.mxu0  ;;  %6329 = vperm.xlu1 %8539, %v8215_v57   ;;  %3373 = vmatpush.bf16.msrb.mxu2 %v7923_v28  ;;  %v7916_v28 = vld [vmem:[%s12896_s3 + $0x84] sm:$0xf0]  ;;  %v8446_v57 = vld [vmem:[%s12896_s3 + $0x80] sm:$0xf0] }
 0x2fe   : > { %v1717_v53 = vpop.f32.mrf.mxu2 }
 0x2ff   : > { %v1718_v31 = vadd.f32 %v1717_v53, %v1610_v4  ;;  %6023 = vperm.xlu2 %8540, %v8170_v32   ;;  %v8216_v53 = vld [vmem:[%s12898_s5 + $0x320] sm:$0xff] }
 0x300   : > { %v10395_v41 = vpop.f32.mrf.mxu1  ;;  %6058 = vperm.xlu0 %8538, %v8177_v10   ;;  %v8211_v10 = vld [vmem:[%s12898_s5 + $0x2f8] sm:$0xff] }
 0x301   : > { %v1825_v46 = vpop.f32.mrf.mxu3 }
 0x302   : > { %v1826_v61 = vadd.f32 %v1825_v46, %v1718_v31  ;;  %v8445_v46 = vld [vmem:[%s12896_s3 + $0x7c] sm:$0xf]  ;;  %v10420_v31 = vpop.permute.xlu2 %2731 }
 0x303   : > { %13196 = vst [vmem:[#allocation80_spill] sm:$0xff] %v10420_v31  ;;  %v7919_v4 = vor.u32 %v8445_v46, %v7916_v28  ;;  %v8178_v46 = vld [vmem:[%s12897_s4 + $0x330] sm:$0xff] }
 0x304   : > { %v10401_v26 = vadd.f32 %v9590_v55, %v1826_v61  ;;  %v7914_v55 = vld [vmem:[%s12896_s3 + $0x78] sm:$0xf]  ;;  %v10418_v61 = vpop.f32.mrf.mxu0  ;;  %6334 = vperm.xlu1 %8539, %v8216_v53  }
 0x305   : > { %v7915_v23 = vor.u32 %v8446_v57, %v7914_v55  ;;  %3264 = vmatpush.bf16.msrb.mxu1 %v7919_v4  ;;  %v8179_v53 = vld [vmem:[%s12897_s4 + $0x338] sm:$0xff] }
 0x306   : > { %13195 = vst [vmem:[#allocation79_spill] sm:$0xff] %v10401_v26  ;;  %v10422_v32 = vpop.f32.mrf.mxu2  ;;  %v10431_v26 = vpop.permute.xlu1 %2491 }
 0x307   : > { %13198 = vst [vmem:[#allocation82_spill] sm:$0xff] %v10431_v26  ;;  %3156 = vmatpush.bf16.msra.mxu0 %v7915_v23  ;;  %6309 = vperm.xlu2 %8540, %v8211_v10   ;;  %v10449_v26 = vpop.permute.xlu0 %2771  ;;  %v8212_v10 = vld [vmem:[%s12898_s5 + $0x300] sm:$0xff] }
 0x308   : > { %v1614_v6 = vpop.f32.mrf.mxu1  ;;  %6063 = vperm.xlu0 %8538, %v8178_v46   ;;  %13201 = vst [vmem:[#allocation85_spill] sm:$0xff] %v10449_v26  ;;  %v8180_v46 = vld [vmem:[%s12897_s4 + $0x340] sm:$0xff]  ;;  %v8175_v26 = vld [vmem:[%s12897_s4 + $0x318] sm:$0xff] }
 0x309   : > { %v10427_v34 = vpop.f32.mrf.mxu3  ;;  %v1615_v31 = vadd.f32 %v1614_v6, %v10318_v54 }
 0x30a   : > { %v10445_v54 = vpop.permute.xlu2 %2736 }
 0x30b   : > { %13200 = vst [vmem:[#allocation84_spill] sm:$0xff] %v10445_v54 }
 0x30c   : > { %v10443_v28 = vpop.f32.mrf.mxu0  ;;  %6068 = vperm.xlu1 %8539, %v8179_v53  }
 0x30d   : > { %13199 = vst [vmem:[#allocation83_spill] sm:$0xff] %v10443_v28 }
 0x30e   : > { %v1722_v55 = vpop.f32.mrf.mxu2  ;;  %v10454_v42 = vpop.permute.xlu1 %2496 }
 0x30f   : > { %v1723_v4 = vadd.f32 %v1722_v55, %v1615_v31  ;;  %13202 = vst [vmem:[#allocation86_spill] sm:$0xff] %v10454_v42  ;;  %v8219_v31 = vld [vmem:[%s12898_s5 + $0x338] sm:$0xff]  ;;  %6314 = vperm.xlu2 %8540, %v8212_v10   ;;  %v10483_v54 = vpop.permute.xlu0 %2776 }
 0x310   : > { %v10447_v57 = vpop.f32.mrf.mxu1  ;;  %6349 = vperm.xlu0 %8538, %v8219_v31   ;;  %v8220_v31 = vld [vmem:[%s12898_s5 + $0x340] sm:$0xff]  ;;  %13205 = vst [vmem:[#allocation89_spill] sm:$0xff] %v10483_v54 }
 0x311   : > { %v1830_v6 = vpop.f32.mrf.mxu3 }
 0x312   : > { %v1831_v23 = vadd.f32 %v1830_v6, %v1723_v4  ;;  %v10474_v42 = vpop.permute.xlu2 %2471 }
 0x313   : > { %13204 = vst [vmem:[#allocation88_spill] sm:$0xff] %v10474_v42 }
 0x314   : > { %v10457_v28 = vadd.f32 %v9620_v35, %v1831_v23  ;;  %v10465_v53 = vpop.f32.mrf.mxu0  ;;  %6073 = vperm.xlu1 %8539, %v8180_v46   ;;  %v2062_v35 = vadd.f32 %v9862_v2, %v9842_v33 }
 0x316   : > { %13203 = vst [vmem:[#allocation87_spill] sm:$0xff] %v10457_v28  ;;  %v10467_v55 = vpop.f32.mrf.mxu2  ;;  %v2063_v10 = vadd.f32 %v2062_v35, %v9880_v45 }
 0x317   : > { %6048 = vperm.xlu2 %8540, %v8175_v26  }
 0x318   : > { %v1619_v6 = vpop.f32.mrf.mxu1  ;;  %v2064_v46 = vadd.f32 %v2063_v10, %v9900_v1  ;;  %6354 = vperm.xlu0 %8538, %v8220_v31   ;;  %v10521_v31 = vpop.permute.xlu0 %2511 }
 0x319   : > { %v10469_v4 = vpop.f32.mrf.mxu3  ;;  %v1620_v23 = vadd.f32 %v1619_v6, %v10365_v47  ;;  %v8221_v47 = vld [vmem:[%s12898_s5 + $0x348] sm:$0xff]  ;;  %v10489_v6 = vpop.permute.xlu1 %2781  ;;  %13208 = vst [vmem:[#allocation92_spill] sm:$0xff] %v10521_v31 }
 0x31a   : > { %13206 = vst [vmem:[#allocation90_spill] sm:$0xff] %v10489_v6  ;;  %v2065_v42 = vadd.f32 %v2064_v46, %v9922_v0  ;;  %v8176_v6 = vld [vmem:[%s12897_s4 + $0x320] sm:$0xff] }
 0x31c   : > { %v10491_v35 = vpop.f32.mrf.mxu0  ;;  %6359 = vperm.xlu1 %8539, %v8221_v47   ;;  %v2066_v54 = vadd.f32 %v2065_v42, %v9942_v18 }
 0x31e   : > { %v1727_v45 = vpop.f32.mrf.mxu2  ;;  %v2067_v10 = vadd.f32 %v2066_v54, %v9966_v9 }
 0x31f   : > { %v1728_v2 = vadd.f32 %v1727_v45, %v1620_v23  ;;  %v8183_v45 = vld [vmem:[%s12897_s4 + $0x358] sm:$0xff]  ;;  %v10507_v23 = vpop.permute.xlu2 %2476  ;;  %6053 = vperm.xlu2 %8540, %v8176_v6  }
 0x320   : > { %v10495_v28 = vpop.f32.mrf.mxu1  ;;  %13207 = vst [vmem:[#allocation91_spill] sm:$0xff] %v10507_v23  ;;  %v2068_v42 = vadd.f32 %v2067_v10, %v9984_v16  ;;  %6088 = vperm.xlu0 %8538, %v8183_v45   ;;  %v8217_v45 = vld [vmem:[%s12898_s5 + $0x328] sm:$0xff] }
 0x321   : > { %v1835_v33 = vpop.f32.mrf.mxu3 }
 0x322   : > { %v1836_v26 = vadd.f32 %v1835_v33, %v1728_v2  ;;  %v8222_v2 = vld [vmem:[%s12898_s5 + $0x350] sm:$0xff]  ;;  %v7910_v33 = vld [vmem:[%s12896_s3 + $0x68] sm:$0xf]  ;;  %v2069_v46 = vadd.f32 %v2068_v42, %v10006_v43  ;;  %v1592_v42 = vadd.f32 %v10193_v20, %v10085_v37  ;;  %v8442_v37 = vld [vmem:[%s12896_s3 + $0x64] sm:$0xf] }
 0x323   : > { %v7904_v20 = vld [vmem:[%s12896_s3 + $0x6c] sm:$0xf0] }
 0x324   : > { %v10502_v1 = vadd.f32 %v9650_v48, %v1836_v26  ;;  %v8444_v48 = vld [vmem:[%s12896_s3 + $0x70] sm:$0xf0]  ;;  %v10519_v54 = vpop.f32.mrf.mxu0  ;;  %v10526_v26 = vpop.permute.xlu1 %2786  ;;  %6364 = vperm.xlu1 %8539, %v8222_v2   ;;  %v2070_v23 = vadd.f32 %v2069_v46, %v10028_v12  ;;  %v1597_v46 = vadd.f32 %v10239_v50, %v10133_v7 }
 0x325   : > { %v7911_v6 = vor.u32 %v8444_v48, %v7910_v33  ;;  %13209 = vst [vmem:[#allocation93_spill] sm:$0xff] %v10526_v26  ;;  %v8184_v33 = vld [vmem:[%s12897_s4 + $0x360] sm:$0xff]  ;;  %v1700_v48 = vadd.f32 %v10213_v63, %v1592_v42  ;;  %v7907_v42 = vor.u32 %v8442_v37, %v7904_v20  ;;  %v8218_v37 = vld [vmem:[%s12898_s5 + $0x330] sm:$0xff] }
 0x326   : > { %v10524_v47 = vpop.f32.mrf.mxu2  ;;  %v2071_v18 = vadd.f32 %v2070_v23, %v10052_v25  ;;  %v10565_v25 = vpop.permute.xlu0 %2516 }
 0x327   : > { %3374 = vmatpush.bf16.msrb.mxu2 %v7911_v6  ;;  %6339 = vperm.xlu2 %8540, %v8217_v45   ;;  %v10557_v63 = vpop.permute.xlu2 %2761  ;;  %v8443_v45 = vld [vmem:[%s12896_s3 + $0x68] sm:$0xf0] }
 0x328   : > { %v1624_v16 = vpop.f32.mrf.mxu1  ;;  %v2072_v2 = vadd.f32 %v2071_v18, %v10074_v13  ;;  %13210 = vst [vmem:[#allocation94_spill] sm:$0xff] %v10557_v63  ;;  %6093 = vperm.xlu0 %8538, %v8184_v33   ;;  %3265 = vmatpush.bf16.msrb.mxu1 %v7907_v42 }
 0x329   : > { %v10528_v10 = vpop.f32.mrf.mxu3  ;;  %v1625_v9 = vadd.f32 %v1624_v16, %v10418_v61  ;;  %v8185_v16 = vld [vmem:[%s12897_s4 + $0x368] sm:$0xff]  ;;  %v7902_v61 = vld [vmem:[%s12896_s3 + $0x60] sm:$0xf] }
 0x32a   : > { %v2073_v23 = vadd.f32 %v2072_v2, %v10094_v56  ;;  %v7903_v13 = vor.u32 %v8443_v45, %v7902_v61  ;;  %v1808_v2 = vadd.f32 %v10215_v11, %v1700_v48  ;;  %v1705_v56 = vadd.f32 %v10265_v3, %v1597_v46  ;;  %v8225_v3 = vld [vmem:[%s12898_s5 + $0x368] sm:$0xff] }
 0x32c   : > { %v10555_v18 = vpop.f32.mrf.mxu0  ;;  %6098 = vperm.xlu1 %8539, %v8185_v16   ;;  %v2074_v63 = vadd.f32 %v2073_v23, %v10114_v52  ;;  %v10572_v50 = vpop.permute.xlu1 %2521  ;;  %3157 = vmatpush.bf16.msra.mxu0 %v7903_v13  ;;  %v1602_v16 = vadd.f32 %v10302_v49, %v10189_v19  ;;  %v8186_v19 = vld [vmem:[%s12897_s4 + $0x370] sm:$0xff] }
 0x32e   : > { %v1732_v6 = vpop.f32.mrf.mxu2  ;;  %v1710_v49 = vadd.f32 %v10320_v27, %v1602_v16 }
 0x32f   : > { %v1733_v26 = vadd.f32 %v1732_v6, %v1625_v9  ;;  %v2075_v9 = vadd.f32 %v2074_v63, %v10144_v30  ;;  %6344 = vperm.xlu2 %8540, %v8218_v37   ;;  %v1607_v63 = vadd.f32 %v10345_v60, %v10237_v44  ;;  %v8181_v60 = vld [vmem:[%s12897_s4 + $0x348] sm:$0xff] }
 0x330   : > { %v10570_v7 = vpop.f32.mrf.mxu1  ;;  %6379 = vperm.xlu0 %8538, %v8225_v3   ;;  %v1818_v46 = vadd.f32 %v10322_v15, %v1710_v49  ;;  %v8226_v15 = vld [vmem:[%s12898_s5 + $0x370] sm:$0xff] }
 0x331   : > { %v1840_v31 = vpop.f32.mrf.mxu3  ;;  %v2076_v48 = vadd.f32 %v2075_v9, %v10178_v39  ;;  %v1715_v42 = vadd.f32 %v10367_v51, %v1607_v63  ;;  %v8227_v9 = vld [vmem:[%s12898_s5 + $0x378] sm:$0xff] }
 0x332   : > { %v1841_v33 = vadd.f32 %v1840_v31, %v1733_v26  ;;  %v13211_v31 = vld [vmem:[#allocation70_spill] sm:$0xff]  ;;  %v1813_v26 = vadd.f32 %v10269_v58, %v1705_v56  ;;  %v10604_v56 = vpop.permute.xlu2 %2766 }
 0x333   : > { %v10588_v13 = vadd.f32 %v13211_v31, %v1808_v2  ;;  %v2077_v20 = vadd.f32 %v2076_v48, %v10203_v62  ;;  %v10613_v2 = vpop.permute.xlu0 %2801  ;;  %v1823_v16 = vadd.f32 %v10369_v59, %v1715_v42  ;;  %v1617_v48 = vadd.f32 %v10447_v57, %v10343_v5  ;;  %v8182_v5 = vld [vmem:[%s12897_s4 + $0x350] sm:$0xff] }
 0x334   : > { %v10581_v11 = vadd.f32 %v9680_v8, %v1841_v33  ;;  %v10595_v8 = vpop.f32.mrf.mxu0  ;;  %6103 = vperm.xlu1 %8539, %v8186_v19   ;;  %v10608_v27 = vadd.f32 %v9508_v14, %v1813_v26  ;;  %13212 = vst [vmem:[#allocation70_spill] sm:$0xff] %v10613_v2  ;;  %v10619_v33 = vpop.permute.xlu1 %2526  ;;  %v1612_v14 = vadd.f32 %v10395_v41, %v10293_v17 }
 0x335   : > { %v2078_v58 = vadd.f32 %v2077_v20, %v10588_v13  ;;  %13213 = vst [vmem:[#allocation95_spill] sm:$0xff] %v10619_v33  ;;  %v10642_v19 = vadd.f32 %v9577_v38, %v1823_v16  ;;  %v8189_v38 = vld [vmem:[%s12897_s4 + $0x388] sm:$0xff] }
 0x336   : > { %v10598_v61 = vpop.f32.mrf.mxu2  ;;  %v1720_v37 = vadd.f32 %v10422_v32, %v1612_v14  ;;  %v1725_v32 = vadd.f32 %v10467_v55, %v1617_v48  ;;  %v8228_v55 = vld [vmem:[%s12898_s5 + $0x380] sm:$0xff]  ;;  %v13217_v14 = vld [vmem:[#allocation79_spill] sm:$0xff] }
 0x337   : > { %v2079_v44 = vadd.f32 %v2078_v58, %v10245_v40  ;;  %6078 = vperm.xlu2 %8540, %v8181_v60   ;;  %v1622_v58 = vadd.f32 %v10495_v28, %v10389_v22 }
 0x338   : > { %v1629_v6 = vpop.f32.mrf.mxu1  ;;  %6384 = vperm.xlu0 %8538, %v8226_v15   ;;  %v1828_v59 = vadd.f32 %v10427_v34, %v1720_v37 }
 0x339   : > { %v10602_v23 = vpop.f32.mrf.mxu3  ;;  %v1630_v45 = vadd.f32 %v1629_v6, %v10465_v53  ;;  %v2080_v51 = vadd.f32 %v2079_v44, %v10608_v27  ;;  %v10628_v53 = vadd.f32 %v9547_v29, %v1818_v46  ;;  %v1730_v28 = vadd.f32 %v10524_v47, %v1622_v58  ;;  %v8441_v58 = vld [vmem:[%s12896_s3 + $0x58] sm:$0xf0] }
 0x33a   : > { %v10646_v63 = vpop.permute.xlu2 %2501 }
 0x33b   : > { %v2081_v17 = vadd.f32 %v2080_v51, %v10310_v21  ;;  %v10660_v34 = vpop.permute.xlu0 %2806  ;;  %v13218_v51 = vld [vmem:[#allocation83_spill] sm:$0xff] }
 0x33c   : > { %v10635_v3 = vpop.f32.mrf.mxu0  ;;  %6389 = vperm.xlu1 %8539, %v8227_v9   ;;  %13214 = vst [vmem:[#allocation96_spill] sm:$0xff] %v10660_v34  ;;  %v10665_v6 = vpop.permute.xlu1 %2811  ;;  %v1627_v9 = vadd.f32 %v10570_v7, %v13218_v51 }
 0x33d   : > { %v2082_v26 = vadd.f32 %v2081_v17, %v10628_v53  ;;  %13215 = vst [vmem:[#allocation97_spill] sm:$0xff] %v10665_v6 }
 0x33e   : > { %v1737_v41 = vpop.f32.mrf.mxu2  ;;  %v1735_v47 = vadd.f32 %v10598_v61, %v1627_v9  ;;  %v13224_v9 = vld [vmem:[#allocation16_spill] sm:$0xff] }
 0x33f   : > { %v1738_v29 = vadd.f32 %v1737_v41, %v1630_v45  ;;  %v2083_v57 = vadd.f32 %v2082_v26, %v10353_v24  ;;  %6083 = vperm.xlu2 %8540, %v8182_v5   ;;  %v13216_v45 = vld [vmem:[#allocation71_spill] sm:$0xff]  ;;  %v13219_v41 = vld [vmem:[#allocation72_spill] sm:$0xff]  ;;  %v13221_v5 = vld [vmem:[#allocation73_spill] sm:$0xff] }
 0x340   : > { %v1631_v49 = vpop.f32.mrf.mxu1  ;;  %v10669_v22 = vadd.f32 %v13216_v45, %v1828_v59  ;;  %6118 = vperm.xlu0 %8538, %v8189_v38  }
 0x341   : > { %v1845_v31 = vpop.f32.mrf.mxu3  ;;  %v2084_v42 = vadd.f32 %v2083_v57, %v10642_v19  ;;  %v1632_v7 = vadd.f32 %v1631_v49, %v10491_v35  ;;  %v1843_v35 = vadd.f32 %v10602_v23, %v1735_v47  ;;  %v13225_v47 = vld [vmem:[#allocation17_spill] sm:$0xff] }
 0x342   : > { %v1846_v20 = vadd.f32 %v1845_v31, %v1738_v29  ;;  %v8223_v29 = vld [vmem:[%s12898_s5 + $0x358] sm:$0xff]  ;;  %v13220_v31 = vld [vmem:[#allocation87_spill] sm:$0xff] }
 0x343   : > { %v2085_v15 = vadd.f32 %v2084_v42, %v13217_v14 }
 0x344   : > { %v10655_v46 = vadd.f32 %v9710_v36, %v1846_v20  ;;  %v1833_v36 = vadd.f32 %v10469_v4, %v1725_v32  ;;  %v10673_v44 = vpop.f32.mrf.mxu0  ;;  %6394 = vperm.xlu1 %8539, %v8228_v55   ;;  %v1838_v4 = vadd.f32 %v10528_v10, %v1730_v28  ;;  %v8190_v32 = vld [vmem:[%s12897_s4 + $0x390] sm:$0xff]  ;;  %v10693_v20 = vpop.permute.xlu2 %2506  ;;  %v8191_v10 = vld [vmem:[%s12897_s4 + $0x398] sm:$0xff] }
 0x345   : > { %v2086_v17 = vadd.f32 %v2085_v15, %v10669_v22  ;;  %v10709_v55 = vpop.permute.xlu0 %4149 }
 0x346   : > { %v1739_v60 = vpop.f32.mrf.mxu2  ;;  %v10680_v48 = vadd.f32 %v13219_v41, %v1833_v36  ;;  %v10700_v57 = vadd.f32 %v13221_v5, %v1838_v4  ;;  %13222 = vst [vmem:[#allocation71_spill] sm:$0xff] %v10709_v55  ;;  %v10711_v36 = vpop.permute.xlu1 %4425 }
 0x347   : > { %v2087_v26 = vadd.f32 %v2086_v17, %v13220_v31  ;;  %6369 = vperm.xlu2 %8540, %v8223_v29   ;;  %v1740_v49 = vadd.f32 %v1739_v60, %v1632_v7  ;;  %13223 = vst [vmem:[#allocation79_spill] sm:$0xff] %v10711_v36  ;;  %v13226_v7 = vld [vmem:[#allocation4_spill] sm:$0xff] }
 0x348   : > { %v1634_v37 = vpop.f32.mrf.mxu1  ;;  %6123 = vperm.xlu0 %8538, %v8190_v32  }
 0x349   : > { %v1847_v16 = vpop.f32.mrf.mxu3  ;;  %v1635_v59 = vadd.f32 %v1634_v37, %v10519_v54  ;;  %v2088_v61 = vadd.f32 %v2087_v26, %v10680_v48  ;;  %v7898_v54 = vld [vmem:[%s12896_s3 + $0x50] sm:$0xf]  ;;  %v10716_v37 = vadd.f32 %v13224_v9, %v1843_v35  ;;  %v13228_v9 = vld [vmem:[#allocation19_spill] sm:$0xff] }
 0x34a   : > { %v7899_v45 = vor.u32 %v8441_v58, %v7898_v54  ;;  %v1848_v17 = vadd.f32 %v1847_v16, %v1740_v49 }
 0x34b   : > { %v2089_v28 = vadd.f32 %v2088_v61, %v10502_v1 }
 0x34c   : > { %v1538_v38 = vpop.f32.mrf.mxu0  ;;  %6128 = vperm.xlu1 %8539, %v8191_v10   ;;  %3375 = vmatpush.bf16.msrb.mxu2 %v7899_v45 }
 0x34d   : > { %v2090_v51 = vadd.f32 %v2089_v28, %v10700_v57  ;;  %v13227_v38 = vld [vmem:[#allocation18_spill] sm:$0xff] }
 0x34e   : > { %v1742_v42 = vpop.f32.mrf.mxu2 }
 0x34f   : > { %v1743_v23 = vadd.f32 %v1742_v42, %v1635_v59  ;;  %v2091_v4 = vadd.f32 %v2090_v51, %v10581_v11  ;;  %v10724_v59 = vadd.f32 %v13226_v7, %v1848_v17 }
 0x350   : > { %v1636_v15 = vpop.f32.mrf.mxu1 }
 0x351   : > { %v1850_v60 = vpop.f32.mrf.mxu3  ;;  %v2092_v26 = vadd.f32 %v2091_v4, %v10716_v37  ;;  %v1637_v32 = vadd.f32 %v1636_v15, %v10555_v18 }
 0x352   : > { %v1851_v41 = vadd.f32 %v1850_v60, %v1743_v23 }
 0x353   : > { %v2093_v61 = vadd.f32 %v2092_v26, %v10655_v46 }
 0x354   : > { %v10720_v29 = vadd.f32 %v13225_v47, %v1851_v41  ;;  %v10738_v41 = vpop.permute.xlu2 %2791 }
 0x355   : > { %v2094_v16 = vadd.f32 %v2093_v61, %v10724_v59  ;;  %v13229_v61 = vld [vmem:[#allocation21_spill] sm:$0xff] }
 0x356   : > { %v1744_v10 = vpop.f32.mrf.mxu2 }
 0x357   : > { %v1745_v5 = vadd.f32 %v1744_v10, %v1637_v32  ;;  %v2095_v58 = vadd.f32 %v2094_v16, %v10720_v29  ;;  %v13230_v16 = vld [vmem:[#allocation7_spill] sm:$0xff] }
 0x358   : > { %v1639_v54 = vpop.f32.mrf.mxu1 }
 0x359   : > { %v1852_v35 = vpop.f32.mrf.mxu3  ;;  %v1640_v45 = vadd.f32 %v1639_v54, %v10595_v8 }
 0x35a   : > { %v1853_v49 = vadd.f32 %v1852_v35, %v1745_v5 }
 0x35c   : > { %v10731_v42 = vadd.f32 %v13227_v38, %v1853_v49  ;;  %v10748_v49 = vrot.slane %v13230_v16, 7 }
 0x35e   : > { %v2096_v28 = vadd.f32 %v2095_v58, %v10731_v42  ;;  %v1747_v23 = vpop.f32.mrf.mxu2  ;;  %v10750_v58 = vpop.permute.xlu2 %2796 }
 0x35f   : > { %v1748_v18 = vadd.f32 %v1747_v23, %v1640_v45  ;;  %13231 = vst [vmem:[#allocation83_spill] sm:$0xff] %v10750_v58  ;;  %v10752_v45 = vpop.permute.xlu0 %4154  ;;  %v8558_v23 = vmov 313.0  }
 0x360   : > { %v1641_v15 = vpop.f32.mrf.mxu1  ;;  %13232 = vst [vmem:[#allocation72_spill] sm:$0xff] %v10752_v45  ;;  %8541 = vrcp.f32 %v8558_v23 }
 0x361   : > { %v1855_v60 = vpop.f32.mrf.mxu3  ;;  %v1642_v47 = vadd.f32 %v1641_v15, %v10635_v3 }
 0x362   : > { %v1856_v51 = vadd.f32 %v1855_v60, %v1748_v18  ;;  %v10754_v60 = vpop.permute.xlu1 %4159 }
 0x363   : > { %13233 = vst [vmem:[#allocation87_spill] sm:$0xff] %v10754_v60  ;;  %v13249_v60 = vld [vmem:[#allocation37_spill] sm:$0xff] }
 0x364   : > { %v10736_v17 = vadd.f32 %v13228_v9, %v1856_v51 }
 0x366   : > { %v2097_v4 = vadd.f32 %v2096_v28, %v10736_v17  ;;  %v1749_v26 = vpop.f32.mrf.mxu2 }
 0x367   : > { %v1750_v7 = vadd.f32 %v1749_v26, %v1642_v47  ;;  %v8231_v47 = vld [vmem:[%s12898_s5 + $0x398] sm:$0xff] }
 0x368   : > { %v1644_v8 = vpop.f32.mrf.mxu1  ;;  %6409 = vperm.xlu0 %8538, %v8231_v47  }
 0x369   : > { %v1857_v32 = vpop.f32.mrf.mxu3  ;;  %v1645_v35 = vadd.f32 %v1644_v8, %v10673_v44  ;;  %v13234_v44 = vld [vmem:[#allocation20_spill] sm:$0xff] }
 0x36a   : > { %v1858_v10 = vadd.f32 %v1857_v32, %v1750_v7  ;;  %v13235_v51 = vrot.slane %v13234_v44, 7  ;;  %v8192_v7 = vld [vmem:[%s12897_s4 + $0x3a0] sm:$0xff]  ;;  %v8542_v32 = vpop.eup %8541 }
 0x36b   : > { %6133 = vperm.xlu1 %8539, %v8192_v7   ;;  %vm2113_vm1 = vweird.f32 %v8542_v32 }
 0x36c   : > { %v10743_v5 = vadd.f32 %v13229_v61, %v1858_v10  ;;  %v1980_v9 = vsel %vm1903_vm0, %v13235_v51, %v10748_v49  ;;  %v2100_v10 = vsel %vm1903_vm0, %v10748_v49, 0.0 }
 0x36e   : > { %v2098_v54 = vadd.f32 %v2097_v4, %v10743_v5  ;;  %v1752_v38 = vpop.f32.mrf.mxu2  ;;  %v8224_v4 = vld [vmem:[%s12898_s5 + $0x360] sm:$0xff] }
 0x36f   : > { %v1753_v3 = vadd.f32 %v1752_v38, %v1645_v35  ;;  %6374 = vperm.xlu2 %8540, %v8224_v4   ;;  %v2109_v38 = vmul.f32 313.0, %v8542_v32 }
 0x370   : > { %v1646_v18 = vpop.f32.mrf.mxu1 }
 0x371   : > { %v1860_v28 = vpop.f32.mrf.mxu3  ;;  %v8187_v18 = vld [vmem:[%s12897_s4 + $0x378] sm:$0xff]  ;;  %v2110_v51 = vsub.f32 1.0, %v2109_v38 }
 0x372   : > { %v1861_v15 = vadd.f32 %v1860_v28, %v1753_v3  ;;  %v10771_v3 = vpop.permute.xlu2 %2531  ;;  %v10773_v28 = vpop.permute.xlu0 %4440 }
 0x373   : > { %13236 = vst [vmem:[#allocation73_spill] sm:$0xff] %v10771_v3  ;;  %v2111_v7 = vmul.f32 %v8542_v32, %v2110_v51  ;;  %v8229_v51 = vld [vmem:[%s12898_s5 + $0x388] sm:$0xff] }
 0x374   : > { %v2060_v26 = vadd.f32 %v1980_v9, %v1861_v15  ;;  %13237 = vst [vmem:[#allocation16_spill] sm:$0xff] %v10773_v28  ;;  %v10781_v15 = vpop.permute.xlu1 %4164  ;;  %v8233_v9 = vld [vmem:[%s12898_s5 + $0x3a8] sm:$0xff] }
 0x375   : > { %13238 = vst [vmem:[#allocation17_spill] sm:$0xff] %v10781_v15  ;;  %6419 = vperm.xlu1 %8539, %v8233_v9   ;;  %v2112_v38 = vadd.f32 %v8542_v32, %v2111_v7  ;;  %v13248_v15 = vld [vmem:[#allocation34_spill] sm:$0xff] }
 0x376   : > { %v2099_v8 = vadd.f32 %v2098_v54, %v2060_v26  ;;  %v1754_v61 = vpop.f32.mrf.mxu2  ;;  %v8232_v54 = vld [vmem:[%s12898_s5 + $0x3a0] sm:$0xff] }
 0x377   : > { %6108 = vperm.xlu2 %8540, %v8187_v18   ;;  %6414 = vperm.xlu0 %8538, %v8232_v54  }
 0x378   : > { %v2101_v35 = vadd.f32 %v2100_v10, %v2099_v8  ;;  %v8188_v8 = vld [vmem:[%s12897_s4 + $0x380] sm:$0xff]  ;;  %v8195_v10 = vld [vmem:[%s12897_s4 + $0x3b8] sm:$0x1] }
 0x379   : > { %v1862_v16 = vpop.f32.mrf.mxu3 }
 0x37a   : > { %v2102_v23 = vrot.slane %v2101_v35, 4  ;;  %v10792_v61 = vpop.permute.xlu2 %4144 }
 0x37b   : > { %13239 = vst [vmem:[#allocation4_spill] sm:$0xff] %v10792_v61  ;;  %v13253_v61 = vld [vmem:[#allocation49_spill] sm:$0xff] }
 0x37c   : > { %v2103_v44 = vadd.f32 %v2102_v23, %v2101_v35  ;;  %v10794_v35 = vpop.permute.xlu0 %4445  ;;  %v8234_v23 = vld [vmem:[%s12898_s5 + $0x3b0] sm:$0xff]  ;;  %v10799_v18 = vpop.permute.xlu1 %4450 }
 0x37d   : > { %13240 = vst [vmem:[#allocation18_spill] sm:$0xff] %v10794_v35  ;;  %6424 = vperm.xlu1 %8539, %v8234_v23  }
 0x37e   : > { %v2104_v4 = vrot.slane %v2103_v44, 2  ;;  %13241 = vst [vmem:[#allocation19_spill] sm:$0xff] %v10799_v18 }
 0x37f   : > { %6113 = vperm.xlu2 %8540, %v8188_v8   ;;  %6148 = vperm.xlu0 %8538, %v8195_v10  }
 0x380   : > { %v2105_v47 = vadd.f32 %v2104_v4, %v2103_v44  ;;  %v10801_v44 = vsel %vm2113_vm1, %v8542_v32, %v2112_v38 }
 0x382   : > { %v2106_v16 = vrot.slane %v2105_v47, 1  ;;  %v10809_v4 = vpop.permute.xlu2 %4430 }
 0x383   : > { %13242 = vst [vmem:[#allocation21_spill] sm:$0xff] %v10809_v4 }
 0x384   : > { %v2107_v54 = vadd.f32 %v2106_v16, %v2105_v47  ;;  %v13243_v16 = vld [vmem:[#allocation24_spill] sm:$0xff] }
 0x386   : > { %v10807_v9 = vmul.f32 %v10801_v44, %v2107_v54 }
 0x387   : > { %6399 = vperm.xlu2 %8540, %v8229_v51  }
 0x388   : > { %v10813_v7 = vsub.f32 %v10720_v29, %v10807_v9  ;;  %v10817_v8 = vsub.f32 %v10731_v42, %v10807_v9  ;;  %v10821_v32 = vsub.f32 %v10736_v17, %v10807_v9  ;;  %v10825_v47 = vsub.f32 %v10743_v5, %v10807_v9  ;;  %v8230_v29 = vld [vmem:[%s12898_s5 + $0x390] sm:$0xff]  ;;  %v13244_v42 = vld [vmem:[#allocation10_spill] sm:$0xff]  ;;  %v13246_v5 = vld [vmem:[#allocation27_spill] sm:$0xff] }
 0x389   : > { %v10828_v10 = vsub.f32 %v2060_v26, %v10807_v9  ;;  %v10835_v38 = vsub.f32 %v13243_v16, %v10807_v9  ;;  %v10839_v23 = vsub.f32 %v13244_v42, %v10807_v9  ;;  %v10845_v54 = vsub.f32 %v13246_v5, %v10807_v9  ;;  %v13247_v16 = vld [vmem:[#allocation30_spill] sm:$0xff] }
 0x38a   : > { %v10841_v17 = vpop.permute.xlu2 %4435  ;;  %v10853_v18 = vsub.f32 %v13247_v16, %v10807_v9  ;;  %v10860_v42 = vsub.f32 %v9922_v0, %v10807_v9  ;;  %v10866_v28 = vsub.f32 %v13248_v15, %v10807_v9  ;;  %v10872_v45 = vsub.f32 %v13249_v60, %v10807_v9 }
 0x38b   : > { %13245 = vst [vmem:[#allocation7_spill] sm:$0xff] %v10841_v17  ;;  %v2156_v26 = vmul.f32 %v10835_v38, %v10835_v38  ;;  %v2157_v51 = vmul.f32 %v10839_v23, %v10839_v23  ;;  %v2158_v5 = vmul.f32 %v10845_v54, %v10845_v54  ;;  %v10889_v60 = vsub.f32 %v10006_v43, %v10807_v9 }
 0x38c   : > { %v2159_v16 = vmul.f32 %v10853_v18, %v10853_v18  ;;  %v2160_v0 = vmul.f32 %v10860_v42, %v10860_v42  ;;  %v2161_v15 = vmul.f32 %v10866_v28, %v10866_v28  ;;  %v2190_v6 = vmul.f32 %v10813_v7, %v10813_v7 }
 0x38d   : > { %v2196_v35 = vadd.f32 %v2157_v51, %v2156_v26  ;;  %v13251_v26 = vld [vmem:[#allocation39_spill] sm:$0xff]  ;;  %v2164_v43 = vmul.f32 %v10889_v60, %v10889_v60  ;;  %v11058_v3 = vsub.f32 %v10748_v49, %v10807_v9 }
 0x38e   : > { %v10880_v51 = vsub.f32 %v13251_v26, %v10807_v9  ;;  %v13252_v26 = vld [vmem:[#allocation45_spill] sm:$0xff] }
 0x38f   : > { %6404 = vperm.xlu2 %8540, %v8230_v29   ;;  %v8193_v29 = vld [vmem:[%s12897_s4 + $0x3a8] sm:$0xff]  ;;  %v2197_v17 = vadd.f32 %v2196_v35, %v2158_v5  ;;  %v8194_v35 = vld [vmem:[%s12897_s4 + $0x3b0] sm:$0xff] }
 0x391   : > { %v2198_v4 = vadd.f32 %v2197_v17, %v2159_v16  ;;  %v2162_v17 = vmul.f32 %v10872_v45, %v10872_v45  ;;  %v10895_v16 = vsub.f32 %v10028_v12, %v10807_v9 }
 0x392   : > { %v10876_v36 = vpop.permute.xlu2 %4169 }
 0x393   : > { %13250 = vst [vmem:[#allocation20_spill] sm:$0xff] %v10876_v36  ;;  %v10901_v36 = vsub.f32 %v13252_v26, %v10807_v9  ;;  %v2165_v12 = vmul.f32 %v10895_v16, %v10895_v16 }
 0x397   : > { %6138 = vperm.xlu2 %8540, %v8193_v29   ;;  %v2199_v29 = vadd.f32 %v2198_v4, %v2160_v0  ;;  %v2163_v4 = vmul.f32 %v10880_v51, %v10880_v51 }
 0x399   : > { %v2200_v5 = vadd.f32 %v2199_v29, %v2161_v15  ;;  %v10907_v15 = vsub.f32 %v13253_v61, %v10807_v9  ;;  %v10924_v61 = vsub.f32 %v10114_v52, %v10807_v9 }
 0x39b   : > { %v2201_v0 = vadd.f32 %v2200_v5, %v2162_v17  ;;  %v10914_v17 = vpop.permute.xlu2 %4174  ;;  %v13255_v5 = vld [vmem:[#allocation51_spill] sm:$0xff]  ;;  %v2169_v52 = vmul.f32 %v10924_v61, %v10924_v61 }
 0x39c   : > { %13254 = vst [vmem:[#allocation24_spill] sm:$0xff] %v10914_v17  ;;  %v10918_v26 = vsub.f32 %v13255_v5, %v10807_v9  ;;  %v10930_v17 = vsub.f32 %v10144_v30, %v10807_v9 }
 0x39d   : > { %v2202_v55 = vadd.f32 %v2201_v0, %v2163_v4  ;;  %v2166_v4 = vmul.f32 %v10901_v36, %v10901_v36 }
 0x39e   : > { %v2168_v5 = vmul.f32 %v10918_v26, %v10918_v26  ;;  %v2170_v30 = vmul.f32 %v10930_v17, %v10930_v17 }
 0x39f   : > { %6143 = vperm.xlu2 %8540, %v8194_v35   ;;  %v2203_v29 = vadd.f32 %v2202_v55, %v2164_v43  ;;  %v8235_v35 = vld [vmem:[%s12898_s5 + $0x3b8] sm:$0x1]  ;;  %v2167_v55 = vmul.f32 %v10907_v15, %v10907_v15 }
 0x3a1   : > { %v2204_v0 = vadd.f32 %v2203_v29, %v2165_v12  ;;  %v10936_v12 = vsub.f32 %v10178_v39, %v10807_v9 }
 0x3a3   : > { %v2205_v43 = vadd.f32 %v2204_v0, %v2166_v4  ;;  %v10948_v0 = vsub.f32 %v10588_v13, %v10807_v9  ;;  %v2171_v39 = vmul.f32 %v10936_v12, %v10936_v12 }
 0x3a5   : > { %v2206_v34 = vadd.f32 %v2205_v43, %v2167_v55  ;;  %v10954_v43 = vsub.f32 %v10245_v40, %v10807_v9  ;;  %v2173_v13 = vmul.f32 %v10948_v0, %v10948_v0 }
 0x3a7   : > { %6429 = vperm.xlu2 %8540, %v8235_v35   ;;  %v2207_v29 = vadd.f32 %v2206_v34, %v2168_v5  ;;  %v10942_v35 = vsub.f32 %v10203_v62, %v10807_v9  ;;  %v10960_v5 = vsub.f32 %v10608_v27, %v10807_v9  ;;  %v2174_v40 = vmul.f32 %v10954_v43, %v10954_v43 }
 0x3a9   : > { %v2208_v4 = vadd.f32 %v2207_v29, %v2169_v52  ;;  %v2172_v62 = vmul.f32 %v10942_v35, %v10942_v35  ;;  %v10966_v29 = vsub.f32 %v10310_v21, %v10807_v9  ;;  %v2175_v27 = vmul.f32 %v10960_v5, %v10960_v5 }
 0x3ab   : > { %v2209_v55 = vadd.f32 %v2208_v4, %v2170_v30  ;;  %v10972_v4 = vsub.f32 %v10628_v53, %v10807_v9  ;;  %v2176_v21 = vmul.f32 %v10966_v29, %v10966_v29 }
 0x3ad   : > { %v2210_v34 = vadd.f32 %v2209_v55, %v2171_v39  ;;  %v10978_v55 = vsub.f32 %v10353_v24, %v10807_v9  ;;  %v2177_v53 = vmul.f32 %v10972_v4, %v10972_v4 }
 0x3af   : > { %v2211_v52 = vadd.f32 %v2210_v34, %v2172_v62  ;;  %v10984_v34 = vsub.f32 %v10642_v19, %v10807_v9  ;;  %v2178_v24 = vmul.f32 %v10978_v55, %v10978_v55 }
 0x3b1   : > { %v2212_v30 = vadd.f32 %v2211_v52, %v2173_v13  ;;  %v10990_v52 = vsub.f32 %v13217_v14, %v10807_v9  ;;  %v2179_v19 = vmul.f32 %v10984_v34, %v10984_v34 }
 0x3b3   : > { %v2213_v39 = vadd.f32 %v2212_v30, %v2174_v40  ;;  %v10996_v30 = vsub.f32 %v10669_v22, %v10807_v9  ;;  %v2180_v14 = vmul.f32 %v10990_v52, %v10990_v52 }
 0x3b5   : > { %v2214_v62 = vadd.f32 %v2213_v39, %v2175_v27  ;;  %v11002_v39 = vsub.f32 %v13220_v31, %v10807_v9  ;;  %v2181_v22 = vmul.f32 %v10996_v30, %v10996_v30 }
 0x3b7   : > { %v2215_v13 = vadd.f32 %v2214_v62, %v2176_v21  ;;  %v11008_v62 = vsub.f32 %v10680_v48, %v10807_v9  ;;  %v2182_v31 = vmul.f32 %v11002_v39, %v11002_v39 }
 0x3b9   : > { %v2216_v40 = vadd.f32 %v2215_v13, %v2177_v53  ;;  %v11014_v13 = vsub.f32 %v10502_v1, %v10807_v9  ;;  %v2183_v48 = vmul.f32 %v11008_v62, %v11008_v62 }
 0x3bb   : > { %v2217_v27 = vadd.f32 %v2216_v40, %v2178_v24  ;;  %v11020_v40 = vsub.f32 %v10700_v57, %v10807_v9  ;;  %v2184_v1 = vmul.f32 %v11014_v13, %v11014_v13 }
 0x3bd   : > { %v2218_v21 = vadd.f32 %v2217_v27, %v2179_v19  ;;  %v11026_v27 = vsub.f32 %v10581_v11, %v10807_v9  ;;  %v2185_v57 = vmul.f32 %v11020_v40, %v11020_v40 }
 0x3bf   : > { %v2219_v53 = vadd.f32 %v2218_v21, %v2180_v14  ;;  %v11032_v21 = vsub.f32 %v10716_v37, %v10807_v9  ;;  %v2186_v11 = vmul.f32 %v11026_v27, %v11026_v27 }
 0x3c1   : > { %v2220_v24 = vadd.f32 %v2219_v53, %v2181_v22  ;;  %v11038_v53 = vsub.f32 %v10655_v46, %v10807_v9  ;;  %v2187_v37 = vmul.f32 %v11032_v21, %v11032_v21 }
 0x3c3   : > { %v2221_v19 = vadd.f32 %v2220_v24, %v2182_v31  ;;  %v11044_v24 = vsub.f32 %v10724_v59, %v10807_v9  ;;  %v2191_v59 = vmul.f32 %v10817_v8, %v10817_v8 }
 0x3c5   : > { %v2222_v14 = vadd.f32 %v2221_v19, %v2183_v48  ;;  %v2188_v19 = vmul.f32 %v11038_v53, %v11038_v53  ;;  %v2189_v46 = vmul.f32 %v11044_v24, %v11044_v24 }
 0x3c7   : > { %v2223_v22 = vadd.f32 %v2222_v14, %v2184_v1 }
 0x3c9   : > { %v2224_v31 = vadd.f32 %v2223_v22, %v2185_v57 }
 0x3cb   : > { %v2225_v48 = vadd.f32 %v2224_v31, %v2186_v11  ;;  %v2192_v11 = vmul.f32 %v10821_v32, %v10821_v32 }
 0x3cd   : > { %v2226_v1 = vadd.f32 %v2225_v48, %v2187_v37  ;;  %v2193_v37 = vmul.f32 %v10825_v47, %v10825_v47 }
 0x3cf   : > { %v2227_v14 = vadd.f32 %v2226_v1, %v2188_v19  ;;  %v2195_v19 = vmul.f32 %v11058_v3, %v11058_v3  ;;  %v2194_v1 = vmul.f32 %v10828_v10, %v10828_v10 }
 0x3d1   : > { %v2228_v57 = vadd.f32 %v2227_v14, %v2189_v46  ;;  %v2234_v14 = vsel %vm1903_vm0, %v2195_v19, 0.0 }
 0x3d3   : > { %v2229_v22 = vadd.f32 %v2228_v57, %v2190_v6 }
 0x3d5   : > { %v2230_v31 = vadd.f32 %v2229_v22, %v2191_v59 }
 0x3d7   : > { %v2231_v48 = vadd.f32 %v2230_v31, %v2192_v11  ;;  %v8439_v11 = vld [vmem:[%s12896_s3 + $0x4c] sm:$0xf]  ;;  %v7892_v31 = vld [vmem:[%s12896_s3 + $0x54] sm:$0xf0] }
 0x3d9   : > { %v2232_v46 = vadd.f32 %v2231_v48, %v2193_v37  ;;  %v7890_v37 = vld [vmem:[%s12896_s3 + $0x48] sm:$0xf]  ;;  %v7895_v48 = vor.u32 %v8439_v11, %v7892_v31  ;;  %v8435_v11 = vld [vmem:[%s12896_s3 + $0x28] sm:$0xf0]  ;;  %v8433_v31 = vld [vmem:[%s12896_s3 + $0x1c] sm:$0xf] }
 0x3db   : > { %v2233_v6 = vadd.f32 %v2232_v46, %v2194_v1  ;;  %3266 = vmatpush.bf16.msrb.mxu1 %v7895_v48  ;;  %v7886_v1 = vld [vmem:[%s12896_s3 + $0x38] sm:$0xf]  ;;  %v8438_v46 = vld [vmem:[%s12896_s3 + $0x40] sm:$0xf0]  ;;  %v7868_v48 = vld [vmem:[%s12896_s3 + $0x24] sm:$0xf0] }
 0x3dd   : > { %v2235_v49 = vadd.f32 %v2234_v14, %v2233_v6  ;;  %v8436_v6 = vld [vmem:[%s12896_s3 + $0x34] sm:$0xf]  ;;  %v7887_v14 = vor.u32 %v8438_v46, %v7886_v1  ;;  %v7871_v46 = vor.u32 %v8433_v31, %v7868_v48  ;;  %v8431_v31 = vld [vmem:[%s12896_s3 + $0x8] sm:$0xf0] }
 0x3df   : > { %v2236_v9 = vrot.slane %v2235_v49, 4  ;;  %3376 = vmatpush.bf16.msrb.mxu2 %v7887_v14 }
 0x3e1   : > { %v2237_v57 = vadd.f32 %v2236_v9, %v2235_v49  ;;  %v7878_v49 = vld [vmem:[%s12896_s3 + $0x30] sm:$0xf]  ;;  %v8437_v9 = vld [vmem:[%s12896_s3 + $0x38] sm:$0xf0] }
 0x3e3   : > { %v2238_v33 = vrot.slane %v2237_v57, 2 }
 0x3e5   : > { %v2239_v2 = vadd.f32 %v2238_v33, %v2237_v57  ;;  %v8440_v33 = vld [vmem:[%s12896_s3 + $0x50] sm:$0xf0] }
 0x3e6   : > { %v7891_v19 = vor.u32 %v8440_v33, %v7890_v37  ;;  %v7866_v33 = vld [vmem:[%s12896_s3 + $0x18] sm:$0xf] }
 0x3e7   : > { %v2240_v59 = vrot.slane %v2239_v2, 1 }
 0x3e8   : > { %3158 = vmatpush.bf16.msra.mxu0 %v7891_v19  ;;  %v8434_v19 = vld [vmem:[%s12896_s3 + $0x20] sm:$0xf0] }
 0x3e9   : > { %v2241_v22 = vadd.f32 %v2240_v59, %v2239_v2  ;;  %v7879_v59 = vor.u32 %v8437_v9, %v7878_v49  ;;  %v8432_v49 = vld [vmem:[%s12896_s3 + $0x10] sm:$0xf0] }
 0x3eb   : > { %v2242_v58 = vmul.f32 %v2241_v22, %v10801_v44  ;;  %v7874_v22 = vld [vmem:[%s12896_s3 + $0x20] sm:$0xf] }
 0x3ec   : > { %3159 = vmatpush.bf16.msra.mxu0 %v7879_v59  ;;  %v7875_v37 = vor.u32 %v8435_v11, %v7874_v22  ;;  %v7856_v59 = vld [vmem:[%s12896_s3 + $0xc] sm:$0xf0]  ;;  %v7854_v22 = vld [vmem:[%s12896_s3] sm:$0xf] }
 0x3ed   : > { %v2243_v2 = vadd.f32 1e-05, %v2242_v58  ;;  %v7880_v58 = vld [vmem:[%s12896_s3 + $0x3c] sm:$0xf0]  ;;  %v7855_v48 = vor.u32 %v8431_v31, %v7854_v22  ;;  %v13258_v22 = vld [vmem:[#allocation23_spill] sm:$0xff] }
 0x3ee   : > { %v7883_v57 = vor.u32 %v8436_v6, %v7880_v58  ;;  %v7867_v6 = vor.u32 %v8434_v19, %v7866_v33  ;;  %3377 = vmatpush.bf16.msrb.mxu2 %v7875_v37  ;;  %v7862_v58 = vld [vmem:[%s12896_s3 + $0x8] sm:$0xf]  ;;  %v13259_v31 = vld [vmem:[#allocation26_spill] sm:$0xff] }
 0x3ef   : > { %8543 = vrsqrt.f32 %v2243_v2  ;;  %v7863_v9 = vor.u32 %v8432_v49, %v7862_v58  ;;  %vm2250_vm3 = vweird.f32 %v2243_v2 }
 0x3f0   : > { %3267 = vmatpush.bf16.msrb.mxu1 %v7883_v57  ;;  %3160 = vmatpush.bf16.msra.mxu0 %v7867_v6  ;;  %v8430_v57 = vld [vmem:[%s12896_s3 + $0x4] sm:$0xf] }
 0x3f1   : > { %v7859_v11 = vor.u32 %v8430_v57, %v7856_v59  ;;  %v13256_v57 = vld [vmem:[#allocation22_spill] sm:$0xff] }
 0x3f2   : > { %3378 = vmatpush.bf16.msrb.mxu2 %v7863_v9  ;;  %v13257_v9 = vld [vmem:[#allocation25_spill] sm:$0xff] }
 0x3f4   : > { %3268 = vmatpush.bf16.msrb.mxu1 %v7871_v46  ;;  %3161 = vmatpush.bf16.msra.mxu0 %v7855_v48 }
 0x3f5   : > { %v8544_v1 = vpop.eup %8543 }
 0x3f6   : > { %v2245_v14 = vmul.f32 %v8544_v1, %v2243_v2  ;;  %vm2251_vm2 = vweird.f32 %v8544_v1 }
 0x3f7   : > { %vm2252_vm4 = vmor %vm2250_vm3, %vm2251_vm2 }
 0x3f8   : > { %v2246_v37 = vmul.f32 %v8544_v1, %v2245_v14  ;;  %3269 = vmatpush.bf16.msrb.mxu1 %v7859_v11 }
 0x3fa   : > { %v2247_v33 = vmul.f32 0.5, %v2246_v37 }
 0x3fc   : > { %v2248_v19 = vsub.f32 1.5, %v2247_v33 }
 0x3fe   : > { %v2249_v46 = vmul.f32 %v8544_v1, %v2248_v19 }
 0x400   : > { %v11136_v6 = vsel %vm2252_vm4, %v8544_v1, %v2249_v46  ;;  %v13260_v46 = vld [vmem:[#allocation35_spill] sm:$0xff] }
 0x401   : > { %v2254_v58 = vmul.f32 %v11136_v6, %v10835_v38  ;;  %v2255_v49 = vmul.f32 %v11136_v6, %v10839_v23  ;;  %v2256_v2 = vmul.f32 %v11136_v6, %v10845_v54  ;;  %v2257_v1 = vmul.f32 %v11136_v6, %v10853_v18  ;;  %v13263_v54 = vld [vmem:[#allocation29_spill] sm:$0xff] }
 0x403   : > { %v2534_v14 = vmul.f32 %v13256_v57, %v2254_v58  ;;  %v2535_v59 = vmul.f32 %v13257_v9, %v2255_v49  ;;  %v2536_v58 = vmul.f32 %v13260_v46, %v2256_v2  ;;  %v13261_v49 = vld [vmem:[#allocation38_spill] sm:$0xff] }
 0x404   : > { %v2537_v57 = vmul.f32 %v13261_v49, %v2257_v1 }
 0x405   : > { %v2814_v11 = vadd.f32 %v13258_v22, %v2534_v14  ;;  %v2815_v37 = vadd.f32 %v13259_v31, %v2535_v59  ;;  %v13262_v14 = vld [vmem:[#allocation28_spill] sm:$0xff]  ;;  %v2259_v31 = vmul.f32 %v11136_v6, %v10866_v28  ;;  %v2260_v28 = vmul.f32 %v11136_v6, %v10872_v45 }
 0x406   : > { %v2816_v9 = vadd.f32 %v13262_v14, %v2536_v58  ;;  %v2817_v59 = vadd.f32 %v13263_v54, %v2537_v57  ;;  %v13267_v58 = vld [vmem:[#allocation44_spill] sm:$0xff]  ;;  %v2262_v45 = vmul.f32 %v11136_v6, %v10889_v60  ;;  %v2264_v60 = vmul.f32 %v11136_v6, %v10901_v36 }
 0x407   : > { %vm2854_vm5 = vcmp.ge.f32.partialorder %v2814_v11, 0.0  ;;  %v2894_v48 = vmul.f32 0.2, %v2814_v11  ;;  %v2895_v38 = vmul.f32 0.2, %v2815_v37  ;;  %vm2855_vm6 = vcmp.ge.f32.partialorder %v2815_v37, 0.0 }
 0x408   : > { %v2896_v22 = vmul.f32 0.2, %v2816_v9  ;;  %v2897_v18 = vmul.f32 0.2, %v2817_v59  ;;  %vm2856_vm7 = vcmp.ge.f32.partialorder %v2816_v9, 0.0  ;;  %vm2857_vm8 = vcmp.ge.f32.partialorder %v2817_v59, 0.0 }
 0x409   : > { %v2934_v33 = vsel %vm2854_vm5, %v2814_v11, %v2894_v48  ;;  %v2935_v23 = vsel %vm2855_vm6, %v2815_v37, %v2895_v38  ;;  %v2258_v11 = vmul.f32 %v11136_v6, %v10860_v42  ;;  %v13264_v48 = vld [vmem:[#allocation40_spill] sm:$0xff]  ;;  %v2261_v42 = vmul.f32 %v11136_v6, %v10880_v51 }
 0x40a   : > { %v2974_v19 = vpack.c.bf16 %v2935_v23, %v2934_v33  ;;  %v2936_v37 = vsel %vm2856_vm7, %v2816_v9, %v2896_v22  ;;  %v2937_v2 = vsel %vm2857_vm8, %v2817_v59, %v2897_v18  ;;  %v13265_v33 = vld [vmem:[#allocation31_spill] sm:$0xff]  ;;  %v13268_v22 = vld [vmem:[#allocation32_spill] sm:$0xff]  ;;  %v2263_v51 = vmul.f32 %v11136_v6, %v10895_v16 }
 0x40b   : > { %v2975_v1 = vpack.c.bf16 %v2937_v2, %v2936_v37  ;;  %v2538_v38 = vmul.f32 %v13264_v48, %v2258_v11  ;;  %v2539_v23 = vmul.f32 %v13265_v33, %v2259_v31  ;;  %v2540_v18 = vmul.f32 %v13268_v22, %v2260_v28  ;;  %v13269_v11 = vld [vmem:[#allocation33_spill] sm:$0xff]  ;;  %v13270_v37 = vld [vmem:[#allocation46_spill] sm:$0xff] }
 0x40c   : > { %3162 = vmatmul.bf16.vlgmr.msra.gmra.mxu0 %v2974_v19  ;;  %3270 = vmatmul.bf16.vlgmr.msrb.gmra.mxu1 %v2974_v19  ;;  %v2541_v31 = vmul.f32 %v13269_v11, %v2261_v42  ;;  %v13274_v28 = vld [vmem:[#allocation5_spill] sm:$0xff]  ;;  %v2265_v16 = vmul.f32 %v11136_v6, %v10907_v15  ;;  %v2266_v36 = vmul.f32 %v11136_v6, %v10918_v26 }
 0x40d   : > { %3379 = vmatmul.bf16.vlgmr.msrb.gmra.mxu2 %v2974_v19  ;;  %v13266_v19 = vld [vmem:[#allocation13_spill] sm:$0xff]  ;;  %v2819_v49 = vadd.f32 %v13267_v58, %v2539_v23  ;;  %v2820_v2 = vadd.f32 %v13270_v37, %v2540_v18  ;;  %v13272_v58 = vld [vmem:[#allocation36_spill] sm:$0xff]  ;;  %v2267_v15 = vmul.f32 %v11136_v6, %v10924_v61  ;;  %v2268_v26 = vmul.f32 %v11136_v6, %v10930_v17 }
 0x40e   : > { %v2818_v46 = vadd.f32 %v13266_v19, %v2538_v38  ;;  %v13276_v37 = vld [vmem:[#allocation56_spill] sm:$0xff]  ;;  %v2269_v61 = vmul.f32 %v11136_v6, %v10936_v12  ;;  %v2270_v17 = vmul.f32 %v11136_v6, %v10942_v35  ;;  %v2271_v12 = vmul.f32 %v11136_v6, %v10948_v0 }
 0x40f   : > { %v2899_v14 = vmul.f32 0.2, %v2819_v49  ;;  %vm2859_vm10 = vcmp.ge.f32.partialorder %v2819_v49, 0.0  ;;  %v2900_v38 = vmul.f32 0.2, %v2820_v2  ;;  %vm2860_vm11 = vcmp.ge.f32.partialorder %v2820_v2, 0.0 }
 0x410   : > { %v2898_v57 = vmul.f32 0.2, %v2818_v46  ;;  %vm2858_vm9 = vcmp.ge.f32.partialorder %v2818_v46, 0.0  ;;  %v2272_v35 = vmul.f32 %v11136_v6, %v10954_v43  ;;  %v2273_v0 = vmul.f32 %v11136_v6, %v10960_v5  ;;  %v13294_v43 = vld [vmem:[#allocation67_spill] sm:$0xff] }
 0x411   : > { %v2939_v54 = vsel %vm2859_vm10, %v2819_v49, %v2899_v14  ;;  %v2940_v23 = vsel %vm2860_vm11, %v2820_v2, %v2900_v38  ;;  %v2542_v49 = vmul.f32 %v13272_v58, %v2262_v45  ;;  %v2544_v2 = vmul.f32 %v13276_v37, %v2264_v60  ;;  %v13278_v38 = vld [vmem:[#allocation42_spill] sm:$0xff]  ;;  %v13279_v45 = vld [vmem:[#allocation55_spill] sm:$0xff] }
 0x412   : > { %v2938_v9 = vsel %vm2858_vm9, %v2818_v46, %v2898_v57  ;;  %v13273_v57 = vld [vmem:[#allocation50_spill] sm:$0xff]  ;;  %v13284_v37 = vld [vmem:[#allocation11_spill] sm:$0xff]  ;;  %vm3717_vm10 = vcmask 1046528  }
 0x413   : > { %v2976_v59 = vpack.c.bf16 %v2939_v54, %v2938_v9  ;;  %v2543_v14 = vmul.f32 %v13273_v57, %v2263_v51  ;;  %v2822_v42 = vadd.f32 %v13274_v28, %v2542_v49  ;;  %v13275_v9 = vld [vmem:[#allocation43_spill] sm:$0xff]  ;;  %v13280_v57 = vld [vmem:[#allocation8_spill] sm:$0xff] }
 0x414   : > { %v13281_v28 = vld [vmem:[#allocation48_spill] sm:$0xff] }
 0x415   : > { %v2823_v54 = vadd.f32 %v13275_v9, %v2543_v14  ;;  %vm2862_vm13 = vcmp.ge.f32.partialorder %v2822_v42, 0.0  ;;  %v2546_v14 = vmul.f32 %v13280_v57, %v2266_v36  ;;  %v13282_v9 = vld [vmem:[#allocation58_spill] sm:$0xff]  ;;  %v13289_v57 = vld [vmem:[#allocation53_spill] sm:$0xff] }
 0x417   : > { %v2903_v22 = vmul.f32 0.2, %v2823_v54  ;;  %vm2863_vm14 = vcmp.ge.f32.partialorder %v2823_v54, 0.0 }
 0x419   : > { %v2943_v11 = vsel %vm2863_vm14, %v2823_v54, %v2903_v22  ;;  %v2826_v54 = vadd.f32 %v13282_v9, %v2546_v14  ;;  %v2551_v14 = vmul.f32 %v13289_v57, %v2271_v12  ;;  %v13291_v9 = vld [vmem:[#allocation65_spill] sm:$0xff] }
 0x41b   : > { %v2906_v60 = vmul.f32 0.2, %v2826_v54  ;;  %vm2866_vm2 = vcmp.ge.f32.partialorder %v2826_v54, 0.0 }
 0x41c   : > { %3167 = vmatmul.bf16.gmra.mxu0 %v2975_v1  ;;  %3275 = vmatmul.bf16.gmra.mxu1 %v2975_v1 }
 0x41d   : > { %3384 = vmatmul.bf16.gmra.mxu2 %v2975_v1  ;;  %v13271_v1 = vld [vmem:[#allocation2_spill] sm:$0xff] }
 0x41e   : > { %v2821_v48 = vadd.f32 %v13271_v1, %v2541_v31  ;;  %v13277_v1 = vld [vmem:[#allocation41_spill] sm:$0xff] }
 0x420   : > { %v2901_v33 = vmul.f32 0.2, %v2821_v48  ;;  %vm2861_vm12 = vcmp.ge.f32.partialorder %v2821_v48, 0.0 }
 0x422   : > { %v2941_v19 = vsel %vm2861_vm12, %v2821_v48, %v2901_v33  ;;  %v2545_v48 = vmul.f32 %v13277_v1, %v2265_v16  ;;  %v2824_v33 = vadd.f32 %v13278_v38, %v2544_v2  ;;  %v2548_v2 = vmul.f32 %v13284_v37, %v2268_v26  ;;  %v13285_v1 = vld [vmem:[#allocation60_spill] sm:$0xff] }
 0x423   : > { %v2977_v46 = vpack.c.bf16 %v2941_v19, %v2940_v23  ;;  %v13286_v38 = vld [vmem:[#allocation52_spill] sm:$0xff] }
 0x424   : > { %v2825_v51 = vadd.f32 %v13279_v45, %v2545_v48  ;;  %v2904_v23 = vmul.f32 0.2, %v2824_v33  ;;  %vm2864_vm15 = vcmp.ge.f32.partialorder %v2824_v33, 0.0  ;;  %v2549_v48 = vmul.f32 %v13285_v1, %v2269_v61  ;;  %v13287_v45 = vld [vmem:[#allocation14_spill] sm:$0xff] }
 0x426   : > { %v2905_v19 = vmul.f32 0.2, %v2825_v51  ;;  %vm2865_vm1 = vcmp.ge.f32.partialorder %v2825_v51, 0.0 }
 0x428   : > { %v2945_v58 = vsel %vm2865_vm1, %v2825_v51, %v2905_v19  ;;  %v2829_v51 = vadd.f32 %v13287_v45, %v2549_v48  ;;  %v13295_v45 = vld [vmem:[#allocation59_spill] sm:$0xff] }
 0x42a   : > { %v2909_v19 = vmul.f32 0.2, %v2829_v51  ;;  %vm2869_vm5 = vcmp.ge.f32.partialorder %v2829_v51, 0.0 }
 0x42c   : > { %3172 = vmatmul.bf16.gmra.mxu0 %v2976_v59  ;;  %3280 = vmatmul.bf16.gmra.mxu1 %v2976_v59 }
 0x42d   : > { %3389 = vmatmul.bf16.gmra.mxu2 %v2976_v59  ;;  %v2902_v59 = vmul.f32 0.2, %v2822_v42 }
 0x42f   : > { %v2942_v18 = vsel %vm2862_vm13, %v2822_v42, %v2902_v59  ;;  %v2547_v42 = vmul.f32 %v13281_v28, %v2267_v15  ;;  %v13283_v59 = vld [vmem:[#allocation47_spill] sm:$0xff]  ;;  %v2949_v15 = vsel %vm2869_vm5, %v2829_v51, %v2909_v19  ;;  %v13290_v28 = vld [vmem:[#allocation54_spill] sm:$0xff] }
 0x430   : > { %v2978_v31 = vpack.c.bf16 %v2943_v11, %v2942_v18  ;;  %v2946_v18 = vsel %vm2866_vm2, %v2826_v54, %v2906_v60  ;;  %v2831_v54 = vadd.f32 %v13291_v9, %v2551_v14 }
 0x431   : > { %v2827_v22 = vadd.f32 %v13283_v59, %v2547_v42 }
 0x432   : > { %vm2871_vm7 = vcmp.ge.f32.partialorder %v2831_v54, 0.0 }
 0x433   : > { %v2907_v16 = vmul.f32 0.2, %v2827_v22  ;;  %vm2867_vm3 = vcmp.ge.f32.partialorder %v2827_v22, 0.0 }
 0x435   : > { %v2947_v11 = vsel %vm2867_vm3, %v2827_v22, %v2907_v16  ;;  %v2911_v22 = vmul.f32 0.2, %v2831_v54 }
 0x437   : > { %v2951_v16 = vsel %vm2871_vm7, %v2831_v54, %v2911_v22 }
 0x43c   : > { %3177 = vmatmul.bf16.gmra.mxu0 %v2977_v46  ;;  %3285 = vmatmul.bf16.gmra.mxu1 %v2977_v46 }
 0x43d   : > { %3394 = vmatmul.bf16.gmra.mxu2 %v2977_v46  ;;  %v2944_v46 = vsel %vm2864_vm15, %v2824_v33, %v2904_v23  ;;  %v2828_v33 = vadd.f32 %v13286_v38, %v2548_v2  ;;  %v13293_v2 = vld [vmem:[#allocation57_spill] sm:$0xff] }
 0x43e   : > { %v2979_v49 = vpack.c.bf16 %v2945_v58, %v2944_v46  ;;  %v13288_v58 = vld [vmem:[#allocation9_spill] sm:$0xff]  ;;  %v2553_v1 = vmul.f32 %v13293_v2, %v2273_v0  ;;  %v13296_v0 = vld [vmem:[#allocation6_spill] sm:$0xff] }
 0x43f   : > { %v2908_v23 = vmul.f32 0.2, %v2828_v33  ;;  %vm2868_vm4 = vcmp.ge.f32.partialorder %v2828_v33, 0.0 }
 0x440   : > { %v2833_v5 = vadd.f32 %v13295_v45, %v2553_v1 }
 0x441   : > { %v2948_v36 = vsel %vm2868_vm4, %v2828_v33, %v2908_v23 }
 0x442   : > { %v2981_v46 = vpack.c.bf16 %v2949_v15, %v2948_v36  ;;  %v2913_v36 = vmul.f32 0.2, %v2833_v5  ;;  %vm2873_vm9 = vcmp.ge.f32.partialorder %v2833_v5, 0.0 }
 0x444   : > { %v2953_v14 = vsel %vm2873_vm9, %v2833_v5, %v2913_v36  ;;  %v2277_v36 = vmul.f32 %v11136_v6, %v10984_v34 }
 0x44c   : > { %3182 = vmatmul.bf16.gmra.mxu0 %v2978_v31  ;;  %3290 = vmatmul.bf16.gmra.mxu1 %v2978_v31 }
 0x44d   : > { %3399 = vmatmul.bf16.gmra.mxu2 %v2978_v31  ;;  %v2980_v31 = vpack.c.bf16 %v2947_v11, %v2946_v18 }
 0x45c   : > { %3187 = vmatmul.bf16.gmra.mxu0 %v2979_v49  ;;  %3295 = vmatmul.bf16.gmra.mxu1 %v2979_v49 }
 0x45d   : > { %3404 = vmatmul.bf16.gmra.mxu2 %v2979_v49  ;;  %v2550_v49 = vmul.f32 %v13288_v58, %v2270_v17  ;;  %v2274_v58 = vmul.f32 %v11136_v6, %v10966_v29 }
 0x45f   : > { %v2830_v42 = vadd.f32 %v13290_v28, %v2550_v49  ;;  %v2275_v49 = vmul.f32 %v11136_v6, %v10972_v4 }
 0x461   : > { %v2910_v59 = vmul.f32 0.2, %v2830_v42  ;;  %vm2870_vm6 = vcmp.ge.f32.partialorder %v2830_v42, 0.0 }
 0x463   : > { %v2950_v60 = vsel %vm2870_vm6, %v2830_v42, %v2910_v59 }
 0x464   : > { %v2982_v11 = vpack.c.bf16 %v2951_v16, %v2950_v60  ;;  %v2554_v60 = vmul.f32 %v13296_v0, %v2274_v58  ;;  %v13297_v16 = vld [vmem:[#allocation69_spill] sm:$0xff] }
 0x46c   : > { %3192 = vmatmul.bf16.gmra.mxu0 %v2980_v31  ;;  %3300 = vmatmul.bf16.gmra.mxu1 %v2980_v31 }
 0x46d   : > { %3409 = vmatmul.bf16.gmra.mxu2 %v2980_v31  ;;  %v13292_v31 = vld [vmem:[#allocation3_spill] sm:$0xff] }
 0x46e   : > { %v2552_v37 = vmul.f32 %v13292_v31, %v2272_v35 }
 0x470   : > { %v2832_v33 = vadd.f32 %v13294_v43, %v2552_v37  ;;  %v13299_v37 = vld [vmem:[#allocation62_spill] sm:$0xff] }
 0x472   : > { %v2912_v12 = vmul.f32 0.2, %v2832_v33  ;;  %vm2872_vm8 = vcmp.ge.f32.partialorder %v2832_v33, 0.0 }
 0x474   : > { %v2952_v57 = vsel %vm2872_vm8, %v2832_v33, %v2912_v12  ;;  %v2276_v12 = vmul.f32 %v11136_v6, %v10978_v55 }
 0x475   : > { %v2983_v35 = vpack.c.bf16 %v2953_v14, %v2952_v57 }
 0x47c   : > { %3197 = vmatmul.bf16.gmra.mxu0 %v2981_v46  ;;  %3305 = vmatmul.bf16.gmra.mxu1 %v2981_v46 }
 0x47d   : > { %3414 = vmatmul.bf16.gmra.mxu2 %v2981_v46 }
 0x489   : > { %v3163_v26 = vpop.f32.mrf.mxu0  ;;  %v3271_v61 = vpop.f32.mrf.mxu1 }
 0x48a   : > { %v3519_v18 = vrot.slane %v3163_v26, 7  ;;  %v2555_v26 = vmul.f32 %v13297_v16, %v2275_v49 }
 0x48c   : > { %v3636_v48 = vsel %vm1903_vm0, 0.0, %v3519_v18  ;;  %3202 = vmatmul.bf16.gmra.mxu0 %v2982_v11  ;;  %3310 = vmatmul.bf16.gmra.mxu1 %v2982_v11  ;;  %v2835_v2 = vadd.f32 %v13299_v37, %v2555_v26  ;;  %v13303_v26 = vld [vmem:[#allocation80_spill] sm:$0xff] }
 0x48d   : > { %v3637_v38 = vadd.f32 %v3636_v48, %v3271_v61  ;;  %3419 = vmatmul.bf16.gmra.mxu2 %v2982_v11  ;;  %v13298_v11 = vld [vmem:[#allocation61_spill] sm:$0xff] }
 0x48e   : > { %v2834_v31 = vadd.f32 %v13298_v11, %v2554_v60  ;;  %vm2875_vm12 = vcmp.ge.f32.partialorder %v2835_v2, 0.0  ;;  %v13302_v60 = vld [vmem:[#allocation64_spill] sm:$0xff] }
 0x490   : > { %v3380_v51 = vpop.f32.mrf.mxu2  ;;  %vm2874_vm11 = vcmp.ge.f32.partialorder %v2834_v31, 0.0 }
 0x491   : > { %v3165_v23 = vpop.f32.mrf.mxu0  ;;  %v3273_v19 = vpop.f32.mrf.mxu1  ;;  %v3718_v42 = vrot.slane %v3380_v51, 1  ;;  %v2914_v51 = vmul.f32 0.2, %v2834_v31 }
 0x492   : > { %v3520_v17 = vrot.slane %v3165_v23, 7 }
 0x494   : > { %v3521_v15 = vsel %vm1903_vm0, %v3519_v18, %v3520_v17 }
 0x495   : > { %v3638_v46 = vadd.f32 %v3521_v15, %v3273_v19  ;;  %v2954_v15 = vsel %vm2874_vm11, %v2834_v31, %v2914_v51  ;;  %v2279_v51 = vmul.f32 %v11136_v6, %v10996_v30 }
 0x498   : > { %v3382_v28 = vpop.f32.mrf.mxu2 }
 0x499   : > { %v3719_v9 = vrot.slane %v3382_v28, 1  ;;  %v3168_v54 = vpop.f32.mrf.mxu0  ;;  %v3276_v59 = vpop.f32.mrf.mxu1 }
 0x49a   : > { %v3522_v22 = vrot.slane %v3168_v54, 7 }
 0x49b   : > { %v3720_v61 = vsel %vm3717_vm10, %v3718_v42, %v3719_v9 }
 0x49c   : > { %v11227_v29 = vadd.f32 %v3720_v61, %v3637_v38  ;;  %v3523_v4 = vsel %vm1903_vm0, %v3520_v17, %v3522_v22  ;;  %3207 = vmatmul.bf16.gmra.mxu0 %v2983_v35  ;;  %3315 = vmatmul.bf16.gmra.mxu1 %v2983_v35  ;;  %v2915_v38 = vmul.f32 0.2, %v2835_v2 }
 0x49d   : > { %v3639_v18 = vadd.f32 %v3523_v4, %v3276_v59  ;;  %3424 = vmatmul.bf16.gmra.mxu2 %v2983_v35  ;;  %v13301_v59 = vld [vmem:[#allocation63_spill] sm:$0xff] }
 0x49e   : > { %v2955_v58 = vsel %vm2875_vm12, %v2835_v2, %v2915_v38 }
 0x4a0   : > { %v3385_v1 = vpop.f32.mrf.mxu2 }
 0x4a1   : > { %v3721_v48 = vrot.slane %v3385_v1, 1  ;;  %v3170_v43 = vpop.f32.mrf.mxu0  ;;  %v3278_v33 = vpop.f32.mrf.mxu1 }
 0x4a2   : > { %v3524_v45 = vrot.slane %v3170_v43, 7 }
 0x4a3   : > { %v3722_v5 = vsel %vm3717_vm10, %v3719_v9, %v3721_v48  ;;  %v13300_v9 = vld [vmem:[#allocation76_spill] sm:$0xff] }
 0x4a4   : > { %v11233_v23 = vadd.f32 %v3722_v5, %v3638_v46  ;;  %v3525_v19 = vsel %vm1903_vm0, %v3522_v22, %v3524_v45  ;;  %v2984_v46 = vpack.c.bf16 %v2955_v58, %v2954_v15  ;;  %v2556_v54 = vmul.f32 %v13300_v9, %v2276_v12 }
 0x4a5   : > { %v3640_v17 = vadd.f32 %v3525_v19, %v3278_v33  ;;  %v2557_v22 = vmul.f32 %v13301_v59, %v2277_v36  ;;  %v2278_v5 = vmul.f32 %v11136_v6, %v10990_v52 }
 0x4a6   : > { %v2836_v16 = vadd.f32 %v13302_v60, %v2556_v54  ;;  %v13306_v54 = vld [vmem:[#allocation84_spill] sm:$0xff] }
 0x4a7   : > { %v2837_v61 = vadd.f32 %v13303_v26, %v2557_v22  ;;  %v13307_v22 = vld [vmem:[#allocation68_spill] sm:$0xff] }
 0x4a8   : > { %v3387_v49 = vpop.f32.mrf.mxu2  ;;  %vm2876_vm13 = vcmp.ge.f32.partialorder %v2836_v16, 0.0 }
 0x4a9   : > { %v3723_v57 = vrot.slane %v3387_v49, 1  ;;  %v3173_v14 = vpop.f32.mrf.mxu0  ;;  %v3281_v28 = vpop.f32.mrf.mxu1  ;;  %vm2877_vm14 = vcmp.ge.f32.partialorder %v2837_v61, 0.0 }
 0x4aa   : > { %v3526_v42 = vrot.slane %v3173_v14, 7 }
 0x4ab   : > { %v3724_v35 = vsel %vm3717_vm10, %v3721_v48, %v3723_v57  ;;  %v2916_v48 = vmul.f32 0.2, %v2836_v16 }
 0x4ac   : > { %v11243_v0 = vadd.f32 %v3724_v35, %v3639_v18  ;;  %v3527_v55 = vsel %vm1903_vm0, %v3524_v45, %v3526_v42  ;;  %3212 = vmatmul.bf16.gmra.mxu0 %v2984_v46  ;;  %3320 = vmatmul.bf16.gmra.mxu1 %v2984_v46  ;;  %v2917_v18 = vmul.f32 0.2, %v2837_v61 }
 0x4ad   : > { %v3641_v34 = vadd.f32 %v3527_v55, %v3281_v28  ;;  %3429 = vmatmul.bf16.gmra.mxu2 %v2984_v46  ;;  %v2956_v38 = vsel %vm2876_vm13, %v2836_v16, %v2916_v48  ;;  %v13305_v28 = vld [vmem:[#allocation66_spill] sm:$0xff]  ;;  %v2281_v48 = vmul.f32 %v11136_v6, %v11008_v62 }
 0x4ae   : > { %v2957_v19 = vsel %vm2877_vm14, %v2837_v61, %v2917_v18 }
 0x4b0   : > { %v3390_v4 = vpop.f32.mrf.mxu2 }
 0x4b1   : > { %v3725_v11 = vrot.slane %v3390_v4, 1  ;;  %v3175_v31 = vpop.f32.mrf.mxu0  ;;  %v3283_v37 = vpop.f32.mrf.mxu1 }
 0x4b2   : > { %v3528_v2 = vrot.slane %v3175_v31, 7 }
 0x4b3   : > { %v3726_v1 = vsel %vm3717_vm10, %v3723_v57, %v3725_v11  ;;  %v13304_v57 = vld [vmem:[#allocation12_spill] sm:$0xff] }
 0x4b4   : > { %v11249_v43 = vadd.f32 %v3726_v1, %v3640_v17  ;;  %v3529_v33 = vsel %vm1903_vm0, %v3526_v42, %v3528_v2  ;;  %v2985_v17 = vpack.c.bf16 %v2957_v19, %v2956_v38  ;;  %v2558_v14 = vmul.f32 %v13304_v57, %v2278_v5 }
 0x4b5   : > { %v3642_v45 = vadd.f32 %v3529_v33, %v3283_v37  ;;  %v2559_v42 = vmul.f32 %v13305_v28, %v2279_v51  ;;  %v2280_v1 = vmul.f32 %v11136_v6, %v11002_v39 }
 0x4b6   : > { %v2838_v59 = vadd.f32 %v13306_v54, %v2558_v14  ;;  %v13310_v14 = vld [vmem:[#allocation74_spill] sm:$0xff] }
 0x4b7   : > { %v2839_v35 = vadd.f32 %v13307_v22, %v2559_v42  ;;  %v13311_v42 = vld [vmem:[#allocation75_spill] sm:$0xff] }
 0x4b8   : > { %v3392_v12 = vpop.f32.mrf.mxu2  ;;  %vm2878_vm15 = vcmp.ge.f32.partialorder %v2838_v59, 0.0 }
 0x4b9   : > { %v3727_v36 = vrot.slane %v3392_v12, 1  ;;  %v3178_v15 = vpop.f32.mrf.mxu0  ;;  %v3286_v58 = vpop.f32.mrf.mxu1  ;;  %vm2879_vm1 = vcmp.ge.f32.partialorder %v2839_v35, 0.0 }
 0x4ba   : > { %v3530_v49 = vrot.slane %v3178_v15, 7 }
 0x4bb   : > { %v3728_v46 = vsel %vm3717_vm10, %v3725_v11, %v3727_v36  ;;  %v2918_v11 = vmul.f32 0.2, %v2838_v59 }
 0x4bc   : > { %v11259_v9 = vadd.f32 %v3728_v46, %v3641_v34  ;;  %v3531_v52 = vsel %vm1903_vm0, %v3528_v2, %v3530_v49  ;;  %3217 = vmatmul.bf16.gmra.mxu0 %v2985_v17  ;;  %3325 = vmatmul.bf16.gmra.mxu1 %v2985_v17  ;;  %v2919_v34 = vmul.f32 0.2, %v2839_v35 }
 0x4bd   : > { %v3643_v30 = vadd.f32 %v3531_v52, %v3286_v58  ;;  %3434 = vmatmul.bf16.gmra.mxu2 %v2985_v17  ;;  %v2958_v18 = vsel %vm2878_vm15, %v2838_v59, %v2918_v11  ;;  %v13309_v58 = vld [vmem:[#allocation88_spill] sm:$0xff]  ;;  %v2283_v11 = vmul.f32 %v11136_v6, %v11020_v40 }
 0x4be   : > { %v2959_v33 = vsel %vm2879_vm1, %v2839_v35, %v2919_v34 }
 0x4c0   : > { %v3395_v55 = vpop.f32.mrf.mxu2 }
 0x4c1   : > { %v3729_v60 = vrot.slane %v3395_v55, 1  ;;  %v3180_v16 = vpop.f32.mrf.mxu0  ;;  %v3288_v26 = vpop.f32.mrf.mxu1 }
 0x4c2   : > { %v3532_v61 = vrot.slane %v3180_v16, 7 }
 0x4c3   : > { %v3730_v4 = vsel %vm3717_vm10, %v3727_v36, %v3729_v60  ;;  %v13308_v36 = vld [vmem:[#allocation15_spill] sm:$0xff] }
 0x4c4   : > { %v11265_v31 = vadd.f32 %v3730_v4, %v3642_v45  ;;  %v3533_v37 = vsel %vm1903_vm0, %v3530_v49, %v3532_v61  ;;  %v2986_v45 = vpack.c.bf16 %v2959_v33, %v2958_v18  ;;  %v2560_v15 = vmul.f32 %v13308_v36, %v2280_v1 }
 0x4c5   : > { %v3644_v2 = vadd.f32 %v3533_v37, %v3288_v26  ;;  %v2561_v49 = vmul.f32 %v13309_v58, %v2281_v48  ;;  %v2282_v4 = vmul.f32 %v11136_v6, %v11014_v13 }
 0x4c6   : > { %v2840_v28 = vadd.f32 %v13310_v14, %v2560_v15  ;;  %v13314_v15 = vld [vmem:[#allocation78_spill] sm:$0xff] }
 0x4c7   : > { %v2841_v46 = vadd.f32 %v13311_v42, %v2561_v49  ;;  %v13315_v49 = vld [vmem:[#allocation94_spill] sm:$0xff] }
 0x4c8   : > { %v3397_v5 = vpop.f32.mrf.mxu2  ;;  %vm2880_vm2 = vcmp.ge.f32.partialorder %v2840_v28, 0.0 }
 0x4c9   : > { %v3731_v51 = vrot.slane %v3397_v5, 1  ;;  %v3183_v38 = vpop.f32.mrf.mxu0  ;;  %v3291_v19 = vpop.f32.mrf.mxu1  ;;  %vm2881_vm3 = vcmp.ge.f32.partialorder %v2841_v46, 0.0 }
 0x4ca   : > { %v3534_v12 = vrot.slane %v3183_v38, 7 }
 0x4cb   : > { %v3732_v17 = vsel %vm3717_vm10, %v3729_v60, %v3731_v51  ;;  %v2920_v60 = vmul.f32 0.2, %v2840_v28 }
 0x4cc   : > { %v11275_v57 = vadd.f32 %v3732_v17, %v3643_v30  ;;  %v3535_v39 = vsel %vm1903_vm0, %v3532_v61, %v3534_v12  ;;  %3222 = vmatmul.bf16.gmra.mxu0 %v2986_v45  ;;  %3330 = vmatmul.bf16.gmra.mxu1 %v2986_v45  ;;  %v2921_v30 = vmul.f32 0.2, %v2841_v46 }
 0x4cd   : > { %v3645_v62 = vadd.f32 %v3535_v39, %v3291_v19  ;;  %3439 = vmatmul.bf16.gmra.mxu2 %v2986_v45  ;;  %v2960_v34 = vsel %vm2880_vm2, %v2840_v28, %v2920_v60  ;;  %v13313_v19 = vld [vmem:[#allocation77_spill] sm:$0xff]  ;;  %v2285_v60 = vmul.f32 %v11136_v6, %v11032_v21 }
 0x4ce   : > { %v2961_v37 = vsel %vm2881_vm3, %v2841_v46, %v2921_v30 }
 0x4d0   : > { %v3400_v52 = vpop.f32.mrf.mxu2 }
 0x4d1   : > { %v3733_v54 = vrot.slane %v3400_v52, 1  ;;  %v3185_v59 = vpop.f32.mrf.mxu0  ;;  %v3293_v22 = vpop.f32.mrf.mxu1 }
 0x4d2   : > { %v3536_v35 = vrot.slane %v3185_v59, 7 }
 0x4d3   : > { %v3734_v55 = vsel %vm3717_vm10, %v3731_v51, %v3733_v54  ;;  %v13312_v51 = vld [vmem:[#allocation91_spill] sm:$0xff] }
 0x4d4   : > { %v11281_v16 = vadd.f32 %v3734_v55, %v3644_v2  ;;  %v3537_v26 = vsel %vm1903_vm0, %v3534_v12, %v3536_v35  ;;  %v2987_v2 = vpack.c.bf16 %v2961_v37, %v2960_v34  ;;  %v2562_v38 = vmul.f32 %v13312_v51, %v2282_v4 }
 0x4d5   : > { %v3646_v61 = vadd.f32 %v3537_v26, %v3293_v22  ;;  %v2563_v12 = vmul.f32 %v13313_v19, %v2283_v11  ;;  %v2284_v55 = vmul.f32 %v11136_v6, %v11026_v27  ;;  %v13318_v19 = vld [vmem:[#allocation85_spill] sm:$0xff] }
 0x4d6   : > { %v2842_v58 = vadd.f32 %v13314_v15, %v2562_v38 }
 0x4d7   : > { %v2843_v17 = vadd.f32 %v13315_v49, %v2563_v12 }
 0x4d8   : > { %v3402_v1 = vpop.f32.mrf.mxu2  ;;  %vm2882_vm4 = vcmp.ge.f32.partialorder %v2842_v58, 0.0 }
 0x4d9   : > { %v3735_v48 = vrot.slane %v3402_v1, 1  ;;  %v3188_v18 = vpop.f32.mrf.mxu0  ;;  %v3296_v33 = vpop.f32.mrf.mxu1  ;;  %vm2883_vm5 = vcmp.ge.f32.partialorder %v2843_v17, 0.0 }
 0x4da   : > { %v3538_v5 = vrot.slane %v3188_v18, 7 }
 0x4db   : > { %v3736_v45 = vsel %vm3717_vm10, %v3733_v54, %v3735_v48  ;;  %v2922_v54 = vmul.f32 0.2, %v2842_v58 }
 0x4dc   : > { %v11291_v36 = vadd.f32 %v3736_v45, %v3645_v62  ;;  %v3539_v13 = vsel %vm1903_vm0, %v3536_v35, %v3538_v5  ;;  %3227 = vmatmul.bf16.gmra.mxu0 %v2987_v2  ;;  %3335 = vmatmul.bf16.gmra.mxu1 %v2987_v2  ;;  %v2923_v62 = vmul.f32 0.2, %v2843_v17 }
 0x4dd   : > { %v3647_v40 = vadd.f32 %v3539_v13, %v3296_v33  ;;  %3444 = vmatmul.bf16.gmra.mxu2 %v2987_v2  ;;  %v2962_v30 = vsel %vm2882_vm4, %v2842_v58, %v2922_v54  ;;  %v13317_v33 = vld [vmem:[#allocation82_spill] sm:$0xff] }
 0x4de   : > { %v2963_v26 = vsel %vm2883_vm5, %v2843_v17, %v2923_v62 }
 0x4e0   : > { %v3405_v39 = vpop.f32.mrf.mxu2 }
 0x4e1   : > { %v3737_v14 = vrot.slane %v3405_v39, 1  ;;  %v3190_v28 = vpop.f32.mrf.mxu0  ;;  %v3298_v42 = vpop.f32.mrf.mxu1 }
 0x4e2   : > { %v3540_v46 = vrot.slane %v3190_v28, 7 }
 0x4e3   : > { %v3738_v52 = vsel %vm3717_vm10, %v3735_v48, %v3737_v14  ;;  %v13316_v48 = vld [vmem:[#allocation81_spill] sm:$0xff] }
 0x4e4   : > { %v11297_v59 = vadd.f32 %v3738_v52, %v3646_v61  ;;  %v3541_v22 = vsel %vm1903_vm0, %v3538_v5, %v3540_v46  ;;  %v2988_v61 = vpack.c.bf16 %v2963_v26, %v2962_v30  ;;  %v2564_v18 = vmul.f32 %v13316_v48, %v2284_v55  ;;  %v13319_v26 = vld [vmem:[#allocation86_spill] sm:$0xff]  ;;  %v13320_v48 = vld [vmem:[#allocation89_spill] sm:$0xff] }
 0x4e5   : > { %v3648_v35 = vadd.f32 %v3541_v22, %v3298_v42  ;;  %v2565_v5 = vmul.f32 %v13317_v33, %v2285_v60  ;;  %v13321_v33 = vld [vmem:[#allocation90_spill] sm:$0xff] }
 0x4e6   : > { %v2844_v38 = vadd.f32 %v10604_v56, %v2564_v18  ;;  %v2286_v56 = vmul.f32 %v11136_v6, %v11038_v53 }
 0x4e7   : > { %v2845_v12 = vadd.f32 %v13318_v19, %v2565_v5 }
 0x4e8   : > { %v3407_v4 = vpop.f32.mrf.mxu2  ;;  %v2924_v39 = vmul.f32 0.2, %v2844_v38  ;;  %vm2884_vm6 = vcmp.ge.f32.partialorder %v2844_v38, 0.0 }
 0x4e9   : > { %v3739_v11 = vrot.slane %v3407_v4, 1  ;;  %v3193_v34 = vpop.f32.mrf.mxu0  ;;  %v3301_v37 = vpop.f32.mrf.mxu1  ;;  %vm2885_vm7 = vcmp.ge.f32.partialorder %v2845_v12, 0.0  ;;  %v2566_v4 = vmul.f32 %v13319_v26, %v2286_v56  ;;  %v8475_v56 = vld [vmem:[%s12896_s3 + $0x16c] sm:$0xf] }
 0x4ea   : > { %v3542_v1 = vrot.slane %v3193_v34, 7  ;;  %v2964_v52 = vsel %vm2884_vm6, %v2844_v38, %v2924_v39 }
 0x4eb   : > { %v3740_v2 = vsel %vm3717_vm10, %v3737_v14, %v3739_v11  ;;  %v2846_v18 = vadd.f32 %v13320_v48, %v2566_v4  ;;  %v13322_v4 = vld [vmem:[#allocation92_spill] sm:$0xff] }
 0x4ec   : > { %v11307_v51 = vadd.f32 %v3740_v2, %v3647_v40  ;;  %v3543_v27 = vsel %vm1903_vm0, %v3540_v46, %v3542_v1  ;;  %3232 = vmatmul.bf16.gmra.mxu0 %v2988_v61  ;;  %3340 = vmatmul.bf16.gmra.mxu1 %v2988_v61  ;;  %v2925_v40 = vmul.f32 0.2, %v2845_v12  ;;  %v2287_v46 = vmul.f32 %v11136_v6, %v11044_v24 }
 0x4ed   : > { %v3649_v21 = vadd.f32 %v3543_v27, %v3301_v37  ;;  %3449 = vmatmul.bf16.gmra.mxu2 %v2988_v61  ;;  %v8476_v61 = vld [vmem:[%s12896_s3 + $0x170] sm:$0xf0]  ;;  %v8477_v27 = vld [vmem:[%s12896_s3 + $0x178] sm:$0xf0]  ;;  %vm2886_vm8 = vcmp.ge.f32.partialorder %v2846_v18, 0.0 }
 0x4ee   : > { %v2965_v54 = vsel %vm2885_vm7, %v2845_v12, %v2925_v40 }
 0x4f0   : > { %v3410_v45 = vpop.f32.mrf.mxu2 }
 0x4f1   : > { %v3741_v13 = vrot.slane %v3410_v45, 1  ;;  %v3195_v15 = vpop.f32.mrf.mxu0  ;;  %v3303_v58 = vpop.f32.mrf.mxu1 }
 0x4f2   : > { %v3544_v49 = vrot.slane %v3195_v15, 7 }
 0x4f3   : > { %v3742_v17 = vsel %vm3717_vm10, %v3739_v11, %v3741_v13  ;;  %v2567_v11 = vmul.f32 %v10646_v63, %v2287_v46  ;;  %v8154_v63 = vld [vmem:[%s12896_s3 + $0x170] sm:$0xf]  ;;  %v8148_v46 = vld [vmem:[%s12896_s3 + $0x174] sm:$0xf0] }
 0x4f4   : > { %v11313_v14 = vadd.f32 %v3742_v17, %v3648_v35  ;;  %v3545_v28 = vsel %vm1903_vm0, %v3542_v1, %v3544_v49  ;;  %v2989_v35 = vpack.c.bf16 %v2965_v54, %v2964_v52  ;;  %v8146_v1 = vld [vmem:[%s12896_s3 + $0x168] sm:$0xf]  ;;  %v8155_v38 = vor.u32 %v8477_v27, %v8154_v63 }
 0x4f5   : > { %v3650_v42 = vadd.f32 %v3545_v28, %v3303_v58  ;;  %v2847_v5 = vadd.f32 %v13321_v33, %v2567_v11  ;;  %v8147_v2 = vor.u32 %v8476_v61, %v8146_v1  ;;  %v2926_v58 = vmul.f32 0.2, %v2846_v18  ;;  %v13323_v61 = vld [vmem:[#allocation93_spill] sm:$0xff] }
 0x4f6   : > { %5181 = vmatpush.bf16.msra.mxu1 %v8155_v38  ;;  %v2288_v28 = vmul.f32 %v11136_v6, %v10813_v7  ;;  %v2290_v38 = vmul.f32 %v11136_v6, %v10821_v32 }
 0x4f7   : > { %4964 = vmatpush.bf16.msrb.mxu3 %v8147_v2  ;;  %vm2887_vm9 = vcmp.ge.f32.partialorder %v2847_v5, 0.0  ;;  %v2966_v52 = vsel %vm2886_vm8, %v2846_v18, %v2926_v58 }
 0x4f8   : > { %v3412_v62 = vpop.f32.mrf.mxu2  ;;  %v2568_v26 = vmul.f32 %v10693_v20, %v2288_v28 }
 0x4f9   : > { %v3743_v22 = vrot.slane %v3412_v62, 1  ;;  %v3198_v55 = vpop.f32.mrf.mxu0  ;;  %v3306_v60 = vpop.f32.mrf.mxu1  ;;  %v8151_v62 = vor.u32 %v8475_v56, %v8148_v46 }
 0x4fa   : > { %v3546_v30 = vrot.slane %v3198_v55, 7  ;;  %v2848_v63 = vadd.f32 %v13323_v61, %v2568_v26  ;;  %v8142_v61 = vld [vmem:[%s12896_s3 + $0x158] sm:$0xf] }
 0x4fb   : > { %v3744_v34 = vsel %vm3717_vm10, %v3741_v13, %v3743_v22  ;;  %5072 = vmatpush.bf16.msrb.mxu0 %v8151_v62 }
 0x4fc   : > { %v11323_v37 = vadd.f32 %v3744_v34, %v3649_v21  ;;  %v3547_v53 = vsel %vm1903_vm0, %v3544_v49, %v3546_v30  ;;  %3237 = vmatmul.bf16.gmra.mxu0 %v2989_v35  ;;  %3345 = vmatmul.bf16.gmra.mxu1 %v2989_v35  ;;  %v2927_v49 = vmul.f32 0.2, %v2847_v5  ;;  %v2928_v27 = vmul.f32 0.2, %v2848_v63 }
 0x4fd   : > { %v3651_v24 = vadd.f32 %v3547_v53, %v3306_v60  ;;  %3454 = vmatmul.bf16.gmra.mxu2 %v2989_v35  ;;  %vm2888_vm11 = vcmp.ge.f32.partialorder %v2848_v63, 0.0 }
 0x4fe   : > { %v2967_v54 = vsel %vm2887_vm9, %v2847_v5, %v2927_v49 }
 0x4ff   : > { %v2990_v35 = vpack.c.bf16 %v2967_v54, %v2966_v52  ;;  %v13324_v54 = vld [vmem:[#allocation83_spill] sm:$0xff] }
 0x500   : > { %v3415_v21 = vpop.f32.mrf.mxu2 }
 0x501   : > { %v3745_v19 = vrot.slane %v3415_v21, 1  ;;  %v3200_v12 = vpop.f32.mrf.mxu0  ;;  %v3308_v45 = vpop.f32.mrf.mxu1 }
 0x502   : > { %v3548_v13 = vrot.slane %v3200_v12, 7  ;;  %v2968_v12 = vsel %vm2888_vm11, %v2848_v63, %v2928_v27  ;;  %v2293_v63 = vmul.f32 %v11136_v6, %v11058_v3  ;;  %v13327_v3 = vld [vmem:[#allocation73_spill] sm:$0xff] }
 0x503   : > { %v3746_v15 = vsel %vm3717_vm10, %v3743_v22, %v3745_v19 }
 0x504   : > { %v11341_v17 = vadd.f32 %v3746_v15, %v3650_v42  ;;  %v3549_v39 = vsel %vm1903_vm0, %v3546_v30, %v3548_v13  ;;  %v2289_v42 = vmul.f32 %v11136_v6, %v10817_v8 }
 0x505   : > { %v3652_v40 = vadd.f32 %v3549_v39, %v3308_v45 }
 0x506   : > { %v2569_v11 = vmul.f32 %v13322_v4, %v2289_v42 }
 0x508   : > { %v3417_v22 = vpop.f32.mrf.mxu2  ;;  %v2849_v48 = vadd.f32 %v10738_v41, %v2569_v11 }
 0x509   : > { %v3747_v55 = vrot.slane %v3417_v22, 1  ;;  %v3203_v60 = vpop.f32.mrf.mxu0  ;;  %v3311_v30 = vpop.f32.mrf.mxu1  ;;  %v13325_v22 = vld [vmem:[#allocation70_spill] sm:$0xff] }
 0x50a   : > { %v3550_v7 = vrot.slane %v3203_v60, 7  ;;  %v2929_v21 = vmul.f32 0.2, %v2849_v48  ;;  %vm2889_vm12 = vcmp.ge.f32.partialorder %v2849_v48, 0.0 }
 0x50b   : > { %v3748_v34 = vsel %vm3717_vm10, %v3745_v19, %v3747_v55  ;;  %v2291_v19 = vmul.f32 %v11136_v6, %v10825_v47 }
 0x50c   : > { %v11357_v53 = vadd.f32 %v3748_v34, %v3651_v24  ;;  %v3551_v8 = vsel %vm1903_vm0, %v3548_v13, %v3550_v7  ;;  %3242 = vmatmul.bf16.gmra.mxu0 %v2990_v35  ;;  %3350 = vmatmul.bf16.gmra.mxu1 %v2990_v35  ;;  %v2969_v41 = vsel %vm2889_vm12, %v2849_v48, %v2929_v21 }
 0x50d   : > { %v3653_v1 = vadd.f32 %v3551_v8, %v3311_v30  ;;  %3459 = vmatmul.bf16.gmra.mxu2 %v2990_v35  ;;  %v2991_v28 = vpack.c.bf16 %v2969_v41, %v2968_v12  ;;  %v2571_v56 = vmul.f32 %v10572_v50, %v2291_v19  ;;  %v8134_v8 = vld [vmem:[%s12896_s3 + $0x150] sm:$0xf]  ;;  %v13326_v41 = vld [vmem:[#allocation95_spill] sm:$0xff] }
 0x510   : > { %v3420_v18 = vpop.f32.mrf.mxu2 }
 0x511   : > { %v3749_v33 = vrot.slane %v3420_v18, 1  ;;  %v3205_v5 = vpop.f32.mrf.mxu0  ;;  %v3313_v20 = vpop.f32.mrf.mxu1 }
 0x512   : > { %v3552_v49 = vrot.slane %v3205_v5, 7 }
 0x513   : > { %v3750_v2 = vsel %vm3717_vm10, %v3747_v55, %v3749_v33  ;;  %v2851_v55 = vadd.f32 %v13325_v22, %v2571_v56  ;;  %v13328_v56 = vld [vmem:[#allocation97_spill] sm:$0xff] }
 0x514   : > { %v11363_v24 = vadd.f32 %v3750_v2, %v3652_v40  ;;  %v2570_v40 = vmul.f32 %v10565_v25, %v2290_v38  ;;  %v3553_v52 = vsel %vm1903_vm0, %v3550_v7, %v3552_v49  ;;  %v2292_v7 = vmul.f32 %v11136_v6, %v10828_v10  ;;  %v8474_v10 = vld [vmem:[%s12896_s3 + $0x160] sm:$0xf0] }
 0x515   : > { %v3654_v35 = vadd.f32 %v3553_v52, %v3313_v20  ;;  %v2931_v11 = vmul.f32 0.2, %v2851_v55  ;;  %vm2891_vm14 = vcmp.ge.f32.partialorder %v2851_v55, 0.0  ;;  %v8143_v20 = vor.u32 %v8474_v10, %v8142_v61 }
 0x516   : > { %v2850_v62 = vadd.f32 %v13324_v54, %v2570_v40  ;;  %v2573_v6 = vmul.f32 %v13327_v3, %v2293_v63  ;;  %v8136_v40 = vld [vmem:[%s12896_s3 + $0x15c] sm:$0xf0] }
 0x517   : > { %v2971_v18 = vsel %vm2891_vm14, %v2851_v55, %v2931_v11  ;;  %5182 = vmatpush.bf16.msra.mxu1 %v8143_v20 }
 0x518   : > { %v3422_v45 = vpop.f32.mrf.mxu2  ;;  %v2930_v4 = vmul.f32 0.2, %v2850_v62  ;;  %vm2890_vm13 = vcmp.ge.f32.partialorder %v2850_v62, 0.0 }
 0x519   : > { %v3751_v13 = vrot.slane %v3422_v45, 1  ;;  %v3208_v15 = vpop.f32.mrf.mxu0  ;;  %v3316_v58 = vpop.f32.mrf.mxu1  ;;  %v2572_v45 = vmul.f32 %v13326_v41, %v2292_v7 }
 0x51a   : > { %v3554_v39 = vrot.slane %v3208_v15, 7  ;;  %v2970_v48 = vsel %vm2890_vm13, %v2850_v62, %v2930_v4 }
 0x51b   : > { %v3752_v46 = vsel %vm3717_vm10, %v3749_v33, %v3751_v13  ;;  %v2992_v12 = vpack.c.bf16 %v2971_v18, %v2970_v48 }
 0x51c   : > { %v11372_v42 = vadd.f32 %v3752_v46, %v3653_v1  ;;  %v3555_v32 = vsel %vm1903_vm0, %v3552_v49, %v3554_v39  ;;  %3247 = vmatmul.bf16.gmra.mxu0 %v2991_v28  ;;  %3355 = vmatmul.bf16.gmra.mxu1 %v2991_v28  ;;  %v8473_v1 = vld [vmem:[%s12896_s3 + $0x158] sm:$0xf0]  ;;  %v2853_v46 = vadd.f32 %v13328_v56, %v2573_v6 }
 0x51d   : > { %v3655_v47 = vadd.f32 %v3555_v32, %v3316_v58  ;;  %3464 = vmatmul.bf16.gmra.mxu2 %v2991_v28  ;;  %v8135_v33 = vor.u32 %v8473_v1, %v8134_v8  ;;  %v8472_v28 = vld [vmem:[%s12896_s3 + $0x154] sm:$0xf] }
 0x51e   : > { %v8139_v54 = vor.u32 %v8472_v28, %v8136_v40  ;;  %vm2893_vm1 = vcmp.ge.f32.partialorder %v2853_v46, 0.0 }
 0x51f   : > { %4965 = vmatpush.bf16.msrb.mxu3 %v8135_v33 }
 0x520   : > { %v3425_v60 = vpop.f32.mrf.mxu2  ;;  %5073 = vmatpush.bf16.msrb.mxu0 %v8139_v54 }
 0x521   : > { %v3753_v25 = vrot.slane %v3425_v60, 1  ;;  %v3210_v30 = vpop.f32.mrf.mxu0  ;;  %v3318_v50 = vpop.f32.mrf.mxu1 }
 0x522   : > { %v3556_v38 = vrot.slane %v3210_v30, 7  ;;  %v2933_v30 = vmul.f32 0.2, %v2853_v46 }
 0x523   : > { %v3754_v26 = vsel %vm3717_vm10, %v3751_v13, %v3753_v25 }
 0x524   : > { %v11379_v34 = vadd.f32 %v3754_v26, %v3654_v35  ;;  %v3557_v32 = vsel %vm1903_vm0, %v3554_v39, %v3556_v38  ;;  %v2973_v7 = vsel %vm2893_vm1, %v2853_v46, %v2933_v30 }
 0x528   : > { %v3427_v5 = vpop.f32.mrf.mxu2 }
 0x529   : > { %v3755_v2 = vrot.slane %v3427_v5, 1  ;;  %v3213_v27 = vpop.f32.mrf.mxu0  ;;  %v3321_v21 = vpop.f32.mrf.mxu1 }
 0x52a   : > { %v3558_v19 = vrot.slane %v3213_v27, 7 }
 0x52b   : > { %v3756_v13 = vsel %vm3717_vm10, %v3753_v25, %v3755_v2  ;;  %v3656_v25 = vadd.f32 %v3557_v32, %v3318_v50  ;;  %v8122_v32 = vld [vmem:[%s12896_s3 + $0x138] sm:$0xf] }
 0x52c   : > { %v11400_v15 = vadd.f32 %v3756_v13, %v3655_v47  ;;  %v3559_v58 = vsel %vm1903_vm0, %v3556_v38, %v3558_v19  ;;  %3252 = vmatmul.bf16.gmra.mxu0 %v2992_v12  ;;  %3360 = vmatmul.bf16.gmra.mxu1 %v2992_v12  ;;  %v13329_v47 = vld [vmem:[#allocation96_spill] sm:$0xff] }
 0x52d   : > { %v3657_v49 = vadd.f32 %v3559_v58, %v3321_v21  ;;  %3469 = vmatmul.bf16.gmra.mxu2 %v2992_v12  ;;  %v2852_v52 = vadd.f32 %v13329_v47, %v2572_v45  ;;  %v8470_v47 = vld [vmem:[%s12896_s3 + $0x140] sm:$0xf0] }
 0x52f   : > { %v2932_v26 = vmul.f32 0.2, %v2852_v52  ;;  %vm2892_vm15 = vcmp.ge.f32.partialorder %v2852_v52, 0.0 }
 0x530   : > { %v3430_v62 = vpop.f32.mrf.mxu2 }
 0x531   : > { %v3757_v22 = vrot.slane %v3430_v62, 1  ;;  %v3215_v55 = vpop.f32.mrf.mxu0  ;;  %v3323_v60 = vpop.f32.mrf.mxu1  ;;  %v2972_v11 = vsel %vm2892_vm15, %v2852_v52, %v2932_v26  ;;  %v8130_v52 = vld [vmem:[%s12896_s3 + $0x140] sm:$0xf]  ;;  %v8123_v62 = vor.u32 %v8470_v47, %v8122_v32 }
 0x532   : > { %v3560_v63 = vrot.slane %v3215_v55, 7  ;;  %v2993_v18 = vpack.c.bf16 %v2973_v7, %v2972_v11 }
 0x533   : > { %v3758_v35 = vsel %vm3717_vm10, %v3755_v2, %v3757_v22  ;;  %4966 = vmatpush.bf16.msrb.mxu3 %v8123_v62 }
 0x534   : > { %v11413_v4 = vadd.f32 %v3758_v35, %v3656_v25  ;;  %v3561_v20 = vsel %vm1903_vm0, %v3558_v19, %v3560_v63 }
 0x535   : > { %v3658_v12 = vadd.f32 %v3561_v20, %v3323_v60 }
 0x536   : > { %13330 = vst [vmem:[#allocation10_spill] sm:$0xff] %v11413_v4 }
 0x538   : > { %v3432_v39 = vpop.f32.mrf.mxu2 }
 0x539   : > { %v3759_v8 = vrot.slane %v3432_v39, 1  ;;  %v3218_v1 = vpop.f32.mrf.mxu0  ;;  %v3326_v61 = vpop.f32.mrf.mxu1  ;;  %v8469_v39 = vld [vmem:[%s12896_s3 + $0x13c] sm:$0xf] }
 0x53a   : > { %v3562_v48 = vrot.slane %v3218_v1, 7 }
 0x53b   : > { %v3760_v33 = vsel %vm3717_vm10, %v3757_v22, %v3759_v8  ;;  %v8471_v22 = vld [vmem:[%s12896_s3 + $0x148] sm:$0xf0] }
 0x53c   : > { %v11416_v50 = vadd.f32 %v3760_v33, %v3657_v49  ;;  %v3563_v10 = vsel %vm1903_vm0, %v3560_v63, %v3562_v48  ;;  %3257 = vmatmul.bf16.gmra.mxu0 %v2993_v18  ;;  %3365 = vmatmul.bf16.gmra.mxu1 %v2993_v18  ;;  %v8131_v60 = vor.u32 %v8471_v22, %v8130_v52 }
 0x53d   : > { %v3659_v5 = vadd.f32 %v3563_v10, %v3326_v61  ;;  %3474 = vmatmul.bf16.gmra.mxu2 %v2993_v18 }
 0x53e   : > { %5183 = vmatpush.bf16.msra.mxu1 %v8131_v60 }
 0x540   : > { %v3435_v2 = vpop.f32.mrf.mxu2 }
 0x541   : > { %v3761_v27 = vrot.slane %v3435_v2, 1  ;;  %v3220_v21 = vpop.f32.mrf.mxu0  ;;  %v3328_v38 = vpop.f32.mrf.mxu1 }
 0x542   : > { %v3564_v49 = vrot.slane %v3220_v21, 7 }
 0x543   : > { %v3762_v41 = vsel %vm3717_vm10, %v3759_v8, %v3761_v27  ;;  %v8124_v8 = vld [vmem:[%s12896_s3 + $0x144] sm:$0xf0] }
 0x544   : > { %v11421_v45 = vadd.f32 %v3762_v41, %v3658_v12  ;;  %v3565_v54 = vsel %vm1903_vm0, %v3562_v48, %v3564_v49  ;;  %v8127_v1 = vor.u32 %v8469_v39, %v8124_v8  ;;  %v8110_v39 = vld [vmem:[%s12896_s3 + $0x120] sm:$0xf]  ;;  %v8467_v8 = vld [vmem:[%s12896_s3 + $0x128] sm:$0xf0] }
 0x545   : > { %v3660_v26 = vadd.f32 %v3565_v54, %v3328_v38 }
 0x546   : > { %13331 = vst [vmem:[#allocation27_spill] sm:$0xff] %v11421_v45  ;;  %5074 = vmatpush.bf16.msrb.mxu0 %v8127_v1  ;;  %v8118_v1 = vld [vmem:[%s12896_s3 + $0x128] sm:$0xf] }
 0x548   : > { %v3437_v3 = vpop.f32.mrf.mxu2 }
 0x549   : > { %v3763_v6 = vrot.slane %v3437_v3, 1  ;;  %v3223_v13 = vpop.f32.mrf.mxu0  ;;  %v3331_v58 = vpop.f32.mrf.mxu1 }
 0x54a   : > { %v3566_v28 = vrot.slane %v3223_v13, 7 }
 0x54b   : > { %v3764_v40 = vsel %vm3717_vm10, %v3761_v27, %v3763_v6 }
 0x54c   : > { %v11424_v56 = vadd.f32 %v3764_v40, %v3659_v5  ;;  %v3567_v19 = vsel %vm1903_vm0, %v3564_v49, %v3566_v28 }
 0x54d   : > { %v3661_v46 = vadd.f32 %v3567_v19, %v3331_v58 }
 0x54e   : > { %13332 = vst [vmem:[#allocation30_spill] sm:$0xff] %v11424_v56 }
 0x550   : > { %v3440_v55 = vpop.f32.mrf.mxu2 }
 0x551   : > { %v3765_v25 = vrot.slane %v3440_v55, 1  ;;  %v3225_v30 = vpop.f32.mrf.mxu0  ;;  %v3333_v35 = vpop.f32.mrf.mxu1 }
 0x552   : > { %v3568_v33 = vrot.slane %v3225_v30, 7 }
 0x553   : > { %v3766_v11 = vsel %vm3717_vm10, %v3763_v6, %v3765_v25 }
 0x554   : > { %v11441_v7 = vadd.f32 %v3766_v11, %v3660_v26  ;;  %v3569_v21 = vsel %vm1903_vm0, %v3566_v28, %v3568_v33 }
 0x555   : > { %v3662_v6 = vadd.f32 %v3569_v21, %v3333_v35  ;;  %v8466_v21 = vld [vmem:[%s12896_s3 + $0x124] sm:$0xf] }
 0x556   : > { %13333 = vst [vmem:[#allocation34_spill] sm:$0xff] %v11441_v7 }
 0x558   : > { %v3442_v61 = vpop.f32.mrf.mxu2 }
 0x559   : > { %v3767_v63 = vrot.slane %v3442_v61, 1  ;;  %v3228_v48 = vpop.f32.mrf.mxu0  ;;  %v3336_v18 = vpop.f32.mrf.mxu1  ;;  %v8111_v61 = vor.u32 %v8467_v8, %v8110_v39 }
 0x55a   : > { %v3570_v10 = vrot.slane %v3228_v48, 7 }
 0x55b   : > { %v3768_v5 = vsel %vm3717_vm10, %v3765_v25, %v3767_v63  ;;  %4967 = vmatpush.bf16.msrb.mxu3 %v8111_v61 }
 0x55c   : > { %v11450_v20 = vadd.f32 %v3768_v5, %v3661_v46  ;;  %v3571_v2 = vsel %vm1903_vm0, %v3568_v33, %v3570_v10 }
 0x55d   : > { %v3663_v27 = vadd.f32 %v3571_v2, %v3336_v18 }
 0x560   : > { %v3445_v38 = vpop.f32.mrf.mxu2 }
 0x561   : > { %v3769_v12 = vrot.slane %v3445_v38, 1  ;;  %v3230_v41 = vpop.f32.mrf.mxu0  ;;  %v3338_v3 = vpop.f32.mrf.mxu1  ;;  %v8112_v38 = vld [vmem:[%s12896_s3 + $0x12c] sm:$0xf0] }
 0x562   : > { %v3572_v32 = vrot.slane %v3230_v41, 7 }
 0x563   : > { %v3770_v13 = vsel %vm3717_vm10, %v3767_v63, %v3769_v12  ;;  %v8468_v63 = vld [vmem:[%s12896_s3 + $0x130] sm:$0xf0] }
 0x564   : > { %v11455_v58 = vadd.f32 %v3770_v13, %v3662_v6  ;;  %v3573_v22 = vsel %vm1903_vm0, %v3570_v10, %v3572_v32  ;;  %v8119_v18 = vor.u32 %v8468_v63, %v8118_v1  ;;  %v3876_v13 = vadd.f32 %v11233_v23, %v11227_v29 }
 0x565   : > { %v3664_v35 = vadd.f32 %v3573_v22, %v3338_v3 }
 0x566   : > { %13334 = vst [vmem:[#allocation37_spill] sm:$0xff] %v11455_v58  ;;  %5184 = vmatpush.bf16.msra.mxu1 %v8119_v18 }
 0x568   : > { %v3447_v49 = vpop.f32.mrf.mxu2 }
 0x569   : > { %v3771_v40 = vrot.slane %v3447_v49, 1  ;;  %v11457_v19 = vpop.f32.mrf.mxu0  ;;  %v3341_v46 = vpop.f32.mrf.mxu1  ;;  %v3877_v49 = vadd.f32 %v3876_v13, %v11243_v0  ;;  %v8098_v13 = vld [vmem:[%s12896_s3 + $0x108] sm:$0xf] }
 0x56a   : > { %v12971_v47 = vrot.slane %v11457_v19, 7 }
 0x56b   : > { %v3772_v52 = vsel %vm3717_vm10, %v3769_v12, %v3771_v40  ;;  %v8115_v12 = vor.u32 %v8466_v21, %v8112_v38 }
 0x56c   : > { %v11461_v28 = vadd.f32 %v3772_v52, %v3663_v27  ;;  %v3575_v54 = vsel %vm1903_vm0, %v3572_v32, %v12971_v47 }
 0x56d   : > { %v3665_v62 = vadd.f32 %v3575_v54, %v3341_v46  ;;  %5075 = vmatpush.bf16.msrb.mxu0 %v8115_v12 }
 0x570   : > { %v3450_v55 = vpop.f32.mrf.mxu2 }
 0x571   : > { %v3773_v60 = vrot.slane %v3450_v55, 1  ;;  %v11467_v25 = vpop.f32.mrf.mxu0  ;;  %v11469_v30 = vpop.f32.mrf.mxu1 }
 0x573   : > { %v3774_v26 = vsel %vm3717_vm10, %v3771_v40, %v3773_v60  ;;  %v3878_v40 = vadd.f32 %v3877_v49, %v11249_v43  ;;  %v8464_v49 = vld [vmem:[%s12896_s3 + $0x110] sm:$0xf0] }
 0x574   : > { %v11472_v11 = vadd.f32 %v3774_v26, %v3664_v35 }
 0x575   : > { %v3879_v54 = vadd.f32 %v3878_v40, %v11259_v9  ;;  %v8106_v40 = vld [vmem:[%s12896_s3 + $0x110] sm:$0xf] }
 0x578   : > { %v11486_v48 = vpop.f32.mrf.mxu2 }
 0x579   : > { %v12970_v33 = vrot.slane %v11486_v48, 1  ;;  %v11489_v10 = vpop.f32.mrf.mxu0  ;;  %v11491_v5 = vpop.f32.mrf.mxu1 }
 0x57b   : > { %v3776_v2 = vsel %vm3717_vm10, %v3773_v60, %v12970_v33  ;;  %v3576_v33 = vrot.slane %v11467_v25, 7 }
 0x57c   : > { %v11496_v27 = vadd.f32 %v3776_v2, %v3665_v62  ;;  %v3880_v62 = vadd.f32 %v3879_v54, %v11265_v31  ;;  %v8099_v54 = vor.u32 %v8464_v49, %v8098_v13  ;;  %v8463_v13 = vld [vmem:[%s12896_s3 + $0x10c] sm:$0xf] }
 0x57e   : > { %v3881_v22 = vadd.f32 %v3880_v62, %v11275_v57  ;;  %v8465_v62 = vld [vmem:[%s12896_s3 + $0x118] sm:$0xf0]  ;;  %4968 = vmatpush.bf16.msrb.mxu3 %v8099_v54 }
 0x580   : > { %v11504_v41 = vpop.f32.mrf.mxu2  ;;  %v3882_v55 = vadd.f32 %v3881_v22, %v11281_v16 }
 0x581   : > { %v11506_v3 = vpop.f32.mrf.mxu0  ;;  %v11508_v6 = vpop.f32.mrf.mxu1 }
 0x582   : > { %v3883_v39 = vadd.f32 %v3882_v55, %v11291_v36 }
 0x584   : > { %v3884_v8 = vadd.f32 %v3883_v39, %v11297_v59  ;;  %v8107_v39 = vor.u32 %v8465_v62, %v8106_v40 }
 0x586   : > { %v3885_v1 = vadd.f32 %v3884_v8, %v11307_v51  ;;  %5185 = vmatpush.bf16.msra.mxu1 %v8107_v39 }
 0x588   : > { %v11514_v46 = vpop.f32.mrf.mxu2  ;;  %v3886_v61 = vadd.f32 %v3885_v1, %v11313_v14 }
 0x589   : > { %v11516_v32 = vpop.f32.mrf.mxu0  ;;  %v11518_v52 = vpop.f32.mrf.mxu1  ;;  %v3779_v25 = vrot.slane %v11514_v46, 1 }
 0x58a   : > { %v3887_v21 = vadd.f32 %v3886_v61, %v11323_v37 }
 0x58c   : > { %v3888_v38 = vadd.f32 %v3887_v21, %v11341_v17 }
 0x58e   : > { %v3889_v12 = vadd.f32 %v3888_v38, %v11357_v53 }
 0x590   : > { %v11524_v60 = vpop.f32.mrf.mxu2  ;;  %v3890_v22 = vadd.f32 %v3889_v12, %v11363_v24  ;;  %v8100_v12 = vld [vmem:[%s12896_s3 + $0x114] sm:$0xf0] }
 0x591   : > { %v11526_v35 = vpop.f32.mrf.mxu0  ;;  %v11528_v26 = vpop.f32.mrf.mxu1  ;;  %v8103_v49 = vor.u32 %v8463_v13, %v8100_v12  ;;  %v3777_v12 = vrot.slane %v11504_v41, 1 }
 0x592   : > { %v3891_v61 = vadd.f32 %v3890_v22, %v11372_v42 }
 0x593   : > { %5076 = vmatpush.bf16.msrb.mxu0 %v8103_v49  ;;  %v3780_v46 = vsel %vm3717_vm10, %v3777_v12, %v3779_v25 }
 0x594   : > { %v3892_v21 = vadd.f32 %v3891_v61, %v11379_v34 }
 0x596   : > { %v3893_v38 = vadd.f32 %v3892_v21, %v11400_v15 }
 0x598   : > { %v11534_v63 = vpop.f32.mrf.mxu2  ;;  %v3894_v40 = vadd.f32 %v3893_v38, %v11413_v4  ;;  %v3578_v38 = vrot.slane %v11489_v10, 7  ;;  %v13336_v10 = vrot.slane %v11486_v48, 1 }
 0x599   : > { %v11536_v18 = vpop.f32.mrf.mxu0  ;;  %v11538_v2 = vpop.f32.mrf.mxu1 }
 0x59a   : > { %v3895_v22 = vadd.f32 %v3894_v40, %v11416_v50  ;;  %v13335_v40 = vrot.slane %v11457_v19, 7  ;;  %v3778_v41 = vsel %vm3717_vm10, %v13336_v10, %v3777_v12 }
 0x59c   : > { %v3896_v61 = vadd.f32 %v3895_v22, %v11421_v45  ;;  %v3577_v22 = vsel %vm1903_vm0, %v13335_v40, %v3576_v33  ;;  %v3582_v45 = vrot.slane %v11516_v32, 7 }
 0x59d   : > { %v3666_v40 = vadd.f32 %v3577_v22, %v11469_v30  ;;  %v3586_v30 = vrot.slane %v11536_v18, 7 }
 0x59e   : > { %v3897_v21 = vadd.f32 %v3896_v61, %v11424_v56  ;;  %v3580_v61 = vrot.slane %v11506_v3, 7  ;;  %v3579_v56 = vsel %vm1903_vm0, %v3576_v33, %v3578_v38  ;;  %v3783_v33 = vrot.slane %v11534_v63, 1 }
 0x59f   : > { %v3667_v10 = vadd.f32 %v3579_v56, %v11491_v5 }
 0x5a0   : > { %v11556_v55 = vpop.f32.mrf.mxu2  ;;  %v3898_v47 = vadd.f32 %v3897_v21, %v11441_v7  ;;  %v3581_v3 = vsel %vm1903_vm0, %v3578_v38, %v3580_v61 }
 0x5a1   : > { %v11558_v8 = vpop.f32.mrf.mxu0  ;;  %v11560_v1 = vpop.f32.mrf.mxu1  ;;  %v3785_v38 = vrot.slane %v11556_v55, 1  ;;  %v3668_v63 = vadd.f32 %v3581_v3, %v11508_v6  ;;  %v11618_v22 = vadd.f32 %v3780_v46, %v3667_v10 }
 0x5a2   : > { %v3899_v49 = vadd.f32 %v3898_v47, %v11450_v20  ;;  %v3781_v47 = vrot.slane %v11524_v60, 1  ;;  %v3583_v60 = vsel %vm1903_vm0, %v3580_v61, %v3582_v45 }
 0x5a3   : > { %v3669_v18 = vadd.f32 %v3583_v60, %v11518_v52  ;;  %v3786_v6 = vsel %vm3717_vm10, %v3783_v33, %v3785_v38 }
 0x5a4   : > { %v3900_v21 = vadd.f32 %v3899_v49, %v11455_v58  ;;  %v3584_v49 = vrot.slane %v11526_v35, 7  ;;  %v11610_v58 = vadd.f32 %v3778_v41, %v3666_v40  ;;  %v3784_v5 = vsel %vm3717_vm10, %v3781_v47, %v3783_v33 }
 0x5a5   : > { %v3588_v41 = vrot.slane %v11558_v8, 7  ;;  %v11634_v3 = vadd.f32 %v3784_v5, %v3669_v18 }
 0x5a6   : > { %v3901_v19 = vadd.f32 %v3900_v21, %v11461_v28  ;;  %v3782_v21 = vsel %vm3717_vm10, %v3779_v25, %v3781_v47  ;;  %v3585_v56 = vsel %vm1903_vm0, %v3582_v45, %v3584_v49 }
 0x5a7   : > { %v11626_v55 = vadd.f32 %v3782_v21, %v3668_v63  ;;  %v3670_v8 = vadd.f32 %v3585_v56, %v11528_v26  ;;  %v3589_v46 = vsel %vm1903_vm0, %v3586_v30, %v3588_v41 }
 0x5a8   : > { %v11572_v62 = vpop.f32.mrf.mxu2  ;;  %v3902_v48 = vadd.f32 %v3901_v19, %v11472_v11  ;;  %v3587_v19 = vsel %vm1903_vm0, %v3584_v49, %v3586_v30 }
 0x5a9   : > { %v11574_v54 = vpop.f32.mrf.mxu0  ;;  %v11577_v39 = vpop.f32.mrf.mxu1  ;;  %v3787_v61 = vrot.slane %v11572_v62, 1  ;;  %v11641_v10 = vadd.f32 %v3786_v6, %v3670_v8 }
 0x5aa   : > { %v3903_v35 = vadd.f32 %v3902_v48, %v11496_v27  ;;  %v3590_v40 = vrot.slane %v11574_v54, 7  ;;  %v3671_v54 = vadd.f32 %v3587_v19, %v11538_v2 }
 0x5ab   : > { %v3788_v52 = vsel %vm3717_vm10, %v3785_v38, %v3787_v61  ;;  %v3672_v38 = vadd.f32 %v3589_v46, %v11560_v1 }
 0x5ac   : > { %v3904_v25 = vadd.f32 %v3903_v35, %v11610_v58  ;;  %v3591_v60 = vsel %vm1903_vm0, %v3588_v41, %v3590_v40  ;;  %v3870_v63 = vadd.f32 %v3788_v52, %v3671_v54 }
 0x5ad   : > { %v3673_v5 = vadd.f32 %v3591_v60, %v11577_v39 }
 0x5ae   : > { %v3905_v47 = vadd.f32 %v3904_v25, %v11618_v22 }
 0x5b0   : > { %v11583_v13 = vpop.f32.mrf.mxu2  ;;  %v3906_v33 = vadd.f32 %v3905_v47, %v11626_v55 }
 0x5b1   : > { %v11587_v4 = vpop.f32.mrf.mxu0  ;;  %v3363_v7 = vpop.f32.mrf.mxu1  ;;  %v3789_v45 = vrot.slane %v11583_v13, 1 }
 0x5b2   : > { %v3592_v48 = vrot.slane %v11587_v4, 7  ;;  %v3907_v30 = vadd.f32 %v3906_v33, %v11634_v3 }
 0x5b3   : > { %v3790_v26 = vsel %vm3717_vm10, %v3787_v61, %v3789_v45 }
 0x5b4   : > { %v3593_v4 = vsel %vm1903_vm0, %v3590_v40, %v3592_v48  ;;  %v3908_v2 = vadd.f32 %v3907_v30, %v11641_v10  ;;  %v3871_v25 = vadd.f32 %v3790_v26, %v3672_v38 }
 0x5b5   : > { %v3674_v18 = vadd.f32 %v3593_v4, %v3363_v7 }
 0x5b6   : > { %v3909_v61 = vadd.f32 %v3908_v2, %v3870_v63 }
 0x5b8   : > { %v3472_v32 = vpop.f32.mrf.mxu2  ;;  %v3910_v47 = vadd.f32 %v3909_v61, %v3871_v25 }
 0x5b9   : > { %v3258_v12 = vpop.f32.mrf.mxu0  ;;  %v3366_v62 = vpop.f32.mrf.mxu1  ;;  %v3791_v49 = vrot.slane %v3472_v32, 1 }
 0x5ba   : > { %v3594_v56 = vrot.slane %v3258_v12, 7 }
 0x5bb   : > { %v3792_v32 = vsel %vm3717_vm10, %v3789_v45, %v3791_v49 }
 0x5bc   : > { %v3872_v19 = vadd.f32 %v3792_v32, %v3673_v5  ;;  %v3595_v6 = vsel %vm1903_vm0, %v3592_v48, %v3594_v56 }
 0x5bd   : > { %v3675_v45 = vadd.f32 %v3595_v6, %v3366_v62 }
 0x5be   : > { %v3911_v52 = vadd.f32 %v3910_v47, %v3872_v19 }
 0x5c0   : > { %v3475_v13 = vpop.f32.mrf.mxu2 }
 0x5c1   : > { %v3793_v21 = vrot.slane %v3475_v13, 1  ;;  %v3260_v35 = vpop.f32.mrf.mxu0  ;;  %v3368_v8 = vpop.f32.mrf.mxu1 }
 0x5c2   : > { %v3676_v12 = vadd.f32 %v3594_v56, %v3368_v8 }
 0x5c3   : > { %v3794_v41 = vsel %vm3717_vm10, %v3791_v49, %v3793_v21 }
 0x5c4   : > { %v3873_v1 = vadd.f32 %v3794_v41, %v3674_v18  ;;  %v3914_v49 = vsel %vm1903_vm0, %v3676_v12, 0.0 }
 0x5c6   : > { %v3912_v54 = vadd.f32 %v3911_v52, %v3873_v1 }
 0x5c8   : > { %v3477_v46 = vpop.f32.mrf.mxu2 }
 0x5c9   : > { %v3795_v40 = vrot.slane %v3477_v46, 1 }
 0x5cb   : > { %v3796_v33 = vsel %vm3717_vm10, %v3793_v21, %v3795_v40 }
 0x5cc   : > { %v3874_v39 = vadd.f32 %v3796_v33, %v3675_v45 }
 0x5ce   : > { %v3913_v13 = vadd.f32 %v3912_v54, %v3874_v39 }
 0x5d0   : > { %v3915_v60 = vadd.f32 %v3914_v49, %v3913_v13 }
 0x5d2   : > { %v3916_v7 = vrot.slane %v3915_v60, 4 }
 0x5d4   : > { %v3917_v26 = vadd.f32 %v3916_v7, %v3915_v60 }
 0x5d6   : > { %v3918_v35 = vrot.slane %v3917_v26, 2 }
 0x5d8   : > { %v3919_v48 = vadd.f32 %v3918_v35, %v3917_v26 }
 0x5da   : > { %v3920_v30 = vrot.slane %v3919_v48, 1 }
 0x5dc   : > { %v3921_v38 = vadd.f32 %v3920_v30, %v3919_v48 }
 0x5de   : > { %v11656_v4 = vmul.f32 %v3921_v38, %v10801_v44 }
 0x5e0   : > { %v11659_v62 = vsub.f32 %v3870_v63, %v11656_v4  ;;  %v11662_v21 = vsub.f32 %v3871_v25, %v11656_v4  ;;  %v11665_v32 = vsub.f32 %v3872_v19, %v11656_v4  ;;  %v11668_v56 = vsub.f32 %v3873_v1, %v11656_v4 }
 0x5e1   : > { %v11671_v2 = vsub.f32 %v3874_v39, %v11656_v4  ;;  %v11674_v5 = vsub.f32 %v3676_v12, %v11656_v4  ;;  %v11678_v41 = vsub.f32 %v11227_v29, %v11656_v4  ;;  %v11682_v63 = vsub.f32 %v11233_v23, %v11656_v4 }
 0x5e2   : > { %v11686_v25 = vsub.f32 %v11243_v0, %v11656_v4  ;;  %v11694_v19 = vsub.f32 %v11249_v43, %v11656_v4  ;;  %v11698_v29 = vsub.f32 %v11259_v9, %v11656_v4  ;;  %v11704_v0 = vsub.f32 %v11265_v31, %v11656_v4 }
 0x5e3   : > { %v3963_v61 = vmul.f32 %v11678_v41, %v11678_v41  ;;  %v3964_v18 = vmul.f32 %v11682_v63, %v11682_v63  ;;  %v11710_v43 = vsub.f32 %v11275_v57, %v11656_v4  ;;  %v11716_v46 = vsub.f32 %v11281_v16, %v11656_v4 }
 0x5e4   : > { %v3965_v23 = vmul.f32 %v11686_v25, %v11686_v25  ;;  %v3966_v47 = vmul.f32 %v11694_v19, %v11694_v19  ;;  %v3967_v9 = vmul.f32 %v11698_v29, %v11698_v29  ;;  %v3968_v31 = vmul.f32 %v11704_v0, %v11704_v0 }
 0x5e5   : > { %v4003_v6 = vadd.f32 %v3964_v18, %v3963_v61  ;;  %v11722_v52 = vsub.f32 %v11291_v36, %v11656_v4  ;;  %v3969_v57 = vmul.f32 %v11710_v43, %v11710_v43  ;;  %v11728_v12 = vsub.f32 %v11297_v59, %v11656_v4 }
 0x5e6   : > { %v3970_v16 = vmul.f32 %v11716_v46, %v11716_v46  ;;  %v11734_v54 = vsub.f32 %v11307_v51, %v11656_v4  ;;  %v11740_v13 = vsub.f32 %v11313_v14, %v11656_v4  ;;  %v11746_v60 = vsub.f32 %v11323_v37, %v11656_v4 }
 0x5e7   : > { %v4004_v1 = vadd.f32 %v4003_v6, %v3965_v23  ;;  %v3971_v36 = vmul.f32 %v11722_v52, %v11722_v52  ;;  %v3972_v59 = vmul.f32 %v11728_v12, %v11728_v12  ;;  %v11752_v26 = vsub.f32 %v11341_v17, %v11656_v4 }
 0x5e8   : > { %v3973_v51 = vmul.f32 %v11734_v54, %v11734_v54  ;;  %v3974_v14 = vmul.f32 %v11740_v13, %v11740_v13  ;;  %v11758_v48 = vsub.f32 %v11357_v53, %v11656_v4  ;;  %v3975_v37 = vmul.f32 %v11746_v60, %v11746_v60 }
 0x5e9   : > { %v4005_v8 = vadd.f32 %v4004_v1, %v3966_v47  ;;  %v11764_v38 = vsub.f32 %v11363_v24, %v11656_v4  ;;  %v3976_v17 = vmul.f32 %v11752_v26, %v11752_v26  ;;  %v11770_v18 = vsub.f32 %v11372_v42, %v11656_v4 }
 0x5ea   : > { %v3977_v53 = vmul.f32 %v11758_v48, %v11758_v48  ;;  %v11776_v6 = vsub.f32 %v11379_v34, %v11656_v4  ;;  %v11782_v1 = vsub.f32 %v11400_v15, %v11656_v4 }
 0x5eb   : > { %v4006_v40 = vadd.f32 %v4005_v8, %v3967_v9  ;;  %v3978_v24 = vmul.f32 %v11764_v38, %v11764_v38  ;;  %v3979_v42 = vmul.f32 %v11770_v18, %v11770_v18  ;;  %v13337_v8 = vld [vmem:[#allocation10_spill] sm:$0xff] }
 0x5ec   : > { %v3980_v34 = vmul.f32 %v11776_v6, %v11776_v6  ;;  %v3981_v15 = vmul.f32 %v11782_v1, %v11782_v1 }
 0x5ed   : > { %v4007_v45 = vadd.f32 %v4006_v40, %v3968_v31  ;;  %v11788_v31 = vsub.f32 %v13337_v8, %v11656_v4  ;;  %v11836_v8 = vsub.f32 %v11472_v11, %v11656_v4 }
 0x5ef   : > { %v4008_v33 = vadd.f32 %v4007_v45, %v3969_v57  ;;  %v11794_v57 = vsub.f32 %v11416_v50, %v11656_v4  ;;  %v3990_v11 = vmul.f32 %v11836_v8, %v11836_v8 }
 0x5f1   : > { %v4009_v39 = vadd.f32 %v4008_v33, %v3970_v16  ;;  %v13338_v16 = vld [vmem:[#allocation27_spill] sm:$0xff]  ;;  %v3983_v50 = vmul.f32 %v11794_v57, %v11794_v57 }
 0x5f2   : > { %v11800_v33 = vsub.f32 %v13338_v16, %v11656_v4  ;;  %v11848_v16 = vsub.f32 %v11610_v58, %v11656_v4 }
 0x5f3   : > { %v4010_v49 = vadd.f32 %v4009_v39, %v3971_v36  ;;  %v3982_v36 = vmul.f32 %v11788_v31, %v11788_v31 }
 0x5f4   : > { %v3992_v58 = vmul.f32 %v11848_v16, %v11848_v16 }
 0x5f5   : > { %v4011_v7 = vadd.f32 %v4010_v49, %v3972_v59  ;;  %v13339_v59 = vld [vmem:[#allocation30_spill] sm:$0xff] }
 0x5f6   : > { %v11806_v49 = vsub.f32 %v13339_v59, %v11656_v4 }
 0x5f7   : > { %v4012_v35 = vadd.f32 %v4011_v7, %v3973_v51  ;;  %v13340_v7 = vld [vmem:[#allocation34_spill] sm:$0xff] }
 0x5f9   : > { %v4013_v30 = vadd.f32 %v4012_v35, %v3974_v14  ;;  %v11812_v14 = vsub.f32 %v13340_v7, %v11656_v4  ;;  %v3984_v35 = vmul.f32 %v11800_v33, %v11800_v33  ;;  %v11866_v7 = vsub.f32 %v11634_v3, %v11656_v4 }
 0x5fb   : > { %v4014_v61 = vadd.f32 %v4013_v30, %v3975_v37  ;;  %v11818_v30 = vsub.f32 %v11450_v20, %v11656_v4 }
 0x5fd   : > { %v4015_v23 = vadd.f32 %v4014_v61, %v3976_v17  ;;  %v3985_v17 = vmul.f32 %v11806_v49, %v11806_v49  ;;  %v3987_v20 = vmul.f32 %v11818_v30, %v11818_v30 }
 0x5ff   : > { %v4016_v47 = vadd.f32 %v4015_v23, %v3977_v53  ;;  %v13341_v53 = vld [vmem:[#allocation37_spill] sm:$0xff] }
 0x600   : > { %v11824_v23 = vsub.f32 %v13341_v53, %v11656_v4 }
 0x601   : > { %v4017_v9 = vadd.f32 %v4016_v47, %v3978_v24  ;;  %v3986_v24 = vmul.f32 %v11812_v14, %v11812_v14 }
 0x603   : > { %v4018_v40 = vadd.f32 %v4017_v9, %v3979_v42  ;;  %v11830_v42 = vsub.f32 %v11461_v28, %v11656_v4 }
 0x605   : > { %v4019_v45 = vadd.f32 %v4018_v40, %v3980_v34  ;;  %v3988_v34 = vmul.f32 %v11824_v23, %v11824_v23  ;;  %v3989_v28 = vmul.f32 %v11830_v42, %v11830_v42 }
 0x607   : > { %v4020_v39 = vadd.f32 %v4019_v45, %v3981_v15  ;;  %v11842_v15 = vsub.f32 %v11496_v27, %v11656_v4 }
 0x609   : > { %v4021_v51 = vadd.f32 %v4020_v39, %v3982_v36  ;;  %v11854_v39 = vsub.f32 %v11618_v22, %v11656_v4  ;;  %v3991_v27 = vmul.f32 %v11842_v15, %v11842_v15 }
 0x60b   : > { %v4022_v37 = vadd.f32 %v4021_v51, %v3983_v50  ;;  %v11860_v50 = vsub.f32 %v11626_v55, %v11656_v4  ;;  %v3993_v22 = vmul.f32 %v11854_v39, %v11854_v39 }
 0x60d   : > { %v4023_v61 = vadd.f32 %v4022_v37, %v3984_v35  ;;  %v11872_v37 = vsub.f32 %v11641_v10, %v11656_v4  ;;  %v3994_v55 = vmul.f32 %v11860_v50, %v11860_v50  ;;  %v3998_v10 = vmul.f32 %v11662_v21, %v11662_v21 }
 0x60f   : > { %v4024_v47 = vadd.f32 %v4023_v61, %v3985_v17  ;;  %v3995_v61 = vmul.f32 %v11866_v7, %v11866_v7  ;;  %v3996_v3 = vmul.f32 %v11872_v37, %v11872_v37 }
 0x611   : > { %v4025_v9 = vadd.f32 %v4024_v47, %v3986_v24  ;;  %v3997_v47 = vmul.f32 %v11659_v62, %v11659_v62 }
 0x613   : > { %v4026_v40 = vadd.f32 %v4025_v9, %v3987_v20  ;;  %v3999_v9 = vmul.f32 %v11665_v32, %v11665_v32 }
 0x615   : > { %v4027_v45 = vadd.f32 %v4026_v40, %v3988_v34  ;;  %v4000_v40 = vmul.f32 %v11668_v56, %v11668_v56 }
 0x617   : > { %v4028_v36 = vadd.f32 %v4027_v45, %v3989_v28  ;;  %v4002_v45 = vmul.f32 %v11674_v5, %v11674_v5 }
 0x619   : > { %v4029_v59 = vadd.f32 %v4028_v36, %v3990_v11  ;;  %v4001_v11 = vmul.f32 %v11671_v2, %v11671_v2 }
 0x61b   : > { %v4030_v51 = vadd.f32 %v4029_v59, %v3991_v27  ;;  %v4041_v59 = vsel %vm1903_vm0, %v4002_v45, 0.0  ;;  %v8458_v45 = vld [vmem:[%s12896_s3 + $0xe0] sm:$0xf0] }
 0x61d   : > { %v4031_v35 = vadd.f32 %v4030_v51, %v3992_v58 }
 0x61f   : > { %v4032_v17 = vadd.f32 %v4031_v35, %v3993_v22 }
 0x621   : > { %v4033_v53 = vadd.f32 %v4032_v17, %v3994_v55 }
 0x623   : > { %v4034_v24 = vadd.f32 %v4033_v53, %v3995_v61 }
 0x625   : > { %v4035_v20 = vadd.f32 %v4034_v24, %v3996_v3  ;;  %v8086_v24 = vld [vmem:[%s12896_s3 + $0xf0] sm:$0xf] }
 0x627   : > { %v4036_v4 = vadd.f32 %v4035_v20, %v3997_v47  ;;  %v8461_v47 = vld [vmem:[%s12896_s3 + $0xf8] sm:$0xf0] }
 0x628   : > { %v8087_v20 = vor.u32 %v8461_v47, %v8086_v24  ;;  %v8454_v24 = vld [vmem:[%s12896_s3 + $0xc4] sm:$0xf]  ;;  %v8064_v47 = vld [vmem:[%s12896_s3 + $0xcc] sm:$0xf0] }
 0x629   : > { %v4037_v34 = vadd.f32 %v4036_v4, %v3998_v10  ;;  %v8094_v10 = vld [vmem:[%s12896_s3 + $0xf8] sm:$0xf]  ;;  %v8462_v4 = vld [vmem:[%s12896_s3 + $0x100] sm:$0xf0] }
 0x62a   : > { %4969 = vmatpush.bf16.msrb.mxu3 %v8087_v20 }
 0x62b   : > { %v4038_v28 = vadd.f32 %v4037_v34, %v3999_v9  ;;  %v8460_v9 = vld [vmem:[%s12896_s3 + $0xf4] sm:$0xf]  ;;  %v8095_v34 = vor.u32 %v8462_v4, %v8094_v10 }
 0x62d   : > { %v4039_v36 = vadd.f32 %v4038_v28, %v4000_v40  ;;  %v8088_v40 = vld [vmem:[%s12896_s3 + $0xfc] sm:$0xf0]  ;;  %v8074_v28 = vld [vmem:[%s12896_s3 + $0xd8] sm:$0xf]  ;;  %5186 = vmatpush.bf16.msra.mxu1 %v8095_v34  ;;  %v8067_v34 = vor.u32 %v8454_v24, %v8064_v47 }
 0x62f   : > { %v4040_v27 = vadd.f32 %v4039_v36, %v4001_v11  ;;  %v8091_v11 = vor.u32 %v8460_v9, %v8088_v40  ;;  %v8075_v36 = vor.u32 %v8458_v45, %v8074_v28 }
 0x631   : > { %v4042_v58 = vadd.f32 %v4041_v59, %v4040_v27  ;;  %v8082_v27 = vld [vmem:[%s12896_s3 + $0xe0] sm:$0xf]  ;;  %v8459_v59 = vld [vmem:[%s12896_s3 + $0xe8] sm:$0xf0]  ;;  %5077 = vmatpush.bf16.msrb.mxu0 %v8091_v11  ;;  %4970 = vmatpush.bf16.msrb.mxu3 %v8075_v36 }
 0x633   : > { %v4043_v51 = vrot.slane %v4042_v58, 4 }
 0x635   : > { %v4044_v22 = vadd.f32 %v4043_v51, %v4042_v58  ;;  %v8457_v58 = vld [vmem:[%s12896_s3 + $0xdc] sm:$0xf]  ;;  %v8083_v51 = vor.u32 %v8459_v59, %v8082_v27 }
 0x637   : > { %v4045_v35 = vrot.slane %v4044_v22, 2  ;;  %5187 = vmatpush.bf16.msra.mxu1 %v8083_v51 }
 0x639   : > { %v4046_v55 = vadd.f32 %v4045_v35, %v4044_v22  ;;  %v8076_v22 = vld [vmem:[%s12896_s3 + $0xe4] sm:$0xf0]  ;;  %v8062_v35 = vld [vmem:[%s12896_s3 + $0xc0] sm:$0xf] }
 0x63b   : > { %v4047_v17 = vrot.slane %v4046_v55, 1 }
 0x63d   : > { %v4048_v61 = vadd.f32 %v4047_v17, %v4046_v55  ;;  %v8455_v55 = vld [vmem:[%s12896_s3 + $0xc8] sm:$0xf0]  ;;  %v8079_v17 = vor.u32 %v8457_v58, %v8076_v22  ;;  %v13342_v58 = vld [vmem:[#allocation4_spill] sm:$0xff] }
 0x63e   : > { %v8063_v20 = vor.u32 %v8455_v55, %v8062_v35  ;;  %v13343_v22 = vld [vmem:[#allocation71_spill] sm:$0xff] }
 0x63f   : > { %v4049_v53 = vmul.f32 %v4048_v61, %v10801_v44  ;;  %v8070_v61 = vld [vmem:[%s12896_s3 + $0xc8] sm:$0xf]  ;;  %5078 = vmatpush.bf16.msrb.mxu0 %v8079_v17 }
 0x640   : > { %4971 = vmatpush.bf16.msrb.mxu3 %v8063_v20  ;;  %v13344_v55 = vld [vmem:[#allocation79_spill] sm:$0xff] }
 0x641   : > { %v4050_v3 = vadd.f32 1e-05, %v4049_v53  ;;  %v8456_v53 = vld [vmem:[%s12896_s3 + $0xd0] sm:$0xf0] }
 0x642   : > { %v8071_v4 = vor.u32 %v8456_v53, %v8070_v61  ;;  %v13345_v61 = vld [vmem:[#allocation21_spill] sm:$0xff] }
 0x643   : > { %8545 = vrsqrt.f32 %v4050_v3  ;;  %5079 = vmatpush.bf16.msrb.mxu0 %v8067_v34  ;;  %vm4057_vm3 = vweird.f32 %v4050_v3  ;;  %v13347_v34 = vld [vmem:[#allocation87_spill] sm:$0xff] }
 0x644   : > { %5188 = vmatpush.bf16.msra.mxu1 %v8071_v4  ;;  %v13346_v4 = vld [vmem:[#allocation72_spill] sm:$0xff] }
 0x649   : > { %v8546_v10 = vpop.eup %8545 }
 0x64a   : > { %v4052_v9 = vmul.f32 %v8546_v10, %v4050_v3  ;;  %vm4058_vm2 = vweird.f32 %v8546_v10 }
 0x64b   : > { %vm4059_vm4 = vmor %vm4057_vm3, %vm4058_vm2 }
 0x64c   : > { %v4053_v40 = vmul.f32 %v8546_v10, %v4052_v9 }
 0x64e   : > { %v4054_v28 = vmul.f32 0.5, %v4053_v40 }
 0x650   : > { %v4055_v45 = vsub.f32 1.5, %v4054_v28  ;;  %v13348_v28 = vld [vmem:[#allocation7_spill] sm:$0xff] }
 0x652   : > { %v4056_v11 = vmul.f32 %v8546_v10, %v4055_v45 }
 0x654   : > { %v11948_v27 = vsel %vm4059_vm4, %v8546_v10, %v4056_v11 }
 0x655   : > { %v4061_v36 = vmul.f32 %v11948_v27, %v11678_v41  ;;  %v4062_v59 = vmul.f32 %v11948_v27, %v11682_v63  ;;  %v4063_v3 = vmul.f32 %v11948_v27, %v11686_v25  ;;  %v4064_v24 = vmul.f32 %v11948_v27, %v11694_v19  ;;  %v13349_v25 = vld [vmem:[#allocation16_spill] sm:$0xff] }
 0x657   : > { %v4342_v51 = vmul.f32 %v13342_v58, %v4061_v36  ;;  %v4343_v35 = vmul.f32 %v13343_v22, %v4062_v59  ;;  %v4344_v9 = vmul.f32 %v13346_v4, %v4063_v3  ;;  %v4345_v40 = vmul.f32 %v13347_v34, %v4064_v24  ;;  %v13352_v3 = vld [vmem:[#allocation18_spill] sm:$0xff] }
 0x658   : > { %v4065_v59 = vmul.f32 %v11948_v27, %v11698_v29  ;;  %v4066_v58 = vmul.f32 %v11948_v27, %v11704_v0  ;;  %v4067_v29 = vmul.f32 %v11948_v27, %v11710_v43  ;;  %v4068_v0 = vmul.f32 %v11948_v27, %v11716_v46 }
 0x659   : > { %v4623_v17 = vadd.f32 %v13344_v55, %v4342_v51  ;;  %v4624_v53 = vadd.f32 %v13345_v61, %v4343_v35  ;;  %v4625_v45 = vadd.f32 %v13348_v28, %v4344_v9  ;;  %v4626_v11 = vadd.f32 %v13349_v25, %v4345_v40  ;;  %v13350_v55 = vld [vmem:[#allocation17_spill] sm:$0xff]  ;;  %v13351_v61 = vld [vmem:[#allocation20_spill] sm:$0xff]  ;;  %v4180_v9 = vpop.permute.xlu0 %4179  ;;  %v4456_v25 = vpop.permute.xlu1 %4455 }
 0x65a   : > { %v13354_v40 = vld [vmem:[#allocation24_spill] sm:$0xff]  ;;  %v4069_v46 = vmul.f32 %v11948_v27, %v11722_v52  ;;  %v4071_v52 = vmul.f32 %v11948_v27, %v11734_v54  ;;  %v4073_v54 = vmul.f32 %v11948_v27, %v11746_v60  ;;  %v4075_v60 = vmul.f32 %v11948_v27, %v11758_v48 }
 0x65b   : > { %vm4663_vm5 = vcmp.ge.f32.partialorder %v4623_v17, 0.0  ;;  %vm4664_vm6 = vcmp.ge.f32.partialorder %v4624_v53, 0.0  ;;  %v4703_v41 = vmul.f32 0.2, %v4623_v17  ;;  %v4704_v47 = vmul.f32 0.2, %v4624_v53 }
 0x65c   : > { %v4705_v36 = vmul.f32 0.2, %v4625_v45  ;;  %v4706_v19 = vmul.f32 0.2, %v4626_v11  ;;  %vm4665_vm7 = vcmp.ge.f32.partialorder %v4625_v45, 0.0  ;;  %vm4666_vm8 = vcmp.ge.f32.partialorder %v4626_v11, 0.0 }
 0x65d   : > { %v4743_v20 = vsel %vm4663_vm5, %v4623_v17, %v4703_v41  ;;  %v4744_v63 = vsel %vm4664_vm6, %v4624_v53, %v4704_v47  ;;  %v4346_v17 = vmul.f32 %v13350_v55, %v4065_v59  ;;  %v4347_v53 = vmul.f32 %v13351_v61, %v4066_v58  ;;  %v13353_v41 = vld [vmem:[#allocation19_spill] sm:$0xff] }
 0x65e   : > { %v4783_v10 = vpack.c.bf16 %v4744_v63, %v4743_v20  ;;  %v4745_v51 = vsel %vm4665_vm7, %v4625_v45, %v4705_v36  ;;  %v4746_v22 = vsel %vm4666_vm8, %v4626_v11, %v4706_v19  ;;  %v4348_v28 = vmul.f32 %v13354_v40, %v4067_v29  ;;  %v4461_v11 = vpop.permute.xlu2 %4460 }
 0x65f   : > { %v4784_v35 = vpack.c.bf16 %v4746_v22, %v4745_v51  ;;  %v4627_v24 = vadd.f32 %v13352_v3, %v4346_v17  ;;  %v4628_v47 = vadd.f32 %v13353_v41, %v4347_v53  ;;  %v4349_v45 = vmul.f32 %v4180_v9, %v4068_v0 }
 0x660   : > { %4972 = vmatmul.bf16.vlgmr.msrb.gmra.mxu3 %v4783_v10  ;;  %5080 = vmatmul.bf16.vlgmr.msrb.gmra.mxu0 %v4783_v10  ;;  %v4629_v36 = vadd.f32 %v4456_v25, %v4348_v28  ;;  %v4070_v51 = vmul.f32 %v11948_v27, %v11728_v12  ;;  %v4072_v12 = vmul.f32 %v11948_v27, %v11740_v13 }
 0x661   : > { %5189 = vmatmul.bf16.vlgmr.msra.gmra.mxu1 %v4783_v10  ;;  %v4707_v20 = vmul.f32 0.2, %v4627_v24  ;;  %v4708_v63 = vmul.f32 0.2, %v4628_v47  ;;  %vm4667_vm9 = vcmp.ge.f32.partialorder %v4627_v24, 0.0  ;;  %vm4668_vm11 = vcmp.ge.f32.partialorder %v4628_v47, 0.0  ;;  %v4185_v43 = vpop.permute.xlu0 %4184  ;;  %v4190_v55 = vpop.permute.xlu1 %4189 }
 0x662   : > { %v4630_v19 = vadd.f32 %v4461_v11, %v4349_v45  ;;  %v4709_v59 = vmul.f32 0.2, %v4629_v36  ;;  %vm4669_vm12 = vcmp.ge.f32.partialorder %v4629_v36, 0.0  ;;  %v4350_v61 = vmul.f32 %v4185_v43, %v4069_v46 }
 0x663   : > { %v4747_v10 = vsel %vm4667_vm9, %v4627_v24, %v4707_v20  ;;  %v4748_v4 = vsel %vm4668_vm11, %v4628_v47, %v4708_v63  ;;  %v4351_v53 = vmul.f32 %v4190_v55, %v4070_v51  ;;  %v4074_v13 = vmul.f32 %v11948_v27, %v11752_v26 }
 0x664   : > { %v4785_v34 = vpack.c.bf16 %v4748_v4, %v4747_v10  ;;  %v4710_v58 = vmul.f32 0.2, %v4630_v19  ;;  %vm4670_vm13 = vcmp.ge.f32.partialorder %v4630_v19, 0.0  ;;  %v4749_v22 = vsel %vm4669_vm12, %v4629_v36, %v4709_v59 }
 0x665   : > { %v4076_v26 = vmul.f32 %v11948_v27, %v11764_v38  ;;  %v4077_v48 = vmul.f32 %v11948_v27, %v11770_v18  ;;  %v4078_v38 = vmul.f32 %v11948_v27, %v11776_v6  ;;  %v4079_v18 = vmul.f32 %v11948_v27, %v11782_v1 }
 0x666   : > { %v4466_v24 = vpop.permute.xlu2 %4465  ;;  %v4080_v6 = vmul.f32 %v11948_v27, %v11788_v31 }
 0x667   : > { %v4631_v41 = vadd.f32 %v4466_v24, %v4350_v61 }
 0x669   : > { %v4471_v3 = vpop.permute.xlu0 %4470  ;;  %v4711_v20 = vmul.f32 0.2, %v4631_v41  ;;  %v4195_v29 = vpop.permute.xlu1 %4194  ;;  %vm4671_vm14 = vcmp.ge.f32.partialorder %v4631_v41, 0.0 }
 0x66a   : > { %v4632_v47 = vadd.f32 %v4471_v3, %v4351_v53 }
 0x66b   : > { %v4751_v0 = vsel %vm4671_vm14, %v4631_v41, %v4711_v20 }
 0x66c   : > { %v4712_v63 = vmul.f32 0.2, %v4632_v47  ;;  %vm4672_vm15 = vcmp.ge.f32.partialorder %v4632_v47, 0.0 }
 0x66e   : > { %v4752_v10 = vsel %vm4672_vm15, %v4632_v47, %v4712_v63  ;;  %v4200_v4 = vpop.permute.xlu2 %4199 }
 0x66f   : > { %v4787_v9 = vpack.c.bf16 %v4752_v10, %v4751_v0  ;;  %v4353_v40 = vmul.f32 %v4200_v4, %v4072_v12 }
 0x670   : > { %4977 = vmatmul.bf16.gmra.mxu3 %v4784_v35  ;;  %5085 = vmatmul.bf16.gmra.mxu0 %v4784_v35 }
 0x671   : > { %5194 = vmatmul.bf16.gmra.mxu1 %v4784_v35  ;;  %v4750_v35 = vsel %vm4670_vm13, %v4630_v19, %v4710_v58  ;;  %v4476_v28 = vpop.permute.xlu0 %4475  ;;  %v4481_v45 = vpop.permute.xlu1 %4480 }
 0x672   : > { %v4786_v17 = vpack.c.bf16 %v4750_v35, %v4749_v22  ;;  %v4634_v11 = vadd.f32 %v4481_v45, %v4353_v40 }
 0x674   : > { %v4714_v19 = vmul.f32 0.2, %v4634_v11  ;;  %vm4674_vm2 = vcmp.ge.f32.partialorder %v4634_v11, 0.0 }
 0x676   : > { %v4205_v59 = vpop.permute.xlu2 %4204  ;;  %v4754_v43 = vsel %vm4674_vm2, %v4634_v11, %v4714_v19 }
 0x677   : > { %v4354_v22 = vmul.f32 %v4205_v59, %v4073_v54 }
 0x679   : > { %v4210_v46 = vpop.permute.xlu0 %4209  ;;  %v4486_v55 = vpop.permute.xlu1 %4485 }
 0x67a   : > { %v4355_v35 = vmul.f32 %v4210_v46, %v4074_v13  ;;  %v4635_v61 = vadd.f32 %v4486_v55, %v4354_v22 }
 0x67c   : > { %v4715_v3 = vmul.f32 0.2, %v4635_v61  ;;  %vm4675_vm3 = vcmp.ge.f32.partialorder %v4635_v61, 0.0 }
 0x67e   : > { %v4755_v47 = vsel %vm4675_vm3, %v4635_v61, %v4715_v3 }
 0x680   : > { %4982 = vmatmul.bf16.gmra.mxu3 %v4785_v34  ;;  %5090 = vmatmul.bf16.gmra.mxu0 %v4785_v34 }
 0x681   : > { %5199 = vmatmul.bf16.gmra.mxu1 %v4785_v34  ;;  %v4352_v34 = vmul.f32 %v4195_v29, %v4071_v52  ;;  %v4215_v41 = vpop.permute.xlu0 %4214  ;;  %v4220_v63 = vpop.permute.xlu1 %4219 }
 0x682   : > { %v4356_v52 = vmul.f32 %v4215_v41, %v4075_v60  ;;  %v4357_v12 = vmul.f32 %v4220_v63, %v4076_v26 }
 0x683   : > { %v4633_v25 = vadd.f32 %v4476_v28, %v4352_v34 }
 0x685   : > { %v4713_v36 = vmul.f32 0.2, %v4633_v25  ;;  %vm4673_vm1 = vcmp.ge.f32.partialorder %v4633_v25, 0.0 }
 0x687   : > { %v4753_v58 = vsel %vm4673_vm1, %v4633_v25, %v4713_v36 }
 0x688   : > { %v4788_v51 = vpack.c.bf16 %v4754_v43, %v4753_v58 }
 0x689   : > { %v4501_v0 = vpop.permute.xlu0 %4500  ;;  %v4225_v28 = vpop.permute.xlu1 %4224 }
 0x68a   : > { %v4358_v19 = vmul.f32 %v4225_v28, %v4077_v48  ;;  %v4081_v48 = vmul.f32 %v11948_v27, %v11794_v57 }
 0x690   : > { %4987 = vmatmul.bf16.gmra.mxu3 %v4786_v17  ;;  %5095 = vmatmul.bf16.gmra.mxu0 %v4786_v17 }
 0x691   : > { %5204 = vmatmul.bf16.gmra.mxu1 %v4786_v17  ;;  %v4491_v17 = vpop.permute.xlu2 %4490  ;;  %v4506_v54 = vpop.permute.xlu0 %4505 }
 0x692   : > { %v4636_v53 = vadd.f32 %v4491_v17, %v4355_v35  ;;  %v4511_v13 = vpop.permute.xlu1 %4510  ;;  %v4639_v58 = vadd.f32 %v4506_v54, %v4358_v19 }
 0x694   : > { %v4716_v24 = vmul.f32 0.2, %v4636_v53  ;;  %vm4676_vm4 = vcmp.ge.f32.partialorder %v4636_v53, 0.0  ;;  %v4719_v46 = vmul.f32 0.2, %v4639_v58  ;;  %vm4679_vm7 = vcmp.ge.f32.partialorder %v4639_v58, 0.0 }
 0x696   : > { %v4756_v20 = vsel %vm4676_vm4, %v4636_v53, %v4716_v24  ;;  %v4759_v35 = vsel %vm4679_vm7, %v4639_v58, %v4719_v46 }
 0x697   : > { %v4789_v29 = vpack.c.bf16 %v4756_v20, %v4755_v47 }
 0x699   : > { %v4496_v10 = vpop.permute.xlu2 %4495  ;;  %v4240_v61 = vpop.permute.xlu0 %4239 }
 0x69a   : > { %v4637_v4 = vadd.f32 %v4496_v10, %v4356_v52  ;;  %v4361_v41 = vmul.f32 %v4240_v61, %v4080_v6  ;;  %v4516_v60 = vpop.permute.xlu1 %4515 }
 0x69c   : > { %v4717_v34 = vmul.f32 0.2, %v4637_v4  ;;  %vm4677_vm5 = vcmp.ge.f32.partialorder %v4637_v4, 0.0 }
 0x69e   : > { %v4757_v45 = vsel %vm4677_vm5, %v4637_v4, %v4717_v34 }
 0x6a0   : > { %4992 = vmatmul.bf16.gmra.mxu3 %v4787_v9  ;;  %5100 = vmatmul.bf16.gmra.mxu0 %v4787_v9 }
 0x6a1   : > { %5209 = vmatmul.bf16.gmra.mxu1 %v4787_v9  ;;  %v4638_v9 = vadd.f32 %v4501_v0, %v4357_v12  ;;  %v4230_v11 = vpop.permute.xlu2 %4229  ;;  %v4245_v34 = vpop.permute.xlu0 %4244 }
 0x6a2   : > { %v4359_v59 = vmul.f32 %v4230_v11, %v4078_v38  ;;  %v4082_v38 = vmul.f32 %v11948_v27, %v11800_v33 }
 0x6a3   : > { %v4718_v40 = vmul.f32 0.2, %v4638_v9  ;;  %vm4678_vm6 = vcmp.ge.f32.partialorder %v4638_v9, 0.0 }
 0x6a4   : > { %v4640_v43 = vadd.f32 %v4511_v13, %v4359_v59  ;;  %v4250_v59 = vpop.permute.xlu1 %4249 }
 0x6a5   : > { %v4758_v25 = vsel %vm4678_vm6, %v4638_v9, %v4718_v40 }
 0x6a6   : > { %v4790_v36 = vpack.c.bf16 %v4758_v25, %v4757_v45  ;;  %vm4680_vm8 = vcmp.ge.f32.partialorder %v4640_v43, 0.0 }
 0x6a9   : > { %v4235_v22 = vpop.permute.xlu2 %4234  ;;  %v4531_v33 = vpop.permute.xlu0 %4530 }
 0x6aa   : > { %v4360_v24 = vmul.f32 %v4235_v22, %v4079_v18  ;;  %v4363_v22 = vmul.f32 %v4250_v59, %v4082_v38 }
 0x6ac   : > { %v4641_v47 = vadd.f32 %v4516_v60, %v4360_v24 }
 0x6ae   : > { %v4721_v12 = vmul.f32 0.2, %v4641_v47  ;;  %vm4681_vm9 = vcmp.ge.f32.partialorder %v4641_v47, 0.0 }
 0x6b0   : > { %4997 = vmatmul.bf16.gmra.mxu3 %v4788_v51  ;;  %5105 = vmatmul.bf16.gmra.mxu0 %v4788_v51  ;;  %v4761_v25 = vsel %vm4681_vm9, %v4641_v47, %v4721_v12 }
 0x6b1   : > { %5214 = vmatmul.bf16.gmra.mxu1 %v4788_v51  ;;  %v4720_v51 = vmul.f32 0.2, %v4640_v43  ;;  %v4521_v26 = vpop.permute.xlu2 %4520 }
 0x6b2   : > { %v4642_v63 = vadd.f32 %v4521_v26, %v4361_v41 }
 0x6b3   : > { %v4760_v55 = vsel %vm4680_vm8, %v4640_v43, %v4720_v51  ;;  %v4362_v51 = vmul.f32 %v4245_v34, %v4081_v48 }
 0x6b4   : > { %v4791_v3 = vpack.c.bf16 %v4760_v55, %v4759_v35  ;;  %v4722_v9 = vmul.f32 0.2, %v4642_v63  ;;  %vm4682_vm11 = vcmp.ge.f32.partialorder %v4642_v63, 0.0 }
 0x6b6   : > { %v4762_v11 = vsel %vm4682_vm11, %v4642_v63, %v4722_v9 }
 0x6b7   : > { %v4792_v58 = vpack.c.bf16 %v4762_v11, %v4761_v25 }
 0x6b9   : > { %v4526_v18 = vpop.permute.xlu2 %4525 }
 0x6ba   : > { %v4643_v55 = vadd.f32 %v4526_v18, %v4362_v51 }
 0x6bc   : > { %v4723_v26 = vmul.f32 0.2, %v4643_v55  ;;  %vm4683_vm12 = vcmp.ge.f32.partialorder %v4643_v55, 0.0 }
 0x6be   : > { %v4763_v12 = vsel %vm4683_vm12, %v4643_v55, %v4723_v26 }
 0x6c0   : > { %5002 = vmatmul.bf16.gmra.mxu3 %v4789_v29  ;;  %5110 = vmatmul.bf16.gmra.mxu0 %v4789_v29 }
 0x6c1   : > { %5219 = vmatmul.bf16.gmra.mxu1 %v4789_v29  ;;  %v4260_v9 = vpop.permute.xlu2 %4259 }
 0x6d0   : > { %5007 = vmatmul.bf16.gmra.mxu3 %v4790_v36  ;;  %5115 = vmatmul.bf16.gmra.mxu0 %v4790_v36 }
 0x6d1   : > { %5224 = vmatmul.bf16.gmra.mxu1 %v4790_v36 }
 0x6dd   : > { %v5081_v17 = vpop.f32.mrf.mxu0 }
 0x6de   : > { %v5190_v53 = vpop.f32.mrf.mxu1 }
 0x6df   : > { %v5527_v0 = vrot.slane %v5190_v53, 1 }
 0x6e0   : > { %5012 = vmatmul.bf16.gmra.mxu3 %v4791_v3  ;;  %5120 = vmatmul.bf16.gmra.mxu0 %v4791_v3 }
 0x6e1   : > { %5229 = vmatmul.bf16.gmra.mxu1 %v4791_v3 }
 0x6e3   : > { %v4973_v20 = vpop.f32.mrf.mxu3 }
 0x6e4   : > { %v5329_v1 = vrot.slane %v4973_v20, 7  ;;  %v4255_v20 = vpop.permute.xlu1 %4254 }
 0x6e5   : > { %v5083_v29 = vpop.f32.mrf.mxu0 }
 0x6e6   : > { %v5446_v31 = vsel %vm1903_vm0, 0.0, %v5329_v1  ;;  %v5192_v52 = vpop.f32.mrf.mxu1 }
 0x6e7   : > { %v5447_v10 = vadd.f32 %v5446_v31, %v5081_v17  ;;  %v5528_v4 = vrot.slane %v5192_v52, 1  ;;  %v4644_v17 = vadd.f32 %v4531_v33, %v4363_v22  ;;  %v4084_v31 = vmul.f32 %v11948_v27, %v11812_v14  ;;  %v4536_v14 = vpop.permute.xlu0 %4535 }
 0x6e9   : > { %v5529_v40 = vsel %vm3717_vm10, %v5527_v0, %v5528_v4  ;;  %v4724_v47 = vmul.f32 0.2, %v4644_v17  ;;  %vm4684_vm13 = vcmp.ge.f32.partialorder %v4644_v17, 0.0  ;;  %v4365_v11 = vmul.f32 %v4260_v9, %v4084_v31 }
 0x6ea   : > { %v12005_v28 = vadd.f32 %v5529_v40, %v5447_v10 }
 0x6eb   : > { %v4975_v45 = vpop.f32.mrf.mxu3  ;;  %v4764_v0 = vsel %vm4684_vm13, %v4644_v17, %v4724_v47 }
 0x6ec   : > { %v5330_v36 = vrot.slane %v4975_v45, 7  ;;  %v4793_v48 = vpack.c.bf16 %v4764_v0, %v4763_v12 }
 0x6ed   : > { %v5086_v19 = vpop.f32.mrf.mxu0 }
 0x6ee   : > { %v5331_v54 = vsel %vm1903_vm0, %v5329_v1, %v5330_v36  ;;  %v5195_v13 = vpop.f32.mrf.mxu1 }
 0x6ef   : > { %v5448_v43 = vadd.f32 %v5331_v54, %v5083_v29  ;;  %v5530_v46 = vrot.slane %v5195_v13, 1  ;;  %v4083_v29 = vmul.f32 %v11948_v27, %v11806_v49  ;;  %v4270_v47 = vpop.permute.xlu0 %4269 }
 0x6f0   : > { %5017 = vmatmul.bf16.gmra.mxu3 %v4792_v58  ;;  %5125 = vmatmul.bf16.gmra.mxu0 %v4792_v58 }
 0x6f1   : > { %v5531_v57 = vsel %vm3717_vm10, %v5528_v4, %v5530_v46  ;;  %5234 = vmatmul.bf16.gmra.mxu1 %v4792_v58  ;;  %v4364_v25 = vmul.f32 %v4255_v20, %v4083_v29 }
 0x6f2   : > { %v12013_v6 = vadd.f32 %v5531_v57, %v5448_v43 }
 0x6f3   : > { %v4978_v35 = vpop.f32.mrf.mxu3  ;;  %v4645_v54 = vadd.f32 %v4536_v14, %v4364_v25 }
 0x6f4   : > { %v5332_v61 = vrot.slane %v4978_v35, 7  ;;  %v4265_v35 = vpop.permute.xlu2 %4264 }
 0x6f5   : > { %v5088_v53 = vpop.f32.mrf.mxu0  ;;  %v4725_v33 = vmul.f32 0.2, %v4645_v54  ;;  %vm4685_vm14 = vcmp.ge.f32.partialorder %v4645_v54, 0.0 }
 0x6f6   : > { %v5333_v3 = vsel %vm1903_vm0, %v5330_v36, %v5332_v61  ;;  %v5197_v24 = vpop.f32.mrf.mxu1  ;;  %v4541_v36 = vpop.permute.xlu1 %4540 }
 0x6f7   : > { %v5449_v41 = vadd.f32 %v5333_v3, %v5086_v19  ;;  %v5532_v60 = vrot.slane %v5197_v24, 1  ;;  %v4646_v13 = vadd.f32 %v4541_v36, %v4365_v11  ;;  %v4765_v24 = vsel %vm4685_vm14, %v4645_v54, %v4725_v33 }
 0x6f9   : > { %v5533_v63 = vsel %vm3717_vm10, %v5530_v46, %v5532_v60  ;;  %v4726_v18 = vmul.f32 0.2, %v4646_v13  ;;  %vm4686_vm15 = vcmp.ge.f32.partialorder %v4646_v13, 0.0 }
 0x6fa   : > { %v12017_v1 = vadd.f32 %v5533_v63, %v5449_v41 }
 0x6fb   : > { %v4980_v52 = vpop.f32.mrf.mxu3  ;;  %v4766_v41 = vsel %vm4686_vm15, %v4646_v13, %v4726_v18 }
 0x6fc   : > { %v5334_v10 = vrot.slane %v4980_v52, 7  ;;  %v4794_v29 = vpack.c.bf16 %v4766_v41, %v4765_v24 }
 0x6fd   : > { %v5091_v4 = vpop.f32.mrf.mxu0 }
 0x6fe   : > { %v5335_v34 = vsel %vm1903_vm0, %v5332_v61, %v5334_v10  ;;  %v5200_v40 = vpop.f32.mrf.mxu1  ;;  %v4085_v61 = vmul.f32 %v11948_v27, %v11818_v30 }
 0x6ff   : > { %v5450_v38 = vadd.f32 %v5335_v34, %v5088_v53  ;;  %v5534_v45 = vrot.slane %v5200_v40, 1  ;;  %v4086_v53 = vmul.f32 %v11948_v27, %v11824_v23  ;;  %v4546_v23 = vpop.permute.xlu1 %4545 }
 0x700   : > { %5022 = vmatmul.bf16.gmra.mxu3 %v4793_v48  ;;  %5130 = vmatmul.bf16.gmra.mxu0 %v4793_v48  ;;  %v4366_v12 = vmul.f32 %v4265_v35, %v4085_v61 }
 0x701   : > { %v5535_v49 = vsel %vm3717_vm10, %v5532_v60, %v5534_v45  ;;  %5239 = vmatmul.bf16.gmra.mxu1 %v4793_v48  ;;  %v4367_v0 = vmul.f32 %v4270_v47, %v4086_v53 }
 0x702   : > { %v12025_v19 = vadd.f32 %v5535_v49, %v5450_v38  ;;  %v4647_v34 = vadd.f32 %v4546_v23, %v4366_v12 }
 0x703   : > { %v4983_v59 = vpop.f32.mrf.mxu3 }
 0x704   : > { %v5336_v58 = vrot.slane %v4983_v59, 7  ;;  %v4727_v14 = vmul.f32 0.2, %v4647_v34  ;;  %v4275_v59 = vpop.permute.xlu0 %4274  ;;  %vm4687_vm1 = vcmp.ge.f32.partialorder %v4647_v34, 0.0 }
 0x705   : > { %v5093_v43 = vpop.f32.mrf.mxu0 }
 0x706   : > { %v5337_v46 = vsel %vm1903_vm0, %v5334_v10, %v5336_v58  ;;  %v5202_v51 = vpop.f32.mrf.mxu1  ;;  %v4551_v10 = vpop.permute.xlu2 %4550 }
 0x707   : > { %v5451_v22 = vadd.f32 %v5337_v46, %v5091_v4  ;;  %v5536_v57 = vrot.slane %v5202_v51, 1  ;;  %v4648_v40 = vadd.f32 %v4551_v10, %v4367_v0  ;;  %v4767_v51 = vsel %vm4687_vm1, %v4647_v34, %v4727_v14  ;;  %v4280_v18 = vpop.permute.xlu1 %4279 }
 0x709   : > { %v5537_v55 = vsel %vm3717_vm10, %v5534_v45, %v5536_v57  ;;  %v4728_v36 = vmul.f32 0.2, %v4648_v40  ;;  %vm4688_vm2 = vcmp.ge.f32.partialorder %v4648_v40, 0.0 }
 0x70a   : > { %v12029_v17 = vadd.f32 %v5537_v55, %v5451_v22 }
 0x70b   : > { %v4985_v3 = vpop.f32.mrf.mxu3  ;;  %v4768_v22 = vsel %vm4688_vm2, %v4648_v40, %v4728_v36 }
 0x70c   : > { %v5338_v60 = vrot.slane %v4985_v3, 7  ;;  %v4795_v61 = vpack.c.bf16 %v4768_v22, %v4767_v51 }
 0x70d   : > { %v5096_v26 = vpop.f32.mrf.mxu0 }
 0x70e   : > { %v5339_v20 = vsel %vm1903_vm0, %v5336_v58, %v5338_v60  ;;  %v5205_v63 = vpop.f32.mrf.mxu1  ;;  %v4087_v58 = vmul.f32 %v11948_v27, %v11830_v42 }
 0x70f   : > { %v5452_v31 = vadd.f32 %v5339_v20, %v5093_v43  ;;  %v5538_v52 = vrot.slane %v5205_v63, 1  ;;  %v4088_v43 = vmul.f32 %v11948_v27, %v11836_v8  ;;  %v4561_v8 = vpop.permute.xlu0 %4560 }
 0x710   : > { %5027 = vmatmul.bf16.gmra.mxu3 %v4794_v29  ;;  %5135 = vmatmul.bf16.gmra.mxu0 %v4794_v29  ;;  %v4368_v24 = vmul.f32 %v4275_v59, %v4087_v58 }
 0x711   : > { %v5539_v30 = vsel %vm3717_vm10, %v5536_v57, %v5538_v52  ;;  %5244 = vmatmul.bf16.gmra.mxu1 %v4794_v29  ;;  %v4369_v41 = vmul.f32 %v4280_v18, %v4088_v43 }
 0x712   : > { %v12037_v4 = vadd.f32 %v5539_v30, %v5452_v31 }
 0x713   : > { %v4988_v9 = vpop.f32.mrf.mxu3  ;;  %v4650_v63 = vadd.f32 %v4561_v8, %v4369_v41 }
 0x714   : > { %v5340_v48 = vrot.slane %v4988_v9, 7  ;;  %v4285_v9 = vpop.permute.xlu1 %4284 }
 0x715   : > { %v5098_v38 = vpop.f32.mrf.mxu0  ;;  %v4730_v10 = vmul.f32 0.2, %v4650_v63  ;;  %vm4690_vm4 = vcmp.ge.f32.partialorder %v4650_v63, 0.0 }
 0x716   : > { %v5341_v45 = vsel %vm1903_vm0, %v5338_v60, %v5340_v48  ;;  %v5207_v25 = vpop.f32.mrf.mxu1  ;;  %v4556_v60 = vpop.permute.xlu2 %4555 }
 0x717   : > { %v5453_v11 = vadd.f32 %v5341_v45, %v5096_v26  ;;  %v5540_v49 = vrot.slane %v5207_v25, 1  ;;  %v4649_v20 = vadd.f32 %v4556_v60, %v4368_v24 }
 0x719   : > { %v5541_v54 = vsel %vm3717_vm10, %v5538_v52, %v5540_v49  ;;  %v4729_v23 = vmul.f32 0.2, %v4649_v20  ;;  %vm4689_vm3 = vcmp.ge.f32.partialorder %v4649_v20, 0.0 }
 0x71a   : > { %v12041_v13 = vadd.f32 %v5541_v54, %v5453_v11  ;;  %v4770_v11 = vsel %vm4690_vm4, %v4650_v63, %v4730_v10 }
 0x71b   : > { %v4990_v46 = vpop.f32.mrf.mxu3  ;;  %v4769_v25 = vsel %vm4689_vm3, %v4649_v20, %v4729_v23 }
 0x71c   : > { %v5342_v57 = vrot.slane %v4990_v46, 7  ;;  %v4796_v58 = vpack.c.bf16 %v4770_v11, %v4769_v25 }
 0x71d   : > { %v5101_v33 = vpop.f32.mrf.mxu0 }
 0x71e   : > { %v5343_v35 = vsel %vm1903_vm0, %v5340_v48, %v5342_v57  ;;  %v5210_v55 = vpop.f32.mrf.mxu1  ;;  %v4089_v48 = vmul.f32 %v11948_v27, %v11842_v15  ;;  %v4290_v36 = vpop.permute.xlu2 %4289 }
 0x71f   : > { %v5454_v53 = vadd.f32 %v5343_v35, %v5098_v38  ;;  %v5542_v3 = vrot.slane %v5210_v55, 1  ;;  %v4090_v38 = vmul.f32 %v11948_v27, %v11848_v16  ;;  %v4566_v16 = vpop.permute.xlu0 %4565 }
 0x720   : > { %5032 = vmatmul.bf16.gmra.mxu3 %v4795_v61  ;;  %5140 = vmatmul.bf16.gmra.mxu0 %v4795_v61  ;;  %v4370_v51 = vmul.f32 %v4285_v9, %v4089_v48 }
 0x721   : > { %v5543_v42 = vsel %vm3717_vm10, %v5540_v49, %v5542_v3  ;;  %5249 = vmatmul.bf16.gmra.mxu1 %v4795_v61  ;;  %v4371_v22 = vmul.f32 %v4290_v36, %v4090_v38 }
 0x722   : > { %v12049_v26 = vadd.f32 %v5543_v42, %v5454_v53  ;;  %v4651_v35 = vadd.f32 %v4566_v16, %v4370_v51 }
 0x723   : > { %v4993_v47 = vpop.f32.mrf.mxu3 }
 0x724   : > { %v5344_v29 = vrot.slane %v4993_v47, 7  ;;  %v4731_v8 = vmul.f32 0.2, %v4651_v35  ;;  %vm4691_vm5 = vcmp.ge.f32.partialorder %v4651_v35, 0.0 }
 0x725   : > { %v5103_v31 = vpop.f32.mrf.mxu0 }
 0x726   : > { %v5345_v52 = vsel %vm1903_vm0, %v5342_v57, %v5344_v29  ;;  %v5212_v12 = vpop.f32.mrf.mxu1  ;;  %v4571_v57 = vpop.permute.xlu1 %4570 }
 0x727   : > { %v5455_v0 = vadd.f32 %v5345_v52, %v5101_v33  ;;  %v5544_v30 = vrot.slane %v5212_v12, 1  ;;  %v4652_v55 = vadd.f32 %v4571_v57, %v4371_v22  ;;  %v4295_v47 = vpop.permute.xlu2 %4294  ;;  %v4771_v12 = vsel %vm4691_vm5, %v4651_v35, %v4731_v8  ;;  %v4300_v10 = vpop.permute.xlu0 %4299 }
 0x729   : > { %v5545_v34 = vsel %vm3717_vm10, %v5542_v3, %v5544_v30  ;;  %v4732_v60 = vmul.f32 0.2, %v4652_v55  ;;  %vm4692_vm6 = vcmp.ge.f32.partialorder %v4652_v55, 0.0 }
 0x72a   : > { %v12053_v40 = vadd.f32 %v5545_v34, %v5455_v0 }
 0x72b   : > { %v4995_v45 = vpop.f32.mrf.mxu3  ;;  %v4772_v0 = vsel %vm4692_vm6, %v4652_v55, %v4732_v60 }
 0x72c   : > { %v5346_v49 = vrot.slane %v4995_v45, 7  ;;  %v4797_v48 = vpack.c.bf16 %v4772_v0, %v4771_v12 }
 0x72d   : > { %v5106_v14 = vpop.f32.mrf.mxu0 }
 0x72e   : > { %v5347_v59 = vsel %vm1903_vm0, %v5344_v29, %v5346_v49  ;;  %v5215_v54 = vpop.f32.mrf.mxu1  ;;  %v4091_v29 = vmul.f32 %v11948_v27, %v11854_v39 }
 0x72f   : > { %v5456_v43 = vadd.f32 %v5347_v59, %v5103_v31  ;;  %v5546_v46 = vrot.slane %v5215_v54, 1  ;;  %v4092_v31 = vmul.f32 %v11948_v27, %v11860_v50  ;;  %v4576_v50 = vpop.permute.xlu1 %4575 }
 0x730   : > { %5037 = vmatmul.bf16.gmra.mxu3 %v4796_v58  ;;  %5145 = vmatmul.bf16.gmra.mxu0 %v4796_v58  ;;  %v4372_v25 = vmul.f32 %v4295_v47, %v4091_v29 }
 0x731   : > { %v5547_v15 = vsel %vm3717_vm10, %v5544_v30, %v5546_v46  ;;  %5254 = vmatmul.bf16.gmra.mxu1 %v4796_v58  ;;  %v4373_v11 = vmul.f32 %v4300_v10, %v4092_v31 }
 0x732   : > { %v12061_v33 = vadd.f32 %v5547_v15, %v5456_v43  ;;  %v4653_v59 = vadd.f32 %v4576_v50, %v4372_v25 }
 0x733   : > { %v4998_v18 = vpop.f32.mrf.mxu3 }
 0x734   : > { %v5348_v61 = vrot.slane %v4998_v18, 7  ;;  %v4733_v16 = vmul.f32 0.2, %v4653_v59  ;;  %v4305_v18 = vpop.permute.xlu0 %4304  ;;  %vm4693_vm7 = vcmp.ge.f32.partialorder %v4653_v59, 0.0 }
 0x735   : > { %v5108_v53 = vpop.f32.mrf.mxu0 }
 0x736   : > { %v5349_v3 = vsel %vm1903_vm0, %v5346_v49, %v5348_v61  ;;  %v5217_v24 = vpop.f32.mrf.mxu1  ;;  %v4581_v49 = vpop.permute.xlu2 %4580 }
 0x737   : > { %v5457_v41 = vadd.f32 %v5349_v3, %v5106_v14  ;;  %v5548_v42 = vrot.slane %v5217_v24, 1  ;;  %v4654_v54 = vadd.f32 %v4581_v49, %v4373_v11  ;;  %v4773_v24 = vsel %vm4693_vm7, %v4653_v59, %v4733_v16  ;;  %v4310_v60 = vpop.permute.xlu1 %4309  ;;  %v8354_v11 = vld [vmem:[%s12896_s3 + $0x228] sm:$0xf]  ;;  %v8501_v59 = vld [vmem:[%s12896_s3 + $0x238] sm:$0xf0] }
 0x739   : > { %v5549_v20 = vsel %vm3717_vm10, %v5546_v46, %v5548_v42  ;;  %v4734_v57 = vmul.f32 0.2, %v4654_v54  ;;  %vm4694_vm8 = vcmp.ge.f32.partialorder %v4654_v54, 0.0 }
 0x73a   : > { %v12065_v63 = vadd.f32 %v5549_v20, %v5457_v41 }
 0x73b   : > { %v5000_v52 = vpop.f32.mrf.mxu3  ;;  %v4774_v41 = vsel %vm4694_vm8, %v4654_v54, %v4734_v57 }
 0x73c   : > { %v5350_v30 = vrot.slane %v5000_v52, 7  ;;  %v4798_v29 = vpack.c.bf16 %v4774_v41, %v4773_v24  ;;  %v4591_v10 = vpop.permute.xlu0 %4590 }
 0x73d   : > { %v5111_v23 = vpop.f32.mrf.mxu0 }
 0x73e   : > { %v5351_v9 = vsel %vm1903_vm0, %v5348_v61, %v5350_v30  ;;  %v5220_v34 = vpop.f32.mrf.mxu1  ;;  %v4093_v61 = vmul.f32 %v11948_v27, %v11866_v7  ;;  %v8499_v7 = vld [vmem:[%s12896_s3 + $0x22c] sm:$0xf] }
 0x73f   : > { %v5458_v38 = vadd.f32 %v5351_v9, %v5108_v53  ;;  %v5550_v45 = vrot.slane %v5220_v34, 1  ;;  %v4094_v53 = vmul.f32 %v11948_v27, %v11872_v37  ;;  %v8356_v37 = vld [vmem:[%s12896_s3 + $0x234] sm:$0xf0]  ;;  %v4586_v9 = vpop.permute.xlu2 %4585  ;;  %v4315_v16 = vpop.permute.xlu1 %4314 }
 0x740   : > { %5042 = vmatmul.bf16.gmra.mxu3 %v4797_v48  ;;  %5150 = vmatmul.bf16.gmra.mxu0 %v4797_v48  ;;  %v4374_v12 = vmul.f32 %v4305_v18, %v4093_v61  ;;  %v4096_v61 = vmul.f32 %v11948_v27, %v11662_v21 }
 0x741   : > { %v5551_v39 = vsel %vm3717_vm10, %v5548_v42, %v5550_v45  ;;  %5259 = vmatmul.bf16.gmra.mxu1 %v4797_v48  ;;  %v4375_v0 = vmul.f32 %v4310_v60, %v4094_v53 }
 0x742   : > { %v12073_v14 = vadd.f32 %v5551_v39, %v5458_v38  ;;  %v4655_v38 = vadd.f32 %v4586_v9, %v4374_v12  ;;  %v8500_v39 = vld [vmem:[%s12896_s3 + $0x230] sm:$0xf0] }
 0x743   : > { %v5003_v36 = vpop.f32.mrf.mxu3  ;;  %v8355_v49 = vor.u32 %v8500_v39, %v8354_v11 }
 0x744   : > { %v5352_v58 = vrot.slane %v5003_v36, 7  ;;  %v8362_v36 = vld [vmem:[%s12896_s3 + $0x230] sm:$0xf]  ;;  %vm4695_vm9 = vcmp.ge.f32.partialorder %v4655_v38, 0.0  ;;  %v4596_v21 = vpop.permute.xlu0 %4595 }
 0x745   : > { %v5113_v43 = vpop.f32.mrf.mxu0  ;;  %6773 = vmatpush.bf16.msra.mxu2 %v8355_v49 }
 0x746   : > { %v5353_v46 = vsel %vm1903_vm0, %v5350_v30, %v5352_v58  ;;  %v5222_v51 = vpop.f32.mrf.mxu1  ;;  %v8359_v30 = vor.u32 %v8499_v7, %v8356_v37 }
 0x747   : > { %v5459_v22 = vadd.f32 %v5353_v46, %v5111_v23  ;;  %v5552_v15 = vrot.slane %v5222_v51, 1 }
 0x748   : > { %6881 = vmatpush.bf16.msra.mxu3 %v8359_v30 }
 0x749   : > { %v5553_v35 = vsel %vm3717_vm10, %v5550_v45, %v5552_v15  ;;  %v4656_v45 = vadd.f32 %v4591_v10, %v4375_v0  ;;  %v4601_v0 = vpop.permute.xlu1 %4600 }
 0x74a   : > { %v12077_v55 = vadd.f32 %v5553_v35, %v5459_v22  ;;  %v4735_v22 = vmul.f32 0.2, %v4655_v38  ;;  %v4095_v35 = vmul.f32 %v11948_v27, %v11659_v62 }
 0x74b   : > { %v5005_v3 = vpop.f32.mrf.mxu3  ;;  %vm4696_vm11 = vcmp.ge.f32.partialorder %v4656_v45, 0.0 }
 0x74c   : > { %v5354_v42 = vrot.slane %v5005_v3, 7  ;;  %v4775_v3 = vsel %vm4695_vm9, %v4655_v38, %v4735_v22  ;;  %v4330_v22 = vpop.permute.xlu0 %4329 }
 0x74d   : > { %v5116_v8 = vpop.f32.mrf.mxu0 }
 0x74e   : > { %v5355_v47 = vsel %vm1903_vm0, %v5352_v58, %v5354_v42  ;;  %v5225_v20 = vpop.f32.mrf.mxu1 }
 0x74f   : > { %v5460_v31 = vadd.f32 %v5355_v47, %v5113_v43  ;;  %v5554_v52 = vrot.slane %v5225_v20, 1  ;;  %v8363_v43 = vor.u32 %v8501_v59, %v8362_v36  ;;  %v4097_v36 = vmul.f32 %v11948_v27, %v11665_v32 }
 0x750   : > { %5047 = vmatmul.bf16.gmra.mxu3 %v4798_v29  ;;  %5155 = vmatmul.bf16.gmra.mxu0 %v4798_v29  ;;  %v4098_v59 = vmul.f32 %v11948_v27, %v11668_v56 }
 0x751   : > { %v5555_v23 = vsel %vm3717_vm10, %v5552_v15, %v5554_v52  ;;  %5264 = vmatmul.bf16.gmra.mxu1 %v4798_v29  ;;  %v4736_v15 = vmul.f32 0.2, %v4656_v45  ;;  %6990 = vmatpush.bf16.msra.mxu0 %v8363_v43  ;;  %v4606_v32 = vpop.permute.xlu1 %4605 }
 0x752   : > { %v12091_v34 = vadd.f32 %v5555_v23, %v5460_v31 }
 0x753   : > { %v5008_v48 = vpop.f32.mrf.mxu3  ;;  %v4776_v24 = vsel %vm4696_vm11, %v4656_v45, %v4736_v15 }
 0x754   : > { %v5356_v25 = vrot.slane %v5008_v48, 7  ;;  %v4799_v20 = vpack.c.bf16 %v4776_v24, %v4775_v3 }
 0x755   : > { %v5118_v50 = vpop.f32.mrf.mxu0 }
 0x756   : > { %v5357_v54 = vsel %vm1903_vm0, %v5354_v42, %v5356_v25  ;;  %v5227_v58 = vpop.f32.mrf.mxu1  ;;  %v4320_v42 = vpop.permute.xlu2 %4319 }
 0x757   : > { %v5461_v46 = vadd.f32 %v5357_v54, %v5116_v8  ;;  %v5556_v51 = vrot.slane %v5227_v58, 1  ;;  %v4377_v12 = vmul.f32 %v4320_v42, %v4096_v61 }
 0x759   : > { %v5557_v57 = vsel %vm3717_vm10, %v5554_v52, %v5556_v51  ;;  %v4376_v52 = vmul.f32 %v4315_v16, %v4095_v35  ;;  %v4658_v23 = vadd.f32 %v4601_v0, %v4377_v12 }
 0x75a   : > { %v12107_v18 = vadd.f32 %v5557_v57, %v5461_v46 }
 0x75b   : > { %v5010_v53 = vpop.f32.mrf.mxu3  ;;  %v4657_v30 = vadd.f32 %v4596_v21, %v4376_v52  ;;  %vm4698_vm13 = vcmp.ge.f32.partialorder %v4658_v23, 0.0 }
 0x75c   : > { %v5358_v41 = vrot.slane %v5010_v53, 7  ;;  %v4379_v53 = vmul.f32 %v4330_v22, %v4098_v59 }
 0x75d   : > { %v5121_v8 = vpop.f32.mrf.mxu0  ;;  %v4737_v39 = vmul.f32 0.2, %v4657_v30  ;;  %vm4697_vm12 = vcmp.ge.f32.partialorder %v4657_v30, 0.0 }
 0x75e   : > { %v5359_v60 = vsel %vm1903_vm0, %v5356_v25, %v5358_v41  ;;  %v5230_v47 = vpop.f32.mrf.mxu1  ;;  %v4325_v45 = vpop.permute.xlu2 %4324 }
 0x75f   : > { %v5462_v29 = vadd.f32 %v5359_v60, %v5118_v50  ;;  %v5558_v31 = vrot.slane %v5230_v47, 1  ;;  %v4738_v50 = vmul.f32 0.2, %v4658_v23  ;;  %v4777_v43 = vsel %vm4697_vm12, %v4657_v30, %v4737_v39  ;;  %v8344_v30 = vld [vmem:[%s12896_s3 + $0x21c] sm:$0xf0] }
 0x760   : > { %5052 = vmatmul.bf16.gmra.mxu3 %v4799_v20  ;;  %5160 = vmatmul.bf16.gmra.mxu0 %v4799_v20  ;;  %v4378_v61 = vmul.f32 %v4325_v45, %v4097_v36  ;;  %v4100_v45 = vmul.f32 %v11948_v27, %v11674_v5  ;;  %v8497_v36 = vld [vmem:[%s12896_s3 + $0x218] sm:$0xf0]  ;;  %v8498_v5 = vld [vmem:[%s12896_s3 + $0x220] sm:$0xf0] }
 0x761   : > { %v5559_v62 = vsel %vm3717_vm10, %v5556_v51, %v5558_v31  ;;  %5269 = vmatmul.bf16.gmra.mxu1 %v4799_v20  ;;  %v4778_v46 = vsel %vm4698_vm13, %v4658_v23, %v4738_v50  ;;  %v4335_v23 = vpop.permute.xlu0 %4334 }
 0x762   : > { %v12115_v7 = vadd.f32 %v5559_v62, %v5462_v29  ;;  %v4800_v35 = vpack.c.bf16 %v4778_v46, %v4777_v43 }
 0x763   : > { %v5013_v37 = vpop.f32.mrf.mxu3 }
 0x764   : > { %v5360_v10 = vrot.slane %v5013_v37, 7  ;;  %v8496_v37 = vld [vmem:[%s12896_s3 + $0x214] sm:$0xf] }
 0x765   : > { %v5123_v9 = vpop.f32.mrf.mxu0 }
 0x766   : > { %v5361_v48 = vsel %vm1903_vm0, %v5358_v41, %v5360_v10  ;;  %v5232_v38 = vpop.f32.mrf.mxu1  ;;  %v4611_v56 = vpop.permute.xlu2 %4610 }
 0x767   : > { %v5463_v25 = vadd.f32 %v5361_v48, %v5121_v8  ;;  %v5560_v11 = vrot.slane %v5232_v38, 1  ;;  %v4659_v8 = vadd.f32 %v4606_v32, %v4378_v61  ;;  %v4660_v60 = vadd.f32 %v4611_v56, %v4379_v53 }
 0x768   : > { %v4099_v38 = vmul.f32 %v11948_v27, %v11671_v2  ;;  %v8350_v2 = vld [vmem:[%s12896_s3 + $0x218] sm:$0xf]  ;;  %v4340_v27 = vpop.permute.xlu1 %4339 }
 0x769   : > { %v5561_v49 = vsel %vm3717_vm10, %v5558_v31, %v5560_v11  ;;  %v4739_v12 = vmul.f32 0.2, %v4659_v8  ;;  %v4740_v62 = vmul.f32 0.2, %v4660_v60  ;;  %vm4699_vm14 = vcmp.ge.f32.partialorder %v4659_v8, 0.0  ;;  %v4621_v53 = vpop.permute.xlu0 %4620 }
 0x76a   : > { %v12123_v54 = vadd.f32 %v5561_v49, %v5463_v25  ;;  %vm4700_vm15 = vcmp.ge.f32.partialorder %v4660_v60, 0.0  ;;  %v8342_v49 = vld [vmem:[%s12896_s3 + $0x210] sm:$0xf]  ;;  %v8351_v22 = vor.u32 %v8498_v5, %v8350_v2 }
 0x76b   : > { %v5015_v58 = vpop.f32.mrf.mxu3  ;;  %v4780_v39 = vsel %vm4700_vm15, %v4660_v60, %v4740_v62 }
 0x76c   : > { %v5362_v51 = vrot.slane %v5015_v58, 7  ;;  %v8343_v58 = vor.u32 %v8497_v36, %v8342_v49  ;;  %6991 = vmatpush.bf16.msra.mxu0 %v8351_v22 }
 0x76d   : > { %v5126_v15 = vpop.f32.mrf.mxu0 }
 0x76e   : > { %v5363_v16 = vsel %vm1903_vm0, %v5360_v10, %v5362_v51  ;;  %v5235_v57 = vpop.f32.mrf.mxu1  ;;  %v8347_v10 = vor.u32 %v8496_v37, %v8344_v30  ;;  %6774 = vmatpush.bf16.msra.mxu2 %v8343_v58 }
 0x76f   : > { %v5464_v3 = vadd.f32 %v5363_v16, %v5123_v9  ;;  %v5562_v24 = vrot.slane %v5235_v57, 1 }
 0x770   : > { %5057 = vmatmul.bf16.gmra.mxu3 %v4800_v35  ;;  %5165 = vmatmul.bf16.gmra.mxu0 %v4800_v35 }
 0x771   : > { %v5563_v41 = vsel %vm3717_vm10, %v5560_v11, %v5562_v24  ;;  %5274 = vmatmul.bf16.gmra.mxu1 %v4800_v35  ;;  %6882 = vmatpush.bf16.msra.mxu3 %v8347_v10  ;;  %v4779_v11 = vsel %vm4699_vm14, %v4659_v8, %v4739_v12  ;;  %v4380_v35 = vmul.f32 %v4335_v23, %v4099_v38 }
 0x772   : > { %v12127_v42 = vadd.f32 %v5563_v41, %v5464_v3  ;;  %v4616_v3 = vpop.permute.xlu2 %4615 }
 0x773   : > { %v5018_v47 = vpop.f32.mrf.mxu3  ;;  %v4661_v56 = vadd.f32 %v4616_v3, %v4380_v35  ;;  %v8332_v3 = vld [vmem:[%s12896_s3 + $0x204] sm:$0xf0] }
 0x774   : > { %v5364_v20 = vrot.slane %v5018_v47, 7 }
 0x775   : > { %v5128_v29 = vpop.f32.mrf.mxu0  ;;  %vm4701_vm1 = vcmp.ge.f32.partialorder %v4661_v56, 0.0 }
 0x776   : > { %v5365_v31 = vsel %vm1903_vm0, %v5362_v51, %v5364_v20  ;;  %v5237_v52 = vpop.f32.mrf.mxu1  ;;  %v4801_v51 = vpack.c.bf16 %v4780_v39, %v4779_v11 }
 0x777   : > { %v5465_v21 = vadd.f32 %v5365_v31, %v5126_v15  ;;  %v5564_v0 = vrot.slane %v5237_v52, 1  ;;  %v4381_v15 = vmul.f32 %v4340_v27, %v4100_v45  ;;  %v4741_v52 = vmul.f32 0.2, %v4661_v56 }
 0x779   : > { %v5565_v9 = vsel %vm3717_vm10, %v5562_v24, %v5564_v0  ;;  %v4662_v41 = vadd.f32 %v4621_v53, %v4381_v15  ;;  %v4781_v37 = vsel %vm4701_vm1, %v4661_v56, %v4741_v52  ;;  %v8493_v53 = vld [vmem:[%s12896_s3 + $0x1fc] sm:$0xf]  ;;  %v8338_v52 = vld [vmem:[%s12896_s3 + $0x200] sm:$0xf] }
 0x77a   : > { %v12137_v48 = vadd.f32 %v5565_v9, %v5465_v21 }
 0x77b   : > { %v5020_v25 = vpop.f32.mrf.mxu3  ;;  %v4742_v12 = vmul.f32 0.2, %v4662_v41  ;;  %vm4702_vm2 = vcmp.ge.f32.partialorder %v4662_v41, 0.0 }
 0x77c   : > { %v5366_v50 = vrot.slane %v5020_v25, 7 }
 0x77d   : > { %v5131_v59 = vpop.f32.mrf.mxu0  ;;  %v4782_v30 = vsel %vm4702_vm2, %v4662_v41, %v4742_v12  ;;  %v8495_v12 = vld [vmem:[%s12896_s3 + $0x208] sm:$0xf0] }
 0x77e   : > { %v5367_v43 = vsel %vm1903_vm0, %v5364_v20, %v5366_v50  ;;  %v5240_v46 = vpop.f32.mrf.mxu1  ;;  %v4802_v45 = vpack.c.bf16 %v4782_v30, %v4781_v37  ;;  %v8339_v37 = vor.u32 %v8495_v12, %v8338_v52 }
 0x77f   : > { %v5466_v16 = vadd.f32 %v5367_v43, %v5128_v29  ;;  %v5566_v57 = vrot.slane %v5240_v46, 1 }
 0x780   : > { %5062 = vmatmul.bf16.gmra.mxu3 %v4801_v51  ;;  %5170 = vmatmul.bf16.gmra.mxu0 %v4801_v51 }
 0x781   : > { %v5567_v61 = vsel %vm3717_vm10, %v5564_v0, %v5566_v57  ;;  %5279 = vmatmul.bf16.gmra.mxu1 %v4801_v51  ;;  %6992 = vmatpush.bf16.msra.mxu0 %v8339_v37  ;;  %v8490_v37 = vld [vmem:[%s12896_s3 + $0x1e4] sm:$0xf] }
 0x782   : > { %v12157_v24 = vadd.f32 %v5567_v61, %v5466_v16 }
 0x783   : > { %v5023_v32 = vpop.f32.mrf.mxu3 }
 0x784   : > { %13355 = vst [vmem:[#allocation39_spill] sm:$0xff] %v12157_v24  ;;  %v5368_v8 = vrot.slane %v5023_v32, 7  ;;  %v8335_v32 = vor.u32 %v8493_v53, %v8332_v3 }
 0x785   : > { %v5133_v60 = vpop.f32.mrf.mxu0 }
 0x786   : > { %v5369_v47 = vsel %vm1903_vm0, %v5366_v50, %v5368_v8  ;;  %v5242_v20 = vpop.f32.mrf.mxu1  ;;  %6883 = vmatpush.bf16.msra.mxu3 %v8335_v32 }
 0x787   : > { %v5467_v29 = vadd.f32 %v5369_v47, %v5131_v59  ;;  %v5568_v31 = vrot.slane %v5242_v20, 1  ;;  %v8330_v47 = vld [vmem:[%s12896_s3 + $0x1f8] sm:$0xf]  ;;  %v8494_v20 = vld [vmem:[%s12896_s3 + $0x200] sm:$0xf0] }
 0x789   : > { %v5569_v62 = vsel %vm3717_vm10, %v5566_v57, %v5568_v31 }
 0x78a   : > { %v12161_v21 = vadd.f32 %v5569_v62, %v5467_v29 }
 0x78b   : > { %v5025_v0 = vpop.f32.mrf.mxu3 }
 0x78c   : > { %v5370_v23 = vrot.slane %v5025_v0, 7 }
 0x78d   : > { %v5136_v10 = vpop.f32.mrf.mxu0 }
 0x78e   : > { %v5371_v9 = vsel %vm1903_vm0, %v5368_v8, %v5370_v23  ;;  %v5245_v38 = vpop.f32.mrf.mxu1 }
 0x78f   : > { %v5468_v25 = vadd.f32 %v5371_v9, %v5133_v60  ;;  %v5570_v11 = vrot.slane %v5245_v38, 1 }
 0x790   : > { %5067 = vmatmul.bf16.gmra.mxu3 %v4802_v45  ;;  %5175 = vmatmul.bf16.gmra.mxu0 %v4802_v45 }
 0x791   : > { %v5571_v39 = vsel %vm3717_vm10, %v5568_v31, %v5570_v11  ;;  %5284 = vmatmul.bf16.gmra.mxu1 %v4802_v45  ;;  %v8331_v31 = vor.u32 %v8494_v20, %v8330_v47 }
 0x792   : > { %v12165_v50 = vadd.f32 %v5571_v39, %v5468_v25 }
 0x793   : > { %v5028_v49 = vpop.f32.mrf.mxu3  ;;  %6775 = vmatpush.bf16.msra.mxu2 %v8331_v31 }
 0x794   : > { %v5372_v36 = vrot.slane %v5028_v49, 7 }
 0x795   : > { %v5138_v59 = vpop.f32.mrf.mxu0 }
 0x796   : > { %v5373_v58 = vsel %vm1903_vm0, %v5370_v23, %v5372_v36  ;;  %v5247_v2 = vpop.f32.mrf.mxu1 }
 0x797   : > { %v5469_v5 = vadd.f32 %v5373_v58, %v5136_v10  ;;  %v5572_v27 = vrot.slane %v5247_v2, 1 }
 0x799   : > { %v5573_v43 = vsel %vm3717_vm10, %v5570_v11, %v5572_v27 }
 0x79a   : > { %v12169_v46 = vadd.f32 %v5573_v43, %v5469_v5 }
 0x79b   : > { %v5030_v51 = vpop.f32.mrf.mxu3 }
 0x79c   : > { %v5374_v22 = vrot.slane %v5030_v51, 7 }
 0x79d   : > { %v5141_v15 = vpop.f32.mrf.mxu0 }
 0x79e   : > { %v5375_v16 = vsel %vm1903_vm0, %v5372_v36, %v5374_v22  ;;  %v5250_v57 = vpop.f32.mrf.mxu1 }
 0x79f   : > { %v5470_v35 = vadd.f32 %v5375_v16, %v5138_v59  ;;  %v5574_v61 = vrot.slane %v5250_v57, 1 }
 0x7a1   : > { %v5575_v56 = vsel %vm3717_vm10, %v5572_v27, %v5574_v61 }
 0x7a2   : > { %v12179_v41 = vadd.f32 %v5575_v56, %v5470_v35 }
 0x7a3   : > { %v5033_v8 = vpop.f32.mrf.mxu3 }
 0x7a4   : > { %v5376_v60 = vrot.slane %v5033_v8, 7 }
 0x7a5   : > { %v5143_v29 = vpop.f32.mrf.mxu0 }
 0x7a6   : > { %v5377_v62 = vsel %vm1903_vm0, %v5374_v22, %v5376_v60  ;;  %v5252_v0 = vpop.f32.mrf.mxu1 }
 0x7a7   : > { %v5471_v30 = vadd.f32 %v5377_v62, %v5141_v15  ;;  %v5576_v23 = vrot.slane %v5252_v0, 1 }
 0x7a9   : > { %v5577_v10 = vsel %vm3717_vm10, %v5574_v61, %v5576_v23 }
 0x7aa   : > { %v12195_v9 = vadd.f32 %v5577_v10, %v5471_v30  ;;  %v8320_v30 = vld [vmem:[%s12896_s3 + $0x1ec] sm:$0xf0] }
 0x7ab   : > { %v5035_v38 = vpop.f32.mrf.mxu3 }
 0x7ac   : > { %13356 = vst [vmem:[#allocation45_spill] sm:$0xff] %v12195_v9  ;;  %v5378_v45 = vrot.slane %v5035_v38, 7 }
 0x7ad   : > { %v5146_v25 = vpop.f32.mrf.mxu0 }
 0x7ae   : > { %v5379_v11 = vsel %vm1903_vm0, %v5376_v60, %v5378_v45  ;;  %v5255_v39 = vpop.f32.mrf.mxu1 }
 0x7af   : > { %v5472_v49 = vadd.f32 %v5379_v11, %v5143_v29  ;;  %v5578_v36 = vrot.slane %v5255_v39, 1  ;;  %v8491_v11 = vld [vmem:[%s12896_s3 + $0x1e8] sm:$0xf0] }
 0x7b1   : > { %v5579_v59 = vsel %vm3717_vm10, %v5576_v23, %v5578_v36  ;;  %v8323_v23 = vor.u32 %v8490_v37, %v8320_v30 }
 0x7b2   : > { %v12199_v58 = vadd.f32 %v5579_v59, %v5472_v49  ;;  %v8492_v59 = vld [vmem:[%s12896_s3 + $0x1f0] sm:$0xf0] }
 0x7b3   : > { %v5038_v2 = vpop.f32.mrf.mxu3  ;;  %6884 = vmatpush.bf16.msra.mxu3 %v8323_v23 }
 0x7b4   : > { %v5380_v5 = vrot.slane %v5038_v2, 7 }
 0x7b5   : > { %v5148_v27 = vpop.f32.mrf.mxu0 }
 0x7b6   : > { %v5381_v43 = vsel %vm1903_vm0, %v5378_v45, %v5380_v5  ;;  %v5257_v51 = vpop.f32.mrf.mxu1 }
 0x7b7   : > { %v5473_v22 = vadd.f32 %v5381_v43, %v5146_v25  ;;  %v5580_v15 = vrot.slane %v5257_v51, 1  ;;  %v8318_v25 = vld [vmem:[%s12896_s3 + $0x1e0] sm:$0xf] }
 0x7b8   : > { %v8319_v49 = vor.u32 %v8491_v11, %v8318_v25 }
 0x7b9   : > { %v5581_v16 = vsel %vm3717_vm10, %v5578_v36, %v5580_v15  ;;  %v8326_v36 = vld [vmem:[%s12896_s3 + $0x1e8] sm:$0xf] }
 0x7ba   : > { %v12203_v57 = vadd.f32 %v5581_v16, %v5473_v22  ;;  %6776 = vmatpush.bf16.msra.mxu2 %v8319_v49 }
 0x7bb   : > { %v5040_v35 = vpop.f32.mrf.mxu3 }
 0x7bc   : > { %v5382_v61 = vrot.slane %v5040_v35, 7 }
 0x7bd   : > { %v5151_v53 = vpop.f32.mrf.mxu0 }
 0x7be   : > { %v5383_v3 = vsel %vm1903_vm0, %v5380_v5, %v5382_v61  ;;  %v5260_v32 = vpop.f32.mrf.mxu1  ;;  %v8327_v5 = vor.u32 %v8492_v59, %v8326_v36 }
 0x7bf   : > { %v5474_v56 = vadd.f32 %v5383_v3, %v5148_v27  ;;  %v5582_v8 = vrot.slane %v5260_v32, 1  ;;  %v5685_v27 = vadd.f32 %v12013_v6, %v12005_v28 }
 0x7c0   : > { %6993 = vmatpush.bf16.msra.mxu0 %v8327_v5 }
 0x7c1   : > { %v5583_v60 = vsel %vm3717_vm10, %v5580_v15, %v5582_v8  ;;  %v5686_v51 = vadd.f32 %v5685_v27, %v12017_v1 }
 0x7c2   : > { %v12207_v47 = vadd.f32 %v5583_v60, %v5474_v56 }
 0x7c3   : > { %v12209_v20 = vpop.f32.mrf.mxu3  ;;  %v5687_v15 = vadd.f32 %v5686_v51, %v12025_v19  ;;  %v8487_v51 = vld [vmem:[%s12896_s3 + $0x1cc] sm:$0xf] }
 0x7c4   : > { %v12978_v29 = vrot.slane %v12209_v20, 7 }
 0x7c5   : > { %v12212_v31 = vpop.f32.mrf.mxu0  ;;  %v5688_v35 = vadd.f32 %v5687_v15, %v12029_v17  ;;  %v8308_v15 = vld [vmem:[%s12896_s3 + $0x1d4] sm:$0xf0] }
 0x7c6   : > { %v5385_v52 = vsel %vm1903_vm0, %v5382_v61, %v12978_v29  ;;  %v12217_v12 = vpop.f32.mrf.mxu1 }
 0x7c7   : > { %v5475_v62 = vadd.f32 %v5385_v52, %v5151_v53  ;;  %v12977_v0 = vrot.slane %v12217_v12, 1  ;;  %v5689_v61 = vadd.f32 %v5688_v35, %v12037_v4 }
 0x7c9   : > { %v5585_v10 = vsel %vm3717_vm10, %v5582_v8, %v12977_v0  ;;  %v5690_v3 = vadd.f32 %v5689_v61, %v12041_v13  ;;  %v8311_v61 = vor.u32 %v8487_v51, %v8308_v15 }
 0x7ca   : > { %v12229_v38 = vadd.f32 %v5585_v10, %v5475_v62 }
 0x7cb   : > { %v12231_v45 = vpop.f32.mrf.mxu3  ;;  %v5691_v56 = vadd.f32 %v5690_v3, %v12049_v26  ;;  %6885 = vmatpush.bf16.msra.mxu3 %v8311_v61 }
 0x7cd   : > { %v12239_v39 = vpop.f32.mrf.mxu0  ;;  %v5692_v60 = vadd.f32 %v5691_v56, %v12053_v40 }
 0x7ce   : > { %v12247_v2 = vpop.f32.mrf.mxu1 }
 0x7cf   : > { %v5693_v52 = vadd.f32 %v5692_v60, %v12061_v33 }
 0x7d1   : > { %v5694_v37 = vadd.f32 %v5693_v52, %v12065_v63  ;;  %v8306_v52 = vld [vmem:[%s12896_s3 + $0x1c8] sm:$0xf] }
 0x7d3   : > { %v12251_v43 = vpop.f32.mrf.mxu3  ;;  %v5695_v23 = vadd.f32 %v5694_v37, %v12073_v14  ;;  %v8488_v37 = vld [vmem:[%s12896_s3 + $0x1d0] sm:$0xf0] }
 0x7d4   : > { %v5388_v0 = vrot.slane %v12251_v43, 7 }
 0x7d5   : > { %v12254_v22 = vpop.f32.mrf.mxu0  ;;  %v5696_v25 = vadd.f32 %v5695_v23, %v12077_v55 }
 0x7d6   : > { %v12257_v16 = vpop.f32.mrf.mxu1 }
 0x7d7   : > { %v5697_v11 = vadd.f32 %v5696_v25, %v12091_v34  ;;  %v8307_v25 = vor.u32 %v8488_v37, %v8306_v52  ;;  %v5588_v43 = vrot.slane %v12257_v16, 1 }
 0x7d9   : > { %v5698_v36 = vadd.f32 %v5697_v11, %v12107_v18  ;;  %v8314_v11 = vld [vmem:[%s12896_s3 + $0x1d0] sm:$0xf]  ;;  %6777 = vmatpush.bf16.msra.mxu2 %v8307_v25  ;;  %v13357_v25 = vrot.slane %v12209_v20, 7  ;;  %v13358_v20 = vrot.slane %v12217_v12, 1 }
 0x7db   : > { %v12261_v53 = vpop.f32.mrf.mxu3  ;;  %v5699_v5 = vadd.f32 %v5698_v36, %v12115_v7  ;;  %v8489_v36 = vld [vmem:[%s12896_s3 + $0x1d8] sm:$0xf0] }
 0x7dc   : > { %v8315_v15 = vor.u32 %v8489_v36, %v8314_v11  ;;  %v5586_v36 = vrot.slane %v12247_v2, 1 }
 0x7dd   : > { %v12264_v32 = vpop.f32.mrf.mxu0  ;;  %v5700_v35 = vadd.f32 %v5699_v5, %v12123_v54 }
 0x7de   : > { %v12267_v8 = vpop.f32.mrf.mxu1  ;;  %6994 = vmatpush.bf16.msra.mxu0 %v8315_v15 }
 0x7df   : > { %v5701_v3 = vadd.f32 %v5700_v35, %v12127_v42 }
 0x7e1   : > { %v5702_v60 = vadd.f32 %v5701_v3, %v12137_v48  ;;  %v5386_v3 = vrot.slane %v12231_v45, 7 }
 0x7e3   : > { %v12271_v62 = vpop.f32.mrf.mxu3  ;;  %v5703_v5 = vadd.f32 %v5702_v60, %v12157_v24  ;;  %v5387_v11 = vsel %vm1903_vm0, %v13357_v25, %v5386_v3  ;;  %v5389_v15 = vsel %vm1903_vm0, %v5386_v3, %v5388_v0  ;;  %v5587_v25 = vsel %vm3717_vm10, %v13358_v20, %v5586_v36 }
 0x7e4   : > { %v5477_v16 = vadd.f32 %v5389_v15, %v12239_v39 }
 0x7e5   : > { %v12274_v30 = vpop.f32.mrf.mxu0  ;;  %v5704_v35 = vadd.f32 %v5703_v5, %v12161_v21  ;;  %v5390_v5 = vrot.slane %v12261_v53, 7  ;;  %v5590_v53 = vrot.slane %v12267_v8, 1 }
 0x7e6   : > { %v12277_v10 = vpop.f32.mrf.mxu1 }
 0x7e7   : > { %v5705_v61 = vadd.f32 %v5704_v35, %v12165_v50  ;;  %v5392_v35 = vrot.slane %v12271_v62, 7  ;;  %v5391_v2 = vsel %vm1903_vm0, %v5388_v0, %v5390_v5  ;;  %v5589_v62 = vsel %vm3717_vm10, %v5586_v36, %v5588_v43 }
 0x7e8   : > { %v5478_v8 = vadd.f32 %v5391_v2, %v12254_v22 }
 0x7e9   : > { %v5706_v37 = vadd.f32 %v5705_v61, %v12169_v46 }
 0x7eb   : > { %v12281_v49 = vpop.f32.mrf.mxu3  ;;  %v5707_v60 = vadd.f32 %v5706_v37, %v12179_v41  ;;  %v5476_v37 = vadd.f32 %v5387_v11, %v12212_v31  ;;  %v5592_v31 = vrot.slane %v12277_v10, 1  ;;  %v12358_v10 = vadd.f32 %v5589_v62, %v5477_v16 }
 0x7ed   : > { %v12284_v59 = vpop.f32.mrf.mxu0  ;;  %v5708_v45 = vadd.f32 %v5707_v60, %v12195_v9  ;;  %v5394_v60 = vrot.slane %v12281_v49, 7  ;;  %v12351_v20 = vadd.f32 %v5587_v25, %v5476_v37 }
 0x7ee   : > { %v12287_v27 = vpop.f32.mrf.mxu1 }
 0x7ef   : > { %v5709_v61 = vadd.f32 %v5708_v45, %v12199_v58  ;;  %v5393_v45 = vsel %vm1903_vm0, %v5390_v5, %v5392_v35  ;;  %v5395_v39 = vsel %vm1903_vm0, %v5392_v35, %v5394_v60  ;;  %v5594_v36 = vrot.slane %v12287_v27, 1 }
 0x7f0   : > { %v5480_v27 = vadd.f32 %v5395_v39, %v12274_v30 }
 0x7f1   : > { %v5710_v3 = vadd.f32 %v5709_v61, %v12203_v57  ;;  %v5591_v61 = vsel %vm3717_vm10, %v5588_v43, %v5590_v53 }
 0x7f2   : > { %v12365_v2 = vadd.f32 %v5591_v61, %v5478_v8 }
 0x7f3   : > { %v12297_v56 = vpop.f32.mrf.mxu3  ;;  %v5711_v0 = vadd.f32 %v5710_v3, %v12207_v47  ;;  %v5593_v3 = vsel %vm3717_vm10, %v5590_v53, %v5592_v31 }
 0x7f4   : > { %v5396_v12 = vrot.slane %v12297_v56, 7  ;;  %v5479_v56 = vadd.f32 %v5393_v45, %v12264_v32 }
 0x7f5   : > { %v12306_v23 = vpop.f32.mrf.mxu0  ;;  %v5712_v5 = vadd.f32 %v5711_v0, %v12229_v38 }
 0x7f6   : > { %v12315_v51 = vpop.f32.mrf.mxu1  ;;  %v5397_v37 = vsel %vm1903_vm0, %v5394_v60, %v5396_v12  ;;  %v12372_v62 = vadd.f32 %v5593_v3, %v5479_v56 }
 0x7f7   : > { %v5596_v22 = vrot.slane %v12315_v51, 1  ;;  %v5713_v43 = vadd.f32 %v5712_v5, %v12351_v20  ;;  %v5481_v51 = vadd.f32 %v5397_v37, %v12284_v59 }
 0x7f9   : > { %v5714_v53 = vadd.f32 %v5713_v43, %v12358_v10  ;;  %v5597_v60 = vsel %vm3717_vm10, %v5594_v36, %v5596_v22 }
 0x7fa   : > { %v5679_v56 = vadd.f32 %v5597_v60, %v5481_v51 }
 0x7fb   : > { %v5060_v52 = vpop.f32.mrf.mxu3 }
 0x7fc   : > { %v5398_v15 = vrot.slane %v5060_v52, 7  ;;  %v5595_v52 = vsel %vm3717_vm10, %v5592_v31, %v5594_v36  ;;  %v5715_v31 = vadd.f32 %v5714_v53, %v12365_v2 }
 0x7fd   : > { %v12322_v29 = vpop.f32.mrf.mxu0  ;;  %v12378_v8 = vadd.f32 %v5595_v52, %v5480_v27 }
 0x7fe   : > { %v12325_v24 = vpop.f32.mrf.mxu1  ;;  %v5399_v35 = vsel %vm1903_vm0, %v5396_v12, %v5398_v15  ;;  %v5716_v59 = vadd.f32 %v5715_v31, %v12372_v62 }
 0x7ff   : > { %v5598_v16 = vrot.slane %v12325_v24, 1  ;;  %v5482_v24 = vadd.f32 %v5399_v35, %v12306_v23 }
 0x801   : > { %v5599_v61 = vsel %vm3717_vm10, %v5596_v22, %v5598_v16 }
 0x802   : > { %v5680_v3 = vadd.f32 %v5599_v61, %v5482_v24 }
 0x803   : > { %v5063_v9 = vpop.f32.mrf.mxu3 }
 0x804   : > { %v5400_v25 = vrot.slane %v5063_v9, 7 }
 0x805   : > { %v5173_v11 = vpop.f32.mrf.mxu0 }
 0x806   : > { %v5282_v49 = vpop.f32.mrf.mxu1  ;;  %v5401_v45 = vsel %vm1903_vm0, %v5398_v15, %v5400_v25  ;;  %v5717_v15 = vadd.f32 %v5716_v59, %v12378_v8 }
 0x807   : > { %v5600_v0 = vrot.slane %v5282_v49, 1  ;;  %v5483_v36 = vadd.f32 %v5401_v45, %v12322_v29 }
 0x808   : > { %v5718_v27 = vadd.f32 %v5717_v15, %v5679_v56 }
 0x809   : > { %v5601_v49 = vsel %vm3717_vm10, %v5598_v16, %v5600_v0 }
 0x80a   : > { %v5681_v52 = vadd.f32 %v5601_v49, %v5483_v36  ;;  %v5719_v35 = vadd.f32 %v5718_v27, %v5680_v3 }
 0x80b   : > { %v5065_v32 = vpop.f32.mrf.mxu3 }
 0x80c   : > { %v5402_v9 = vrot.slane %v5065_v32, 7  ;;  %v5720_v45 = vadd.f32 %v5719_v35, %v5681_v52 }
 0x80d   : > { %v5176_v30 = vpop.f32.mrf.mxu0 }
 0x80e   : > { %v5285_v12 = vpop.f32.mrf.mxu1  ;;  %v5403_v39 = vsel %vm1903_vm0, %v5400_v25, %v5402_v9 }
 0x80f   : > { %v5602_v5 = vrot.slane %v5285_v12, 1  ;;  %v5484_v37 = vadd.f32 %v5403_v39, %v5173_v11 }
 0x811   : > { %v5603_v43 = vsel %vm3717_vm10, %v5600_v0, %v5602_v5 }
 0x812   : > { %v5682_v25 = vadd.f32 %v5603_v43, %v5484_v37 }
 0x813   : > { %v5068_v23 = vpop.f32.mrf.mxu3 }
 0x814   : > { %v5404_v22 = vrot.slane %v5068_v23, 7  ;;  %v5721_v24 = vadd.f32 %v5720_v45, %v5682_v25 }
 0x815   : > { %v5178_v53 = vpop.f32.mrf.mxu0 }
 0x816   : > { %v5405_v32 = vsel %vm1903_vm0, %v5402_v9, %v5404_v22  ;;  %v5287_v51 = vpop.f32.mrf.mxu1  ;;  %v5486_v16 = vadd.f32 %v5404_v22, %v5178_v53 }
 0x817   : > { %v5485_v60 = vadd.f32 %v5405_v32, %v5176_v30  ;;  %v5604_v29 = vrot.slane %v5287_v51, 1 }
 0x818   : > { %v5723_v61 = vsel %vm1903_vm0, %v5486_v16, 0.0 }
 0x819   : > { %v5605_v31 = vsel %vm3717_vm10, %v5602_v5, %v5604_v29 }
 0x81a   : > { %v5683_v11 = vadd.f32 %v5605_v31, %v5485_v60 }
 0x81b   : > { %v5070_v12 = vpop.f32.mrf.mxu3 }
 0x81c   : > { %v5722_v0 = vadd.f32 %v5721_v24, %v5683_v11 }
 0x81e   : > { %v5724_v39 = vadd.f32 %v5723_v61, %v5722_v0 }
 0x820   : > { %v5725_v59 = vrot.slane %v5724_v39, 4 }
 0x822   : > { %v5726_v36 = vadd.f32 %v5725_v59, %v5724_v39 }
 0x824   : > { %v5727_v49 = vrot.slane %v5726_v36, 2 }
 0x826   : > { %v5728_v15 = vadd.f32 %v5727_v49, %v5726_v36 }
 0x828   : > { %v5729_v9 = vrot.slane %v5728_v15, 1 }
 0x82a   : > { %v5730_v37 = vadd.f32 %v5729_v9, %v5728_v15 }
 0x82c   : > { %v12392_v30 = vmul.f32 %v5730_v37, %v10801_v44 }
 0x82e   : > { %v12395_v43 = vsub.f32 %v5679_v56, %v12392_v30  ;;  %v12398_v5 = vsub.f32 %v5680_v3, %v12392_v30  ;;  %v12401_v23 = vsub.f32 %v5681_v52, %v12392_v30  ;;  %v12404_v27 = vsub.f32 %v5682_v25, %v12392_v30 }
 0x82f   : > { %v12407_v22 = vsub.f32 %v5683_v11, %v12392_v30  ;;  %v12410_v35 = vsub.f32 %v5486_v16, %v12392_v30  ;;  %v12414_v32 = vsub.f32 %v12005_v28, %v12392_v30  ;;  %v12418_v56 = vsub.f32 %v12013_v6, %v12392_v30 }
 0x830   : > { %v12422_v3 = vsub.f32 %v12017_v1, %v12392_v30  ;;  %v12430_v53 = vsub.f32 %v12025_v19, %v12392_v30  ;;  %v12434_v28 = vsub.f32 %v12029_v17, %v12392_v30  ;;  %v12440_v1 = vsub.f32 %v12037_v4, %v12392_v30 }
 0x831   : > { %v5772_v52 = vmul.f32 %v12414_v32, %v12414_v32  ;;  %v5773_v25 = vmul.f32 %v12418_v56, %v12418_v56  ;;  %v12446_v19 = vsub.f32 %v12041_v13, %v12392_v30  ;;  %v12452_v16 = vsub.f32 %v12049_v26, %v12392_v30 }
 0x832   : > { %v5774_v6 = vmul.f32 %v12422_v3, %v12422_v3  ;;  %v5775_v60 = vmul.f32 %v12430_v53, %v12430_v53  ;;  %v5776_v17 = vmul.f32 %v12434_v28, %v12434_v28  ;;  %v5777_v4 = vmul.f32 %v12440_v1, %v12440_v1 }
 0x833   : > { %v5812_v51 = vadd.f32 %v5773_v25, %v5772_v52  ;;  %v12458_v24 = vsub.f32 %v12053_v40, %v12392_v30  ;;  %v5778_v13 = vmul.f32 %v12446_v19, %v12446_v19  ;;  %v12464_v12 = vsub.f32 %v12061_v33, %v12392_v30 }
 0x834   : > { %v5779_v26 = vmul.f32 %v12452_v16, %v12452_v16  ;;  %v12470_v61 = vsub.f32 %v12065_v63, %v12392_v30  ;;  %v12476_v59 = vsub.f32 %v12073_v14, %v12392_v30  ;;  %v12482_v49 = vsub.f32 %v12077_v55, %v12392_v30 }
 0x835   : > { %v5813_v29 = vadd.f32 %v5812_v51, %v5774_v6  ;;  %v5780_v40 = vmul.f32 %v12458_v24, %v12458_v24  ;;  %v5781_v33 = vmul.f32 %v12464_v12, %v12464_v12  ;;  %v12488_v9 = vsub.f32 %v12091_v34, %v12392_v30 }
 0x836   : > { %v5782_v63 = vmul.f32 %v12470_v61, %v12470_v61  ;;  %v5783_v14 = vmul.f32 %v12476_v59, %v12476_v59  ;;  %v12494_v52 = vsub.f32 %v12107_v18, %v12392_v30  ;;  %v5784_v55 = vmul.f32 %v12482_v49, %v12482_v49 }
 0x837   : > { %v5814_v45 = vadd.f32 %v5813_v29, %v5775_v60  ;;  %v12500_v6 = vsub.f32 %v12115_v7, %v12392_v30  ;;  %v5785_v34 = vmul.f32 %v12488_v9, %v12488_v9  ;;  %v12506_v60 = vsub.f32 %v12123_v54, %v12392_v30 }
 0x838   : > { %v5786_v18 = vmul.f32 %v12494_v52, %v12494_v52 }
 0x839   : > { %v5815_v31 = vadd.f32 %v5814_v45, %v5776_v17  ;;  %v12512_v17 = vsub.f32 %v12127_v42, %v12392_v30  ;;  %v5787_v7 = vmul.f32 %v12500_v6, %v12500_v6  ;;  %v5788_v54 = vmul.f32 %v12506_v60, %v12506_v60 }
 0x83b   : > { %v5816_v11 = vadd.f32 %v5815_v31, %v5777_v4  ;;  %v12518_v4 = vsub.f32 %v12137_v48, %v12392_v30  ;;  %v5789_v42 = vmul.f32 %v12512_v17, %v12512_v17 }
 0x83d   : > { %v5817_v0 = vadd.f32 %v5816_v11, %v5778_v13  ;;  %v13359_v13 = vld [vmem:[#allocation39_spill] sm:$0xff]  ;;  %v5790_v48 = vmul.f32 %v12518_v4, %v12518_v4 }
 0x83e   : > { %v12524_v11 = vsub.f32 %v13359_v13, %v12392_v30  ;;  %v12578_v13 = vsub.f32 %v12229_v38, %v12392_v30 }
 0x83f   : > { %v5818_v39 = vadd.f32 %v5817_v0, %v5779_v26  ;;  %v12530_v0 = vsub.f32 %v12161_v21, %v12392_v30 }
 0x840   : > { %v5800_v38 = vmul.f32 %v12578_v13, %v12578_v13 }
 0x841   : > { %v5819_v36 = vadd.f32 %v5818_v39, %v5780_v40  ;;  %v12536_v39 = vsub.f32 %v12165_v50, %v12392_v30  ;;  %v5792_v21 = vmul.f32 %v12530_v0, %v12530_v0 }
 0x843   : > { %v5820_v15 = vadd.f32 %v5819_v36, %v5781_v33  ;;  %v5791_v33 = vmul.f32 %v12524_v11, %v12524_v11  ;;  %v5793_v50 = vmul.f32 %v12536_v39, %v12536_v39 }
 0x845   : > { %v5821_v37 = vadd.f32 %v5820_v15, %v5782_v63  ;;  %v12542_v63 = vsub.f32 %v12169_v46, %v12392_v30 }
 0x847   : > { %v5822_v25 = vadd.f32 %v5821_v37, %v5783_v14  ;;  %v12548_v14 = vsub.f32 %v12179_v41, %v12392_v30  ;;  %v5794_v46 = vmul.f32 %v12542_v63, %v12542_v63 }
 0x849   : > { %v5823_v51 = vadd.f32 %v5822_v25, %v5784_v55  ;;  %v13360_v55 = vld [vmem:[#allocation45_spill] sm:$0xff]  ;;  %v5795_v41 = vmul.f32 %v12548_v14, %v12548_v14 }
 0x84a   : > { %v12554_v25 = vsub.f32 %v13360_v55, %v12392_v30 }
 0x84b   : > { %v5824_v29 = vadd.f32 %v5823_v51, %v5785_v34  ;;  %v12560_v51 = vsub.f32 %v12199_v58, %v12392_v30 }
 0x84d   : > { %v5825_v45 = vadd.f32 %v5824_v29, %v5786_v18  ;;  %v12566_v29 = vsub.f32 %v12203_v57, %v12392_v30  ;;  %v5797_v58 = vmul.f32 %v12560_v51, %v12560_v51 }
 0x84f   : > { %v5826_v31 = vadd.f32 %v5825_v45, %v5787_v7  ;;  %v5796_v7 = vmul.f32 %v12554_v25, %v12554_v25  ;;  %v5798_v57 = vmul.f32 %v12566_v29, %v12566_v29 }
 0x851   : > { %v5827_v26 = vadd.f32 %v5826_v31, %v5788_v54  ;;  %v12572_v54 = vsub.f32 %v12207_v47, %v12392_v30 }
 0x853   : > { %v5828_v40 = vadd.f32 %v5827_v26, %v5789_v42  ;;  %v12584_v26 = vsub.f32 %v12351_v20, %v12392_v30  ;;  %v5799_v47 = vmul.f32 %v12572_v54, %v12572_v54 }
 0x855   : > { %v5829_v36 = vadd.f32 %v5828_v40, %v5790_v48  ;;  %v12590_v40 = vsub.f32 %v12358_v10, %v12392_v30  ;;  %v5801_v20 = vmul.f32 %v12584_v26, %v12584_v26 }
 0x857   : > { %v5830_v15 = vadd.f32 %v5829_v36, %v5791_v33  ;;  %v12596_v36 = vsub.f32 %v12365_v2, %v12392_v30  ;;  %v5802_v10 = vmul.f32 %v12590_v40, %v12590_v40 }
 0x859   : > { %v5831_v37 = vadd.f32 %v5830_v15, %v5792_v21  ;;  %v12602_v15 = vsub.f32 %v12372_v62, %v12392_v30  ;;  %v5803_v2 = vmul.f32 %v12596_v36, %v12596_v36 }
 0x85b   : > { %v5832_v34 = vadd.f32 %v5831_v37, %v5793_v50  ;;  %v12608_v37 = vsub.f32 %v12378_v8, %v12392_v30  ;;  %v5807_v8 = vmul.f32 %v12398_v5, %v12398_v5 }
 0x85d   : > { %v5833_v18 = vadd.f32 %v5832_v34, %v5794_v46  ;;  %v5804_v46 = vmul.f32 %v12602_v15, %v12602_v15  ;;  %v5805_v62 = vmul.f32 %v12608_v37, %v12608_v37 }
 0x85f   : > { %v5834_v45 = vadd.f32 %v5833_v18, %v5795_v41  ;;  %v5806_v18 = vmul.f32 %v12395_v43, %v12395_v43 }
 0x861   : > { %v5835_v31 = vadd.f32 %v5834_v45, %v5796_v7  ;;  %v5808_v45 = vmul.f32 %v12401_v23, %v12401_v23 }
 0x863   : > { %v5836_v42 = vadd.f32 %v5835_v31, %v5797_v58  ;;  %v5809_v31 = vmul.f32 %v12404_v27, %v12404_v27 }
 0x865   : > { %v5837_v48 = vadd.f32 %v5836_v42, %v5798_v57  ;;  %v5811_v42 = vmul.f32 %v12410_v35, %v12410_v35 }
 0x867   : > { %v5838_v33 = vadd.f32 %v5837_v48, %v5799_v47  ;;  %v5810_v47 = vmul.f32 %v12407_v22, %v12407_v22 }
 0x869   : > { %v5839_v21 = vadd.f32 %v5838_v33, %v5800_v38  ;;  %v5850_v33 = vsel %vm1903_vm0, %v5811_v42, 0.0 }
 0x86b   : > { %v5840_v50 = vadd.f32 %v5839_v21, %v5801_v20 }
 0x86d   : > { %v5841_v55 = vadd.f32 %v5840_v50, %v5802_v10 }
 0x86f   : > { %v5842_v34 = vadd.f32 %v5841_v55, %v5803_v2 }
 0x871   : > { %v5843_v41 = vadd.f32 %v5842_v34, %v5804_v46 }
 0x873   : > { %v5844_v7 = vadd.f32 %v5843_v41, %v5805_v62  ;;  %v8484_v41 = vld [vmem:[%s12896_s3 + $0x1b4] sm:$0xf] }
 0x875   : > { %v5845_v30 = vadd.f32 %v5844_v7, %v5806_v18  ;;  %v8296_v18 = vld [vmem:[%s12896_s3 + $0x1bc] sm:$0xf0] }
 0x876   : > { %v8299_v7 = vor.u32 %v8484_v41, %v8296_v18  ;;  %v8480_v41 = vld [vmem:[%s12896_s3 + $0x190] sm:$0xf0] }
 0x877   : > { %v5846_v58 = vadd.f32 %v5845_v30, %v5807_v8  ;;  %v8294_v8 = vld [vmem:[%s12896_s3 + $0x1b0] sm:$0xf]  ;;  %v8485_v30 = vld [vmem:[%s12896_s3 + $0x1b8] sm:$0xf0] }
 0x878   : > { %6886 = vmatpush.bf16.msra.mxu3 %v8299_v7 }
 0x879   : > { %v5847_v57 = vadd.f32 %v5846_v58, %v5808_v45  ;;  %v8295_v45 = vor.u32 %v8485_v30, %v8294_v8  ;;  %v8486_v58 = vld [vmem:[%s12896_s3 + $0x1c0] sm:$0xf0] }
 0x87b   : > { %v5848_v48 = vadd.f32 %v5847_v57, %v5809_v31  ;;  %v8481_v31 = vld [vmem:[%s12896_s3 + $0x19c] sm:$0xf]  ;;  %v8284_v57 = vld [vmem:[%s12896_s3 + $0x1a4] sm:$0xf0]  ;;  %6778 = vmatpush.bf16.msra.mxu2 %v8295_v45 }
 0x87d   : > { %v5849_v38 = vadd.f32 %v5848_v48, %v5810_v47  ;;  %v8287_v47 = vor.u32 %v8481_v31, %v8284_v57  ;;  %v8282_v48 = vld [vmem:[%s12896_s3 + $0x198] sm:$0xf] }
 0x87f   : > { %v5851_v20 = vadd.f32 %v5850_v33, %v5849_v38  ;;  %v8482_v38 = vld [vmem:[%s12896_s3 + $0x1a0] sm:$0xf0]  ;;  %v8290_v33 = vld [vmem:[%s12896_s3 + $0x1a0] sm:$0xf]  ;;  %6887 = vmatpush.bf16.msra.mxu3 %v8287_v47 }
 0x881   : > { %v5852_v21 = vrot.slane %v5851_v20, 4 }
 0x883   : > { %v5853_v10 = vadd.f32 %v5852_v21, %v5851_v20  ;;  %v8283_v20 = vor.u32 %v8482_v38, %v8282_v48  ;;  %v8483_v21 = vld [vmem:[%s12896_s3 + $0x1a8] sm:$0xf0]  ;;  %v5959_v48 = vpop.permute.xlu2 %5958 }
 0x885   : > { %v5854_v50 = vrot.slane %v5853_v10, 2  ;;  %6779 = vmatpush.bf16.msra.mxu2 %v8283_v20  ;;  %v6235_v20 = vpop.permute.xlu0 %6234 }
 0x887   : > { %v5855_v2 = vadd.f32 %v5854_v50, %v5853_v10  ;;  %v8478_v10 = vld [vmem:[%s12896_s3 + $0x184] sm:$0xf]  ;;  %v8272_v50 = vld [vmem:[%s12896_s3 + $0x18c] sm:$0xf0] }
 0x888   : > { %v8275_v18 = vor.u32 %v8478_v10, %v8272_v50 }
 0x889   : > { %v5856_v55 = vrot.slane %v5855_v2, 1 }
 0x88a   : > { %6888 = vmatpush.bf16.msra.mxu3 %v8275_v18 }
 0x88b   : > { %v5857_v46 = vadd.f32 %v5856_v55, %v5855_v2  ;;  %v8291_v2 = vor.u32 %v8483_v21, %v8290_v33  ;;  %v8270_v55 = vld [vmem:[%s12896_s3 + $0x180] sm:$0xf] }
 0x88d   : > { %v5858_v34 = vmul.f32 %v5857_v46, %v10801_v44  ;;  %v8302_v44 = vld [vmem:[%s12896_s3 + $0x1b8] sm:$0xf]  ;;  %v8479_v46 = vld [vmem:[%s12896_s3 + $0x188] sm:$0xf0] }
 0x88e   : > { %v8303_v42 = vor.u32 %v8486_v58, %v8302_v44  ;;  %v8271_v8 = vor.u32 %v8479_v46, %v8270_v55 }
 0x88f   : > { %v5859_v62 = vadd.f32 1e-05, %v5858_v34  ;;  %v8278_v34 = vld [vmem:[%s12896_s3 + $0x188] sm:$0xf] }
 0x890   : > { %6995 = vmatpush.bf16.msra.mxu0 %v8303_v42  ;;  %v8279_v44 = vor.u32 %v8480_v41, %v8278_v34  ;;  %6780 = vmatpush.bf16.msra.mxu2 %v8271_v8  ;;  %v5954_v42 = vpop.permute.xlu1 %5953 }
 0x891   : > { %8547 = vrsqrt.f32 %v5859_v62  ;;  %vm5866_vm4 = vweird.f32 %v5859_v62 }
 0x894   : > { %6996 = vmatpush.bf16.msra.mxu0 %v8291_v2  ;;  %v5964_v2 = vpop.permute.xlu2 %5963 }
 0x897   : > { %v8548_v7 = vpop.eup %8547 }
 0x898   : > { %v5861_v30 = vmul.f32 %v8548_v7, %v5859_v62  ;;  %6997 = vmatpush.bf16.msra.mxu0 %v8279_v44  ;;  %vm5867_vm3 = vweird.f32 %v8548_v7  ;;  %v6240_v50 = vpop.permute.xlu1 %6239 }
 0x899   : > { %vm5868_vm5 = vmor %vm5866_vm4, %vm5867_vm3 }
 0x89a   : > { %v5862_v45 = vmul.f32 %v8548_v7, %v5861_v30 }
 0x89c   : > { %v5863_v58 = vmul.f32 0.5, %v5862_v45 }
 0x89e   : > { %v5864_v31 = vsub.f32 1.5, %v5863_v58  ;;  %v6250_v58 = vpop.permute.xlu2 %6249 }
 0x8a0   : > { %v5865_v57 = vmul.f32 %v8548_v7, %v5864_v31  ;;  %v6245_v45 = vpop.permute.xlu1 %6244 }
 0x8a2   : > { %v12684_v47 = vsel %vm5868_vm5, %v8548_v7, %v5865_v57 }
 0x8a3   : > { %v5870_v38 = vmul.f32 %v12684_v47, %v12414_v32  ;;  %v5871_v33 = vmul.f32 %v12684_v47, %v12418_v56  ;;  %v5872_v34 = vmul.f32 %v12684_v47, %v12422_v3  ;;  %v5873_v62 = vmul.f32 %v12684_v47, %v12430_v53  ;;  %v5969_v56 = vpop.permute.xlu0 %5968 }
 0x8a5   : > { %v6151_v21 = vmul.f32 %v5954_v42, %v5870_v38  ;;  %v6152_v10 = vmul.f32 %v5959_v48, %v5871_v33  ;;  %v6153_v30 = vmul.f32 %v5964_v2, %v5872_v34  ;;  %v6154_v44 = vmul.f32 %v5969_v56, %v5873_v62 }
 0x8a6   : > { %v5874_v48 = vmul.f32 %v12684_v47, %v12434_v28  ;;  %v5875_v38 = vmul.f32 %v12684_v47, %v12440_v1  ;;  %v5876_v28 = vmul.f32 %v12684_v47, %v12446_v19  ;;  %v5877_v1 = vmul.f32 %v12684_v47, %v12452_v16 }
 0x8a7   : > { %v6432_v55 = vadd.f32 %v6235_v20, %v6151_v21  ;;  %v6433_v46 = vadd.f32 %v6240_v50, %v6152_v10  ;;  %v6434_v31 = vadd.f32 %v6245_v45, %v6153_v30  ;;  %v6435_v3 = vadd.f32 %v6250_v58, %v6154_v44 }
 0x8a8   : > { %v5979_v21 = vpop.permute.xlu1 %5978  ;;  %v5878_v19 = vmul.f32 %v12684_v47, %v12458_v24  ;;  %v5879_v16 = vmul.f32 %v12684_v47, %v12464_v12  ;;  %v5880_v24 = vmul.f32 %v12684_v47, %v12470_v61  ;;  %v5881_v12 = vmul.f32 %v12684_v47, %v12476_v59 }
 0x8a9   : > { %vm6472_vm6 = vcmp.ge.f32.partialorder %v6432_v55, 0.0  ;;  %vm6473_vm7 = vcmp.ge.f32.partialorder %v6433_v46, 0.0  ;;  %v6512_v41 = vmul.f32 0.2, %v6432_v55  ;;  %v6513_v32 = vmul.f32 0.2, %v6433_v46 }
 0x8aa   : > { %v6514_v57 = vmul.f32 0.2, %v6434_v31  ;;  %v6515_v42 = vmul.f32 0.2, %v6435_v3  ;;  %vm6474_vm8 = vcmp.ge.f32.partialorder %v6434_v31, 0.0  ;;  %vm6475_vm9 = vcmp.ge.f32.partialorder %v6435_v3, 0.0 }
 0x8ab   : > { %v6552_v18 = vsel %vm6472_vm6, %v6432_v55, %v6512_v41  ;;  %v6553_v7 = vsel %vm6473_vm7, %v6433_v46, %v6513_v32  ;;  %v5974_v53 = vpop.permute.xlu0 %5973  ;;  %v6156_v2 = vmul.f32 %v5979_v21, %v5875_v38  ;;  %v6255_v46 = vpop.permute.xlu2 %6254  ;;  %v5882_v61 = vmul.f32 %v12684_v47, %v12482_v49 }
 0x8ac   : > { %v6592_v8 = vpack.c.bf16 %v6553_v7, %v6552_v18  ;;  %v6554_v33 = vsel %vm6474_vm8, %v6434_v31, %v6514_v57  ;;  %v6555_v20 = vsel %vm6475_vm9, %v6435_v3, %v6515_v42  ;;  %v6155_v50 = vmul.f32 %v5974_v53, %v5874_v48 }
 0x8ad   : > { %v6593_v10 = vpack.c.bf16 %v6555_v20, %v6554_v33  ;;  %v5883_v59 = vmul.f32 %v12684_v47, %v12488_v9  ;;  %v5884_v49 = vmul.f32 %v12684_v47, %v12494_v52  ;;  %v5885_v9 = vmul.f32 %v12684_v47, %v12500_v6 }
 0x8ae   : > { %6781 = vmatmul.bf16.vlgmr.msra.gmra.mxu2 %v6592_v8  ;;  %6889 = vmatmul.bf16.vlgmr.msra.gmra.mxu3 %v6592_v8  ;;  %v6436_v34 = vadd.f32 %v6255_v46, %v6155_v50  ;;  %v5886_v52 = vmul.f32 %v12684_v47, %v12506_v60  ;;  %v5887_v6 = vmul.f32 %v12684_v47, %v12512_v17 }
 0x8af   : > { %6998 = vmatmul.bf16.vlgmr.msra.gmra.mxu0 %v6592_v8  ;;  %v5888_v60 = vmul.f32 %v12684_v47, %v12518_v4  ;;  %v5889_v17 = vmul.f32 %v12684_v47, %v12524_v11 }
 0x8b0   : > { %v6516_v41 = vmul.f32 0.2, %v6436_v34  ;;  %v5984_v18 = vpop.permute.xlu1 %5983  ;;  %vm6476_vm11 = vcmp.ge.f32.partialorder %v6436_v34, 0.0 }
 0x8b1   : > { %v6157_v44 = vmul.f32 %v5984_v18, %v5876_v28 }
 0x8b2   : > { %v6556_v7 = vsel %vm6476_vm11, %v6436_v34, %v6516_v41 }
 0x8b3   : > { %v6260_v55 = vpop.permute.xlu0 %6259  ;;  %v5989_v8 = vpop.permute.xlu2 %5988 }
 0x8b4   : > { %v6437_v62 = vadd.f32 %v6260_v55, %v6156_v2  ;;  %v6158_v45 = vmul.f32 %v5989_v8, %v5877_v1 }
 0x8b6   : > { %v6517_v32 = vmul.f32 0.2, %v6437_v62  ;;  %vm6477_vm12 = vcmp.ge.f32.partialorder %v6437_v62, 0.0 }
 0x8b8   : > { %v6557_v56 = vsel %vm6477_vm12, %v6437_v62, %v6517_v32  ;;  %v6270_v31 = vpop.permute.xlu1 %6269 }
 0x8b9   : > { %v6594_v30 = vpack.c.bf16 %v6557_v56, %v6556_v7  ;;  %v6439_v57 = vadd.f32 %v6270_v31, %v6158_v45 }
 0x8bb   : > { %v6265_v58 = vpop.permute.xlu0 %6264  ;;  %v6519_v53 = vmul.f32 0.2, %v6439_v57  ;;  %v5994_v48 = vpop.permute.xlu2 %5993  ;;  %vm6479_vm14 = vcmp.ge.f32.partialorder %v6439_v57, 0.0 }
 0x8bc   : > { %v6438_v3 = vadd.f32 %v6265_v58, %v6157_v44 }
 0x8bd   : > { %v6559_v33 = vsel %vm6479_vm14, %v6439_v57, %v6519_v53 }
 0x8be   : > { %6786 = vmatmul.bf16.gmra.mxu2 %v6593_v10  ;;  %6894 = vmatmul.bf16.gmra.mxu3 %v6593_v10  ;;  %v6518_v42 = vmul.f32 0.2, %v6438_v3  ;;  %vm6478_vm13 = vcmp.ge.f32.partialorder %v6438_v3, 0.0 }
 0x8bf   : > { %7003 = vmatmul.bf16.gmra.mxu0 %v6593_v10  ;;  %v6159_v10 = vmul.f32 %v5994_v48, %v5878_v19 }
 0x8c0   : > { %v6558_v38 = vsel %vm6478_vm13, %v6438_v3, %v6518_v42  ;;  %v6275_v2 = vpop.permute.xlu1 %6274 }
 0x8c1   : > { %v6595_v21 = vpack.c.bf16 %v6559_v33, %v6558_v38  ;;  %v6440_v46 = vadd.f32 %v6275_v2, %v6159_v10 }
 0x8c3   : > { %v5999_v20 = vpop.permute.xlu0 %5998  ;;  %v6280_v55 = vpop.permute.xlu2 %6279  ;;  %v6520_v62 = vmul.f32 0.2, %v6440_v46  ;;  %vm6480_vm15 = vcmp.ge.f32.partialorder %v6440_v46, 0.0 }
 0x8c4   : > { %v6160_v50 = vmul.f32 %v5999_v20, %v5879_v16 }
 0x8c5   : > { %v6560_v18 = vsel %vm6480_vm15, %v6440_v46, %v6520_v62 }
 0x8c6   : > { %v6441_v34 = vadd.f32 %v6280_v55, %v6160_v50 }
 0x8c8   : > { %v6521_v41 = vmul.f32 0.2, %v6441_v34  ;;  %vm6481_vm1 = vcmp.ge.f32.partialorder %v6441_v34, 0.0  ;;  %v6009_v1 = vpop.permute.xlu1 %6008 }
 0x8c9   : > { %v6162_v8 = vmul.f32 %v6009_v1, %v5881_v12 }
 0x8ca   : > { %v6561_v28 = vsel %vm6481_vm1, %v6441_v34, %v6521_v41 }
 0x8cb   : > { %v6004_v32 = vpop.permute.xlu0 %6003  ;;  %v6596_v7 = vpack.c.bf16 %v6561_v28, %v6560_v18  ;;  %v6285_v44 = vpop.permute.xlu2 %6284 }
 0x8cc   : > { %v6161_v56 = vmul.f32 %v6004_v32, %v5880_v24 }
 0x8ce   : > { %6791 = vmatmul.bf16.gmra.mxu2 %v6594_v30  ;;  %6899 = vmatmul.bf16.gmra.mxu3 %v6594_v30  ;;  %v6442_v45 = vadd.f32 %v6285_v44, %v6161_v56 }
 0x8cf   : > { %7008 = vmatmul.bf16.gmra.mxu0 %v6594_v30 }
 0x8d0   : > { %v6522_v31 = vmul.f32 0.2, %v6442_v45  ;;  %v6014_v57 = vpop.permute.xlu1 %6013  ;;  %vm6482_vm2 = vcmp.ge.f32.partialorder %v6442_v45, 0.0 }
 0x8d1   : > { %v6163_v16 = vmul.f32 %v6014_v57, %v5882_v61 }
 0x8d2   : > { %v6562_v42 = vsel %vm6482_vm2, %v6442_v45, %v6522_v31 }
 0x8d3   : > { %v6290_v30 = vpop.permute.xlu0 %6289  ;;  %v6019_v48 = vpop.permute.xlu2 %6018 }
 0x8d4   : > { %v6443_v58 = vadd.f32 %v6290_v30, %v6162_v8  ;;  %v6164_v38 = vmul.f32 %v6019_v48, %v5883_v59 }
 0x8d6   : > { %v6523_v3 = vmul.f32 0.2, %v6443_v58  ;;  %vm6483_vm3 = vcmp.ge.f32.partialorder %v6443_v58, 0.0 }
 0x8d8   : > { %v6563_v53 = vsel %vm6483_vm3, %v6443_v58, %v6523_v3  ;;  %v6300_v20 = vpop.permute.xlu1 %6299 }
 0x8d9   : > { %v6597_v19 = vpack.c.bf16 %v6563_v53, %v6562_v42  ;;  %v6445_v10 = vadd.f32 %v6300_v20, %v6164_v38 }
 0x8db   : > { %v6295_v33 = vpop.permute.xlu0 %6294  ;;  %v6525_v2 = vmul.f32 0.2, %v6445_v10  ;;  %v6024_v55 = vpop.permute.xlu2 %6023  ;;  %vm6485_vm5 = vcmp.ge.f32.partialorder %v6445_v10, 0.0 }
 0x8dc   : > { %v6165_v32 = vmul.f32 %v6024_v55, %v5884_v49 }
 0x8dd   : > { %v6565_v34 = vsel %vm6485_vm5, %v6445_v10, %v6525_v2 }
 0x8de   : > { %6796 = vmatmul.bf16.gmra.mxu2 %v6595_v21  ;;  %6904 = vmatmul.bf16.gmra.mxu3 %v6595_v21 }
 0x8df   : > { %7013 = vmatmul.bf16.gmra.mxu0 %v6595_v21  ;;  %v6444_v21 = vadd.f32 %v6295_v33, %v6163_v16 }
 0x8e0   : > { %v6305_v12 = vpop.permute.xlu1 %6304 }
 0x8e1   : > { %v6524_v50 = vmul.f32 0.2, %v6444_v21  ;;  %vm6484_vm4 = vcmp.ge.f32.partialorder %v6444_v21, 0.0  ;;  %v6446_v28 = vadd.f32 %v6305_v12, %v6165_v32 }
 0x8e3   : > { %v6564_v46 = vsel %vm6484_vm4, %v6444_v21, %v6524_v50  ;;  %v6029_v62 = vpop.permute.xlu0 %6028  ;;  %v6310_v18 = vpop.permute.xlu2 %6309  ;;  %vm6486_vm6 = vcmp.ge.f32.partialorder %v6446_v28, 0.0 }
 0x8e4   : > { %v6598_v41 = vpack.c.bf16 %v6565_v34, %v6564_v46  ;;  %v6166_v24 = vmul.f32 %v6029_v62, %v5885_v9 }
 0x8e6   : > { %v6447_v1 = vadd.f32 %v6310_v18, %v6166_v24 }
 0x8e8   : > { %v6527_v56 = vmul.f32 0.2, %v6447_v1  ;;  %vm6487_vm7 = vcmp.ge.f32.partialorder %v6447_v1, 0.0  ;;  %v6039_v45 = vpop.permute.xlu1 %6038 }
 0x8e9   : > { %v6168_v3 = vmul.f32 %v6039_v45, %v5887_v6 }
 0x8ea   : > { %v6567_v44 = vsel %vm6487_vm7, %v6447_v1, %v6527_v56  ;;  %v5890_v56 = vmul.f32 %v12684_v47, %v12530_v0 }
 0x8eb   : > { %v6034_v8 = vpop.permute.xlu0 %6033  ;;  %v6315_v61 = vpop.permute.xlu2 %6314 }
 0x8ec   : > { %v6167_v31 = vmul.f32 %v6034_v8, %v5886_v52  ;;  %v5891_v8 = vmul.f32 %v12684_v47, %v12536_v39 }
 0x8ee   : > { %6801 = vmatmul.bf16.gmra.mxu2 %v6596_v7  ;;  %6909 = vmatmul.bf16.gmra.mxu3 %v6596_v7  ;;  %v6448_v59 = vadd.f32 %v6315_v61, %v6167_v31 }
 0x8ef   : > { %7018 = vmatmul.bf16.gmra.mxu0 %v6596_v7  ;;  %v6526_v7 = vmul.f32 0.2, %v6446_v28 }
 0x8f0   : > { %v6528_v53 = vmul.f32 0.2, %v6448_v59  ;;  %vm6488_vm8 = vcmp.ge.f32.partialorder %v6448_v59, 0.0 }
 0x8f1   : > { %v6566_v30 = vsel %vm6486_vm6, %v6446_v28, %v6526_v7 }
 0x8f2   : > { %v6599_v58 = vpack.c.bf16 %v6567_v44, %v6566_v30  ;;  %v6568_v16 = vsel %vm6488_vm8, %v6448_v59, %v6528_v53 }
 0x8f3   : > { %v6320_v57 = vpop.permute.xlu0 %6319  ;;  %v6049_v33 = vpop.permute.xlu2 %6048 }
 0x8f4   : > { %v6449_v42 = vadd.f32 %v6320_v57, %v6168_v3  ;;  %v6170_v50 = vmul.f32 %v6049_v33, %v5889_v17 }
 0x8f6   : > { %v6529_v48 = vmul.f32 0.2, %v6449_v42  ;;  %vm6489_vm9 = vcmp.ge.f32.partialorder %v6449_v42, 0.0 }
 0x8f8   : > { %v6569_v38 = vsel %vm6489_vm9, %v6449_v42, %v6529_v48 }
 0x8f9   : > { %v6600_v21 = vpack.c.bf16 %v6569_v38, %v6568_v16 }
 0x8fb   : > { %v6325_v2 = vpop.permute.xlu0 %6324  ;;  %v6054_v28 = vpop.permute.xlu2 %6053 }
 0x8fc   : > { %v6171_v42 = vmul.f32 %v6054_v28, %v5890_v56 }
 0x8fe   : > { %6806 = vmatmul.bf16.gmra.mxu2 %v6597_v19  ;;  %6914 = vmatmul.bf16.gmra.mxu3 %v6597_v19 }
 0x8ff   : > { %7023 = vmatmul.bf16.gmra.mxu0 %v6597_v19  ;;  %v6044_v19 = vpop.permute.xlu1 %6043 }
 0x900   : > { %v6169_v10 = vmul.f32 %v6044_v19, %v5888_v60 }
 0x902   : > { %v6450_v49 = vadd.f32 %v6325_v2, %v6169_v10 }
 0x903   : > { %v6340_v48 = vpop.permute.xlu2 %6339 }
 0x904   : > { %vm6490_vm11 = vcmp.ge.f32.partialorder %v6450_v49, 0.0 }
 0x907   : > { %v6330_v55 = vpop.permute.xlu1 %6329 }
 0x908   : > { %v6451_v4 = vadd.f32 %v6330_v55, %v6170_v50 }
 0x90a   : > { %v6531_v18 = vmul.f32 0.2, %v6451_v4  ;;  %vm6491_vm12 = vcmp.ge.f32.partialorder %v6451_v4, 0.0 }
 0x90c   : > { %v6571_v44 = vsel %vm6491_vm12, %v6451_v4, %v6531_v18  ;;  %v5892_v4 = vmul.f32 %v12684_v47, %v12542_v63 }
 0x90e   : > { %6811 = vmatmul.bf16.gmra.mxu2 %v6598_v41  ;;  %6919 = vmatmul.bf16.gmra.mxu3 %v6598_v41 }
 0x90f   : > { %7028 = vmatmul.bf16.gmra.mxu0 %v6598_v41  ;;  %v6530_v41 = vmul.f32 0.2, %v6450_v49  ;;  %v6335_v39 = vpop.permute.xlu1 %6334 }
 0x910   : > { %v6452_v16 = vadd.f32 %v6335_v39, %v6171_v42 }
 0x911   : > { %v6570_v30 = vsel %vm6490_vm11, %v6450_v49, %v6530_v41 }
 0x912   : > { %v6601_v57 = vpack.c.bf16 %v6571_v44, %v6570_v30  ;;  %v6532_v2 = vmul.f32 0.2, %v6452_v16  ;;  %vm6492_vm13 = vcmp.ge.f32.partialorder %v6452_v16, 0.0 }
 0x914   : > { %v6572_v41 = vsel %vm6492_vm13, %v6452_v16, %v6532_v2 }
 0x91e   : > { %6816 = vmatmul.bf16.gmra.mxu2 %v6599_v58  ;;  %6924 = vmatmul.bf16.gmra.mxu3 %v6599_v58 }
 0x91f   : > { %7033 = vmatmul.bf16.gmra.mxu0 %v6599_v58  ;;  %v6059_v58 = vpop.permute.xlu0 %6058 }
 0x920   : > { %v6172_v53 = vmul.f32 %v6059_v58, %v5891_v8 }
 0x922   : > { %v6453_v38 = vadd.f32 %v6340_v48, %v6172_v53 }
 0x924   : > { %v6533_v55 = vmul.f32 0.2, %v6453_v38  ;;  %vm6493_vm14 = vcmp.ge.f32.partialorder %v6453_v38, 0.0 }
 0x927   : > { %v6064_v49 = vpop.permute.xlu0 %6063 }
 0x928   : > { %v6173_v8 = vmul.f32 %v6064_v49, %v5892_v4 }
 0x92c   : > { %v6999_v20 = vpop.f32.mrf.mxu0 }
 0x92d   : > { %v7336_v32 = vrot.slane %v6999_v20, 1 }
 0x92e   : > { %6821 = vmatmul.bf16.gmra.mxu2 %v6600_v21  ;;  %6929 = vmatmul.bf16.gmra.mxu3 %v6600_v21 }
 0x92f   : > { %7038 = vmatmul.bf16.gmra.mxu0 %v6600_v21 }
 0x931   : > { %v6782_v9 = vpop.f32.mrf.mxu2  ;;  %v6890_v46 = vpop.f32.mrf.mxu3 }
 0x932   : > { %v7138_v34 = vrot.slane %v6782_v9, 7 }
 0x934   : > { %v7255_v11 = vsel %vm1903_vm0, 0.0, %v7138_v34  ;;  %v7001_v62 = vpop.f32.mrf.mxu0 }
 0x935   : > { %v7256_v24 = vadd.f32 %v7255_v11, %v6890_v46  ;;  %v7337_v12 = vrot.slane %v7001_v62, 1 }
 0x937   : > { %v7338_v1 = vsel %vm3717_vm10, %v7336_v32, %v7337_v12  ;;  %v6573_v32 = vsel %vm6493_vm14, %v6453_v38, %v6533_v55 }
 0x938   : > { %v7454_v7 = vadd.f32 %v7338_v1, %v7256_v24  ;;  %v6602_v1 = vpack.c.bf16 %v6573_v32, %v6572_v41 }
 0x939   : > { %v6784_v52 = vpop.f32.mrf.mxu2  ;;  %v6892_v6 = vpop.f32.mrf.mxu3 }
 0x93a   : > { %7494 = vst [vmem:[%s12731_s11] sm:$0xff] %v7454_v7  ;;  %v7139_v45 = vrot.slane %v6784_v52, 7 }
 0x93c   : > { %v7140_v31 = vsel %vm1903_vm0, %v7138_v34, %v7139_v45  ;;  %v7004_v3 = vpop.f32.mrf.mxu0  ;;  %v5893_v34 = vmul.f32 %v12684_v47, %v12548_v14  ;;  %v6350_v14 = vpop.permute.xlu0 %6349 }
 0x93d   : > { %v7257_v61 = vadd.f32 %v7140_v31, %v6892_v6  ;;  %v7339_v59 = vrot.slane %v7004_v3, 1  ;;  %v6345_v6 = vpop.permute.xlu2 %6344 }
 0x93e   : > { %6826 = vmatmul.bf16.gmra.mxu2 %v6601_v57  ;;  %6934 = vmatmul.bf16.gmra.mxu3 %v6601_v57  ;;  %v6454_v58 = vadd.f32 %v6345_v6, %v6173_v8  ;;  %v5896_v6 = vmul.f32 %v12684_v47, %v12566_v29 }
 0x93f   : > { %v7340_v0 = vsel %vm3717_vm10, %v7337_v12, %v7339_v59  ;;  %7043 = vmatmul.bf16.gmra.mxu0 %v6601_v57  ;;  %v6069_v12 = vpop.permute.xlu1 %6068 }
 0x940   : > { %v7455_v19 = vadd.f32 %v7340_v0, %v7257_v61  ;;  %v6174_v52 = vmul.f32 %v6069_v12, %v5893_v34  ;;  %v6534_v53 = vmul.f32 0.2, %v6454_v58  ;;  %vm6494_vm15 = vcmp.ge.f32.partialorder %v6454_v58, 0.0 }
 0x941   : > { %v6787_v60 = vpop.f32.mrf.mxu2  ;;  %v6895_v17 = vpop.f32.mrf.mxu3 }
 0x942   : > { %7495 = vst [vmem:[%s12731_s11 + $0x8] sm:$0xff] %v7455_v19  ;;  %v7141_v33 = vrot.slane %v6787_v60, 7  ;;  %v6455_v31 = vadd.f32 %v6350_v14, %v6174_v52  ;;  %v5894_v60 = vmul.f32 %v12684_v47, %v12554_v25 }
 0x944   : > { %v7142_v20 = vsel %vm1903_vm0, %v7139_v45, %v7141_v33  ;;  %v7006_v21 = vpop.f32.mrf.mxu0  ;;  %v6535_v0 = vmul.f32 0.2, %v6455_v31  ;;  %vm6495_vm1 = vcmp.ge.f32.partialorder %v6455_v31, 0.0 }
 0x945   : > { %v7258_v10 = vadd.f32 %v7142_v20, %v6895_v17  ;;  %v7341_v50 = vrot.slane %v7006_v21, 1  ;;  %v5895_v17 = vmul.f32 %v12684_v47, %v12560_v51  ;;  %v6355_v51 = vpop.permute.xlu0 %6354 }
 0x946   : > { %v6575_v20 = vsel %vm6495_vm1, %v6455_v31, %v6535_v0 }
 0x947   : > { %v7342_v9 = vsel %vm3717_vm10, %v7339_v59, %v7341_v50  ;;  %v6074_v39 = vpop.permute.xlu1 %6073 }
 0x948   : > { %v7456_v46 = vadd.f32 %v7342_v9, %v7258_v10  ;;  %v6079_v10 = vpop.permute.xlu2 %6078 }
 0x949   : > { %v6789_v11 = vpop.f32.mrf.mxu2  ;;  %v6897_v62 = vpop.f32.mrf.mxu3  ;;  %v6176_v4 = vmul.f32 %v6079_v10, %v5895_v17 }
 0x94a   : > { %7496 = vst [vmem:[%s12731_s11 + $0x10] sm:$0xff] %v7456_v46  ;;  %v7143_v24 = vrot.slane %v6789_v11, 7  ;;  %v6175_v46 = vmul.f32 %v6074_v39, %v5894_v60 }
 0x94c   : > { %v7144_v18 = vsel %vm1903_vm0, %v7141_v33, %v7143_v24  ;;  %v7009_v28 = vpop.f32.mrf.mxu0  ;;  %v6574_v33 = vsel %vm6494_vm15, %v6454_v58, %v6534_v53  ;;  %v6456_v32 = vadd.f32 %v6355_v51, %v6175_v46  ;;  %v5899_v51 = vmul.f32 %v12684_v47, %v12584_v26 }
 0x94d   : > { %v7259_v7 = vadd.f32 %v7144_v18, %v6897_v62  ;;  %v7343_v56 = vrot.slane %v7009_v28, 1  ;;  %v6603_v55 = vpack.c.bf16 %v6575_v20, %v6574_v33 }
 0x94e   : > { %6831 = vmatmul.bf16.gmra.mxu2 %v6602_v1  ;;  %6939 = vmatmul.bf16.gmra.mxu3 %v6602_v1  ;;  %vm6496_vm2 = vcmp.ge.f32.partialorder %v6456_v32, 0.0 }
 0x94f   : > { %v7344_v63 = vsel %vm3717_vm10, %v7341_v50, %v7343_v56  ;;  %7048 = vmatmul.bf16.gmra.mxu0 %v6602_v1  ;;  %v6360_v34 = vpop.permute.xlu1 %6359 }
 0x950   : > { %v7457_v30 = vadd.f32 %v7344_v63, %v7259_v7  ;;  %v6084_v52 = vpop.permute.xlu2 %6083 }
 0x951   : > { %v6792_v44 = vpop.f32.mrf.mxu2  ;;  %v6900_v45 = vpop.f32.mrf.mxu3  ;;  %v6177_v39 = vmul.f32 %v6084_v52, %v5896_v6 }
 0x952   : > { %7497 = vst [vmem:[%s12731_s11 + $0x18] sm:$0xff] %v7457_v30  ;;  %v7145_v3 = vrot.slane %v6792_v44, 7  ;;  %v5897_v30 = vmul.f32 %v12684_v47, %v12572_v54 }
 0x954   : > { %v7146_v57 = vsel %vm1903_vm0, %v7143_v24, %v7145_v3  ;;  %v7011_v61 = vpop.f32.mrf.mxu0  ;;  %v6457_v24 = vadd.f32 %v6360_v34, %v6176_v4 }
 0x955   : > { %v7260_v59 = vadd.f32 %v7146_v57, %v6900_v45  ;;  %v7345_v42 = vrot.slane %v7011_v61, 1  ;;  %v6089_v57 = vpop.permute.xlu0 %6088 }
 0x956   : > { %v6537_v8 = vmul.f32 0.2, %v6457_v24  ;;  %vm6497_vm3 = vcmp.ge.f32.partialorder %v6457_v24, 0.0 }
 0x957   : > { %v7346_v48 = vsel %vm3717_vm10, %v7343_v56, %v7345_v42  ;;  %v6536_v56 = vmul.f32 0.2, %v6456_v32  ;;  %v6365_v54 = vpop.permute.xlu1 %6364 }
 0x958   : > { %v7458_v19 = vadd.f32 %v7346_v48, %v7260_v59  ;;  %v6577_v31 = vsel %vm6497_vm3, %v6457_v24, %v6537_v8  ;;  %v6178_v48 = vmul.f32 %v6089_v57, %v5897_v30 }
 0x959   : > { %v6794_v16 = vpop.f32.mrf.mxu2  ;;  %v6902_v38 = vpop.f32.mrf.mxu3  ;;  %v6576_v58 = vsel %vm6496_vm2, %v6456_v32, %v6536_v56 }
 0x95a   : > { %7498 = vst [vmem:[%s12731_s11 + $0x20] sm:$0xff] %v7458_v19  ;;  %v7147_v21 = vrot.slane %v6794_v16, 7  ;;  %v6370_v19 = vpop.permute.xlu2 %6369 }
 0x95b   : > { %v6459_v33 = vadd.f32 %v6370_v19, %v6178_v48  ;;  %v5901_v48 = vmul.f32 %v12684_v47, %v12596_v36 }
 0x95c   : > { %v7148_v50 = vsel %vm1903_vm0, %v7145_v3, %v7147_v21  ;;  %v7014_v2 = vpop.f32.mrf.mxu0 }
 0x95d   : > { %v7261_v49 = vadd.f32 %v7148_v50, %v6902_v38  ;;  %v7347_v9 = vrot.slane %v7014_v2, 1  ;;  %v6458_v38 = vadd.f32 %v6365_v54, %v6177_v39  ;;  %vm6499_vm5 = vcmp.ge.f32.partialorder %v6459_v33, 0.0 }
 0x95e   : > { %6836 = vmatmul.bf16.gmra.mxu2 %v6603_v55  ;;  %6944 = vmatmul.bf16.gmra.mxu3 %v6603_v55  ;;  %v5900_v39 = vmul.f32 %v12684_v47, %v12590_v40 }
 0x95f   : > { %v7348_v25 = vsel %vm3717_vm10, %v7345_v42, %v7347_v9  ;;  %7053 = vmatmul.bf16.gmra.mxu0 %v6603_v55  ;;  %v6604_v42 = vpack.c.bf16 %v6577_v31, %v6576_v58  ;;  %v6538_v55 = vmul.f32 0.2, %v6458_v38  ;;  %vm6498_vm4 = vcmp.ge.f32.partialorder %v6458_v38, 0.0  ;;  %v6099_v24 = vpop.permute.xlu1 %6098 }
 0x960   : > { %v7459_v11 = vadd.f32 %v7348_v25, %v7261_v49  ;;  %v6539_v49 = vmul.f32 0.2, %v6459_v33  ;;  %v5898_v25 = vmul.f32 %v12684_v47, %v12578_v13  ;;  %v6180_v8 = vmul.f32 %v6099_v24, %v5899_v51 }
 0x961   : > { %v6797_v62 = vpop.f32.mrf.mxu2  ;;  %v6905_v41 = vpop.f32.mrf.mxu3 }
 0x962   : > { %7499 = vst [vmem:[%s12731_s11 + $0x28] sm:$0xff] %v7459_v11  ;;  %v7149_v12 = vrot.slane %v6797_v62, 7  ;;  %v6578_v62 = vsel %vm6498_vm4, %v6458_v38, %v6538_v55  ;;  %v6375_v52 = vpop.permute.xlu2 %6374 }
 0x964   : > { %v7150_v18 = vsel %vm1903_vm0, %v7147_v21, %v7149_v12  ;;  %v7016_v28 = vpop.f32.mrf.mxu0 }
 0x965   : > { %v7262_v1 = vadd.f32 %v7150_v18, %v6905_v41  ;;  %v7349_v7 = vrot.slane %v7016_v28, 1  ;;  %v6579_v41 = vsel %vm6499_vm5, %v6459_v33, %v6539_v49 }
 0x966   : > { %v6605_v28 = vpack.c.bf16 %v6579_v41, %v6578_v62 }
 0x967   : > { %v7350_v63 = vsel %vm3717_vm10, %v7347_v9, %v7349_v7  ;;  %v6094_v9 = vpop.permute.xlu0 %6093 }
 0x968   : > { %v7460_v14 = vadd.f32 %v7350_v63, %v7262_v1  ;;  %v6179_v56 = vmul.f32 %v6094_v9, %v5898_v25 }
 0x969   : > { %v6799_v44 = vpop.f32.mrf.mxu2  ;;  %v6907_v45 = vpop.f32.mrf.mxu3 }
 0x96a   : > { %7500 = vst [vmem:[%s12731_s11 + $0x30] sm:$0xff] %v7460_v14  ;;  %v7151_v3 = vrot.slane %v6799_v44, 7  ;;  %v6460_v30 = vadd.f32 %v6375_v52, %v6179_v56 }
 0x96c   : > { %v7152_v61 = vsel %vm1903_vm0, %v7149_v12, %v7151_v3  ;;  %v7019_v59 = vpop.f32.mrf.mxu0  ;;  %vm6500_vm6 = vcmp.ge.f32.partialorder %v6460_v30, 0.0 }
 0x96d   : > { %v7263_v53 = vadd.f32 %v7152_v61, %v6907_v45  ;;  %v7351_v0 = vrot.slane %v7019_v59, 1  ;;  %v6540_v61 = vmul.f32 0.2, %v6460_v30 }
 0x96e   : > { %6841 = vmatmul.bf16.gmra.mxu2 %v6604_v42  ;;  %6949 = vmatmul.bf16.gmra.mxu3 %v6604_v42 }
 0x96f   : > { %v7352_v29 = vsel %vm3717_vm10, %v7349_v7, %v7351_v0  ;;  %7058 = vmatmul.bf16.gmra.mxu0 %v6604_v42  ;;  %v6380_v26 = vpop.permute.xlu0 %6379  ;;  %v6104_v42 = vpop.permute.xlu1 %6103  ;;  %v6580_v19 = vsel %vm6500_vm6, %v6460_v30, %v6540_v61 }
 0x970   : > { %v7461_v60 = vadd.f32 %v7352_v29, %v7263_v53  ;;  %v6461_v44 = vadd.f32 %v6380_v26, %v6180_v8 }
 0x971   : > { %v6802_v17 = vpop.f32.mrf.mxu2  ;;  %v6910_v16 = vpop.f32.mrf.mxu3 }
 0x972   : > { %7501 = vst [vmem:[%s12731_s11 + $0x38] sm:$0xff] %v7461_v60  ;;  %v7153_v20 = vrot.slane %v6802_v17, 7  ;;  %v6541_v59 = vmul.f32 0.2, %v6461_v44  ;;  %vm6501_vm7 = vcmp.ge.f32.partialorder %v6461_v44, 0.0 }
 0x974   : > { %v7154_v21 = vsel %vm1903_vm0, %v7151_v3, %v7153_v20  ;;  %v7021_v10 = vpop.f32.mrf.mxu0  ;;  %v6581_v60 = vsel %vm6501_vm7, %v6461_v44, %v6541_v59 }
 0x975   : > { %v7264_v50 = vadd.f32 %v7154_v21, %v6910_v16  ;;  %v7353_v2 = vrot.slane %v7021_v10, 1  ;;  %v6109_v16 = vpop.permute.xlu2 %6108 }
 0x977   : > { %v7354_v46 = vsel %vm3717_vm10, %v7351_v0, %v7353_v2  ;;  %v6385_v36 = vpop.permute.xlu0 %6384  ;;  %v6390_v55 = vpop.permute.xlu1 %6389 }
 0x978   : > { %v7462_v4 = vadd.f32 %v7354_v46, %v7264_v50  ;;  %v6181_v50 = vmul.f32 %v6104_v42, %v5900_v39 }
 0x979   : > { %v6804_v34 = vpop.f32.mrf.mxu2  ;;  %v6912_v11 = vpop.f32.mrf.mxu3 }
 0x97a   : > { %7502 = vst [vmem:[%s12731_s11 + $0x40] sm:$0xff] %v7462_v4  ;;  %v7155_v32 = vrot.slane %v6804_v34, 7  ;;  %v6462_v4 = vadd.f32 %v6385_v36, %v6181_v50 }
 0x97c   : > { %v7156_v12 = vsel %vm1903_vm0, %v7153_v20, %v7155_v32  ;;  %v7024_v18 = vpop.f32.mrf.mxu0  ;;  %v6606_v20 = vpack.c.bf16 %v6581_v60, %v6580_v19  ;;  %vm6502_vm8 = vcmp.ge.f32.partialorder %v6462_v4, 0.0 }
 0x97d   : > { %v7265_v1 = vadd.f32 %v7156_v12, %v6912_v11  ;;  %v7355_v7 = vrot.slane %v7024_v18, 1  ;;  %v6114_v12 = vpop.permute.xlu2 %6113 }
 0x97e   : > { %6846 = vmatmul.bf16.gmra.mxu2 %v6605_v28  ;;  %6954 = vmatmul.bf16.gmra.mxu3 %v6605_v28 }
 0x97f   : > { %v7356_v13 = vsel %vm3717_vm10, %v7353_v2, %v7355_v7  ;;  %7063 = vmatmul.bf16.gmra.mxu0 %v6605_v28  ;;  %v6182_v2 = vmul.f32 %v6109_v16, %v5901_v48 }
 0x980   : > { %v7463_v63 = vadd.f32 %v7356_v13, %v7265_v1  ;;  %v5902_v1 = vmul.f32 %v12684_v47, %v12602_v15 }
 0x981   : > { %v6807_v14 = vpop.f32.mrf.mxu2  ;;  %v6915_v6 = vpop.f32.mrf.mxu3  ;;  %v6463_v25 = vadd.f32 %v6390_v55, %v6182_v2 }
 0x982   : > { %7503 = vst [vmem:[%s12731_s11 + $0x48] sm:$0xff] %v7463_v63  ;;  %v7157_v45 = vrot.slane %v6807_v14, 7  ;;  %v6119_v63 = vpop.permute.xlu0 %6118 }
 0x983   : > { %v6543_v24 = vmul.f32 0.2, %v6463_v25  ;;  %vm6503_vm9 = vcmp.ge.f32.partialorder %v6463_v25, 0.0 }
 0x984   : > { %v7158_v58 = vsel %vm1903_vm0, %v7155_v32, %v7157_v45  ;;  %v7026_v31 = vpop.f32.mrf.mxu0  ;;  %v6542_v32 = vmul.f32 0.2, %v6462_v4 }
 0x985   : > { %v7266_v3 = vadd.f32 %v7158_v58, %v6915_v6  ;;  %v7357_v57 = vrot.slane %v7026_v31, 1  ;;  %v6583_v26 = vsel %vm6503_vm9, %v6463_v25, %v6543_v24  ;;  %v6183_v58 = vmul.f32 %v6114_v12, %v5902_v1 }
 0x986   : > { %v6582_v13 = vsel %vm6502_vm8, %v6462_v4, %v6542_v32 }
 0x987   : > { %v7358_v53 = vsel %vm3717_vm10, %v7355_v7, %v7357_v57  ;;  %v5903_v7 = vmul.f32 %v12684_v47, %v12608_v37  ;;  %v6607_v30 = vpack.c.bf16 %v6583_v26, %v6582_v13  ;;  %v6395_v37 = vpop.permute.xlu1 %6394 }
 0x988   : > { %v7464_v0 = vadd.f32 %v7358_v53, %v7266_v3  ;;  %v6400_v3 = vpop.permute.xlu2 %6399  ;;  %v6464_v42 = vadd.f32 %v6395_v37, %v6183_v58 }
 0x989   : > { %v6809_v29 = vpop.f32.mrf.mxu2  ;;  %v6917_v54 = vpop.f32.mrf.mxu3  ;;  %v6184_v31 = vmul.f32 %v6119_v63, %v5903_v7  ;;  %v5906_v63 = vmul.f32 %v12684_v47, %v12401_v23 }
 0x98a   : > { %7504 = vst [vmem:[%s12731_s11 + $0x50] sm:$0xff] %v7464_v0  ;;  %v7159_v17 = vrot.slane %v6809_v29, 7  ;;  %v6544_v19 = vmul.f32 0.2, %v6464_v42  ;;  %vm6504_vm11 = vcmp.ge.f32.partialorder %v6464_v42, 0.0 }
 0x98b   : > { %v6465_v53 = vadd.f32 %v6400_v3, %v6184_v31 }
 0x98c   : > { %v7160_v38 = vsel %vm1903_vm0, %v7157_v45, %v7159_v17  ;;  %v7029_v33 = vpop.f32.mrf.mxu0  ;;  %v6584_v50 = vsel %vm6504_vm11, %v6464_v42, %v6544_v19 }
 0x98d   : > { %v7267_v21 = vadd.f32 %v7160_v38, %v6917_v54  ;;  %v7359_v10 = vrot.slane %v7029_v33, 1  ;;  %v6545_v60 = vmul.f32 0.2, %v6465_v53  ;;  %vm6505_vm12 = vcmp.ge.f32.partialorder %v6465_v53, 0.0 }
 0x98e   : > { %6851 = vmatmul.bf16.gmra.mxu2 %v6606_v20  ;;  %6959 = vmatmul.bf16.gmra.mxu3 %v6606_v20  ;;  %v5904_v33 = vmul.f32 %v12684_v47, %v12395_v43 }
 0x98f   : > { %v7360_v40 = vsel %vm3717_vm10, %v7357_v57, %v7359_v10  ;;  %7068 = vmatmul.bf16.gmra.mxu0 %v6606_v20  ;;  %v5905_v20 = vmul.f32 %v12684_v47, %v12398_v5  ;;  %v6585_v2 = vsel %vm6505_vm12, %v6465_v53, %v6545_v60  ;;  %v6129_v36 = vpop.permute.xlu1 %6128 }
 0x990   : > { %v7465_v49 = vadd.f32 %v7360_v40, %v7267_v21 }
 0x991   : > { %v6812_v9 = vpop.f32.mrf.mxu2  ;;  %v6920_v46 = vpop.f32.mrf.mxu3 }
 0x992   : > { %7505 = vst [vmem:[%s12731_s11 + $0x58] sm:$0xff] %v7465_v49  ;;  %v7161_v51 = vrot.slane %v6812_v9, 7  ;;  %v6608_v9 = vpack.c.bf16 %v6585_v2, %v6584_v50  ;;  %v5908_v2 = vmul.f32 %v12684_v47, %v12407_v22 }
 0x994   : > { %v7162_v34 = vsel %vm1903_vm0, %v7159_v17, %v7161_v51  ;;  %v7031_v11 = vpop.f32.mrf.mxu0  ;;  %v6124_v17 = vpop.permute.xlu0 %6123 }
 0x995   : > { %v7268_v62 = vadd.f32 %v7162_v34, %v6920_v46  ;;  %v7361_v41 = vrot.slane %v7031_v11, 1  ;;  %v6185_v25 = vmul.f32 %v6124_v17, %v5904_v33  ;;  %v6405_v34 = vpop.permute.xlu2 %6404 }
 0x997   : > { %v7362_v18 = vsel %vm3717_vm10, %v7359_v10, %v7361_v41  ;;  %v6466_v32 = vadd.f32 %v6405_v34, %v6185_v25  ;;  %v6134_v13 = vpop.permute.xlu1 %6133 }
 0x998   : > { %v7466_v28 = vadd.f32 %v7362_v18, %v7268_v62 }
 0x999   : > { %v6814_v56 = vpop.f32.mrf.mxu2  ;;  %v6922_v8 = vpop.f32.mrf.mxu3  ;;  %vm6506_vm13 = vcmp.ge.f32.partialorder %v6466_v32, 0.0 }
 0x99a   : > { %7506 = vst [vmem:[%s12731_s11 + $0x60] sm:$0xff] %v7466_v28  ;;  %v7163_v52 = vrot.slane %v6814_v56, 7  ;;  %v6546_v56 = vmul.f32 0.2, %v6466_v32 }
 0x99c   : > { %v7164_v14 = vsel %vm1903_vm0, %v7161_v51, %v7163_v52  ;;  %v7034_v6 = vpop.f32.mrf.mxu0  ;;  %v6186_v51 = vmul.f32 %v6129_v36, %v5905_v20  ;;  %v6410_v5 = vpop.permute.xlu0 %6409 }
 0x99d   : > { %v7269_v44 = vadd.f32 %v7164_v14, %v6922_v8  ;;  %v7363_v45 = vrot.slane %v7034_v6, 1  ;;  %v5907_v14 = vmul.f32 %v12684_v47, %v12404_v27  ;;  %v6139_v31 = vpop.permute.xlu2 %6138 }
 0x99e   : > { %6856 = vmatmul.bf16.gmra.mxu2 %v6607_v30  ;;  %6964 = vmatmul.bf16.gmra.mxu3 %v6607_v30  ;;  %v6467_v24 = vadd.f32 %v6410_v5, %v6186_v51 }
 0x99f   : > { %v7364_v15 = vsel %vm3717_vm10, %v7361_v41, %v7363_v45  ;;  %7073 = vmatmul.bf16.gmra.mxu0 %v6607_v30  ;;  %v6188_v42 = vmul.f32 %v6139_v31, %v5907_v14  ;;  %v6420_v53 = vpop.permute.xlu1 %6419 }
 0x9a0   : > { %v7467_v57 = vadd.f32 %v7364_v15, %v7269_v44  ;;  %v6547_v8 = vmul.f32 0.2, %v6467_v24  ;;  %vm6507_vm14 = vcmp.ge.f32.partialorder %v6467_v24, 0.0  ;;  %v6586_v44 = vsel %vm6506_vm13, %v6466_v32, %v6546_v56 }
 0x9a1   : > { %v6817_v61 = vpop.f32.mrf.mxu2  ;;  %v6925_v59 = vpop.f32.mrf.mxu3 }
 0x9a2   : > { %7507 = vst [vmem:[%s12731_s11 + $0x68] sm:$0xff] %v7467_v57  ;;  %v7165_v0 = vrot.slane %v6817_v61, 7 }
 0x9a4   : > { %v7166_v39 = vsel %vm1903_vm0, %v7163_v52, %v7165_v0  ;;  %v7036_v48 = vpop.f32.mrf.mxu0  ;;  %v6415_v27 = vpop.permute.xlu0 %6414 }
 0x9a5   : > { %v7270_v29 = vadd.f32 %v7166_v39, %v6925_v59  ;;  %v7365_v54 = vrot.slane %v7036_v48, 1  ;;  %v6187_v59 = vmul.f32 %v6134_v13, %v5906_v63 }
 0x9a7   : > { %v7366_v16 = vsel %vm3717_vm10, %v7363_v45, %v7365_v54  ;;  %v6587_v45 = vsel %vm6507_vm14, %v6467_v24, %v6547_v8 }
 0x9a8   : > { %v7468_v38 = vadd.f32 %v7366_v16, %v7270_v29  ;;  %v6609_v3 = vpack.c.bf16 %v6587_v45, %v6586_v44  ;;  %v6468_v29 = vadd.f32 %v6415_v27, %v6187_v59 }
 0x9a9   : > { %v6819_v21 = vpop.f32.mrf.mxu2  ;;  %v6927_v10 = vpop.f32.mrf.mxu3 }
 0x9aa   : > { %7508 = vst [vmem:[%s12731_s11 + $0x70] sm:$0xff] %v7468_v38  ;;  %v7167_v40 = vrot.slane %v6819_v21, 7  ;;  %v6548_v33 = vmul.f32 0.2, %v6468_v29  ;;  %v6144_v21 = vpop.permute.xlu2 %6143  ;;  %vm6508_vm15 = vcmp.ge.f32.partialorder %v6468_v29, 0.0 }
 0x9ab   : > { %v6189_v5 = vmul.f32 %v6144_v21, %v5908_v2 }
 0x9ac   : > { %v7168_v55 = vsel %vm1903_vm0, %v7165_v0, %v7167_v40  ;;  %v7039_v49 = vpop.f32.mrf.mxu0 }
 0x9ad   : > { %v7271_v46 = vadd.f32 %v7168_v55, %v6927_v10  ;;  %v7367_v4 = vrot.slane %v7039_v49, 1  ;;  %v6588_v49 = vsel %vm6508_vm15, %v6468_v29, %v6548_v33 }
 0x9ae   : > { %6861 = vmatmul.bf16.gmra.mxu2 %v6608_v9  ;;  %6969 = vmatmul.bf16.gmra.mxu3 %v6608_v9 }
 0x9af   : > { %v7368_v43 = vsel %vm3717_vm10, %v7365_v54, %v7367_v4  ;;  %7078 = vmatmul.bf16.gmra.mxu0 %v6608_v9  ;;  %v6469_v54 = vadd.f32 %v6420_v53, %v6188_v42 }
 0x9b0   : > { %v7469_v11 = vadd.f32 %v7368_v43, %v7271_v46 }
 0x9b1   : > { %v6822_v62 = vpop.f32.mrf.mxu2  ;;  %v6930_v41 = vpop.f32.mrf.mxu3  ;;  %v6549_v20 = vmul.f32 0.2, %v6469_v54  ;;  %vm6509_vm1 = vcmp.ge.f32.partialorder %v6469_v54, 0.0 }
 0x9b2   : > { %7509 = vst [vmem:[%s12731_s11 + $0x78] sm:$0xff] %v7469_v11  ;;  %v7169_v12 = vrot.slane %v6822_v62, 7 }
 0x9b3   : > { %v6589_v9 = vsel %vm6509_vm1, %v6469_v54, %v6549_v20 }
 0x9b4   : > { %v7170_v18 = vsel %vm1903_vm0, %v7167_v40, %v7169_v12  ;;  %v7041_v28 = vpop.f32.mrf.mxu0  ;;  %v5909_v40 = vmul.f32 %v12684_v47, %v12410_v35  ;;  %v6610_v43 = vpack.c.bf16 %v6589_v9, %v6588_v49  ;;  %v6425_v35 = vpop.permute.xlu1 %6424 }
 0x9b5   : > { %v7272_v1 = vadd.f32 %v7170_v18, %v6930_v41  ;;  %v7369_v7 = vrot.slane %v7041_v28, 1  ;;  %v6430_v47 = vpop.permute.xlu2 %6429 }
 0x9b7   : > { %v7370_v26 = vsel %vm3717_vm10, %v7367_v4, %v7369_v7  ;;  %v6149_v4 = vpop.permute.xlu0 %6148 }
 0x9b8   : > { %v7470_v52 = vadd.f32 %v7370_v26, %v7272_v1  ;;  %v6190_v34 = vmul.f32 %v6149_v4, %v5909_v40 }
 0x9b9   : > { %v6824_v6 = vpop.f32.mrf.mxu2  ;;  %v6932_v30 = vpop.f32.mrf.mxu3 }
 0x9ba   : > { %7510 = vst [vmem:[%s12731_s11 + $0x80] sm:$0xff] %v7470_v52  ;;  %v7171_v58 = vrot.slane %v6824_v6, 7  ;;  %v6471_v18 = vadd.f32 %v6430_v47, %v6190_v34 }
 0x9bc   : > { %v7172_v15 = vsel %vm1903_vm0, %v7169_v12, %v7171_v58  ;;  %v7044_v37 = vpop.f32.mrf.mxu0  ;;  %v6470_v12 = vadd.f32 %v6425_v35, %v6189_v5  ;;  %v6551_v26 = vmul.f32 0.2, %v6471_v18  ;;  %vm6511_vm3 = vcmp.ge.f32.partialorder %v6471_v18, 0.0 }
 0x9bd   : > { %v7273_v57 = vadd.f32 %v7172_v15, %v6932_v30  ;;  %v7371_v61 = vrot.slane %v7044_v37, 1 }
 0x9be   : > { %6866 = vmatmul.bf16.gmra.mxu2 %v6609_v3  ;;  %6974 = vmatmul.bf16.gmra.mxu3 %v6609_v3  ;;  %v6550_v13 = vmul.f32 0.2, %v6470_v12  ;;  %vm6510_vm2 = vcmp.ge.f32.partialorder %v6470_v12, 0.0  ;;  %v6591_v44 = vsel %vm6511_vm3, %v6471_v18, %v6551_v26 }
 0x9bf   : > { %v7372_v23 = vsel %vm3717_vm10, %v7369_v7, %v7371_v61  ;;  %7083 = vmatmul.bf16.gmra.mxu0 %v6609_v3 }
 0x9c0   : > { %v7471_v0 = vadd.f32 %v7372_v23, %v7273_v57  ;;  %v6590_v30 = vsel %vm6510_vm2, %v6470_v12, %v6550_v13 }
 0x9c1   : > { %v6827_v39 = vpop.f32.mrf.mxu2  ;;  %v6935_v48 = vpop.f32.mrf.mxu3  ;;  %v6611_v15 = vpack.c.bf16 %v6591_v44, %v6590_v30 }
 0x9c2   : > { %7511 = vst [vmem:[%s12731_s11 + $0x88] sm:$0xff] %v7471_v0  ;;  %v7173_v19 = vrot.slane %v6827_v39, 7 }
 0x9c4   : > { %v7174_v60 = vsel %vm1903_vm0, %v7171_v58, %v7173_v19  ;;  %v7046_v17 = vpop.f32.mrf.mxu0 }
 0x9c5   : > { %v7274_v16 = vadd.f32 %v7174_v60, %v6935_v48  ;;  %v7373_v38 = vrot.slane %v7046_v17, 1 }
 0x9c7   : > { %v7374_v10 = vsel %vm3717_vm10, %v7371_v61, %v7373_v38 }
 0x9c8   : > { %v7472_v50 = vadd.f32 %v7374_v10, %v7274_v16 }
 0x9c9   : > { %v6829_v36 = vpop.f32.mrf.mxu2  ;;  %v6937_v55 = vpop.f32.mrf.mxu3 }
 0x9ca   : > { %7512 = vst [vmem:[%s12731_s11 + $0x90] sm:$0xff] %v7472_v50  ;;  %v7175_v46 = vrot.slane %v6829_v36, 7 }
 0x9cc   : > { %v7176_v25 = vsel %vm1903_vm0, %v7173_v19, %v7175_v46  ;;  %v7049_v51 = vpop.f32.mrf.mxu0 }
 0x9cd   : > { %v7275_v11 = vadd.f32 %v7176_v25, %v6937_v55  ;;  %v7375_v62 = vrot.slane %v7049_v51, 1 }
 0x9ce   : > { %6871 = vmatmul.bf16.gmra.mxu2 %v6610_v43  ;;  %6979 = vmatmul.bf16.gmra.mxu3 %v6610_v43 }
 0x9cf   : > { %v7376_v22 = vsel %vm3717_vm10, %v7373_v38, %v7375_v62  ;;  %7088 = vmatmul.bf16.gmra.mxu0 %v6610_v43 }
 0x9d0   : > { %v7473_v41 = vadd.f32 %v7376_v22, %v7275_v11 }
 0x9d1   : > { %v6832_v32 = vpop.f32.mrf.mxu2  ;;  %v6940_v24 = vpop.f32.mrf.mxu3 }
 0x9d2   : > { %7513 = vst [vmem:[%s12731_s11 + $0x98] sm:$0xff] %v7473_v41  ;;  %v7177_v28 = vrot.slane %v6832_v32, 7 }
 0x9d4   : > { %v7178_v1 = vsel %vm1903_vm0, %v7175_v46, %v7177_v28  ;;  %v7051_v7 = vpop.f32.mrf.mxu0 }
 0x9d5   : > { %v7276_v56 = vadd.f32 %v7178_v1, %v6940_v24  ;;  %v7377_v8 = vrot.slane %v7051_v7, 1 }
 0x9d7   : > { %v7378_v52 = vsel %vm3717_vm10, %v7375_v62, %v7377_v8 }
 0x9d8   : > { %v7474_v63 = vadd.f32 %v7378_v52, %v7276_v56 }
 0x9d9   : > { %v6834_v14 = vpop.f32.mrf.mxu2  ;;  %v6942_v6 = vpop.f32.mrf.mxu3 }
 0x9da   : > { %7514 = vst [vmem:[%s12731_s11 + $0xa0] sm:$0xff] %v7474_v63  ;;  %v7179_v45 = vrot.slane %v6834_v14, 7 }
 0x9dc   : > { %v7180_v58 = vsel %vm1903_vm0, %v7177_v28, %v7179_v45  ;;  %v7054_v31 = vpop.f32.mrf.mxu0 }
 0x9dd   : > { %v7277_v37 = vadd.f32 %v7180_v58, %v6942_v6  ;;  %v7379_v3 = vrot.slane %v7054_v31, 1 }
 0x9de   : > { %6876 = vmatmul.bf16.gmra.mxu2 %v6611_v15  ;;  %6984 = vmatmul.bf16.gmra.mxu3 %v6611_v15 }
 0x9df   : > { %v7380_v57 = vsel %vm3717_vm10, %v7377_v8, %v7379_v3  ;;  %7093 = vmatmul.bf16.gmra.mxu0 %v6611_v15 }
 0x9e0   : > { %v7475_v61 = vadd.f32 %v7380_v57, %v7277_v37 }
 0x9e1   : > { %v6837_v59 = vpop.f32.mrf.mxu2  ;;  %v6945_v42 = vpop.f32.mrf.mxu3 }
 0x9e2   : > { %7515 = vst [vmem:[%s12731_s11 + $0xa8] sm:$0xff] %v7475_v61  ;;  %v7181_v23 = vrot.slane %v6837_v59, 7 }
 0x9e4   : > { %v7182_v27 = vsel %vm1903_vm0, %v7179_v45, %v7181_v23  ;;  %v7056_v53 = vpop.f32.mrf.mxu0 }
 0x9e5   : > { %v7278_v0 = vadd.f32 %v7182_v27, %v6945_v42  ;;  %v7381_v39 = vrot.slane %v7056_v53, 1 }
 0x9e7   : > { %v7382_v48 = vsel %vm3717_vm10, %v7379_v3, %v7381_v39 }
 0x9e8   : > { %v7476_v29 = vadd.f32 %v7382_v48, %v7278_v0 }
 0x9e9   : > { %v6839_v54 = vpop.f32.mrf.mxu2  ;;  %v6947_v19 = vpop.f32.mrf.mxu3 }
 0x9ea   : > { %7516 = vst [vmem:[%s12731_s11 + $0xb0] sm:$0xff] %v7476_v29  ;;  %v7183_v60 = vrot.slane %v6839_v54, 7 }
 0x9ec   : > { %v7184_v17 = vsel %vm1903_vm0, %v7181_v23, %v7183_v60  ;;  %v7059_v16 = vpop.f32.mrf.mxu0 }
 0x9ed   : > { %v7279_v38 = vadd.f32 %v7184_v17, %v6947_v19  ;;  %v7383_v33 = vrot.slane %v7059_v16, 1 }
 0x9ef   : > { %v7384_v20 = vsel %vm3717_vm10, %v7381_v39, %v7383_v33 }
 0x9f0   : > { %v7477_v21 = vadd.f32 %v7384_v20, %v7279_v38 }
 0x9f1   : > { %v6842_v10 = vpop.f32.mrf.mxu2  ;;  %v6950_v50 = vpop.f32.mrf.mxu3 }
 0x9f2   : > { %7517 = vst [vmem:[%s12731_s11 + $0xb8] sm:$0xff] %v7477_v21  ;;  %v7185_v2 = vrot.slane %v6842_v10, 7 }
 0x9f4   : > { %v7186_v40 = vsel %vm1903_vm0, %v7183_v60, %v7185_v2  ;;  %v7061_v36 = vpop.f32.mrf.mxu0 }
 0x9f5   : > { %v7280_v55 = vadd.f32 %v7186_v40, %v6950_v50  ;;  %v7385_v49 = vrot.slane %v7061_v36, 1 }
 0x9f7   : > { %v7386_v9 = vsel %vm3717_vm10, %v7383_v33, %v7385_v49 }
 0x9f8   : > { %v7478_v46 = vadd.f32 %v7386_v9, %v7280_v55 }
 0x9f9   : > { %v6844_v4 = vpop.f32.mrf.mxu2  ;;  %v6952_v25 = vpop.f32.mrf.mxu3 }
 0x9fa   : > { %7518 = vst [vmem:[%s12731_s11 + $0xc0] sm:$0xff] %v7478_v46  ;;  %v7187_v51 = vrot.slane %v6844_v4, 7 }
 0x9fc   : > { %v7188_v43 = vsel %vm1903_vm0, %v7185_v2, %v7187_v51  ;;  %v7064_v5 = vpop.f32.mrf.mxu0 }
 0x9fd   : > { %v7281_v34 = vadd.f32 %v7188_v43, %v6952_v25  ;;  %v7387_v11 = vrot.slane %v7064_v5, 1 }
 0x9ff   : > { %v7388_v62 = vsel %vm3717_vm10, %v7385_v49, %v7387_v11 }
 0xa00   : > { %v7479_v22 = vadd.f32 %v7388_v62, %v7281_v34 }
 0xa01   : > { %v6847_v35 = vpop.f32.mrf.mxu2  ;;  %v6955_v47 = vpop.f32.mrf.mxu3 }
 0xa02   : > { %7519 = vst [vmem:[%s12731_s11 + $0xc8] sm:$0xff] %v7479_v22  ;;  %v7189_v41 = vrot.slane %v6847_v35, 7 }
 0xa04   : > { %v7190_v32 = vsel %vm1903_vm0, %v7187_v51, %v7189_v41  ;;  %v7066_v24 = vpop.f32.mrf.mxu0 }
 0xa05   : > { %v7282_v12 = vadd.f32 %v7190_v32, %v6955_v47  ;;  %v7389_v18 = vrot.slane %v7066_v24, 1 }
 0xa07   : > { %v7390_v28 = vsel %vm3717_vm10, %v7387_v11, %v7389_v18 }
 0xa08   : > { %v7480_v1 = vadd.f32 %v7390_v28, %v7282_v12 }
 0xa09   : > { %v6849_v7 = vpop.f32.mrf.mxu2  ;;  %v6957_v56 = vpop.f32.mrf.mxu3 }
 0xa0a   : > { %7520 = vst [vmem:[%s12731_s11 + $0xd0] sm:$0xff] %v7480_v1  ;;  %v7191_v8 = vrot.slane %v6849_v7, 7 }
 0xa0c   : > { %v7192_v13 = vsel %vm1903_vm0, %v7189_v41, %v7191_v8  ;;  %v7069_v26 = vpop.f32.mrf.mxu0 }
 0xa0d   : > { %v7283_v52 = vadd.f32 %v7192_v13, %v6957_v56  ;;  %v7391_v63 = vrot.slane %v7069_v26, 1 }
 0xa0f   : > { %v7392_v14 = vsel %vm3717_vm10, %v7389_v18, %v7391_v63 }
 0xa10   : > { %v7481_v6 = vadd.f32 %v7392_v14, %v7283_v52 }
 0xa11   : > { %v6852_v30 = vpop.f32.mrf.mxu2  ;;  %v6960_v44 = vpop.f32.mrf.mxu3 }
 0xa12   : > { %7521 = vst [vmem:[%s12731_s11 + $0xd8] sm:$0xff] %v7481_v6  ;;  %v7193_v45 = vrot.slane %v6852_v30, 7 }
 0xa14   : > { %v7194_v58 = vsel %vm1903_vm0, %v7191_v8, %v7193_v45  ;;  %v7071_v31 = vpop.f32.mrf.mxu0 }
 0xa15   : > { %v7284_v15 = vadd.f32 %v7194_v58, %v6960_v44  ;;  %v7393_v37 = vrot.slane %v7071_v31, 1 }
 0xa17   : > { %v7394_v3 = vsel %vm3717_vm10, %v7391_v63, %v7393_v37 }
 0xa18   : > { %v7482_v57 = vadd.f32 %v7394_v3, %v7284_v15 }
 0xa19   : > { %v6854_v61 = vpop.f32.mrf.mxu2  ;;  %v6962_v59 = vpop.f32.mrf.mxu3 }
 0xa1a   : > { %7522 = vst [vmem:[%s12731_s11 + $0xe0] sm:$0xff] %v7482_v57  ;;  %v7195_v42 = vrot.slane %v6854_v61, 7 }
 0xa1c   : > { %v7196_v23 = vsel %vm1903_vm0, %v7193_v45, %v7195_v42  ;;  %v7074_v27 = vpop.f32.mrf.mxu0 }
 0xa1d   : > { %v7285_v53 = vadd.f32 %v7196_v23, %v6962_v59  ;;  %v7395_v0 = vrot.slane %v7074_v27, 1 }
 0xa1f   : > { %v7396_v39 = vsel %vm3717_vm10, %v7393_v37, %v7395_v0 }
 0xa20   : > { %v7483_v48 = vadd.f32 %v7396_v39, %v7285_v53 }
 0xa21   : > { %v6857_v29 = vpop.f32.mrf.mxu2  ;;  %v6965_v54 = vpop.f32.mrf.mxu3 }
 0xa22   : > { %7523 = vst [vmem:[%s12731_s11 + $0xe8] sm:$0xff] %v7483_v48  ;;  %v7197_v19 = vrot.slane %v6857_v29, 7 }
 0xa24   : > { %v7198_v60 = vsel %vm1903_vm0, %v7195_v42, %v7197_v19  ;;  %v7076_v17 = vpop.f32.mrf.mxu0 }
 0xa25   : > { %v7286_v16 = vadd.f32 %v7198_v60, %v6965_v54  ;;  %v7397_v38 = vrot.slane %v7076_v17, 1 }
 0xa27   : > { %v7398_v33 = vsel %vm3717_vm10, %v7395_v0, %v7397_v38 }
 0xa28   : > { %v7484_v20 = vadd.f32 %v7398_v33, %v7286_v16 }
 0xa29   : > { %v6859_v21 = vpop.f32.mrf.mxu2  ;;  %v6967_v10 = vpop.f32.mrf.mxu3 }
 0xa2a   : > { %7524 = vst [vmem:[%s12731_s11 + $0xf0] sm:$0xff] %v7484_v20  ;;  %v7199_v50 = vrot.slane %v6859_v21, 7 }
 0xa2c   : > { %v7200_v2 = vsel %vm1903_vm0, %v7197_v19, %v7199_v50  ;;  %v7079_v40 = vpop.f32.mrf.mxu0 }
 0xa2d   : > { %v7287_v36 = vadd.f32 %v7200_v2, %v6967_v10  ;;  %v7399_v55 = vrot.slane %v7079_v40, 1 }
 0xa2f   : > { %v7400_v49 = vsel %vm3717_vm10, %v7397_v38, %v7399_v55 }
 0xa30   : > { %v7485_v9 = vadd.f32 %v7400_v49, %v7287_v36 }
 0xa31   : > { %v6862_v46 = vpop.f32.mrf.mxu2  ;;  %v6970_v4 = vpop.f32.mrf.mxu3 }
 0xa32   : > { %7525 = vst [vmem:[%s12731_s11 + $0xf8] sm:$0xff] %v7485_v9  ;;  %v7201_v25 = vrot.slane %v6862_v46, 7 }
 0xa34   : > { %v7202_v51 = vsel %vm1903_vm0, %v7199_v50, %v7201_v25  ;;  %v7081_v43 = vpop.f32.mrf.mxu0 }
 0xa35   : > { %v7288_v5 = vadd.f32 %v7202_v51, %v6970_v4  ;;  %v7401_v34 = vrot.slane %v7081_v43, 1 }
 0xa37   : > { %v7402_v11 = vsel %vm3717_vm10, %v7399_v55, %v7401_v34 }
 0xa38   : > { %v7486_v62 = vadd.f32 %v7402_v11, %v7288_v5 }
 0xa39   : > { %v6864_v22 = vpop.f32.mrf.mxu2  ;;  %v6972_v35 = vpop.f32.mrf.mxu3 }
 0xa3a   : > { %7526 = vst [vmem:[%s12731_s11 + $0x100] sm:$0xff] %v7486_v62  ;;  %v7203_v47 = vrot.slane %v6864_v22, 7 }
 0xa3c   : > { %v7204_v41 = vsel %vm1903_vm0, %v7201_v25, %v7203_v47  ;;  %v7084_v32 = vpop.f32.mrf.mxu0 }
 0xa3d   : > { %v7289_v24 = vadd.f32 %v7204_v41, %v6972_v35  ;;  %v7403_v12 = vrot.slane %v7084_v32, 1 }
 0xa3f   : > { %v7404_v18 = vsel %vm3717_vm10, %v7401_v34, %v7403_v12 }
 0xa40   : > { %v7487_v28 = vadd.f32 %v7404_v18, %v7289_v24 }
 0xa41   : > { %v6867_v1 = vpop.f32.mrf.mxu2  ;;  %v6975_v7 = vpop.f32.mrf.mxu3 }
 0xa42   : > { %7527 = vst [vmem:[%s12731_s11 + $0x108] sm:$0xff] %v7487_v28  ;;  %v7205_v56 = vrot.slane %v6867_v1, 7 }
 0xa44   : > { %v7206_v8 = vsel %vm1903_vm0, %v7203_v47, %v7205_v56  ;;  %v7086_v13 = vpop.f32.mrf.mxu0 }
 0xa45   : > { %v7290_v26 = vadd.f32 %v7206_v8, %v6975_v7  ;;  %v7405_v52 = vrot.slane %v7086_v13, 1 }
 0xa47   : > { %v7406_v63 = vsel %vm3717_vm10, %v7403_v12, %v7405_v52 }
 0xa48   : > { %v7488_v14 = vadd.f32 %v7406_v63, %v7290_v26 }
 0xa49   : > { %v6869_v6 = vpop.f32.mrf.mxu2  ;;  %v6977_v30 = vpop.f32.mrf.mxu3 }
 0xa4a   : > { %7528 = vst [vmem:[%s12731_s11 + $0x110] sm:$0xff] %v7488_v14  ;;  %v7207_v44 = vrot.slane %v6869_v6, 7 }
 0xa4c   : > { %v7208_v45 = vsel %vm1903_vm0, %v7205_v56, %v7207_v44  ;;  %v7089_v58 = vpop.f32.mrf.mxu0 }
 0xa4d   : > { %v7291_v31 = vadd.f32 %v7208_v45, %v6977_v30  ;;  %v7407_v15 = vrot.slane %v7089_v58, 1 }
 0xa4f   : > { %v7408_v37 = vsel %vm3717_vm10, %v7405_v52, %v7407_v15 }
 0xa50   : > { %v7489_v3 = vadd.f32 %v7408_v37, %v7291_v31 }
 0xa51   : > { %v6872_v57 = vpop.f32.mrf.mxu2  ;;  %v6980_v61 = vpop.f32.mrf.mxu3 }
 0xa52   : > { %7529 = vst [vmem:[%s12731_s11 + $0x118] sm:$0xff] %v7489_v3  ;;  %v7209_v59 = vrot.slane %v6872_v57, 7 }
 0xa54   : > { %v7210_v42 = vsel %vm1903_vm0, %v7207_v44, %v7209_v59  ;;  %v7091_v23 = vpop.f32.mrf.mxu0 }
 0xa55   : > { %v7292_v27 = vadd.f32 %v7210_v42, %v6980_v61  ;;  %v7409_v53 = vrot.slane %v7091_v23, 1 }
 0xa57   : > { %v7410_v0 = vsel %vm3717_vm10, %v7407_v15, %v7409_v53 }
 0xa58   : > { %v7490_v39 = vadd.f32 %v7410_v0, %v7292_v27 }
 0xa59   : > { %v6874_v48 = vpop.f32.mrf.mxu2  ;;  %v6982_v29 = vpop.f32.mrf.mxu3 }
 0xa5a   : > { %7530 = vst [vmem:[%s12731_s11 + $0x120] sm:$0xff] %v7490_v39  ;;  %v7211_v54 = vrot.slane %v6874_v48, 7 }
 0xa5c   : > { %v7212_v19 = vsel %vm1903_vm0, %v7209_v59, %v7211_v54  ;;  %v7094_v60 = vpop.f32.mrf.mxu0 }
 0xa5d   : > { %v7293_v17 = vadd.f32 %v7212_v19, %v6982_v29  ;;  %v7411_v16 = vrot.slane %v7094_v60, 1 }
 0xa5f   : > { %v7412_v38 = vsel %vm3717_vm10, %v7409_v53, %v7411_v16 }
 0xa60   : > { %v7491_v33 = vadd.f32 %v7412_v38, %v7293_v17 }
 0xa61   : > { %v6877_v20 = vpop.f32.mrf.mxu2  ;;  %v6985_v21 = vpop.f32.mrf.mxu3 }
 0xa62   : > { %7531 = vst [vmem:[%s12731_s11 + $0x128] sm:$0xff] %v7491_v33  ;;  %v7213_v10 = vrot.slane %v6877_v20, 7 }
 0xa64   : > { %v7214_v50 = vsel %vm1903_vm0, %v7211_v54, %v7213_v10  ;;  %v7096_v2 = vpop.f32.mrf.mxu0 }
 0xa65   : > { %v7294_v40 = vadd.f32 %v7214_v50, %v6985_v21  ;;  %v7413_v36 = vrot.slane %v7096_v2, 1 }
 0xa67   : > { %v7414_v55 = vsel %vm3717_vm10, %v7411_v16, %v7413_v36 }
 0xa68   : > { %v7492_v49 = vadd.f32 %v7414_v55, %v7294_v40 }
 0xa69   : > { %v6879_v9 = vpop.f32.mrf.mxu2  ;;  %v6987_v46 = vpop.f32.mrf.mxu3 }
 0xa6a   : > { %7532 = vst [vmem:[%s12731_s11 + $0x130] sm:$0xff] %v7492_v49  ;;  %v7295_v4 = vadd.f32 %v7213_v10, %v6987_v46 }
 0xa6c   : > { %7533 = vst [vmem:[%s12731_s11 + $0x138] sm:$0x1] %v7295_v4 }
 0xa6d PF: > { %s16_s21 = sadd.s32 1, %s8555_s21  }
 0xa6e   : > { %p13_p4 = scmp.ge.s32.totalorder %s16_s21, 4  }
 0xa70   :  { %15 = sbr.rel (!%p13_p4) target bundleno = 1 (0x1), region = 80 }

</bundles_post_ra>
